<compile_context>
chip_gen: v6e
topology: v6e:2x2x1
jax: 0.10.0
libtpu: 0.0.40
codegen_flags: <defaults>
</compile_context>

<pallas_src>
import jax
import jax.numpy as jnp
from jax import lax
from jax.experimental import pallas as pl
from jax.experimental.pallas import tpu as pltpu


def _round_up(n, m=128):
    return ((n + m - 1) // m) * m


# ---------------------------------------------------------------------------
# Fused kernel: [conv3x3 + bias + ReLU] * n_blocks -> avgpool(1) -> fc
# One grid step == B images. All channel dims pre-padded to multiples of 128.
# ---------------------------------------------------------------------------
def make_fused_kernel(H, W, B, n_blocks):
    Wp = W + 2
    HWp = H * Wp                                  # width-extended output rows
    buf_rows = _round_up((H + 2) * Wp + 2, 8)     # flattened padded buffer
    bot_start = (H + 1) * Wp + 1                  # first row of bottom strip
    n_act = n_blocks - 1

    def kernel(*refs):
        x_ref = refs[0]                                   # (B, HWp, Kp0) bf16
        blk = [(refs[1 + 2 * j], refs[2 + 2 * j]) for j in range(n_blocks)]
        fc_w_ref = refs[1 + 2 * n_blocks]                 # (Clast_p, NCp) bf16
        fc_b_ref = refs[2 + 2 * n_blocks]                 # (1, NCp)       f32
        o_ref = refs[3 + 2 * n_blocks]                    # (B, NCp)       f32
        scr = list(refs[4 + 2 * n_blocks:])
        act_scr = scr[:n_act]                             # bf16 padded buffers
        acc_ref = scr[n_act] if n_blocks > 1 else None    # (HWp, Cmax) f32
        pooled_ref = scr[-1]                              # (B, Clast_p) f32

        # Row-validity mask of the width-extended layout (row i = y*Wp + x is
        # a real output pixel iff x < W). Hoisted: computed once.
        col = lax.broadcasted_iota(jnp.int32, (HWp, 1), 0) % Wp
        valid = col < W
        inv_hw = jnp.float32(1.0 / (H * W))

        # Border zero strips, one constant per intermediate scratch (hoisted).
        ztop = [jnp.zeros((Wp + 1, act_scr[j].shape[1]), act_scr[j].dtype)
                for j in range(n_act)]
        zbot = [jnp.zeros((buf_rows - bot_start, act_scr[j].shape[1]),
                          act_scr[j].dtype) for j in range(n_act)]

        for b in range(B):                        # batch outermost -> scratch
            for j in range(n_blocks):             # holds only one image
                w_ref, b_ref = blk[j]
                cout_p = b_ref.shape[1]

                if j == 0:
                    # Taps folded into K: a single MXU matmul per image.
                    acc = jnp.dot(x_ref[b], w_ref[...],
                                  preferred_element_type=jnp.float32)
                else:
                    prev = act_scr[j - 1]
                    for t in range(9):
                        off = (t // 3) * Wp + (t % 3)
                        contrib = jnp.dot(prev[off:off + HWp, :], w_ref[t],
                                          preferred_element_type=jnp.float32)
                        if t == 0:
                            acc_ref[:, :cout_p] = contrib
                        else:
                            acc_ref[:, :cout_p] = acc_ref[:, :cout_p] + contrib
                    acc = acc_ref[:, :cout_p]

                # bias + ReLU, zero the junk columns (they become the halo
                # columns of the next padded buffer).
                act = jnp.where(valid, jnp.maximum(acc + b_ref[...], 0.0), 0.0)

                if j < n_blocks - 1:
                    nxt = act_scr[j]
                    # One contiguous bulk store of the whole block output.
                    nxt[Wp + 1:Wp + 1 + HWp, :] = act.astype(nxt.dtype)
                    # Border-only zeroing (every iteration; NOT pid-gated).
                    nxt[0:Wp + 1, :] = ztop[j]
                    nxt[bot_start:buf_rows, :] = zbot[j]
                else:
                    # AdaptiveAvgPool(1): junk rows are already zero.
                    pooled_ref[b:b + 1, :] = (
                        jnp.sum(act, axis=0, keepdims=True) * inv_hw)

        # Batched FC head: one (B, Clast_p) x (Clast_p, NCp) matmul per step.
        logits = jnp.dot(pooled_ref[...].astype(jnp.bfloat16), fc_w_ref[...],
                         preferred_element_type=jnp.float32) + fc_b_ref[...]
        o_ref[...] = logits.astype(o_ref.dtype)

    return kernel


def plainnet_fused(patches, packed, H, W, B):
    """patches: (N_pad, H*Wp, Kp0) bf16 width-extended im2col of the input."""
    N_pad, HWp, Kp0 = patches.shape
    Wp = W + 2
    assert HWp == H * Wp and N_pad % B == 0
    num_steps = N_pad // B

    blocks = packed["blocks"]
    n_blocks = len(blocks)
    fc_w, fc_b = packed["fc_w"], packed["fc_b"]
    NCp = fc_w.shape[1]
    cout_ps = [bi.shape[1] for (_, bi) in blocks]
    buf_rows = _round_up((H + 2) * Wp + 2, 8)

    inputs = [patches]
    in_specs = [pl.BlockSpec((B, HWp, Kp0), lambda n: (n, 0, 0))]
    for (w, bi) in blocks:
        inputs += [w, bi]
        in_specs += [
            pl.BlockSpec(w.shape, lambda n, nd=w.ndim: (0,) * nd),
            pl.BlockSpec(bi.shape, lambda n: (0, 0)),
        ]
    inputs += [fc_w, fc_b]
    in_specs += [pl.BlockSpec(fc_w.shape, lambda n: (0, 0)),
                 pl.BlockSpec(fc_b.shape, lambda n: (0, 0))]

    # bf16 single-image padded activation scratches + f32 accumulator + pooled.
    scratch_shapes = [pltpu.VMEM((buf_rows, cout_ps[j]), jnp.bfloat16)
                      for j in range(n_blocks - 1)]
    if n_blocks > 1:
        scratch_shapes.append(pltpu.VMEM((HWp, max(cout_ps[1:])), jnp.float32))
    scratch_shapes.append(pltpu.VMEM((B, cout_ps[-1]), jnp.float32))

    # Derive the VMEM limit from actual buffer totals (double-buffered inputs
    # + resident scratch), clamped to the chip's capacity when queryable.
    w_bytes = sum(int(w.size) * w.dtype.itemsize + int(bi.size) * bi.dtype.itemsize
                  for (w, bi) in blocks)
    w_bytes += int(fc_w.size) * fc_w.dtype.itemsize
    w_bytes += int(fc_b.size) * fc_b.dtype.itemsize
    scr_bytes = sum(buf_rows * c * 2 for c in cout_ps[:-1])
    if n_blocks > 1:
        scr_bytes += HWp * max(cout_ps[1:]) * 4
    scr_bytes += B * cout_ps[-1] * 4
    needed = (2 * (B * HWp * Kp0 * 2) + 2 * w_bytes + scr_bytes
              + 2 * (B * NCp * 4))
    try:
        cap = int(pltpu.get_tpu_info().vmem_capacity_bytes)
    except Exception:
        cap = 64 * 1024 * 1024
    vmem_limit = int(max(32 * 1024 * 1024,
                         min(2 * needed + 4 * 1024 * 1024, int(cap * 0.9))))

    out = pl.pallas_call(
        make_fused_kernel(H, W, B, n_blocks),
        out_shape=jax.ShapeDtypeStruct((num_steps, B, NCp), jnp.float32),
        grid_spec=pltpu.PrefetchScalarGridSpec(
            num_scalar_prefetch=0,
            grid=(num_steps,),
            in_specs=in_specs,
            out_specs=pl.BlockSpec((None, B, NCp), lambda n: (n, 0, 0)),
            scratch_shapes=scratch_shapes),
        compiler_params=pltpu.CompilerParams(
            dimension_semantics=("parallel",),
            vmem_limit_bytes=vmem_limit),
    )(*inputs)
    return out.reshape(N_pad, NCp)


# ---------------------------------------------------------------------------
# Parameter construction / packing
# ---------------------------------------------------------------------------
def init_plainnet_params(key, in_channels, block_channels, num_classes):
    """Torch-like f32 params. block_channels: list of Cout per block."""
    params = {"blocks": []}
    cin = in_channels
    for cout in block_channels:
        key, kw, kb = jax.random.split(key, 3)
        w = 0.1 * jax.random.normal(kw, (cout, cin, 3, 3), dtype=jnp.float32)
        b = 0.01 * jax.random.normal(kb, (cout,), dtype=jnp.float32)
        params["blocks"].append((w, b))
        cin = cout
    key, kw, kb = jax.random.split(key, 3)
    # torch Linear weight is (num_classes, C); stored pre-transposed.
    params["fc_w"] = 0.1 * jax.random.normal(kw, (cin, num_classes), dtype=jnp.float32)
    params["fc_b"] = 0.01 * jax.random.normal(kb, (num_classes,), dtype=jnp.float32)
    return params


def pack_params(params):
    """Pre-reshape / zero-pad to 128 / cast weights to bf16 for the kernel.

    Block 0 is packed with its 3x3 taps folded into the contraction dim
    (shape (round_up(9*cin), cout_p)); later blocks keep (9, cin_p, cout_p).
    """
    packed = {"blocks": []}
    for j, (w, b) in enumerate(params["blocks"]):
        cout, cin, kh, kw = w.shape
        cout_p = _round_up(cout)
        if j == 0:
            K = kh * kw * cin
            Kp = _round_up(K)
            wk = jnp.transpose(w, (2, 3, 1, 0)).reshape(K, cout)
            wk = jnp.zeros((Kp, cout_p), jnp.float32).at[:K, :cout].set(wk)
        else:
            cin_p = _round_up(cin)
            wk = jnp.transpose(w, (2, 3, 1, 0)).reshape(kh * kw, cin, cout)
            wk = (jnp.zeros((kh * kw, cin_p, cout_p), jnp.float32)
                  .at[:, :cin, :cout].set(wk))
        b2 = jnp.zeros((1, cout_p), jnp.float32).at[0, :cout].set(b)
        packed["blocks"].append((wk.astype(jnp.bfloat16), b2))
    c, nc = params["fc_w"].shape
    cp, ncp = _round_up(c), _round_up(nc)
    fw = jnp.zeros((cp, ncp), jnp.float32).at[:c, :nc].set(params["fc_w"])
    fb = jnp.zeros((1, ncp), jnp.float32).at[0, :nc].set(params["fc_b"])
    packed["fc_w"] = fw.astype(jnp.bfloat16)
    packed["fc_b"] = fb
    return packed


# ---------------------------------------------------------------------------
# Forward + pure-JAX reference (same bf16 quantization points as the kernel)
# ---------------------------------------------------------------------------
def plainnet_forward(packed, x_nchw, num_classes):
    N, C, H, W = x_nchw.shape
    Wp = W + 2
    HWp = H * Wp
    x = jnp.transpose(x_nchw, (0, 2, 3, 1)).astype(jnp.bfloat16)     # NHWC bf16

    # Width-extended im2col for the first conv (taps folded into K). Built in
    # XLA; it is *smaller* than the channel-padded input it replaces.
    xpad = jnp.pad(x, ((0, 0), (1, 2), (1, 1), (0, 0)))              # (N,H+3,Wp,C)
    flat = xpad.reshape(N, (H + 3) * Wp, C)
    cols = [flat[:, dy * Wp + dx: dy * Wp + dx + HWp, :]
            for dy in range(3) for dx in range(3)]
    patches = jnp.concatenate(cols, axis=-1)                         # (N,HWp,9C)
    Kp0 = packed["blocks"][0][0].shape[0]
    patches = jnp.pad(patches, ((0, 0), (0, 0), (0, Kp0 - 9 * C)))

    # B images per grid step to amortize per-step pipeline overhead.
    B = min(N, 8)
    N_pad = ((N + B - 1) // B) * B
    if N_pad != N:
        patches = jnp.pad(patches, ((0, N_pad - N), (0, 0), (0, 0)))

    out = plainnet_fused(patches, packed, H, W, B)                   # (N_pad,NCp)
    return out[:N, :num_classes]


def plainnet_reference(params, x_nchw):
    f32 = jnp.float32
    x = jnp.transpose(x_nchw, (0, 2, 3, 1)).astype(jnp.bfloat16).astype(f32)
    n_blocks = len(params["blocks"])
    for j, (w, b) in enumerate(params["blocks"]):
        w_hwio = jnp.transpose(w, (2, 3, 1, 0)).astype(jnp.bfloat16).astype(f32)
        y = lax.conv_general_dilated(x, w_hwio, (1, 1), ((1, 1), (1, 1)),
                                     dimension_numbers=("NHWC", "HWIO", "NHWC"))
        y = jnp.maximum(y + b, 0.0)
        x = y.astype(jnp.bfloat16).astype(f32) if j < n_blocks - 1 else y
    pooled = jnp.mean(x, axis=(1, 2)).astype(jnp.bfloat16).astype(f32)
    fc_w = params["fc_w"].astype(jnp.bfloat16).astype(f32)
    return pooled @ fc_w + params["fc_b"]


if __name__ == "__main__":
    key = jax.random.PRNGKey(0)
    key, kx = jax.random.split(key)

    N, C, H, W = 2, 4, 16, 16
    num_classes = 10
    block_channels = [8, 16]

    x = jax.random.normal(kx, (N, C, H, W), dtype=jnp.float32)
    params = init_plainnet_params(key, C, block_channels, num_classes)
    packed = pack_params(params)

    fwd = jax.jit(plainnet_forward, static_argnums=(2,))
    logits = fwd(packed, x, num_classes)
    jax.block_until_ready(logits)
    assert logits.shape == (N, num_classes)

    ref = plainnet_reference(params, x)
    err = float(jnp.max(jnp.abs(logits - ref)))
    assert err < 2e-2, f"mismatch vs reference: max abs err {err}"

    print("KERNEL_OK")
</pallas_src>

<mosaic_0001>
module attributes {stable_mosaic.version = 11 : i64} {
  func.func @kernel(%arg0: i32, %arg1: memref<2x288x128xbf16, #tpu.memory_space<vmem>>, %arg2: memref<128x128xbf16, #tpu.memory_space<vmem>>, %arg3: memref<1x128xf32, #tpu.memory_space<vmem>>, %arg4: memref<9x128x128xbf16, #tpu.memory_space<vmem>>, %arg5: memref<1x128xf32, #tpu.memory_space<vmem>>, %arg6: memref<128x128xbf16, #tpu.memory_space<vmem>>, %arg7: memref<1x128xf32, #tpu.memory_space<vmem>>, %arg8: memref<1x2x128xf32, #tpu.memory_space<vmem>>, %arg9: memref<328x128xbf16, #tpu.memory_space<vmem>>, %arg10: memref<288x128xf32, #tpu.memory_space<vmem>>, %arg11: memref<2x128xf32, #tpu.memory_space<vmem>>) attributes {dimension_semantics = [#tpu.dimension_semantics<parallel>], iteration_bounds = array<i64: 1>, scalar_prefetch = 0 : i64, scratch_operands = 3 : i64, tpu.core_type = #tpu.core_type<tc>, window_params = [{transform_indices = @transform_0, window_bounds = array<i64: 2, 288, 128>}, {pipeline_mode = #tpu.pipeline_mode<synchronous>, transform_indices = @transform_1, window_bounds = array<i64: 128, 128>}, {pipeline_mode = #tpu.pipeline_mode<synchronous>, transform_indices = @transform_2, window_bounds = array<i64: 1, 128>}, {pipeline_mode = #tpu.pipeline_mode<synchronous>, transform_indices = @transform_3, window_bounds = array<i64: 9, 128, 128>}, {pipeline_mode = #tpu.pipeline_mode<synchronous>, transform_indices = @transform_4, window_bounds = array<i64: 1, 128>}, {pipeline_mode = #tpu.pipeline_mode<synchronous>, transform_indices = @transform_5, window_bounds = array<i64: 128, 128>}, {pipeline_mode = #tpu.pipeline_mode<synchronous>, transform_indices = @transform_6, window_bounds = array<i64: 1, 128>}, {transform_indices = @transform_7, window_bounds = array<i64: 1, 2, 128>}]} {
    %0 = tpu.iota {dimensions = array<i32: 0>} : vector<288x1xi32>
    %c18_i32 = arith.constant 18 : i32
    %c0_i32 = arith.constant 0 : i32
    %1 = arith.cmpi eq, %c18_i32, %c0_i32 : i32
    %c1_i32 = arith.constant 1 : i32
    %2 = arith.select %1, %c1_i32, %c18_i32 : i32
    %3 = vector.broadcast %2 : i32 to vector<288x1xi32>
    %4 = arith.remsi %0, %3 : vector<288x1xi32>
    %c0_i32_0 = arith.constant 0 : i32
    %5 = vector.broadcast %c0_i32_0 : i32 to vector<288x1xi32>
    %6 = arith.cmpi ne, %4, %5 : vector<288x1xi32>
    %c0_i32_1 = arith.constant 0 : i32
    %7 = vector.broadcast %c0_i32_1 : i32 to vector<288x1xi32>
    %8 = arith.cmpi slt, %4, %7 : vector<288x1xi32>
    %c0_i32_2 = arith.constant 0 : i32
    %9 = arith.cmpi slt, %2, %c0_i32_2 : i32
    %10 = vector.broadcast %9 : i1 to vector<288x1xi1>
    %11 = vector.broadcast %10 : vector<288x1xi1> to vector<288x1xi1>
    %12 = arith.xori %8, %11 : vector<288x1xi1>
    %13 = arith.andi %12, %6 : vector<288x1xi1>
    %14 = vector.broadcast %2 : i32 to vector<288x1xi32>
    %15 = arith.addi %4, %14 : vector<288x1xi32>
    %16 = arith.select %13, %15, %4 : vector<288x1xi1>, vector<288x1xi32>
    %c16_i32 = arith.constant 16 : i32
    %17 = vector.broadcast %c16_i32 : i32 to vector<288x1xi32>
    %18 = arith.cmpi slt, %16, %17 : vector<288x1xi32>
    %cst = arith.constant 0.000000e+00 : bf16
    %19 = vector.broadcast %cst : bf16 to vector<19x128xbf16>
    %cst_3 = arith.constant 0.000000e+00 : bf16
    %20 = vector.broadcast %cst_3 : bf16 to vector<21x128xbf16>
    %c0 = arith.constant 0 : index
    %c0_4 = arith.constant 0 : index
    %c0_5 = arith.constant 0 : index
    %21 = vector.load %arg1[%c0, %c0_4, %c0_5] : memref<2x288x128xbf16, #tpu.memory_space<vmem>>, vector<1x288x128xbf16>
    %22 = vector.shape_cast %21 : vector<1x288x128xbf16> to vector<288x128xbf16>
    %c0_6 = arith.constant 0 : index
    %c0_7 = arith.constant 0 : index
    %23 = vector.load %arg2[%c0_6, %c0_7] : memref<128x128xbf16, #tpu.memory_space<vmem>>, vector<128x128xbf16>
    %cst_8 = arith.constant dense<0.000000e+00> : vector<288x128xf32>
    %24 = tpu.matmul %22, %23, %cst_8 {dimension_numbers = #tpu.dot_dimension_numbers<[1], [0], [0], [1], [0, 0, 1, 1], [], []>} : vector<288x128xbf16>, vector<128x128xbf16>, vector<288x128xf32> -> vector<288x128xf32>
    %c0_9 = arith.constant 0 : index
    %c0_10 = arith.constant 0 : index
    %25 = vector.load %arg3[%c0_9, %c0_10] : memref<1x128xf32, #tpu.memory_space<vmem>>, vector<1x128xf32>
    %26 = vector.broadcast %25 : vector<1x128xf32> to vector<288x128xf32>
    %27 = arith.addf %24, %26 : vector<288x128xf32>
    %cst_11 = arith.constant 0.000000e+00 : f32
    %28 = vector.broadcast %cst_11 : f32 to vector<288x128xf32>
    %29 = arith.maximumf %27, %28 : vector<288x128xf32>
    %cst_12 = arith.constant 0.000000e+00 : f32
    %30 = vector.shape_cast %18 : vector<288x1xi1> to vector<288x1xi1>
    %31 = vector.broadcast %30 : vector<288x1xi1> to vector<288x128xi1>
    %32 = vector.broadcast %cst_12 : f32 to vector<288x128xf32>
    %33 = arith.select %31, %29, %32 : vector<288x128xi1>, vector<288x128xf32>
    %34 = arith.truncf %33 : vector<288x128xf32> to vector<288x128xbf16>
    %c19 = arith.constant 19 : index
    %c0_13 = arith.constant 0 : index
    %35 = vector.load %arg9[%c19, %c0_13] : memref<328x128xbf16, #tpu.memory_space<vmem>>, vector<288x128xbf16>
    tpu.vector_store %arg9[%c19, %c0_13], %34 {strides = array<i32>} : memref<328x128xbf16, #tpu.memory_space<vmem>>, vector<288x128xbf16>,
    %c0_14 = arith.constant 0 : index
    %c0_15 = arith.constant 0 : index
    %36 = vector.load %arg9[%c0_14, %c0_15] : memref<328x128xbf16, #tpu.memory_space<vmem>>, vector<19x128xbf16>
    tpu.vector_store %arg9[%c0_14, %c0_15], %19 {strides = array<i32>} : memref<328x128xbf16, #tpu.memory_space<vmem>>, vector<19x128xbf16>,
    %c307 = arith.constant 307 : index
    %c0_16 = arith.constant 0 : index
    %37 = vector.load %arg9[%c307, %c0_16] : memref<328x128xbf16, #tpu.memory_space<vmem>>, vector<21x128xbf16>
    tpu.vector_store %arg9[%c307, %c0_16], %20 {strides = array<i32>} : memref<328x128xbf16, #tpu.memory_space<vmem>>, vector<21x128xbf16>,
    %c0_17 = arith.constant 0 : index
    %c0_18 = arith.constant 0 : index
    %38 = vector.load %arg9[%c0_17, %c0_18] : memref<328x128xbf16, #tpu.memory_space<vmem>>, vector<288x128xbf16>
    %c0_19 = arith.constant 0 : index
    %c0_20 = arith.constant 0 : index
    %c0_21 = arith.constant 0 : index
    %39 = vector.load %arg4[%c0_19, %c0_20, %c0_21] : memref<9x128x128xbf16, #tpu.memory_space<vmem>>, vector<1x128x128xbf16>
    %40 = vector.shape_cast %39 : vector<1x128x128xbf16> to vector<128x128xbf16>
    %cst_22 = arith.constant dense<0.000000e+00> : vector<288x128xf32>
    %41 = tpu.matmul %38, %40, %cst_22 {dimension_numbers = #tpu.dot_dimension_numbers<[1], [0], [0], [1], [0, 0, 1, 1], [], []>} : vector<288x128xbf16>, vector<128x128xbf16>, vector<288x128xf32> -> vector<288x128xf32>
    %c0_23 = arith.constant 0 : index
    %c0_24 = arith.constant 0 : index
    %42 = vector.load %arg10[%c0_23, %c0_24] : memref<288x128xf32, #tpu.memory_space<vmem>>, vector<288x128xf32>
    tpu.vector_store %arg10[%c0_23, %c0_24], %41 {strides = array<i32>} : memref<288x128xf32, #tpu.memory_space<vmem>>, vector<288x128xf32>,
    %c1 = arith.constant 1 : index
    %c0_25 = arith.constant 0 : index
    %43 = vector.load %arg9[%c1, %c0_25] : memref<328x128xbf16, #tpu.memory_space<vmem>>, vector<288x128xbf16>
    %c1_26 = arith.constant 1 : index
    %c0_27 = arith.constant 0 : index
    %c0_28 = arith.constant 0 : index
    %44 = vector.load %arg4[%c1_26, %c0_27, %c0_28] : memref<9x128x128xbf16, #tpu.memory_space<vmem>>, vector<1x128x128xbf16>
    %45 = vector.shape_cast %44 : vector<1x128x128xbf16> to vector<128x128xbf16>
    %cst_29 = arith.constant dense<0.000000e+00> : vector<288x128xf32>
    %46 = tpu.matmul %43, %45, %cst_29 {dimension_numbers = #tpu.dot_dimension_numbers<[1], [0], [0], [1], [0, 0, 1, 1], [], []>} : vector<288x128xbf16>, vector<128x128xbf16>, vector<288x128xf32> -> vector<288x128xf32>
    %c0_30 = arith.constant 0 : index
    %c0_31 = arith.constant 0 : index
    %47 = vector.load %arg10[%c0_30, %c0_31] : memref<288x128xf32, #tpu.memory_space<vmem>>, vector<288x128xf32>
    %48 = arith.addf %47, %46 : vector<288x128xf32>
    %c0_32 = arith.constant 0 : index
    %c0_33 = arith.constant 0 : index
    %49 = vector.load %arg10[%c0_32, %c0_33] : memref<288x128xf32, #tpu.memory_space<vmem>>, vector<288x128xf32>
    tpu.vector_store %arg10[%c0_32, %c0_33], %48 {strides = array<i32>} : memref<288x128xf32, #tpu.memory_space<vmem>>, vector<288x128xf32>,
    %c2 = arith.constant 2 : index
    %c0_34 = arith.constant 0 : index
    %50 = vector.load %arg9[%c2, %c0_34] : memref<328x128xbf16, #tpu.memory_space<vmem>>, vector<288x128xbf16>
    %c2_35 = arith.constant 2 : index
    %c0_36 = arith.constant 0 : index
    %c0_37 = arith.constant 0 : index
    %51 = vector.load %arg4[%c2_35, %c0_36, %c0_37] : memref<9x128x128xbf16, #tpu.memory_space<vmem>>, vector<1x128x128xbf16>
    %52 = vector.shape_cast %51 : vector<1x128x128xbf16> to vector<128x128xbf16>
    %cst_38 = arith.constant dense<0.000000e+00> : vector<288x128xf32>
    %53 = tpu.matmul %50, %52, %cst_38 {dimension_numbers = #tpu.dot_dimension_numbers<[1], [0], [0], [1], [0, 0, 1, 1], [], []>} : vector<288x128xbf16>, vector<128x128xbf16>, vector<288x128xf32> -> vector<288x128xf32>
    %c0_39 = arith.constant 0 : index
    %c0_40 = arith.constant 0 : index
    %54 = vector.load %arg10[%c0_39, %c0_40] : memref<288x128xf32, #tpu.memory_space<vmem>>, vector<288x128xf32>
    %55 = arith.addf %54, %53 : vector<288x128xf32>
    %c0_41 = arith.constant 0 : index
    %c0_42 = arith.constant 0 : index
    %56 = vector.load %arg10[%c0_41, %c0_42] : memref<288x128xf32, #tpu.memory_space<vmem>>, vector<288x128xf32>
    tpu.vector_store %arg10[%c0_41, %c0_42], %55 {strides = array<i32>} : memref<288x128xf32, #tpu.memory_space<vmem>>, vector<288x128xf32>,
    %c18 = arith.constant 18 : index
    %c0_43 = arith.constant 0 : index
    %57 = vector.load %arg9[%c18, %c0_43] : memref<328x128xbf16, #tpu.memory_space<vmem>>, vector<288x128xbf16>
    %c3 = arith.constant 3 : index
    %c0_44 = arith.constant 0 : index
    %c0_45 = arith.constant 0 : index
    %58 = vector.load %arg4[%c3, %c0_44, %c0_45] : memref<9x128x128xbf16, #tpu.memory_space<vmem>>, vector<1x128x128xbf16>
    %59 = vector.shape_cast %58 : vector<1x128x128xbf16> to vector<128x128xbf16>
    %cst_46 = arith.constant dense<0.000000e+00> : vector<288x128xf32>
    %60 = tpu.matmul %57, %59, %cst_46 {dimension_numbers = #tpu.dot_dimension_numbers<[1], [0], [0], [1], [0, 0, 1, 1], [], []>} : vector<288x128xbf16>, vector<128x128xbf16>, vector<288x128xf32> -> vector<288x128xf32>
    %c0_47 = arith.constant 0 : index
    %c0_48 = arith.constant 0 : index
    %61 = vector.load %arg10[%c0_47, %c0_48] : memref<288x128xf32, #tpu.memory_space<vmem>>, vector<288x128xf32>
    %62 = arith.addf %61, %60 : vector<288x128xf32>
    %c0_49 = arith.constant 0 : index
    %c0_50 = arith.constant 0 : index
    %63 = vector.load %arg10[%c0_49, %c0_50] : memref<288x128xf32, #tpu.memory_space<vmem>>, vector<288x128xf32>
    tpu.vector_store %arg10[%c0_49, %c0_50], %62 {strides = array<i32>} : memref<288x128xf32, #tpu.memory_space<vmem>>, vector<288x128xf32>,
    %c19_51 = arith.constant 19 : index
    %c0_52 = arith.constant 0 : index
    %64 = vector.load %arg9[%c19_51, %c0_52] : memref<328x128xbf16, #tpu.memory_space<vmem>>, vector<288x128xbf16>
    %c4 = arith.constant 4 : index
    %c0_53 = arith.constant 0 : index
    %c0_54 = arith.constant 0 : index
    %65 = vector.load %arg4[%c4, %c0_53, %c0_54] : memref<9x128x128xbf16, #tpu.memory_space<vmem>>, vector<1x128x128xbf16>
    %66 = vector.shape_cast %65 : vector<1x128x128xbf16> to vector<128x128xbf16>
    %cst_55 = arith.constant dense<0.000000e+00> : vector<288x128xf32>
    %67 = tpu.matmul %64, %66, %cst_55 {dimension_numbers = #tpu.dot_dimension_numbers<[1], [0], [0], [1], [0, 0, 1, 1], [], []>} : vector<288x128xbf16>, vector<128x128xbf16>, vector<288x128xf32> -> vector<288x128xf32>
    %c0_56 = arith.constant 0 : index
    %c0_57 = arith.constant 0 : index
    %68 = vector.load %arg10[%c0_56, %c0_57] : memref<288x128xf32, #tpu.memory_space<vmem>>, vector<288x128xf32>
    %69 = arith.addf %68, %67 : vector<288x128xf32>
    %c0_58 = arith.constant 0 : index
    %c0_59 = arith.constant 0 : index
    %70 = vector.load %arg10[%c0_58, %c0_59] : memref<288x128xf32, #tpu.memory_space<vmem>>, vector<288x128xf32>
    tpu.vector_store %arg10[%c0_58, %c0_59], %69 {strides = array<i32>} : memref<288x128xf32, #tpu.memory_space<vmem>>, vector<288x128xf32>,
    %c20 = arith.constant 20 : index
    %c0_60 = arith.constant 0 : index
    %71 = vector.load %arg9[%c20, %c0_60] : memref<328x128xbf16, #tpu.memory_space<vmem>>, vector<288x128xbf16>
    %c5 = arith.constant 5 : index
    %c0_61 = arith.constant 0 : index
    %c0_62 = arith.constant 0 : index
    %72 = vector.load %arg4[%c5, %c0_61, %c0_62] : memref<9x128x128xbf16, #tpu.memory_space<vmem>>, vector<1x128x128xbf16>
    %73 = vector.shape_cast %72 : vector<1x128x128xbf16> to vector<128x128xbf16>
    %cst_63 = arith.constant dense<0.000000e+00> : vector<288x128xf32>
    %74 = tpu.matmul %71, %73, %cst_63 {dimension_numbers = #tpu.dot_dimension_numbers<[1], [0], [0], [1], [0, 0, 1, 1], [], []>} : vector<288x128xbf16>, vector<128x128xbf16>, vector<288x128xf32> -> vector<288x128xf32>
    %c0_64 = arith.constant 0 : index
    %c0_65 = arith.constant 0 : index
    %75 = vector.load %arg10[%c0_64, %c0_65] : memref<288x128xf32, #tpu.memory_space<vmem>>, vector<288x128xf32>
    %76 = arith.addf %75, %74 : vector<288x128xf32>
    %c0_66 = arith.constant 0 : index
    %c0_67 = arith.constant 0 : index
    %77 = vector.load %arg10[%c0_66, %c0_67] : memref<288x128xf32, #tpu.memory_space<vmem>>, vector<288x128xf32>
    tpu.vector_store %arg10[%c0_66, %c0_67], %76 {strides = array<i32>} : memref<288x128xf32, #tpu.memory_space<vmem>>, vector<288x128xf32>,
    %c36 = arith.constant 36 : index
    %c0_68 = arith.constant 0 : index
    %78 = vector.load %arg9[%c36, %c0_68] : memref<328x128xbf16, #tpu.memory_space<vmem>>, vector<288x128xbf16>
    %c6 = arith.constant 6 : index
    %c0_69 = arith.constant 0 : index
    %c0_70 = arith.constant 0 : index
    %79 = vector.load %arg4[%c6, %c0_69, %c0_70] : memref<9x128x128xbf16, #tpu.memory_space<vmem>>, vector<1x128x128xbf16>
    %80 = vector.shape_cast %79 : vector<1x128x128xbf16> to vector<128x128xbf16>
    %cst_71 = arith.constant dense<0.000000e+00> : vector<288x128xf32>
    %81 = tpu.matmul %78, %80, %cst_71 {dimension_numbers = #tpu.dot_dimension_numbers<[1], [0], [0], [1], [0, 0, 1, 1], [], []>} : vector<288x128xbf16>, vector<128x128xbf16>, vector<288x128xf32> -> vector<288x128xf32>
    %c0_72 = arith.constant 0 : index
    %c0_73 = arith.constant 0 : index
    %82 = vector.load %arg10[%c0_72, %c0_73] : memref<288x128xf32, #tpu.memory_space<vmem>>, vector<288x128xf32>
    %83 = arith.addf %82, %81 : vector<288x128xf32>
    %c0_74 = arith.constant 0 : index
    %c0_75 = arith.constant 0 : index
    %84 = vector.load %arg10[%c0_74, %c0_75] : memref<288x128xf32, #tpu.memory_space<vmem>>, vector<288x128xf32>
    tpu.vector_store %arg10[%c0_74, %c0_75], %83 {strides = array<i32>} : memref<288x128xf32, #tpu.memory_space<vmem>>, vector<288x128xf32>,
    %c37 = arith.constant 37 : index
    %c0_76 = arith.constant 0 : index
    %85 = vector.load %arg9[%c37, %c0_76] : memref<328x128xbf16, #tpu.memory_space<vmem>>, vector<288x128xbf16>
    %c7 = arith.constant 7 : index
    %c0_77 = arith.constant 0 : index
    %c0_78 = arith.constant 0 : index
    %86 = vector.load %arg4[%c7, %c0_77, %c0_78] : memref<9x128x128xbf16, #tpu.memory_space<vmem>>, vector<1x128x128xbf16>
    %87 = vector.shape_cast %86 : vector<1x128x128xbf16> to vector<128x128xbf16>
    %cst_79 = arith.constant dense<0.000000e+00> : vector<288x128xf32>
    %88 = tpu.matmul %85, %87, %cst_79 {dimension_numbers = #tpu.dot_dimension_numbers<[1], [0], [0], [1], [0, 0, 1, 1], [], []>} : vector<288x128xbf16>, vector<128x128xbf16>, vector<288x128xf32> -> vector<288x128xf32>
    %c0_80 = arith.constant 0 : index
    %c0_81 = arith.constant 0 : index
    %89 = vector.load %arg10[%c0_80, %c0_81] : memref<288x128xf32, #tpu.memory_space<vmem>>, vector<288x128xf32>
    %90 = arith.addf %89, %88 : vector<288x128xf32>
    %c0_82 = arith.constant 0 : index
    %c0_83 = arith.constant 0 : index
    %91 = vector.load %arg10[%c0_82, %c0_83] : memref<288x128xf32, #tpu.memory_space<vmem>>, vector<288x128xf32>
    tpu.vector_store %arg10[%c0_82, %c0_83], %90 {strides = array<i32>} : memref<288x128xf32, #tpu.memory_space<vmem>>, vector<288x128xf32>,
    %c38 = arith.constant 38 : index
    %c0_84 = arith.constant 0 : index
    %92 = vector.load %arg9[%c38, %c0_84] : memref<328x128xbf16, #tpu.memory_space<vmem>>, vector<288x128xbf16>
    %c8 = arith.constant 8 : index
    %c0_85 = arith.constant 0 : index
    %c0_86 = arith.constant 0 : index
    %93 = vector.load %arg4[%c8, %c0_85, %c0_86] : memref<9x128x128xbf16, #tpu.memory_space<vmem>>, vector<1x128x128xbf16>
    %94 = vector.shape_cast %93 : vector<1x128x128xbf16> to vector<128x128xbf16>
    %cst_87 = arith.constant dense<0.000000e+00> : vector<288x128xf32>
    %95 = tpu.matmul %92, %94, %cst_87 {dimension_numbers = #tpu.dot_dimension_numbers<[1], [0], [0], [1], [0, 0, 1, 1], [], []>} : vector<288x128xbf16>, vector<128x128xbf16>, vector<288x128xf32> -> vector<288x128xf32>
    %c0_88 = arith.constant 0 : index
    %c0_89 = arith.constant 0 : index
    %96 = vector.load %arg10[%c0_88, %c0_89] : memref<288x128xf32, #tpu.memory_space<vmem>>, vector<288x128xf32>
    %97 = arith.addf %96, %95 : vector<288x128xf32>
    %c0_90 = arith.constant 0 : index
    %c0_91 = arith.constant 0 : index
    %98 = vector.load %arg10[%c0_90, %c0_91] : memref<288x128xf32, #tpu.memory_space<vmem>>, vector<288x128xf32>
    tpu.vector_store %arg10[%c0_90, %c0_91], %97 {strides = array<i32>} : memref<288x128xf32, #tpu.memory_space<vmem>>, vector<288x128xf32>,
    %c0_92 = arith.constant 0 : index
    %c0_93 = arith.constant 0 : index
    %99 = vector.load %arg10[%c0_92, %c0_93] : memref<288x128xf32, #tpu.memory_space<vmem>>, vector<288x128xf32>
    %c0_94 = arith.constant 0 : index
    %c0_95 = arith.constant 0 : index
    %100 = vector.load %arg5[%c0_94, %c0_95] : memref<1x128xf32, #tpu.memory_space<vmem>>, vector<1x128xf32>
    %101 = vector.broadcast %100 : vector<1x128xf32> to vector<288x128xf32>
    %102 = arith.addf %99, %101 : vector<288x128xf32>
    %cst_96 = arith.constant 0.000000e+00 : f32
    %103 = vector.broadcast %cst_96 : f32 to vector<288x128xf32>
    %104 = arith.maximumf %102, %103 : vector<288x128xf32>
    %cst_97 = arith.constant 0.000000e+00 : f32
    %105 = vector.shape_cast %18 : vector<288x1xi1> to vector<288x1xi1>
    %106 = vector.broadcast %105 : vector<288x1xi1> to vector<288x128xi1>
    %107 = vector.broadcast %cst_97 : f32 to vector<288x128xf32>
    %108 = arith.select %106, %104, %107 : vector<288x128xi1>, vector<288x128xf32>
    %cst_98 = arith.constant dense<0.000000e+00> : vector<128xf32>
    %109 = vector.multi_reduction <add>, %108, %cst_98 [0] : vector<288x128xf32> to vector<128xf32>
    %110 = vector.shape_cast %109 : vector<128xf32> to vector<1x128xf32>
    %cst_99 = arith.constant 3.906250e-03 : f32
    %111 = vector.broadcast %cst_99 : f32 to vector<1x128xf32>
    %112 = arith.mulf %110, %111 : vector<1x128xf32>
    %c0_100 = arith.constant 0 : index
    %c0_101 = arith.constant 0 : index
    %113 = vector.load %arg11[%c0_100, %c0_101] : memref<2x128xf32, #tpu.memory_space<vmem>>, vector<1x128xf32>
    tpu.vector_store %arg11[%c0_100, %c0_101], %112 {strides = array<i32>} : memref<2x128xf32, #tpu.memory_space<vmem>>, vector<1x128xf32>,
    %c1_102 = arith.constant 1 : index
    %c0_103 = arith.constant 0 : index
    %c0_104 = arith.constant 0 : index
    %114 = vector.load %arg1[%c1_102, %c0_103, %c0_104] : memref<2x288x128xbf16, #tpu.memory_space<vmem>>, vector<1x288x128xbf16>
    %115 = vector.shape_cast %114 : vector<1x288x128xbf16> to vector<288x128xbf16>
    %c0_105 = arith.constant 0 : index
    %c0_106 = arith.constant 0 : index
    %116 = vector.load %arg2[%c0_105, %c0_106] : memref<128x128xbf16, #tpu.memory_space<vmem>>, vector<128x128xbf16>
    %cst_107 = arith.constant dense<0.000000e+00> : vector<288x128xf32>
    %117 = tpu.matmul %115, %116, %cst_107 {dimension_numbers = #tpu.dot_dimension_numbers<[1], [0], [0], [1], [0, 0, 1, 1], [], []>} : vector<288x128xbf16>, vector<128x128xbf16>, vector<288x128xf32> -> vector<288x128xf32>
    %c0_108 = arith.constant 0 : index
    %c0_109 = arith.constant 0 : index
    %118 = vector.load %arg3[%c0_108, %c0_109] : memref<1x128xf32, #tpu.memory_space<vmem>>, vector<1x128xf32>
    %119 = vector.broadcast %118 : vector<1x128xf32> to vector<288x128xf32>
    %120 = arith.addf %117, %119 : vector<288x128xf32>
    %cst_110 = arith.constant 0.000000e+00 : f32
    %121 = vector.broadcast %cst_110 : f32 to vector<288x128xf32>
    %122 = arith.maximumf %120, %121 : vector<288x128xf32>
    %cst_111 = arith.constant 0.000000e+00 : f32
    %123 = vector.shape_cast %18 : vector<288x1xi1> to vector<288x1xi1>
    %124 = vector.broadcast %123 : vector<288x1xi1> to vector<288x128xi1>
    %125 = vector.broadcast %cst_111 : f32 to vector<288x128xf32>
    %126 = arith.select %124, %122, %125 : vector<288x128xi1>, vector<288x128xf32>
    %127 = arith.truncf %126 : vector<288x128xf32> to vector<288x128xbf16>
    %c19_112 = arith.constant 19 : index
    %c0_113 = arith.constant 0 : index
    %128 = vector.load %arg9[%c19_112, %c0_113] : memref<328x128xbf16, #tpu.memory_space<vmem>>, vector<288x128xbf16>
    tpu.vector_store %arg9[%c19_112, %c0_113], %127 {strides = array<i32>} : memref<328x128xbf16, #tpu.memory_space<vmem>>, vector<288x128xbf16>,
    %c0_114 = arith.constant 0 : index
    %c0_115 = arith.constant 0 : index
    %129 = vector.load %arg9[%c0_114, %c0_115] : memref<328x128xbf16, #tpu.memory_space<vmem>>, vector<19x128xbf16>
    tpu.vector_store %arg9[%c0_114, %c0_115], %19 {strides = array<i32>} : memref<328x128xbf16, #tpu.memory_space<vmem>>, vector<19x128xbf16>,
    %c307_116 = arith.constant 307 : index
    %c0_117 = arith.constant 0 : index
    %130 = vector.load %arg9[%c307_116, %c0_117] : memref<328x128xbf16, #tpu.memory_space<vmem>>, vector<21x128xbf16>
    tpu.vector_store %arg9[%c307_116, %c0_117], %20 {strides = array<i32>} : memref<328x128xbf16, #tpu.memory_space<vmem>>, vector<21x128xbf16>,
    %c0_118 = arith.constant 0 : index
    %c0_119 = arith.constant 0 : index
    %131 = vector.load %arg9[%c0_118, %c0_119] : memref<328x128xbf16, #tpu.memory_space<vmem>>, vector<288x128xbf16>
    %c0_120 = arith.constant 0 : index
    %c0_121 = arith.constant 0 : index
    %c0_122 = arith.constant 0 : index
    %132 = vector.load %arg4[%c0_120, %c0_121, %c0_122] : memref<9x128x128xbf16, #tpu.memory_space<vmem>>, vector<1x128x128xbf16>
    %133 = vector.shape_cast %132 : vector<1x128x128xbf16> to vector<128x128xbf16>
    %cst_123 = arith.constant dense<0.000000e+00> : vector<288x128xf32>
    %134 = tpu.matmul %131, %133, %cst_123 {dimension_numbers = #tpu.dot_dimension_numbers<[1], [0], [0], [1], [0, 0, 1, 1], [], []>} : vector<288x128xbf16>, vector<128x128xbf16>, vector<288x128xf32> -> vector<288x128xf32>
    %c0_124 = arith.constant 0 : index
    %c0_125 = arith.constant 0 : index
    %135 = vector.load %arg10[%c0_124, %c0_125] : memref<288x128xf32, #tpu.memory_space<vmem>>, vector<288x128xf32>
    tpu.vector_store %arg10[%c0_124, %c0_125], %134 {strides = array<i32>} : memref<288x128xf32, #tpu.memory_space<vmem>>, vector<288x128xf32>,
    %c1_126 = arith.constant 1 : index
    %c0_127 = arith.constant 0 : index
    %136 = vector.load %arg9[%c1_126, %c0_127] : memref<328x128xbf16, #tpu.memory_space<vmem>>, vector<288x128xbf16>
    %c1_128 = arith.constant 1 : index
    %c0_129 = arith.constant 0 : index
    %c0_130 = arith.constant 0 : index
    %137 = vector.load %arg4[%c1_128, %c0_129, %c0_130] : memref<9x128x128xbf16, #tpu.memory_space<vmem>>, vector<1x128x128xbf16>
    %138 = vector.shape_cast %137 : vector<1x128x128xbf16> to vector<128x128xbf16>
    %cst_131 = arith.constant dense<0.000000e+00> : vector<288x128xf32>
    %139 = tpu.matmul %136, %138, %cst_131 {dimension_numbers = #tpu.dot_dimension_numbers<[1], [0], [0], [1], [0, 0, 1, 1], [], []>} : vector<288x128xbf16>, vector<128x128xbf16>, vector<288x128xf32> -> vector<288x128xf32>
    %c0_132 = arith.constant 0 : index
    %c0_133 = arith.constant 0 : index
    %140 = vector.load %arg10[%c0_132, %c0_133] : memref<288x128xf32, #tpu.memory_space<vmem>>, vector<288x128xf32>
    %141 = arith.addf %140, %139 : vector<288x128xf32>
    %c0_134 = arith.constant 0 : index
    %c0_135 = arith.constant 0 : index
    %142 = vector.load %arg10[%c0_134, %c0_135] : memref<288x128xf32, #tpu.memory_space<vmem>>, vector<288x128xf32>
    tpu.vector_store %arg10[%c0_134, %c0_135], %141 {strides = array<i32>} : memref<288x128xf32, #tpu.memory_space<vmem>>, vector<288x128xf32>,
    %c2_136 = arith.constant 2 : index
    %c0_137 = arith.constant 0 : index
    %143 = vector.load %arg9[%c2_136, %c0_137] : memref<328x128xbf16, #tpu.memory_space<vmem>>, vector<288x128xbf16>
    %c2_138 = arith.constant 2 : index
    %c0_139 = arith.constant 0 : index
    %c0_140 = arith.constant 0 : index
    %144 = vector.load %arg4[%c2_138, %c0_139, %c0_140] : memref<9x128x128xbf16, #tpu.memory_space<vmem>>, vector<1x128x128xbf16>
    %145 = vector.shape_cast %144 : vector<1x128x128xbf16> to vector<128x128xbf16>
    %cst_141 = arith.constant dense<0.000000e+00> : vector<288x128xf32>
    %146 = tpu.matmul %143, %145, %cst_141 {dimension_numbers = #tpu.dot_dimension_numbers<[1], [0], [0], [1], [0, 0, 1, 1], [], []>} : vector<288x128xbf16>, vector<128x128xbf16>, vector<288x128xf32> -> vector<288x128xf32>
    %c0_142 = arith.constant 0 : index
    %c0_143 = arith.constant 0 : index
    %147 = vector.load %arg10[%c0_142, %c0_143] : memref<288x128xf32, #tpu.memory_space<vmem>>, vector<288x128xf32>
    %148 = arith.addf %147, %146 : vector<288x128xf32>
    %c0_144 = arith.constant 0 : index
    %c0_145 = arith.constant 0 : index
    %149 = vector.load %arg10[%c0_144, %c0_145] : memref<288x128xf32, #tpu.memory_space<vmem>>, vector<288x128xf32>
    tpu.vector_store %arg10[%c0_144, %c0_145], %148 {strides = array<i32>} : memref<288x128xf32, #tpu.memory_space<vmem>>, vector<288x128xf32>,
    %c18_146 = arith.constant 18 : index
    %c0_147 = arith.constant 0 : index
    %150 = vector.load %arg9[%c18_146, %c0_147] : memref<328x128xbf16, #tpu.memory_space<vmem>>, vector<288x128xbf16>
    %c3_148 = arith.constant 3 : index
    %c0_149 = arith.constant 0 : index
    %c0_150 = arith.constant 0 : index
    %151 = vector.load %arg4[%c3_148, %c0_149, %c0_150] : memref<9x128x128xbf16, #tpu.memory_space<vmem>>, vector<1x128x128xbf16>
    %152 = vector.shape_cast %151 : vector<1x128x128xbf16> to vector<128x128xbf16>
    %cst_151 = arith.constant dense<0.000000e+00> : vector<288x128xf32>
    %153 = tpu.matmul %150, %152, %cst_151 {dimension_numbers = #tpu.dot_dimension_numbers<[1], [0], [0], [1], [0, 0, 1, 1], [], []>} : vector<288x128xbf16>, vector<128x128xbf16>, vector<288x128xf32> -> vector<288x128xf32>
    %c0_152 = arith.constant 0 : index
    %c0_153 = arith.constant 0 : index
    %154 = vector.load %arg10[%c0_152, %c0_153] : memref<288x128xf32, #tpu.memory_space<vmem>>, vector<288x128xf32>
    %155 = arith.addf %154, %153 : vector<288x128xf32>
    %c0_154 = arith.constant 0 : index
    %c0_155 = arith.constant 0 : index
    %156 = vector.load %arg10[%c0_154, %c0_155] : memref<288x128xf32, #tpu.memory_space<vmem>>, vector<288x128xf32>
    tpu.vector_store %arg10[%c0_154, %c0_155], %155 {strides = array<i32>} : memref<288x128xf32, #tpu.memory_space<vmem>>, vector<288x128xf32>,
    %c19_156 = arith.constant 19 : index
    %c0_157 = arith.constant 0 : index
    %157 = vector.load %arg9[%c19_156, %c0_157] : memref<328x128xbf16, #tpu.memory_space<vmem>>, vector<288x128xbf16>
    %c4_158 = arith.constant 4 : index
    %c0_159 = arith.constant 0 : index
    %c0_160 = arith.constant 0 : index
    %158 = vector.load %arg4[%c4_158, %c0_159, %c0_160] : memref<9x128x128xbf16, #tpu.memory_space<vmem>>, vector<1x128x128xbf16>
    %159 = vector.shape_cast %158 : vector<1x128x128xbf16> to vector<128x128xbf16>
    %cst_161 = arith.constant dense<0.000000e+00> : vector<288x128xf32>
    %160 = tpu.matmul %157, %159, %cst_161 {dimension_numbers = #tpu.dot_dimension_numbers<[1], [0], [0], [1], [0, 0, 1, 1], [], []>} : vector<288x128xbf16>, vector<128x128xbf16>, vector<288x128xf32> -> vector<288x128xf32>
    %c0_162 = arith.constant 0 : index
    %c0_163 = arith.constant 0 : index
    %161 = vector.load %arg10[%c0_162, %c0_163] : memref<288x128xf32, #tpu.memory_space<vmem>>, vector<288x128xf32>
    %162 = arith.addf %161, %160 : vector<288x128xf32>
    %c0_164 = arith.constant 0 : index
    %c0_165 = arith.constant 0 : index
    %163 = vector.load %arg10[%c0_164, %c0_165] : memref<288x128xf32, #tpu.memory_space<vmem>>, vector<288x128xf32>
    tpu.vector_store %arg10[%c0_164, %c0_165], %162 {strides = array<i32>} : memref<288x128xf32, #tpu.memory_space<vmem>>, vector<288x128xf32>,
    %c20_166 = arith.constant 20 : index
    %c0_167 = arith.constant 0 : index
    %164 = vector.load %arg9[%c20_166, %c0_167] : memref<328x128xbf16, #tpu.memory_space<vmem>>, vector<288x128xbf16>
    %c5_168 = arith.constant 5 : index
    %c0_169 = arith.constant 0 : index
    %c0_170 = arith.constant 0 : index
    %165 = vector.load %arg4[%c5_168, %c0_169, %c0_170] : memref<9x128x128xbf16, #tpu.memory_space<vmem>>, vector<1x128x128xbf16>
    %166 = vector.shape_cast %165 : vector<1x128x128xbf16> to vector<128x128xbf16>
    %cst_171 = arith.constant dense<0.000000e+00> : vector<288x128xf32>
    %167 = tpu.matmul %164, %166, %cst_171 {dimension_numbers = #tpu.dot_dimension_numbers<[1], [0], [0], [1], [0, 0, 1, 1], [], []>} : vector<288x128xbf16>, vector<128x128xbf16>, vector<288x128xf32> -> vector<288x128xf32>
    %c0_172 = arith.constant 0 : index
    %c0_173 = arith.constant 0 : index
    %168 = vector.load %arg10[%c0_172, %c0_173] : memref<288x128xf32, #tpu.memory_space<vmem>>, vector<288x128xf32>
    %169 = arith.addf %168, %167 : vector<288x128xf32>
    %c0_174 = arith.constant 0 : index
    %c0_175 = arith.constant 0 : index
    %170 = vector.load %arg10[%c0_174, %c0_175] : memref<288x128xf32, #tpu.memory_space<vmem>>, vector<288x128xf32>
    tpu.vector_store %arg10[%c0_174, %c0_175], %169 {strides = array<i32>} : memref<288x128xf32, #tpu.memory_space<vmem>>, vector<288x128xf32>,
    %c36_176 = arith.constant 36 : index
    %c0_177 = arith.constant 0 : index
    %171 = vector.load %arg9[%c36_176, %c0_177] : memref<328x128xbf16, #tpu.memory_space<vmem>>, vector<288x128xbf16>
    %c6_178 = arith.constant 6 : index
    %c0_179 = arith.constant 0 : index
    %c0_180 = arith.constant 0 : index
    %172 = vector.load %arg4[%c6_178, %c0_179, %c0_180] : memref<9x128x128xbf16, #tpu.memory_space<vmem>>, vector<1x128x128xbf16>
    %173 = vector.shape_cast %172 : vector<1x128x128xbf16> to vector<128x128xbf16>
    %cst_181 = arith.constant dense<0.000000e+00> : vector<288x128xf32>
    %174 = tpu.matmul %171, %173, %cst_181 {dimension_numbers = #tpu.dot_dimension_numbers<[1], [0], [0], [1], [0, 0, 1, 1], [], []>} : vector<288x128xbf16>, vector<128x128xbf16>, vector<288x128xf32> -> vector<288x128xf32>
    %c0_182 = arith.constant 0 : index
    %c0_183 = arith.constant 0 : index
    %175 = vector.load %arg10[%c0_182, %c0_183] : memref<288x128xf32, #tpu.memory_space<vmem>>, vector<288x128xf32>
    %176 = arith.addf %175, %174 : vector<288x128xf32>
    %c0_184 = arith.constant 0 : index
    %c0_185 = arith.constant 0 : index
    %177 = vector.load %arg10[%c0_184, %c0_185] : memref<288x128xf32, #tpu.memory_space<vmem>>, vector<288x128xf32>
    tpu.vector_store %arg10[%c0_184, %c0_185], %176 {strides = array<i32>} : memref<288x128xf32, #tpu.memory_space<vmem>>, vector<288x128xf32>,
    %c37_186 = arith.constant 37 : index
    %c0_187 = arith.constant 0 : index
    %178 = vector.load %arg9[%c37_186, %c0_187] : memref<328x128xbf16, #tpu.memory_space<vmem>>, vector<288x128xbf16>
    %c7_188 = arith.constant 7 : index
    %c0_189 = arith.constant 0 : index
    %c0_190 = arith.constant 0 : index
    %179 = vector.load %arg4[%c7_188, %c0_189, %c0_190] : memref<9x128x128xbf16, #tpu.memory_space<vmem>>, vector<1x128x128xbf16>
    %180 = vector.shape_cast %179 : vector<1x128x128xbf16> to vector<128x128xbf16>
    %cst_191 = arith.constant dense<0.000000e+00> : vector<288x128xf32>
    %181 = tpu.matmul %178, %180, %cst_191 {dimension_numbers = #tpu.dot_dimension_numbers<[1], [0], [0], [1], [0, 0, 1, 1], [], []>} : vector<288x128xbf16>, vector<128x128xbf16>, vector<288x128xf32> -> vector<288x128xf32>
    %c0_192 = arith.constant 0 : index
    %c0_193 = arith.constant 0 : index
    %182 = vector.load %arg10[%c0_192, %c0_193] : memref<288x128xf32, #tpu.memory_space<vmem>>, vector<288x128xf32>
    %183 = arith.addf %182, %181 : vector<288x128xf32>
    %c0_194 = arith.constant 0 : index
    %c0_195 = arith.constant 0 : index
    %184 = vector.load %arg10[%c0_194, %c0_195] : memref<288x128xf32, #tpu.memory_space<vmem>>, vector<288x128xf32>
    tpu.vector_store %arg10[%c0_194, %c0_195], %183 {strides = array<i32>} : memref<288x128xf32, #tpu.memory_space<vmem>>, vector<288x128xf32>,
    %c38_196 = arith.constant 38 : index
    %c0_197 = arith.constant 0 : index
    %185 = vector.load %arg9[%c38_196, %c0_197] : memref<328x128xbf16, #tpu.memory_space<vmem>>, vector<288x128xbf16>
    %c8_198 = arith.constant 8 : index
    %c0_199 = arith.constant 0 : index
    %c0_200 = arith.constant 0 : index
    %186 = vector.load %arg4[%c8_198, %c0_199, %c0_200] : memref<9x128x128xbf16, #tpu.memory_space<vmem>>, vector<1x128x128xbf16>
    %187 = vector.shape_cast %186 : vector<1x128x128xbf16> to vector<128x128xbf16>
    %cst_201 = arith.constant dense<0.000000e+00> : vector<288x128xf32>
    %188 = tpu.matmul %185, %187, %cst_201 {dimension_numbers = #tpu.dot_dimension_numbers<[1], [0], [0], [1], [0, 0, 1, 1], [], []>} : vector<288x128xbf16>, vector<128x128xbf16>, vector<288x128xf32> -> vector<288x128xf32>
    %c0_202 = arith.constant 0 : index
    %c0_203 = arith.constant 0 : index
    %189 = vector.load %arg10[%c0_202, %c0_203] : memref<288x128xf32, #tpu.memory_space<vmem>>, vector<288x128xf32>
    %190 = arith.addf %189, %188 : vector<288x128xf32>
    %c0_204 = arith.constant 0 : index
    %c0_205 = arith.constant 0 : index
    %191 = vector.load %arg10[%c0_204, %c0_205] : memref<288x128xf32, #tpu.memory_space<vmem>>, vector<288x128xf32>
    tpu.vector_store %arg10[%c0_204, %c0_205], %190 {strides = array<i32>} : memref<288x128xf32, #tpu.memory_space<vmem>>, vector<288x128xf32>,
    %c0_206 = arith.constant 0 : index
    %c0_207 = arith.constant 0 : index
    %192 = vector.load %arg10[%c0_206, %c0_207] : memref<288x128xf32, #tpu.memory_space<vmem>>, vector<288x128xf32>
    %c0_208 = arith.constant 0 : index
    %c0_209 = arith.constant 0 : index
    %193 = vector.load %arg5[%c0_208, %c0_209] : memref<1x128xf32, #tpu.memory_space<vmem>>, vector<1x128xf32>
    %194 = vector.broadcast %193 : vector<1x128xf32> to vector<288x128xf32>
    %195 = arith.addf %192, %194 : vector<288x128xf32>
    %cst_210 = arith.constant 0.000000e+00 : f32
    %196 = vector.broadcast %cst_210 : f32 to vector<288x128xf32>
    %197 = arith.maximumf %195, %196 : vector<288x128xf32>
    %cst_211 = arith.constant 0.000000e+00 : f32
    %198 = vector.shape_cast %18 : vector<288x1xi1> to vector<288x1xi1>
    %199 = vector.broadcast %198 : vector<288x1xi1> to vector<288x128xi1>
    %200 = vector.broadcast %cst_211 : f32 to vector<288x128xf32>
    %201 = arith.select %199, %197, %200 : vector<288x128xi1>, vector<288x128xf32>
    %cst_212 = arith.constant dense<0.000000e+00> : vector<128xf32>
    %202 = vector.multi_reduction <add>, %201, %cst_212 [0] : vector<288x128xf32> to vector<128xf32>
    %203 = vector.shape_cast %202 : vector<128xf32> to vector<1x128xf32>
    %cst_213 = arith.constant 3.906250e-03 : f32
    %204 = vector.broadcast %cst_213 : f32 to vector<1x128xf32>
    %205 = arith.mulf %203, %204 : vector<1x128xf32>
    %c1_214 = arith.constant 1 : index
    %c0_215 = arith.constant 0 : index
    %206 = vector.load %arg11[%c1_214, %c0_215] : memref<2x128xf32, #tpu.memory_space<vmem>>, vector<1x128xf32>
    tpu.vector_store %arg11[%c1_214, %c0_215], %205 {strides = array<i32>} : memref<2x128xf32, #tpu.memory_space<vmem>>, vector<1x128xf32>,
    %c0_216 = arith.constant 0 : index
    %c0_217 = arith.constant 0 : index
    %207 = vector.load %arg11[%c0_216, %c0_217] : memref<2x128xf32, #tpu.memory_space<vmem>>, vector<2x128xf32>
    %208 = arith.truncf %207 : vector<2x128xf32> to vector<2x128xbf16>
    %c0_218 = arith.constant 0 : index
    %c0_219 = arith.constant 0 : index
    %209 = vector.load %arg6[%c0_218, %c0_219] : memref<128x128xbf16, #tpu.memory_space<vmem>>, vector<128x128xbf16>
    %cst_220 = arith.constant dense<0.000000e+00> : vector<2x128xf32>
    %210 = tpu.matmul %208, %209, %cst_220 {dimension_numbers = #tpu.dot_dimension_numbers<[1], [0], [0], [1], [0, 0, 1, 1], [], []>} : vector<2x128xbf16>, vector<128x128xbf16>, vector<2x128xf32> -> vector<2x128xf32>
    %c0_221 = arith.constant 0 : index
    %c0_222 = arith.constant 0 : index
    %211 = vector.load %arg7[%c0_221, %c0_222] : memref<1x128xf32, #tpu.memory_space<vmem>>, vector<1x128xf32>
    %212 = vector.broadcast %211 : vector<1x128xf32> to vector<2x128xf32>
    %213 = arith.addf %210, %212 : vector<2x128xf32>
    %c0_223 = arith.constant 0 : index
    %c0_224 = arith.constant 0 : index
    %c0_225 = arith.constant 0 : index
    %214 = vector.load %arg8[%c0_223, %c0_224, %c0_225] : memref<1x2x128xf32, #tpu.memory_space<vmem>>, vector<1x2x128xf32>
    %215 = vector.shape_cast %214 : vector<1x2x128xf32> to vector<2x128xf32>
    %216 = vector.shape_cast %213 : vector<2x128xf32> to vector<1x2x128xf32>
    tpu.vector_store %arg8[%c0_223, %c0_224, %c0_225], %216 {strides = array<i32>} : memref<1x2x128xf32, #tpu.memory_space<vmem>>, vector<1x2x128xf32>,
    return
  }
  func.func @transform_0(%arg0: i32) -> (i32, i32, i32) {
    %c0_i32 = arith.constant 0 : i32
    %c0_i32_0 = arith.constant 0 : i32
    %c0_i32_1 = arith.constant 0 : i32
    return %arg0, %c0_i32, %c0_i32_0 : i32, i32, i32
  }
  func.func @transform_1(%arg0: i32) -> (i32, i32) {
    %c0_i32 = arith.constant 0 : i32
    %c0_i32_0 = arith.constant 0 : i32
    %c0_i32_1 = arith.constant 0 : i32
    return %c0_i32, %c0_i32_0 : i32, i32
  }
  func.func @transform_2(%arg0: i32) -> (i32, i32) {
    %c0_i32 = arith.constant 0 : i32
    %c0_i32_0 = arith.constant 0 : i32
    %c0_i32_1 = arith.constant 0 : i32
    return %c0_i32, %c0_i32_0 : i32, i32
  }
  func.func @transform_3(%arg0: i32) -> (i32, i32, i32) {
    %c0_i32 = arith.constant 0 : i32
    %c0_i32_0 = arith.constant 0 : i32
    %c0_i32_1 = arith.constant 0 : i32
    %c0_i32_2 = arith.constant 0 : i32
    return %c0_i32, %c0_i32_0, %c0_i32_1 : i32, i32, i32
  }
  func.func @transform_4(%arg0: i32) -> (i32, i32) {
    %c0_i32 = arith.constant 0 : i32
    %c0_i32_0 = arith.constant 0 : i32
    %c0_i32_1 = arith.constant 0 : i32
    return %c0_i32, %c0_i32_0 : i32, i32
  }
  func.func @transform_5(%arg0: i32) -> (i32, i32) {
    %c0_i32 = arith.constant 0 : i32
    %c0_i32_0 = arith.constant 0 : i32
    %c0_i32_1 = arith.constant 0 : i32
    return %c0_i32, %c0_i32_0 : i32, i32
  }
  func.func @transform_6(%arg0: i32) -> (i32, i32) {
    %c0_i32 = arith.constant 0 : i32
    %c0_i32_0 = arith.constant 0 : i32
    %c0_i32_1 = arith.constant 0 : i32
    return %c0_i32, %c0_i32_0 : i32, i32
  }
  func.func @transform_7(%arg0: i32) -> (i32, i32, i32) {
    %c0_i32 = arith.constant 0 : i32
    %c0_i32_0 = arith.constant 0 : i32
    %c0_i32_1 = arith.constant 0 : i32
    return %arg0, %c0_i32, %c0_i32_0 : i32, i32, i32
  }
}

</mosaic_0001>

<bundles_post_ra>
// kernel: plainnet_forward.1
= control target key start
LH: loop header
LB: loop body
LE: loop exit
PB: predicated region body
PF: predicated region fallthrough
CT: control target
= control target key end

     0   :  { %v28_v34 = vlaneseq  ;;  %v21366_v57 = vmov 0   ;;  %s21358_s0 = inlined_call_operand.vmem [shape: bf16[2,288,128], index: 0, kind: input, shape index: {}]   ;;  %s21359_s1 = inlined_call_operand.vmem [shape: bf16[128,128], index: 1, kind: input, shape index: {}]   ;;  %s21360_s2 = inlined_call_operand.vmem [shape: f32[1,128], index: 2, kind: input, shape index: {}]   ;;  %s21361_s3 = inlined_call_operand.vmem [shape: bf16[9,128,128], index: 3, kind: input, shape index: {}]   ;;  %s21362_s4 = inlined_call_operand.vmem [shape: f32[1,128], index: 4, kind: input, shape index: {}]   ;;  %s21363_s5 = inlined_call_operand.vmem [shape: bf16[128,128], index: 5, kind: input, shape index: {}]   ;;  %s21364_s6 = inlined_call_operand.vmem [shape: f32[1,128], index: 6, kind: input, shape index: {}]   ;;  %s21365_s7 = inlined_call_operand.hbm [shape: f32[1,2,128], index: 7, kind: output, shape index: {}]  }
   0x1   :  { %v16116_v0 = vld [vmem:[%s21359_s1 + $0x38] sm:$0xff]   ;;  %v16117_v1 = vld [vmem:[%s21359_s1 + $0x30] sm:$0xff]   ;;  %v16118_v2 = vld [vmem:[%s21359_s1 + $0x28] sm:$0xff]   ;;  %1766 = vst [vmem:[#allocation2] sm:$0xf] %v21366_v57 }
   0x2   :  { %14980 = vmatprep.subr.bf16.mxu0 %v16116_v0  ;;  %v16119_v3 = vld [vmem:[%s21359_s1 + $0x20] sm:$0xff]   ;;  %v16120_v5 = vld [vmem:[%s21359_s1 + $0x18] sm:$0xff]   ;;  %v16121_v6 = vld [vmem:[%s21359_s1 + $0x10] sm:$0xff]   ;;  %v16838_v37 = vshrl.u32 %v28_v34, 7  ;;  %1767 = vst [vmem:[#allocation2 + $0x4] sm:$0xf] %v21366_v57 }
   0x3   :  { %14981 = vmatpush3.bf16.msra.mxu0 %v16116_v0  ;;  %v16124_v4 = vld [vmem:[%s21358_s0] sm:$0xff]   ;;  %v16122_v7 = vld [vmem:[%s21359_s1 + $0x8] sm:$0xff]   ;;  %v16142_v10 = vld [vmem:[%s21361_s3 + $0x78] sm:$0xff]   ;;  %1774 = vst [vmem:[#allocation2 + $0x9c] sm:$0xf] %v21366_v57 }
   0x4   :  { %14982 = vmatprep.subr.bf16.mxu0 %v16117_v1  ;;  %14996 = vmatprep.mubr.bf16.mxu0 %v16124_v4  ;;  %v16123_v8 = vld [vmem:[%s21359_s1] sm:$0xff]   ;;  %v16125_v9 = vld [vmem:[%s21358_s0 + $0x8] sm:$0xff]   ;;  %v16126_v11 = vld [vmem:[%s21358_s0 + $0x10] sm:$0xff]   ;;  %v16844_v39 = vadd.s32 16, %v16838_v37  ;;  %v16847_v40 = vadd.s32 24, %v16838_v37  ;;  %v16850_v41 = vadd.s32 8, %v16838_v37 }
   0x5   :  { %v16143_v12 = vld [vmem:[%s21361_s3 + $0x70] sm:$0xff]   ;;  %v16127_v13 = vld [vmem:[%s21358_s0 + $0x18] sm:$0xff]   ;;  %v16144_v14 = vld [vmem:[%s21361_s3 + $0x68] sm:$0xff]   ;;  %v16863_v46 = vmul.u32.u64.low 3817748708, %v16838_v37  ;;  %v16864_v47 = vmul.u32.u64.high 3817748708, %v16838_v37, %v16863_v46  ;;  %v16875_v52 = vadd.s32 48, %v16838_v37 }
   0x6   :  { %v16128_v15 = vld [vmem:[%s21358_s0 + $0x20] sm:$0xff]   ;;  %v16129_v17 = vld [vmem:[%s21358_s0 + $0x28] sm:$0xff]   ;;  %v16130_v18 = vld [vmem:[%s21358_s0 + $0x30] sm:$0xff]   ;;  %v16856_v43 = vmul.u32.u64.low 3817748708, %v16844_v39  ;;  %v16857_v44 = vmul.u32.u64.high 3817748708, %v16844_v39, %v16856_v43  ;;  %v16878_v53 = vadd.s32 32, %v16838_v37 }
   0x7   :  { %14983 = vmatpush3.bf16.msra.mxu0 %v16117_v1  ;;  %v16145_v16 = vld [vmem:[%s21361_s3 + $0x60] sm:$0xff]   ;;  %v16131_v19 = vld [vmem:[%s21358_s0 + $0x38] sm:$0xff]   ;;  %v16133_v21 = vld [vmem:[%s21358_s0 + $0x48] sm:$0xff]   ;;  %v16867_v48 = vmul.u32.u64.low 3817748708, %v16847_v40  ;;  %v16868_v49 = vmul.u32.u64.high 3817748708, %v16847_v40, %v16867_v48  ;;  %v16881_v54 = vadd.s32 56, %v16838_v37 }
   0x8   :  { %14984 = vmatprep.subr.bf16.mxu0 %v16118_v2  ;;  %v16132_v20 = vld [vmem:[%s21358_s0 + $0x40] sm:$0xff]   ;;  %v16134_v22 = vld [vmem:[%s21358_s0 + $0x50] sm:$0xff]   ;;  %v16135_v23 = vld [vmem:[%s21358_s0 + $0x58] sm:$0xff]   ;;  %v16871_v50 = vmul.u32.u64.low 3817748708, %v16850_v41  ;;  %v16872_v51 = vmul.u32.u64.high 3817748708, %v16850_v41, %v16871_v50  ;;  %v34_v58 = vadd.s32 40, %v16838_v37 }
   0x9   :  { %v16136_v24 = vld [vmem:[%s21358_s0 + $0x60] sm:$0xff]   ;;  %v16137_v25 = vld [vmem:[%s21358_s0 + $0x68] sm:$0xff]   ;;  %v16138_v26 = vld [vmem:[%s21358_s0 + $0x70] sm:$0xff]   ;;  %1775 = vst [vmem:[#allocation2 + $0xa0] sm:$0xf] %v21366_v57  ;;  %v93_v1 = vshrl.u32 %v16857_v44, 4 }
   0xa   :  { %v16139_v27 = vld [vmem:[%s21358_s0 + $0x78] sm:$0xff]   ;;  %v16140_v28 = vld [vmem:[%s21358_s0 + $0x80] sm:$0xff]   ;;  %v16141_v29 = vld [vmem:[%s21358_s0 + $0x88] sm:$0xff]   ;;  %v16895_v59 = vmul.u32.u64.low 3817748708, %v16875_v52  ;;  %v16896_v60 = vmul.u32.u64.high 3817748708, %v16875_v52, %v16895_v59  ;;  %v16952_v34 = vadd.s32 88, %v16838_v37 }
   0xb   :  { %14985 = vmatpush3.bf16.msra.mxu0 %v16118_v2  ;;  %v16146_v30 = vld [vmem:[%s21361_s3 + $0x38] sm:$0xff]   ;;  %v16148_v31 = vld [vmem:[%s21361_s3 + $0x30] sm:$0xff]   ;;  %v16149_v32 = vld [vmem:[%s21361_s3 + $0x28] sm:$0xff]   ;;  %v16899_v61 = vmul.u32.u64.low 3817748708, %v16878_v53  ;;  %v16900_v62 = vmul.u32.u64.high 3817748708, %v16878_v53, %v16899_v61  ;;  %v71_v2 = vshrl.u32 %v16864_v47, 4 }
   0xc   :  { %14986 = vmatprep.subr.bf16.mxu0 %v16119_v3  ;;  %15032 = vmatprep.subr.bf16.mxu1 %v16146_v30  ;;  %v16151_v33 = vld [vmem:[%s21361_s3 + $0x20] sm:$0xff]   ;;  %v16152_v35 = vld [vmem:[%s21361_s3 + $0x18] sm:$0xff]   ;;  %v16153_v38 = vld [vmem:[%s21361_s3 + $0x10] sm:$0xff]   ;;  %v16903_v63 = vmul.u32.u64.low 3817748708, %v16881_v54  ;;  %v16904_v0 = vmul.u32.u64.high 3817748708, %v16881_v54, %v16903_v63  ;;  %v17006_v59 = vadd.s32 120, %v16838_v37 }
   0xd   :  { %15033 = vmatpush3.bf16.msra.mxu1 %v16146_v30  ;;  %v16147_v36 = vld [vmem:[%s21361_s3 + $0x58] sm:$0xff]   ;;  %v16150_v42 = vld [vmem:[%s21361_s3 + $0x50] sm:$0xff]   ;;  %v16155_v45 = vld [vmem:[%s21361_s3 + $0x8] sm:$0xff]   ;;  %v16980_v46 = vmul.u32.u64.low 3817748708, %v16952_v34  ;;  %v16981_v47 = vmul.u32.u64.high 3817748708, %v16952_v34, %v16980_v46 }
   0xe   :  { %15034 = vmatprep.subr.bf16.mxu1 %v16148_v31  ;;  %v16154_v55 = vld [vmem:[%s21361_s3 + $0x48] sm:$0xff]   ;;  %v16156_v56 = vld [vmem:[%s21361_s3] sm:$0xff]   ;;  %v17077_v46 = vadd.s32 160, %v16838_v37 }
   0xf   :  { %14987 = vmatpush3.bf16.msra.mxu0 %v16119_v3  ;;  %v16908_v3 = vmul.u32.u64.low 3817748708, %v34_v58  ;;  %v16909_v4 = vmul.u32.u64.high 3817748708, %v34_v58, %v16908_v3 }
  0x10   :  { %14988 = vmatprep.subr.bf16.mxu0 %v16120_v5 }
  0x11   :  { %15035 = vmatpush3.bf16.msra.mxu1 %v16148_v31 }
  0x12   :  { %15036 = vmatprep.subr.bf16.mxu1 %v16149_v32 }
  0x13   :  { %14989 = vmatpush3.bf16.msra.mxu0 %v16120_v5  ;;  %v104_v5 = vshrl.u32 %v16868_v49, 4 }
  0x14   :  { %14990 = vmatprep.subr.bf16.mxu0 %v16121_v6 }
  0x15   :  { %15037 = vmatpush3.bf16.msra.mxu1 %v16149_v32 }
  0x16   :  { %15038 = vmatprep.subr.bf16.mxu1 %v16151_v33 }
  0x17   :  { %14991 = vmatpush3.bf16.msra.mxu0 %v16121_v6  ;;  %v82_v6 = vshrl.u32 %v16872_v51, 4 }
  0x18   :  { %14992 = vmatprep.subr.bf16.mxu0 %v16122_v7 }
  0x19   :  { %15039 = vmatpush3.bf16.msra.mxu1 %v16151_v33 }
  0x1a   :  { %15040 = vmatprep.subr.bf16.mxu1 %v16152_v35 }
  0x1b   :  { %14993 = vmatpush3.bf16.msra.mxu0 %v16122_v7  ;;  %v16914_v7 = vadd.s32 64, %v16838_v37 }
  0x1c   :  { %14994 = vmatprep.subr.bf16.mxu0 %v16123_v8 }
  0x1d   :  { %15041 = vmatpush3.bf16.msra.mxu1 %v16152_v35 }
  0x1e   :  { %15042 = vmatprep.subr.bf16.mxu1 %v16153_v38 }
  0x1f   :  { %14995 = vmatpush3.bf16.msra.mxu0 %v16123_v8  ;;  %v16157_v8 = vld [vmem:[%s21361_s3 + $0x40] sm:$0xff]  }
  0x20   :  { %15084 = vmatprep.subr.bf16.mxu0 %v16142_v10 }
  0x21   :  { %15043 = vmatpush3.bf16.msra.mxu1 %v16153_v38 }
  0x22   :  { %14997 = vmatmul.mubr.bf16.vlgmr.msra.gmra.mxu0 %v16125_v9  ;;  %15044 = vmatprep.subr.bf16.mxu1 %v16155_v45  ;;  %v16158_v9 = vld [vmem:[#allocation2] sm:$0xff]  }
  0x23   :  { %15000 = vmatprep.mubr.bf16.mxu0 %v16126_v11  ;;  %15085 = vmatpush3.bf16.msra.mxu0 %v16142_v10  ;;  %v94_v10 = vmul.u32 18, %v93_v1  ;;  %v72_v11 = vmul.u32 18, %v71_v2  ;;  %v192_v1 = vshrl.u32 %v16981_v47, 4  ;;  %v17021_v2 = vadd.s32 144, %v16838_v37 }
  0x24   :  { %15086 = vmatprep.subr.bf16.mxu0 %v16143_v12  ;;  %15048 = vmatprep.mubr.bf16.mxu1 %v16158_v9 }
  0x25   :  { %15045 = vmatpush3.bf16.msra.mxu1 %v16155_v45 }
  0x26   :  { %15046 = vmatprep.subr.bf16.mxu1 %v16156_v56 }
  0x27   :  { %15087 = vmatpush3.bf16.msra.mxu0 %v16143_v12  ;;  %v16919_v12 = vld [vmem:[#allocation2] sm:$0xff]  }
  0x28   :  { %15088 = vmatprep.subr.bf16.mxu0 %v16144_v14 }
  0x29   :  { %15047 = vmatpush3.bf16.msra.mxu1 %v16156_v56 }
  0x2a   :  { %15001 = vmatmul.mubr.bf16.gmra.mxu0 %v16127_v13  ;;  %v16921_v13 = vld [vmem:[#allocation2] sm:$0xe] }
  0x2b   :  { %15004 = vmatprep.mubr.bf16.mxu0 %v16128_v15  ;;  %15089 = vmatpush3.bf16.msra.mxu0 %v16144_v14  ;;  %21677 = vst [vmem:[#allocation8_spill] sm:$0xff] %v16921_v13  ;;  %v105_v14 = vmul.u32 18, %v104_v5  ;;  %v83_v15 = vmul.u32 18, %v82_v6  ;;  %8064 = vst [vmem:[#allocation2] sm:$0xf] %v21366_v57  ;;  %v17029_v6 = vadd.s32 128, %v16838_v37 }
  0x2c   :  { %15090 = vmatprep.subr.bf16.mxu0 %v16145_v16 }
  0x2f   :  { %15091 = vmatpush3.bf16.msra.mxu0 %v16145_v16  ;;  %v137_v16 = vshrl.u32 %v16896_v60, 4  ;;  %v17009_v60 = vadd.s32 104, %v16838_v37 }
  0x30   :  { %15092 = vmatprep.subr.bf16.mxu0 %v16147_v36 }
  0x32   :  { %15005 = vmatmul.mubr.bf16.gmra.mxu0 %v16129_v17  ;;  %v115_v17 = vshrl.u32 %v16900_v62, 4 }
  0x33   :  { %15008 = vmatprep.mubr.bf16.mxu0 %v16130_v18  ;;  %15093 = vmatpush3.bf16.msra.mxu0 %v16147_v36  ;;  %v16925_v18 = vld [vmem:[#allocation2 + $0x4] sm:$0xf] }
  0x34   :  { %15094 = vmatprep.subr.bf16.mxu0 %v16150_v42  ;;  %21678 = vst [vmem:[#allocation9_spill] sm:$0xff] %v16925_v18  ;;  %8065 = vst [vmem:[#allocation2 + $0x4] sm:$0xf] %v21366_v57 }
  0x37   :  { %15095 = vmatpush3.bf16.msra.mxu0 %v16150_v42 }
  0x38   :  { %15096 = vmatprep.subr.bf16.mxu0 %v16154_v55 }
  0x3a   :  { %15009 = vmatmul.mubr.bf16.gmra.mxu0 %v16131_v19 }
  0x3b   :  { %15012 = vmatprep.mubr.bf16.mxu0 %v16132_v20  ;;  %15097 = vmatpush3.bf16.msra.mxu0 %v16154_v55  ;;  %v16929_v19 = vmul.u32.u64.low 3817748708, %v16914_v7  ;;  %v16930_v20 = vmul.u32.u64.high 3817748708, %v16914_v7, %v16929_v19 }
  0x3c   :  { %15098 = vmatprep.subr.bf16.mxu0 %v16157_v8  ;;  %v17046_v19 = vadd.s32 136, %v16838_v37 }
  0x3d   :  { %v159_v43 = vshrl.u32 %v16930_v20, 4 }
  0x3f   :  { %15099 = vmatpush3.bf16.msra.mxu0 %v16157_v8  ;;  %v17032_v8 = vmul.u32.u64.low 3817748708, %v17009_v60  ;;  %v17033_v9 = vmul.u32.u64.high 3817748708, %v17009_v60, %v17032_v8 }
  0x40   :  { %v17103_v8 = vadd.s32 168, %v16838_v37 }
  0x42   :  { %15013 = vmatmul.mubr.bf16.gmra.mxu0 %v16133_v21  ;;  %v148_v21 = vshrl.u32 %v16904_v0, 4 }
  0x43   :  { %15016 = vmatprep.mubr.bf16.mxu0 %v16134_v22  ;;  %v39_v22 = vadd.s32 80, %v16838_v37 }
  0x44   :  { %v149_v30 = vmul.u32 18, %v148_v21 }
  0x45   :  { %v16948_v31 = vmul.u32.u64.low 3817748708, %v39_v22  ;;  %v16949_v32 = vmul.u32.u64.high 3817748708, %v39_v22, %v16948_v31 }
  0x46   :  { %v16975_v44 = vsub.s32 %v16881_v54, %v149_v30 }
  0x47   :  { %v181_v56 = vshrl.u32 %v16949_v32, 4  ;;  %v16162_v32 = vld [vmem:[%s21361_s3 + $0xf8] sm:$0xff]  }
  0x48   :  { %v16999_v54 = vadd.s32 18, %v16975_v44  ;;  %15188 = vmatprep.subr.bf16.mxu0 %v16162_v32  ;;  %vm468_vm15 = vcmp.ne.s32.totalorder %v16975_v44, 0 }
  0x4a   :  { %15017 = vmatmul.mubr.bf16.gmra.mxu0 %v16135_v23  ;;  %v126_v23 = vshrl.u32 %v16909_v4, 4  ;;  %v17025_v4 = vmul.u32.u64.low 3817748708, %v17006_v59  ;;  %v17026_v5 = vmul.u32.u64.high 3817748708, %v17006_v59, %v17025_v4 }
  0x4b   :  { %15020 = vmatprep.mubr.bf16.mxu0 %v16136_v24  ;;  %v16937_v24 = vsub.s32 %v16844_v39, %v94_v10  ;;  %v38_v39 = vadd.s32 72, %v16838_v37  ;;  %v182_v10 = vmul.u32 18, %v181_v56  ;;  %v17089_v56 = vadd.s32 184, %v16838_v37 }
  0x4c   :  { %v127_v33 = vmul.u32 18, %v126_v23  ;;  %v17049_v21 = vmul.u32.u64.low 3817748708, %v17029_v6  ;;  %v17050_v23 = vmul.u32.u64.high 3817748708, %v17029_v6, %v17049_v21 }
  0x4d   :  { %21679 = vst [vmem:[#allocation10_spill] sm:$0xff] %v16937_v24  ;;  %v16955_v35 = vadd.s32 18, %v16937_v24  ;;  %v16989_v50 = vmul.u32.u64.low 3817748708, %v38_v39  ;;  %v16990_v51 = vmul.u32.u64.high 3817748708, %v38_v39, %v16989_v50  ;;  %vm463_vm0 = vcmp.ne.s32.totalorder %v16937_v24, 0 }
  0x4e   :  { %v16977_v45 = vsub.s32 %v34_v58, %v127_v33  ;;  %v160_v58 = vmul.u32 18, %v159_v43  ;;  %vm499_vm1 = vcmp.lt.s32.totalorder %v16937_v24, 0  ;;  %v17360_v24 = vadd.s32 232, %v16838_v37 }
  0x4f   :  { %21683 = vst [vmem:[#allocation14_spill] sm:$0xff] %v16955_v35  ;;  %v170_v3 = vshrl.u32 %v16990_v51, 4  ;;  %v17073_v33 = vmul.u32.u64.low 3817748708, %v17046_v19  ;;  %v17074_v43 = vmul.u32.u64.high 3817748708, %v17046_v19, %v17073_v33  ;;  %vm17137_vm8 = vmand %vm499_vm1, %vm463_vm0  ;;  %vm504_vm0 = vcmp.lt.s32.totalorder %v16975_v44, 0 }
  0x50   :  { %21689 = vst [vmem:[#allocation20_spill] sm:$0xff] %v16977_v45  ;;  %v17002_v55 = vadd.s32 18, %v16977_v45  ;;  %vm466_vm1 = vcmp.ne.s32.totalorder %v16977_v45, 0  ;;  %21742 = vst [vmem:[#allocation52_spill] sm:$0xff] %v17360_v24  ;;  %v21745_v35 = vmov 0 }
  0x51   :  { %v171_v20 = vmul.u32 18, %v170_v3  ;;  %v17099_v3 = vmul.u32.u64.low 3817748708, %v17077_v46  ;;  %v17100_v4 = vmul.u32.u64.high 3817748708, %v17077_v46, %v17099_v3 }
  0x52   :  { %15021 = vmatmul.mubr.bf16.gmra.mxu0 %v16137_v25  ;;  %v138_v25 = vmul.u32 18, %v137_v16  ;;  %v17043_v16 = vsub.s32 %v16914_v7, %v160_v58 }
  0x53   :  { %15024 = vmatprep.mubr.bf16.mxu0 %v16138_v26  ;;  %v116_v26 = vmul.u32 18, %v115_v17  ;;  %v193_v17 = vmul.u32 18, %v192_v1  ;;  %v236_v1 = vshrl.u32 %v17026_v5, 4 }
  0x54   :  { %v16958_v36 = vsub.s32 %v16875_v52, %v138_v25  ;;  %v16993_v52 = vadd.s32 112, %v16838_v37  ;;  %21692 = vst [vmem:[#allocation23_spill] sm:$0xff] %v17043_v16  ;;  %v17053_v25 = vadd.s32 176, %v16838_v37 }
  0x55   :  { %v16961_v38 = vsub.s32 %v16878_v53, %v116_v26  ;;  %v16996_v53 = vadd.s32 96, %v16838_v37  ;;  %v17055_v26 = vsub.s32 %v39_v22, %v182_v10  ;;  %v17070_v22 = vadd.s32 18, %v17043_v16 }
  0x56   :  { %21684 = vst [vmem:[#allocation15_spill] sm:$0xff] %v16958_v36  ;;  %v16984_v48 = vadd.s32 18, %v16958_v36  ;;  %v17012_v61 = vmul.u32.u64.low 3817748708, %v16993_v52  ;;  %v17013_v62 = vmul.u32.u64.high 3817748708, %v16993_v52, %v17012_v61  ;;  %v17092_v58 = vsub.s32 %v16952_v34, %v193_v17 }
  0x57   :  { %21685 = vst [vmem:[#allocation16_spill] sm:$0xff] %v16961_v38  ;;  %v16987_v49 = vadd.s32 18, %v16961_v38  ;;  %v17016_v63 = vmul.u32.u64.low 3817748708, %v16996_v53  ;;  %v17017_v0 = vmul.u32.u64.high 3817748708, %v16996_v53, %v17016_v63  ;;  %21693 = vst [vmem:[#allocation24_spill] sm:$0xff] %v17055_v26  ;;  %v17086_v51 = vadd.s32 18, %v17055_v26 }
  0x58   :  { %21690 = vst [vmem:[#allocation21_spill] sm:$0xff] %v16984_v48  ;;  %v225_v7 = vshrl.u32 %v17013_v62, 4  ;;  %21694 = vst [vmem:[#allocation25_spill] sm:$0xff] %v17070_v22  ;;  %v17082_v47 = vmul.u32.u64.low 3817748708, %v17053_v25  ;;  %v17083_v50 = vmul.u32.u64.high 3817748708, %v17053_v25, %v17082_v47  ;;  %v17094_v61 = vsub.s32 %v38_v39, %v171_v20 }
  0x59   :  { %21691 = vst [vmem:[#allocation22_spill] sm:$0xff] %v16987_v49  ;;  %21695 = vst [vmem:[#allocation26_spill] sm:$0xff] %v17086_v51  ;;  %v203_v63 = vshrl.u32 %v17017_v0, 4  ;;  %v17108_v34 = vmul.u32.u64.low 3817748708, %v17089_v56  ;;  %v17109_v39 = vmul.u32.u64.high 3817748708, %v17089_v56, %v17108_v34  ;;  %v17119_v20 = vadd.s32 18, %v17092_v58 }
  0x5a   :  { %15025 = vmatmul.mubr.bf16.gmra.mxu0 %v16139_v27  ;;  %v16940_v27 = vsub.s32 %v16838_v37, %v72_v11  ;;  %v17036_v11 = vadd.s32 152, %v16838_v37  ;;  %v226_v62 = vmul.u32 18, %v225_v7  ;;  %v17122_v21 = vadd.s32 18, %v17094_v61 }
  0x5b   :  { %15028 = vmatprep.mubr.bf16.mxu0 %v16140_v28  ;;  %v16943_v28 = vsub.s32 %v16847_v40, %v105_v14  ;;  %v204_v10 = vmul.u32 18, %v203_v63  ;;  %v237_v32 = vmul.u32 18, %v236_v1  ;;  %v17131_v47 = vadd.s32 208, %v16838_v37 }
  0x5c   :  { %21680 = vst [vmem:[#allocation11_spill] sm:$0xff] %v16940_v27  ;;  %v16965_v40 = vadd.s32 18, %v16940_v27  ;;  %v17058_v30 = vmul.u32.u64.low 3817748708, %v17036_v11  ;;  %v17059_v31 = vmul.u32.u64.high 3817748708, %v17036_v11, %v17058_v30  ;;  %vm461_vm2 = vcmp.ne.s32.totalorder %v16940_v27, 0 }
  0x5d   :  { %21681 = vst [vmem:[#allocation12_spill] sm:$0xff] %v16943_v28  ;;  %vm497_vm3 = vcmp.lt.s32.totalorder %v16940_v27, 0  ;;  %vm464_vm4 = vcmp.ne.s32.totalorder %v16943_v28, 0  ;;  %vm500_vm5 = vcmp.lt.s32.totalorder %v16943_v28, 0  ;;  %v17114_v5 = vsub.s32 %v16993_v52, %v226_v62 }
  0x5e   :  { %21686 = vst [vmem:[#allocation17_spill] sm:$0xff] %v16965_v40  ;;  %v247_v30 = vshrl.u32 %v17050_v23, 4  ;;  %v280_v7 = vshrl.u32 %v17059_v31, 4  ;;  %v17127_v33 = vmul.u32.u64.low 3817748708, %v17103_v8  ;;  %v17128_v52 = vmul.u32.u64.high 3817748708, %v17103_v8, %v17127_v33  ;;  %vm17149_vm11 = vmand %vm497_vm3, %vm461_vm2 }
  0x5f   :  { %vm465_vm9 = vcmp.ne.s32.totalorder %v16961_v38, 0  ;;  %vm501_vm10 = vcmp.lt.s32.totalorder %v16961_v38, 0  ;;  %v313_v23 = vshrl.u32 %v17083_v50, 4  ;;  %v21699_v31 = vmov 0  ;;  %vm17165_vm14 = vmand %vm500_vm5, %vm464_vm4 }
  0x60   :  { %v21700_v31 = vsel %vm17149_vm11, 4294967295, %v21699_v31  ;;  %vm467_vm12 = vcmp.ne.s32.totalorder %v16958_v36, 0  ;;  %vm503_vm13 = vcmp.lt.s32.totalorder %v16958_v36, 0  ;;  %v17156_v62 = vadd.s32 18, %v17114_v5  ;;  %vm17273_vm3 = vmand %vm501_vm10, %vm465_vm9 }
  0x61   :  { %21701 = vst [vmem:[#allocation28_spill] sm:$0xff] %v21700_v31  ;;  %v17159_v63 = vsub.s32 %v16996_v53, %v204_v10  ;;  %v21702_v1 = vmov 0  ;;  %v248_v3 = vmul.u32 18, %v247_v30  ;;  %v281_v34 = vmul.u32 18, %v280_v7  ;;  %vm17290_vm9 = vmand %vm503_vm13, %vm467_vm12 }
  0x62   :  { %15029 = vmatmul.mubr.bf16.gmra.mxu0 %v16141_v29  ;;  %v16946_v29 = vsub.s32 %v16850_v41, %v83_v15  ;;  %v16968_v41 = vadd.s32 18, %v16943_v28  ;;  %v17039_v14 = vmul.u32.u64.low 3817748708, %v17021_v2  ;;  %v17040_v15 = vmul.u32.u64.high 3817748708, %v17021_v2, %v17039_v14  ;;  %vm17309_vm12 = vmand %vm504_vm0, %vm468_vm15 }
  0x63   :  { %v214_v14 = vshrl.u32 %v17033_v9, 4  ;;  %v21696_v9 = vmov 0  ;;  %v21703_v1 = vsel %vm17165_vm14, 4294967295, %v21702_v1  ;;  %v291_v33 = vshrl.u32 %v17100_v4, 4 }
  0x64   :  { %21682 = vst [vmem:[#allocation13_spill] sm:$0xff] %v16946_v29  ;;  %21687 = vst [vmem:[#allocation18_spill] sm:$0xff] %v16968_v41  ;;  %v16971_v42 = vadd.s32 18, %v16946_v29  ;;  %vm462_vm6 = vcmp.ne.s32.totalorder %v16946_v29, 0  ;;  %vm498_vm7 = vcmp.lt.s32.totalorder %v16946_v29, 0  ;;  %v269_v17 = vshrl.u32 %v17040_v15, 4 }
  0x65   :  { %v21697_v9 = vsel %vm17137_vm8, 4294967295, %v21696_v9  ;;  %v258_v15 = vshrl.u32 %v17074_v43, 4  ;;  %v215_v43 = vmul.u32 18, %v214_v14  ;;  %21704 = vst [vmem:[#allocation29_spill] sm:$0xff] %v21703_v1  ;;  %v17173_v53 = vadd.s32 192, %v16838_v37  ;;  %vm17219_vm4 = vmand %vm498_vm7, %vm462_vm6 }
  0x66   :  { %21688 = vst [vmem:[#allocation19_spill] sm:$0xff] %v16971_v42  ;;  %21698 = vst [vmem:[#allocation27_spill] sm:$0xff] %v21697_v9  ;;  %v270_v50 = vmul.u32 18, %v269_v17  ;;  %v17178_v10 = vmul.u32.u64.low 3817748708, %v17131_v47  ;;  %v17179_v14 = vmul.u32.u64.high 3817748708, %v17131_v47, %v17178_v10  ;;  %v324_v7 = vshrl.u32 %v17109_v39, 4 }
  0x67   :  { %v259_v17 = vmul.u32 18, %v258_v15  ;;  %v314_v30 = vmul.u32 18, %v313_v23  ;;  %v17185_v4 = vadd.s32 216, %v16838_v37  ;;  %v17202_v39 = vsub.s32 %v17006_v59, %v237_v32 }
  0x68   :  { %v17207_v23 = vadd.s32 18, %v17159_v63  ;;  %v17210_v0 = vsub.s32 %v17009_v60, %v215_v43  ;;  %v17213_v10 = vsub.s32 %v17021_v2, %v270_v50  ;;  %v292_v15 = vmul.u32 18, %v291_v33 }
  0x69   :  { %21705 = vst [vmem:[#allocation30_spill] sm:$0xff] %v17202_v39  ;;  %v21707_v59 = vmov 0  ;;  %vm470_vm2 = vcmp.ne.s32.totalorder %v17094_v61, 0  ;;  %v17226_v32 = vsub.s32 %v17029_v6, %v248_v3  ;;  %v302_v60 = vshrl.u32 %v17128_v52, 4 }
  0x6a   :  { %21706 = vst [vmem:[#allocation31_spill] sm:$0xff] %v17213_v10  ;;  %v21708_v59 = vsel %vm17219_vm4, 4294967295, %v21707_v59  ;;  %v17230_v2 = vmul.u32.u64.low 3817748708, %v17173_v53  ;;  %v17231_v43 = vmul.u32.u64.high 3817748708, %v17173_v53, %v17230_v2  ;;  %v17236_v50 = vsub.s32 %v17036_v11, %v281_v34 }
  0x6b   :  { %21709 = vst [vmem:[#allocation32_spill] sm:$0xff] %v21708_v59  ;;  %21710 = vst [vmem:[#allocation33_spill] sm:$0xff] %v17226_v32  ;;  %v2348_v33 = vshll.u32 %v16919_v12, 16  ;;  %v17240_v57 = vmul.u32.u64.low 3817748708, %v17185_v4  ;;  %v17241_v18 = vmul.u32.u64.high 3817748708, %v17185_v4, %v17240_v57  ;;  %v17246_v6 = vadd.s32 18, %v17202_v39 }
  0x6c   :  { %21711 = vst [vmem:[#allocation34_spill] sm:$0xff] %v17236_v50  ;;  %v17249_v52 = vsub.s32 %v17046_v19, %v259_v17  ;;  %v17252_v3 = vsub.s32 %v17053_v25, %v314_v30  ;;  %v325_v11 = vmul.u32 18, %v324_v7  ;;  %v17261_v57 = vadd.s32 18, %v17210_v0 }
  0x6d   :  { %21712 = vst [vmem:[#allocation35_spill] sm:$0xff] %v17246_v6  ;;  %v17264_v2 = vsub.s32 %v17077_v46, %v292_v15  ;;  %v17267_v19 = vadd.s32 200, %v16838_v37  ;;  %v21716_v25 = vmov 0  ;;  %v17280_v17 = vadd.s32 18, %v17213_v10 }
  0x6e   :  { %21713 = vst [vmem:[#allocation36_spill] sm:$0xff] %v17249_v52  ;;  %21714 = vst [vmem:[#allocation37_spill] sm:$0xff] %v17252_v3  ;;  %v21717_v25 = vsel %vm17273_vm3, 4294967295, %v21716_v25  ;;  %v17283_v46 = vadd.s32 18, %v17226_v32  ;;  %v303_v30 = vmul.u32 18, %v302_v60  ;;  %v357_v7 = vshrl.u32 %v17179_v14, 4 }
  0x6f   :  { %21715 = vst [vmem:[#allocation38_spill] sm:$0xff] %v17264_v2  ;;  %21718 = vst [vmem:[#allocation39_spill] sm:$0xff] %v21717_v25  ;;  %v21721_v15 = vmov 0  ;;  %v17297_v34 = vadd.s32 18, %v17236_v50  ;;  %v17300_v60 = vrot.slane %v2348_v33, 1  ;;  %v17303_v14 = vadd.s32 240, %v16838_v37 }
  0x70   :  { %21719 = vst [vmem:[#allocation40_spill] sm:$0xff] %v17280_v17  ;;  %21720 = vst [vmem:[#allocation41_spill] sm:$0xff] %v17283_v46  ;;  %v21722_v15 = vsel %vm17290_vm9, 4294967295, %v21721_v15  ;;  %v21726_v29 = vmov 0  ;;  %v17316_v42 = vadd.s32 18, %v17249_v52  ;;  %v17319_v33 = vadd.s32 18, %v17252_v3 }
  0x71   :  { %21723 = vst [vmem:[#allocation42_spill] sm:$0xff] %v21722_v15  ;;  %21724 = vst [vmem:[#allocation43_spill] sm:$0xff] %v17297_v34  ;;  %v21727_v29 = vsel %vm17309_vm12, 4294967295, %v21726_v29  ;;  %v17322_v13 = vsub.s32 %v17089_v56, %v325_v11  ;;  %v17325_v59 = vadd.s32 224, %v16838_v37  ;;  %vm21731_vm15 = vcmp.lt.s32.totalorder %v16977_v45, 0 }
  0x72   :  { %21725 = vst [vmem:[#allocation44_spill] sm:$0xff] %v17303_v14  ;;  %21728 = vst [vmem:[#allocation45_spill] sm:$0xff] %v17316_v42  ;;  %v21732_v28 = vmov 0  ;;  %v17336_v41 = vadd.s32 18, %v17264_v2  ;;  %v17339_v1 = vmul.u32.u64.low 3817748708, %v17267_v19  ;;  %v17340_v27 = vmul.u32.u64.high 3817748708, %v17267_v19, %v17339_v1 }
  0x73   :  { %21729 = vst [vmem:[#allocation46_spill] sm:$0xff] %v17319_v33  ;;  %21730 = vst [vmem:[#allocation47_spill] sm:$0xff] %v17322_v13  ;;  %v17343_v56 = vadd.s32 248, %v16838_v37  ;;  %vm21736_vm7 = vcmp.ne.s32.totalorder %v17043_v16, 0  ;;  %vm21737_vm13 = vcmp.lt.s32.totalorder %v17043_v16, 0  ;;  %v21738_v11 = vmov 0 }
  0x74   :  { %vm17331_vm0 = vmand %vm21731_vm15, %vm466_vm1  ;;  %21734 = vst [vmem:[#allocation48_spill] sm:$0xff] %v17336_v41  ;;  %v17356_v40 = vsub.s32 %v17103_v8, %v303_v30  ;;  %v358_v31 = vmul.u32 18, %v357_v7  ;;  %v335_v1 = vshrl.u32 %v17231_v43, 4  ;;  %vm21743_vm6 = vcmp.ne.s32.totalorder %v17055_v26, 0 }
  0x75   :  { %v21733_v28 = vsel %vm17331_vm0, 4294967295, %v21732_v28  ;;  %21735 = vst [vmem:[#allocation49_spill] sm:$0xff] %v17343_v56  ;;  %vm17349_vm10 = vmand %vm21737_vm13, %vm21736_vm7  ;;  %vm21744_vm7 = vcmp.lt.s32.totalorder %v17055_v26, 0  ;;  %v368_v8 = vshrl.u32 %v17241_v18, 4  ;;  %v17378_v7 = vadd.s32 272, %v16838_v37 }
  0x76   :  { %v21739_v11 = vsel %vm17349_vm10, 4294967295, %v21738_v11  ;;  %21741 = vst [vmem:[#allocation51_spill] sm:$0xff] %v17356_v40  ;;  %vm17366_vm13 = vmand %vm21744_vm7, %vm21743_vm6  ;;  %v17374_v30 = vmul.u32.u64.low 3817748708, %v17303_v14  ;;  %v17375_v43 = vmul.u32.u64.high 3817748708, %v17303_v14, %v17374_v30  ;;  %vm21747_vm5 = vcmp.ne.s32.totalorder %v17092_v58, 0 }
  0x77   :  { %21740 = vst [vmem:[#allocation50_spill] sm:$0xff] %v21739_v11  ;;  %v21746_v35 = vsel %vm17366_vm13, 4294967295, %v21745_v35  ;;  %vm21748_vm6 = vcmp.lt.s32.totalorder %v17092_v58, 0  ;;  %v21749_v9 = vmov 0  ;;  %v17391_v18 = vadd.s32 18, %v17322_v13 }
  0x78   :  { %vm17384_vm7 = vmand %vm21748_vm6, %vm21747_vm5  ;;  %v17394_v30 = vmul.u32.u64.low 3817748708, %v17325_v59  ;;  %v17395_v14 = vmul.u32.u64.high 3817748708, %v17325_v59, %v17394_v30  ;;  %v17398_v41 = vadd.s32 256, %v16838_v37  ;;  %vm21752_vm5 = vcmp.lt.s32.totalorder %v17094_v61, 0 }
  0x79   :  { %v21750_v9 = vsel %vm17384_vm7, 4294967295, %v21749_v9  ;;  %21751 = vst [vmem:[#allocation53_spill] sm:$0xff] %v17391_v18  ;;  %vm17412_vm6 = vmand %vm21752_vm5, %vm470_vm2  ;;  %v21753_v18 = vmov 0  ;;  %v17419_v30 = vmul.u32.u64.low 3817748708, %v17343_v56  ;;  %v17420_v33 = vmul.u32.u64.high 3817748708, %v17343_v56, %v17419_v30 }
  0x7a   :  { %v21754_v18 = vsel %vm17412_vm6, 4294967295, %v21753_v18  ;;  %vm21755_vm9 = vcmp.ne.s32.totalorder %v17114_v5, 0  ;;  %vm21756_vm3 = vcmp.lt.s32.totalorder %v17114_v5, 0  ;;  %v21757_v42 = vmov 0 }
  0x7b   :  { %vm17426_vm4 = vmand %vm21756_vm3, %vm21755_vm9  ;;  %v336_v38 = vmul.u32 18, %v335_v1  ;;  %v17433_v49 = vmul.u32.u64.low 3817748708, %v17360_v24  ;;  %v17434_v25 = vmul.u32.u64.high 3817748708, %v17360_v24, %v17433_v49  ;;  %v17437_v36 = vadd.s32 280, %v16838_v37 }
  0x7c   :  { %v21758_v42 = vsel %vm17426_vm4, 4294967295, %v21757_v42  ;;  %vm21760_vm1 = vcmp.ne.s32.totalorder %v17159_v63, 0  ;;  %vm21761_vm15 = vcmp.lt.s32.totalorder %v17159_v63, 0  ;;  %v21762_v30 = vmov 0 }
  0x7d   :  { %21759 = vst [vmem:[#allocation54_spill] sm:$0xff] %v21758_v42  ;;  %vm17443_vm3 = vmand %vm21761_vm15, %vm21760_vm1  ;;  %v17450_v1 = vsub.s32 %v17131_v47, %v358_v31  ;;  %v369_v48 = vmul.u32 18, %v368_v8  ;;  %v17453_v49 = vmul.u32.u64.low 3817748708, %v17378_v7  ;;  %v17454_v15 = vmul.u32.u64.high 3817748708, %v17378_v7, %v17453_v49 }
  0x7e   :  { %v21763_v30 = vsel %vm17443_vm3, 4294967295, %v21762_v30  ;;  %vm21765_vm1 = vcmp.ne.s32.totalorder %v17202_v39, 0  ;;  %vm21766_vm15 = vcmp.lt.s32.totalorder %v17202_v39, 0  ;;  %v21767_v47 = vmov 0 }
  0x7f   :  { %21764 = vst [vmem:[#allocation55_spill] sm:$0xff] %v17450_v1  ;;  %vm17468_vm5 = vmand %vm21766_vm15, %vm21765_vm1  ;;  %v17473_v31 = vmul.u32.u64.low 3817748708, %v17398_v41  ;;  %v17474_v8 = vmul.u32.u64.high 3817748708, %v17398_v41, %v17473_v31  ;;  %vm21769_vm9 = vcmp.ne.s32.totalorder %v17210_v0, 0  ;;  %vm21770_vm1 = vcmp.lt.s32.totalorder %v17210_v0, 0 }
  0x80   :  { %v21768_v47 = vsel %vm17468_vm5, 4294967295, %v21767_v47  ;;  %vm17488_vm15 = vmand %vm21770_vm1, %vm21769_vm9  ;;  %v21771_v24 = vmov 0  ;;  %v346_v31 = vshrl.u32 %v17340_v27, 4  ;;  %v17494_v45 = vadd.s32 264, %v16838_v37 }
  0x81   :  { %v21772_v24 = vsel %vm17488_vm15, 4294967295, %v21771_v24  ;;  %vm21773_vm2 = vcmp.ne.s32.totalorder %v17213_v10, 0  ;;  %vm21774_vm13 = vcmp.lt.s32.totalorder %v17213_v10, 0  ;;  %v21775_v49 = vmov 0 }
  0x82   :  { %vm17500_vm0 = vmand %vm21774_vm13, %vm21773_vm2  ;;  %v17505_v56 = vadd.s32 18, %v17356_v40  ;;  %v17508_v16 = vsub.s32 %v17173_v53, %v336_v38  ;;  %v17511_v22 = vmul.u32.u64.low 3817748708, %v17437_v36  ;;  %v17512_v27 = vmul.u32.u64.high 3817748708, %v17437_v36, %v17511_v22 }
  0x83   :  { %v21776_v49 = vsel %vm17500_vm0, 4294967295, %v21775_v49  ;;  %vm21780_vm9 = vcmp.ne.s32.totalorder %v17226_v32, 0  ;;  %vm21781_vm1 = vcmp.lt.s32.totalorder %v17226_v32, 0  ;;  %v21782_v37 = vmov 0 }
  0x84   :  { %21777 = vst [vmem:[#allocation56_spill] sm:$0xff] %v21776_v49  ;;  %21778 = vst [vmem:[#allocation57_spill] sm:$0xff] %v17505_v56  ;;  %v401_v11 = vshrl.u32 %v17375_v43, 4  ;;  %v17525_v26 = vmul.u32.u64.low 3817748708, %v17494_v45  ;;  %v17526_v38 = vmul.u32.u64.high 3817748708, %v17494_v45, %v17525_v26  ;;  %v17541_v43 = vsub.s32 %v17185_v4, %v369_v48 }
  0x85   :  { %21779 = vst [vmem:[#allocation58_spill] sm:$0xff] %v17508_v16  ;;  %vm17518_vm10 = vmand %vm21781_vm1, %vm21780_vm9  ;;  %vm21785_vm2 = vcmp.ne.s32.totalorder %v17236_v50, 0  ;;  %vm21786_vm9 = vcmp.lt.s32.totalorder %v17236_v50, 0  ;;  %v21787_v26 = vmov 0  ;;  %v17553_v53 = vadd.s32 18, %v17450_v1  ;;  %v21825_v50 = vld [vmem:[#allocation44_spill] sm:$0xff] }
  0x86   :  { %v21783_v37 = vsel %vm17518_vm10, 4294967295, %v21782_v37  ;;  %21784 = vst [vmem:[#allocation59_spill] sm:$0xff] %v17541_v43  ;;  %vm17547_vm1 = vmand %vm21786_vm9, %vm21785_vm2  ;;  %v347_v22 = vmul.u32 18, %v346_v31  ;;  %v379_v42 = vshrl.u32 %v17395_v14, 4  ;;  %vm21790_vm2 = vcmp.ne.s32.totalorder %v17249_v52, 0 }
  0x87   :  { %v21788_v26 = vsel %vm17547_vm1, 4294967295, %v21787_v26  ;;  %21789 = vst [vmem:[#allocation60_spill] sm:$0xff] %v17553_v53  ;;  %vm21791_vm9 = vcmp.lt.s32.totalorder %v17249_v52, 0  ;;  %v21792_v51 = vmov 0  ;;  %v412_v14 = vshrl.u32 %v17420_v33, 4 }
  0x88   :  { %vm17568_vm13 = vmand %vm21791_vm9, %vm21790_vm2  ;;  %v390_v31 = vshrl.u32 %v17434_v25, 4  ;;  %vm21794_vm4 = vcmp.ne.s32.totalorder %v17252_v3, 0  ;;  %vm21795_vm3 = vcmp.lt.s32.totalorder %v17252_v3, 0  ;;  %v21796_v48 = vmov 0 }
  0x89   :  { %v21793_v51 = vsel %vm17568_vm13, 4294967295, %v21792_v51  ;;  %vm17578_vm6 = vmand %vm21795_vm3, %vm21794_vm4  ;;  %v17585_v4 = vadd.s32 18, %v17508_v16  ;;  %v445_v39 = vshrl.u32 %v17454_v15, 4  ;;  %vm21800_vm4 = vcmp.ne.s32.totalorder %v17264_v2, 0 }
  0x8a   :  { %v21797_v48 = vsel %vm17578_vm6, 4294967295, %v21796_v48  ;;  %vm21801_vm3 = vcmp.lt.s32.totalorder %v17264_v2, 0  ;;  %v21802_v6 = vmov 0  ;;  %v402_v15 = vmul.u32 18, %v401_v11 }
  0x8b   :  { %21798 = vst [vmem:[#allocation61_spill] sm:$0xff] %v21797_v48  ;;  %21799 = vst [vmem:[#allocation62_spill] sm:$0xff] %v17585_v4  ;;  %vm21805_vm7 = vcmp.ne.s32.totalorder %v17322_v13, 0  ;;  %vm21806_vm5 = vcmp.lt.s32.totalorder %v17322_v13, 0  ;;  %v21807_v33 = vmov 0  ;;  %v17618_v10 = vsub.s32 %v17267_v19, %v347_v22 }
  0x8c   :  { %vm17600_vm2 = vmand %vm21801_vm3, %vm21800_vm4  ;;  %v380_v17 = vmul.u32 18, %v379_v42  ;;  %v423_v49 = vshrl.u32 %v17474_v8, 4  ;;  %vm21810_vm4 = vcmp.ne.s32.totalorder %v17356_v40, 0  ;;  %vm21811_vm3 = vcmp.lt.s32.totalorder %v17356_v40, 0 }
  0x8d   :  { %v21803_v6 = vsel %vm17600_vm2, 4294967295, %v21802_v6  ;;  %vm17613_vm0 = vmand %vm21806_vm5, %vm21805_vm7  ;;  %v21812_v11 = vmov 0  ;;  %v413_v25 = vmul.u32 18, %v412_v14  ;;  %v391_v32 = vmul.u32 18, %v390_v31  ;;  %v21822_v31 = vld [vmem:[#allocation45_spill] sm:$0xff] }
  0x8e   :  { %21804 = vst [vmem:[#allocation63_spill] sm:$0xff] %v21803_v6  ;;  %v21808_v33 = vsel %vm17613_vm0, 4294967295, %v21807_v33  ;;  %vm17625_vm9 = vmand %vm21811_vm3, %vm21810_vm4  ;;  %v456_v46 = vshrl.u32 %v17512_v27, 4  ;;  %v21815_v19 = vshrl.u32 %v16919_v12, 16  ;;  %vm21817_vm7 = vcmp.ne.s32.totalorder %v17450_v1, 0  ;;  %v21851_v6 = vld [vmem:[#allocation11_spill] sm:$0xff] }
  0x8f   :  { %21809 = vst [vmem:[#allocation64_spill] sm:$0xff] %v21808_v33  ;;  %v21813_v11 = vsel %vm17625_vm9, 4294967295, %v21812_v11  ;;  %vm21818_vm5 = vcmp.lt.s32.totalorder %v17450_v1, 0  ;;  %v21819_v22 = vmov 0  ;;  %v446_v14 = vmul.u32 18, %v445_v39 }
  0x90   :  { %21814 = vst [vmem:[#allocation65_spill] sm:$0xff] %v21813_v11  ;;  %v17638_v8 = vor.u32 %v17300_v60, %v21815_v19  ;;  %vm17644_vm4 = vmand %vm21818_vm5, %vm21817_vm7  ;;  %v434_v27 = vshrl.u32 %v17526_v38, 4  ;;  %v17662_v34 = vsub.s32 %v21825_v50, %v402_v15  ;;  %vm21826_vm3 = vcmp.ne.s32.totalorder %v17508_v16, 0  ;;  %v21834_v50 = vld [vmem:[#allocation14_spill] sm:$0xff] }
  0x91   :  { %v21820_v22 = vsel %vm17644_vm4, 4294967295, %v21819_v22  ;;  %vm21827_vm7 = vcmp.lt.s32.totalorder %v17508_v16, 0  ;;  %v21828_v39 = vmov 0  ;;  %v17673_v38 = vadd.s32 18, %v17541_v43  ;;  %v21835_v15 = vld [vmem:[#allocation10_spill] sm:$0xff] }
  0x92   :  { %21816 = vst [vmem:[#allocation66_spill] sm:$0xff] %v17638_v8  ;;  %21821 = vst [vmem:[#allocation67_spill] sm:$0xff] %v21820_v22  ;;  %v17677_v60 = vsub.s32 %v17325_v59, %v380_v17  ;;  %v424_v8 = vmul.u32 18, %v423_v49  ;;  %v21836_v2 = vsel %vm17137_vm8, %v21834_v50, %v21835_v15  ;;  %v21837_v19 = vmov 0  ;;  %v21846_v17 = vld [vmem:[#allocation49_spill] sm:$0xff]  ;;  %v21847_v15 = vld [vmem:[#allocation52_spill] sm:$0xff] }
  0x93   :  { %vm17668_vm5 = vmand %vm21827_vm7, %vm21826_vm3  ;;  %21831 = vst [vmem:[#allocation44_spill] sm:$0xff] %v17673_v38  ;;  %vm17684_vm2 = vcmp.lt.s32.totalorder %v21836_v2, 16  ;;  %vm21841_vm3 = vcmp.ne.s32.totalorder %v17541_v43, 0  ;;  %vm21842_vm7 = vcmp.lt.s32.totalorder %v17541_v43, 0  ;;  %v21843_v59 = vmov 0 }
  0x94   :  { %v21829_v39 = vsel %vm17668_vm5, 4294967295, %v21828_v39  ;;  %21832 = vst [vmem:[#allocation68_spill] sm:$0xff] %v17677_v60  ;;  %v21838_v19 = vsel %vm17684_vm2, 4294967295, %v21837_v19  ;;  %vm17696_vm10 = vmand %vm21842_vm7, %vm21841_vm3  ;;  %v17702_v2 = vsub.s32 %v21846_v17, %v413_v25  ;;  %v457_v49 = vmul.u32 18, %v456_v46  ;;  %v17718_v25 = vld [vmem:[%s21361_s3 + $0xb8] sm:$0xff]   ;;  %v21850_v17 = vld [vmem:[#allocation17_spill] sm:$0xff] }
  0x95   :  { %21830 = vst [vmem:[#allocation45_spill] sm:$0xff] %v21829_v39  ;;  %21839 = vst [vmem:[#allocation27_spill] sm:$0xff] %v21838_v19  ;;  %v21844_v59 = vsel %vm17696_vm10, 4294967295, %v21843_v59  ;;  %v17713_v3 = vsub.s32 %v21847_v15, %v391_v32  ;;  %v435_v13 = vmul.u32 18, %v434_v27  ;;  %v21852_v11 = vsel %vm17149_vm11, %v21850_v17, %v21851_v6 }
  0x96   :  { %21845 = vst [vmem:[#allocation14_spill] sm:$0xff] %v21844_v59  ;;  %vm17725_vm8 = vcmp.lt.s32.totalorder %v21852_v11, 16  ;;  %v21853_v42 = vmov 0  ;;  %v17736_v27 = vsub.s32 %v17378_v7, %v446_v14 }
  0x97   :  { %21848 = vst [vmem:[#allocation10_spill] sm:$0xff] %v17713_v3  ;;  %v21854_v42 = vsel %vm17725_vm8, 4294967295, %v21853_v42 }
  0x98   :  { %21855 = vst [vmem:[#allocation49_spill] sm:$0xff] %v21854_v42  ;;  %21856 = vst [vmem:[#allocation52_spill] sm:$0xff] %v17736_v27 }
  0x99   :  { %12 = vsyncpa [#allocation6], 0  ;;  %v17739_v15 = vadd.s32 18, %v17618_v10  ;;  %v17744_v6 = vsub.s32 %v17398_v41, %v424_v8  ;;  %15136 = vmatprep.subr.bf16.mxu1 %v17718_v25  ;;  %v17750_v11 = vld [vmem:[%s21360_s2] ss:$0 sm:$0xff]  ;;  %v21859_v14 = vld [vmem:[#allocation18_spill] sm:$0xff]  ;;  %v17776_v7 = vsub.s32 %v17437_v36, %v457_v49 }
  0x9a   :  { %v21860_v46 = vld [vmem:[#allocation12_spill] sm:$0xff]  ;;  %v21862_v32 = vmov 0  ;;  %vm21865_vm6 = vcmp.ne.s32.totalorder %v17618_v10, 0  ;;  %vm21866_vm11 = vcmp.lt.s32.totalorder %v17618_v10, 0  ;;  %v21867_v8 = vmov 0  ;;  %v21877_v41 = vld [vmem:[#allocation19_spill] sm:$0xff] }
  0x9b   :  { %21857 = vst [vmem:[#allocation28_spill] sm:$0xff] %v17744_v6  ;;  %v21861_v17 = vsel %vm17165_vm14, %v21859_v14, %v21860_v46  ;;  %vm17769_vm3 = vmand %vm21866_vm11, %vm21865_vm6  ;;  %vm21870_vm4 = vcmp.ne.s32.totalorder %v17662_v34, 0  ;;  %vm21871_vm9 = vcmp.lt.s32.totalorder %v17662_v34, 0  ;;  %v21872_v14 = vmov 0  ;;  %v21875_v49 = vld [vmem:[#allocation32_spill] sm:$0xff]  ;;  %v21878_v50 = vld [vmem:[#allocation13_spill] sm:$0xff] }
  0x9c   :  { %vm17757_vm7 = vcmp.lt.s32.totalorder %v21861_v17, 16  ;;  %v21868_v8 = vsel %vm17769_vm3, 4294967295, %v21867_v8  ;;  %21869 = vst [vmem:[#allocation11_spill] sm:$0xff] %v17776_v7  ;;  %vm17782_vm10 = vmand %vm21871_vm9, %vm21870_vm4  ;;  %v17787_v46 = vadd.s32 18, %v17662_v34  ;;  %v17792_v17 = vsub.s32 %v17494_v45, %v435_v13  ;;  %v21893_v16 = vld [vmem:[#allocation42_spill] sm:$0xff]  ;;  %v21896_v4 = vld [vmem:[#allocation15_spill] sm:$0xff] }
  0x9d   :  { %v21863_v32 = vsel %vm17757_vm7, 4294967295, %v21862_v32  ;;  %v21873_v14 = vsel %vm17782_vm10, 4294967295, %v21872_v14  ;;  %vm21876_vm14 = vnez %v21875_v49  ;;  %v21880_v38 = vmov 0  ;;  %v21913_v56 = vld [vmem:[#allocation39_spill] sm:$0xff]  ;;  %v21915_v33 = vld [vmem:[#allocation22_spill] sm:$0xff]  ;;  %v21916_v12 = vld [vmem:[#allocation16_spill] sm:$0xff] }
  0x9e   :  { %21864 = vst [vmem:[#allocation17_spill] sm:$0xff] %v21863_v32  ;;  %21874 = vst [vmem:[#allocation29_spill] sm:$0xff] %v17792_v17  ;;  %v21879_v43 = vsel %vm21876_vm14, %v21877_v41, %v21878_v50  ;;  %vm21883_vm4 = vcmp.ne.s32.totalorder %v17677_v60, 0  ;;  %vm21884_vm5 = vcmp.lt.s32.totalorder %v17677_v60, 0  ;;  %v21885_v59 = vmov 0  ;;  %s16689_s14 = smov [#allocation5]  }
  0x9f   :  { %vm17799_vm9 = vcmp.lt.s32.totalorder %v21879_v43, 16  ;;  %vm17807_vm6 = vmand %vm21884_vm5, %vm21883_vm4  ;;  %v17812_v13 = vadd.s32 18, %v17677_v60  ;;  %v17815_v45 = vadd.s32 18, %v17702_v2  ;;  %vm21889_vm0 = vcmp.ne.s32.totalorder %v17702_v2, 0  ;;  %s13458_s15 = sshll.u32 %s16689_s14, 4  ;;  %s13459_s15 = int_to_ptr.vmem [resolvable:$true] %s13458_s15 }
  0xa0   :  { %v21881_v38 = vsel %vm17799_vm9, 4294967295, %v21880_v38  ;;  %v21886_v59 = vsel %vm17807_vm6, 4294967295, %v21885_v59  ;;  %vm21890_vm13 = vcmp.lt.s32.totalorder %v17702_v2, 0  ;;  %v17829_v41 = vadd.s32 18, %v17713_v3  ;;  %s16664_s16 = scalar_lea.vmem %s13459_s15, 32  ;;  %p16669_p1 = scmp.lt.s32.totalorder %s13459_s15, %s13459_s15 }
  0xa1   :  { %21882 = vst [vmem:[#allocation18_spill] sm:$0xff] %v21881_v38  ;;  %21887 = vst [vmem:[#allocation12_spill] sm:$0xff] %v21886_v59  ;;  %vm21894_vm15 = vnez %v21893_v16  ;;  %v21898_v1 = vmov 0  ;;  %v21903_v53 = vmov 0  ;;  %v17851_v22 = vadd.s32 18, %v17736_v27  ;;  %p16665_p0 = scmp.ne.s32.totalorder %s13459_s15, %s16664_s16  ;;  %p16670_p2 = scmp.lt.s32.totalorder %s16664_s16, %s16664_s16 }
  0xa2   :  { %21888 = vst [vmem:[#allocation32_spill] sm:$0xff] %v17812_v13  ;;  %vm17824_vm5 = vmand %vm21890_vm13, %vm21889_vm0  ;;  %vm21901_vm0 = vcmp.ne.s32.totalorder %v17713_v3, 0  ;;  %vm21902_vm13 = vcmp.lt.s32.totalorder %v17713_v3, 0  ;;  %v17854_v16 = vadd.s32 18, %v17744_v6  ;;  %vm21908_vm11 = vcmp.ne.s32.totalorder %v17736_v27, 0 }
  0xa3   :  { %vm17846_vm9 = vmand %vm21902_vm13, %vm21901_vm0  ;;  %21906 = vst [vmem:[#allocation42_spill] sm:$0xff] %v17851_v22  ;;  %vm21909_vm0 = vcmp.lt.s32.totalorder %v17736_v27, 0  ;;  %vm21927_vm6 = vcmp.ne.s32.totalorder %v17776_v7, 0  ;;  %vm21928_vm10 = vcmp.lt.s32.totalorder %v17776_v7, 0  ;;  %v17913_v60 = vadd.s32 18, %v17792_v17  ;;  %p16671_p3 = por %p16670_p2, %p16669_p1 }
  0xa4   :  { %v21904_v53 = vsel %vm17846_vm9, 4294967295, %v21903_v53  ;;  %vm17863_vm13 = vmand %vm21909_vm0, %vm21908_vm11  ;;  %vm21921_vm11 = vcmp.ne.s32.totalorder %v17744_v6, 0 }
  0xa5   :  { %21905 = vst [vmem:[#allocation13_spill] sm:$0xff] %v21904_v53  ;;  %vm17908_vm3 = vmand %vm21928_vm10, %vm21927_vm6  ;;  %vm21932_vm10 = vcmp.ne.s32.totalorder %v17792_v17, 0  ;;  %vm21933_vm6 = vcmp.lt.s32.totalorder %v17792_v17, 0  ;;  %p16672_p4 = pnand %p16671_p3, %p16665_p0 }
  0xa6   :  { %21931 = vst [vmem:[#allocation69_spill] sm:$0xff] %v17913_v60  ;;  %v21971_v60 = vmov 0 }
  0xe2   :  { %v14998_v36 = vpop.f32.mrf.mxu0 }
  0xe3   :  { %v935_v43 = vadd.f32 %v14998_v36, %v17750_v11  ;;  %v21895_v36 = vld [vmem:[#allocation21_spill] sm:$0xff] }
  0xe4   :  { %v926_v49 = vpop.f32.mrf.mxu0  ;;  %v21897_v39 = vsel %vm21894_vm15, %v21895_v36, %v21896_v4  ;;  %21907 = vst [vmem:[#allocation21_spill] sm:$0xff] %v17854_v16  ;;  %v21910_v36 = vmov 0  ;;  %vm21914_vm15 = vnez %v21913_v56 }
  0xe5   :  { %vm17838_vm12 = vcmp.lt.s32.totalorder %v21897_v39, 16  ;;  %v1071_v4 = vmax.f32 %v935_v43, 0.0  ;;  %v927_v39 = vadd.f32 %v17750_v11, %v926_v49  ;;  %v21911_v36 = vsel %vm17863_vm13, 4294967295, %v21910_v36 }
  0xe6   :  { %v21899_v1 = vsel %vm17838_vm12, 4294967295, %v21898_v1  ;;  %21912 = vst [vmem:[#allocation15_spill] sm:$0xff] %v21911_v36  ;;  %v14999_v40 = vpop.f32.mrf.mxu0  ;;  %v21917_v43 = vsel %vm21914_vm15, %v21915_v33, %v21916_v12  ;;  %v21918_v49 = vmov 0  ;;  %vm21922_vm15 = vcmp.lt.s32.totalorder %v17744_v6, 0 }
  0xe7   :  { %21900 = vst [vmem:[#allocation19_spill] sm:$0xff] %v21899_v1  ;;  %vm17874_vm14 = vcmp.lt.s32.totalorder %v21917_v43, 16  ;;  %vm17894_vm0 = vmand %vm21922_vm15, %vm21921_vm11  ;;  %v21923_v33 = vmov 0  ;;  %v17899_v12 = vadd.s32 18, %v17776_v7  ;;  %v1179_v43 = vsel %vm17684_vm2, %v1071_v4, 0.0  ;;  %v21969_v1 = vld [vmem:[#allocation23_spill] sm:$0xff] }
  0xe8   :  { %v21919_v49 = vsel %vm17874_vm14, 4294967295, %v21918_v49  ;;  %v21924_v33 = vsel %vm17894_vm0, 4294967295, %v21923_v33  ;;  %v1069_v52 = vmax.f32 %v927_v39, 0.0  ;;  %v938_v48 = vadd.f32 %v14999_v40, %v17750_v11  ;;  %v929_v59 = vpop.f32.mrf.mxu0  ;;  %vm17931_vm11 = vmand %vm21933_vm6, %vm21932_vm10 }
  0xe9   :  { %21920 = vst [vmem:[#allocation39_spill] sm:$0xff] %v21919_v49  ;;  %21925 = vst [vmem:[#allocation22_spill] sm:$0xff] %v21924_v33  ;;  %v14381_v13 = vpack.c.bf16 %v1179_v43, %v1179_v43  ;;  %v21934_v43 = vmov 0  ;;  %v930_v53 = vadd.f32 %v17750_v11, %v929_v59  ;;  %vm21937_vm10 = vnez %v21881_v38  ;;  %v21966_v49 = vld [vmem:[#allocation50_spill] sm:$0xff] }
  0xea   :  { %21926 = vst [vmem:[#allocation16_spill] sm:$0xff] %v17899_v12  ;;  %v21935_v43 = vsel %vm17931_vm11, 4294967295, %v21934_v43  ;;  %v1177_v4 = vsel %vm17725_vm8, %v1069_v52, 0.0  ;;  %v1072_v19 = vmax.f32 %v938_v48, 0.0  ;;  %v15002_v36 = vpop.f32.mrf.mxu0  ;;  %vm21938_vm6 = vnez %v21727_v29  ;;  %v21950_v29 = vld [vmem:[#allocation26_spill] sm:$0xff] }
  0xeb   :  { %21936 = vst [vmem:[#allocation70_spill] sm:$0xff] %v21935_v43  ;;  %v1344_v39 = vshrl.u32 %v14381_v13, 16  ;;  %v1347_v27 = vshll.u32 %v14381_v13, 16  ;;  %v14379_v22 = vpack.c.bf16 %v1177_v4, %v1177_v4  ;;  %v1070_v48 = vmax.f32 %v930_v53, 0.0 }
  0xec   :  { %v1180_v52 = vsel %vm17757_vm7, %v1072_v19, 0.0  ;;  %v951_v59 = vadd.f32 %v15002_v36, %v17750_v11  ;;  %v942_v16 = vpop.f32.mrf.mxu0  ;;  %vm21943_vm15 = vnez %v21733_v28  ;;  %vm21949_vm7 = vnez %v21746_v35 }
  0xed   :  { %v1346_v42 = vrot.slane %v1344_v39, 6  ;;  %v1349_v13 = vrot.slane %v1347_v27, 7  ;;  %v1325_v4 = vshrl.u32 %v14379_v22, 16  ;;  %v1328_v6 = vshll.u32 %v14379_v22, 16 }
  0xee   :  { %v14382_v33 = vpack.c.bf16 %v1180_v52, %v1180_v52  ;;  %v1178_v3 = vsel %vm21937_vm10, %v1070_v48, 0.0  ;;  %v1075_v32 = vmax.f32 %v951_v59, 0.0  ;;  %v943_v53 = vadd.f32 %v17750_v11, %v942_v16  ;;  %v15003_v39 = vpop.f32.mrf.mxu0  ;;  %v21944_v52 = vld [vmem:[#allocation20_spill] sm:$0xff] }
  0xef   :  { %v1350_v19 = vor.u32 %v1349_v13, %v1346_v42  ;;  %v1327_v36 = vrot.slane %v1325_v4, 6  ;;  %v1330_v7 = vrot.slane %v1328_v6, 7  ;;  %v14380_v12 = vpack.c.bf16 %v1178_v3, %v1178_v3  ;;  %v21951_v3 = vld [vmem:[#allocation24_spill] sm:$0xff] }
  0xf0   :  { %v21939_v27 = vsel %vm21938_vm6, %v16999_v54, %v16975_v44  ;;  %v21940_v22 = vmov 0  ;;  %v21945_v48 = vsel %vm21943_vm15, %v17002_v55, %v21944_v52  ;;  %v21946_v42 = vmov 0  ;;  %v1723_v54 = vld [vmem:[#allocation2 + $0x8] sm:$0xe] }
  0xf1   :  { %vm17961_vm4 = vcmp.lt.s32.totalorder %v21939_v27, 16  ;;  %vm17970_vm1 = vcmp.lt.s32.totalorder %v21945_v48, 16  ;;  %v21952_v6 = vsel %vm21949_vm7, %v21950_v29, %v21951_v3  ;;  %v21953_v44 = vmov 0  ;;  %v945_v48 = vpop.f32.mrf.mxu0 }
  0xf2   :  { %v21941_v22 = vsel %vm17961_vm4, 4294967295, %v21940_v22  ;;  %v21947_v42 = vsel %vm17970_vm1, 4294967295, %v21946_v42  ;;  %vm17979_vm6 = vcmp.lt.s32.totalorder %v21952_v6, 16  ;;  %vm21956_vm2 = vsmask.f32 7942 }
  0xf3   :  { %21942 = vst [vmem:[#allocation71_spill] sm:$0xff] %v21941_v22  ;;  %21948 = vst [vmem:[#allocation20_spill] sm:$0xff] %v21947_v42  ;;  %v21954_v44 = vsel %vm17979_vm6, 4294967295, %v21953_v44  ;;  %vm21957_vm10 = vcmask 1043457   ;;  %v21958_v28 = vmov 0  ;;  %v1354_v55 = vshrl.u32 %v14382_v33, 16 }
  0xf4   :  { %21955 = vst [vmem:[#allocation26_spill] sm:$0xff] %v21954_v44  ;;  %vm17985_vm8 = vmand %vm21957_vm10, %vm21956_vm2  ;;  %v1357_v16 = vshll.u32 %v14382_v33, 16  ;;  %v1183_v59 = vsel %vm17838_vm12, %v1075_v32, 0.0  ;;  %v1073_v35 = vmax.f32 %v943_v53, 0.0  ;;  %v1352_v13 = vrot.slane %v1350_v19, 4 }
  0xf5   :  { %v21959_v28 = vsel %vm17985_vm8, 4294967295, %v21958_v28  ;;  %v1331_v4 = vor.u32 %v1330_v7, %v1327_v36  ;;  %v1334_v27 = vshrl.u32 %v14380_v12, 16  ;;  %v1337_v52 = vshll.u32 %v14380_v12, 16  ;;  %v15006_v12 = vpop.f32.mrf.mxu0 }
  0xf6   :  { %21960 = vst [vmem:[#allocation24_spill] sm:$0xff] %v21959_v28  ;;  %v1356_v29 = vrot.slane %v1354_v55, 6  ;;  %v1359_v3 = vrot.slane %v1357_v16, 7  ;;  %v14385_v6 = vpack.c.bf16 %v1183_v59, %v1183_v59  ;;  %v1181_v40 = vsel %vm17874_vm14, %v1073_v35, 0.0  ;;  %v21968_v35 = vld [vmem:[#allocation25_spill] sm:$0xff] }
  0xf7   :  { %vm21961_vm2 = vsmask.f32 5392  ;;  %vm21962_vm7 = vsmask.f32 1280  ;;  %v21963_v38 = vmov 0  ;;  %v1332_v33 = vrot.slane %v1331_v4, 4 }
  0xf8   :  { %vm17995_vm15 = vmor %vm21962_vm7, %vm21961_vm2  ;;  %v1724_v32 = vsel %vm17985_vm8, %v1331_v4, %v1723_v54  ;;  %v1336_v7 = vrot.slane %v1334_v27, 6  ;;  %v1339_v53 = vrot.slane %v1337_v52, 7  ;;  %v1360_v36 = vor.u32 %v1359_v3, %v1356_v29  ;;  %v958_v52 = vpop.f32.mrf.mxu0 }
  0xf9   :  { %v21964_v38 = vsel %vm17995_vm15, 4294967295, %v21963_v38  ;;  %1725 = vst [vmem:[#allocation2 + $0x8] sm:$0xe] %v1724_v32  ;;  %v1384_v55 = vshrl.u32 %v14385_v6, 16  ;;  %v1387_v16 = vshll.u32 %v14385_v6, 16  ;;  %v14383_v59 = vpack.c.bf16 %v1181_v40, %v1181_v40 }
  0xfa   :  { %21965 = vst [vmem:[#allocation72_spill] sm:$0xff] %v21964_v38  ;;  %vm21967_vm10 = vnez %v21966_v49  ;;  %v1340_v43 = vor.u32 %v1339_v53, %v1336_v7  ;;  %v954_v54 = vadd.f32 %v15003_v39, %v17750_v11  ;;  %v946_v4 = vadd.f32 %v17750_v11, %v945_v48 }
  0xfb   :  { %v21970_v17 = vsel %vm21967_vm10, %v21968_v35, %v21969_v1  ;;  %v967_v27 = vadd.f32 %v15006_v12, %v17750_v11  ;;  %v1361_v40 = vsel %vm17995_vm15, %v1352_v13, %v1360_v36  ;;  %v1362_v29 = vrot.slane %v1360_v36, 4  ;;  %v15007_v13 = vpop.f32.mrf.mxu0 }
  0xfc   :  { %vm18006_vm2 = vcmp.lt.s32.totalorder %v21970_v17, 16  ;;  %v1386_v49 = vrot.slane %v1384_v55, 6  ;;  %v1389_v3 = vrot.slane %v1387_v16, 7  ;;  %vm21974_vm7 = vnez %v21750_v9  ;;  %1728 = vst [vmem:[#allocation2 + $0x14] sm:$0xf] %v1361_v40 }
  0xfd   :  { %v21972_v60 = vsel %vm18006_vm2, 4294967295, %v21971_v60  ;;  %v21975_v1 = vsel %vm21974_vm7, %v17119_v20, %v17092_v58  ;;  %v21976_v17 = vmov 0  ;;  %v1341_v39 = vsel %vm17995_vm15, %v1332_v33, %v1340_v43  ;;  %v961_v55 = vpop.f32.mrf.mxu0 }
  0xfe   :  { %21973 = vst [vmem:[#allocation50_spill] sm:$0xff] %v21972_v60  ;;  %vm18020_vm10 = vcmp.lt.s32.totalorder %v21975_v1, 16  ;;  %v1342_v48 = vrot.slane %v1340_v43, 4  ;;  %v1364_v6 = vshrl.u32 %v14383_v59, 16  ;;  %v1367_v32 = vshll.u32 %v14383_v59, 16 }
  0xff   :  { %v21977_v17 = vsel %vm18020_vm10, 4294967295, %v21976_v17  ;;  %1726 = vst [vmem:[#allocation2 + $0xc] sm:$0xf] %v1341_v39  ;;  %v18026_v7 = vor.u32 %v1389_v3, %v1386_v49  ;;  %v1076_v53 = vmax.f32 %v954_v54, 0.0  ;;  %v1074_v9 = vmax.f32 %v946_v4, 0.0  ;;  %v15010_v1 = vpop.f32.mrf.mxu0 }
 0x100   :  { %21978 = vst [vmem:[#allocation25_spill] sm:$0xff] %v21977_v17  ;;  %v1079_v12 = vmax.f32 %v967_v27, 0.0  ;;  %vm21979_vm14 = vsmask.f32 1280  ;;  %vm21980_vm7 = vcmask 1041408   ;;  %v21981_v58 = vmov 0 }
 0x101   :  { %vm18030_vm12 = vmand %vm21980_vm7, %vm21979_vm14  ;;  %v1351_v20 = vsel %vm17995_vm15, %v1342_v48, %v1350_v19  ;;  %v1366_v33 = vrot.slane %v1364_v6, 6  ;;  %v1369_v43 = vrot.slane %v1367_v32, 7  ;;  %v959_v36 = vadd.f32 %v17750_v11, %v958_v52  ;;  %v1768_v27 = vld [vmem:[#allocation2 + $0x8] sm:$0x3] }
 0x102   :  { %v21982_v58 = vsel %vm18030_vm12, 4294967295, %v21981_v58  ;;  %1727 = vst [vmem:[#allocation2 + $0x10] sm:$0xf] %v1351_v20  ;;  %v1392_v16 = vrot.slane %v18026_v7, 4  ;;  %v1184_v59 = vsel %vm17961_vm4, %v1076_v53, 0.0  ;;  %v1182_v35 = vsel %vm17970_vm1, %v1074_v9, 0.0 }
 0x103   :  { %21983 = vst [vmem:[#allocation23_spill] sm:$0xff] %v21982_v58  ;;  %v1187_v54 = vsel %vm17979_vm6, %v1079_v12, 0.0  ;;  %vm21984_vm14 = vnez %v21754_v18  ;;  %v21986_v4 = vmov 0  ;;  %v1370_v52 = vor.u32 %v1369_v43, %v1366_v33  ;;  %v21989_v9 = vld [vmem:[#allocation54_spill] sm:$0xff]  ;;  %v974_v33 = vpop.f32.mrf.mxu0 }
 0x104   :  { %v21985_v19 = vsel %vm21984_vm14, %v17122_v21, %v17094_v61  ;;  %v14386_v40 = vpack.c.bf16 %v1184_v59, %v1184_v59  ;;  %v14384_v49 = vpack.c.bf16 %v1182_v35, %v1182_v35  ;;  %v14389_v3 = vpack.c.bf16 %v1187_v54, %v1187_v54 }
 0x105   :  { %vm18049_vm7 = vcmp.lt.s32.totalorder %v21985_v19, 16  ;;  %v1769_v39 = vsel %vm18030_vm12, 0, %v1768_v27  ;;  %v1077_v48 = vmax.f32 %v959_v36, 0.0  ;;  %v970_v6 = vadd.f32 %v15007_v13, %v17750_v11  ;;  %v15011_v19 = vpop.f32.mrf.mxu0 }
 0x106   :  { %v21987_v4 = vsel %vm18049_vm7, 4294967295, %v21986_v4  ;;  %v962_v18 = vadd.f32 %v17750_v11, %v961_v55  ;;  %1770 = vst [vmem:[#allocation2 + $0x8] sm:$0x3] %v1769_v39  ;;  %v1371_v61 = vsel %vm17995_vm15, %v1362_v29, %v1370_v52  ;;  %v1372_v21 = vrot.slane %v1370_v52, 4 }
 0x107   :  { %21988 = vst [vmem:[#allocation73_spill] sm:$0xff] %v21987_v4  ;;  %v1394_v32 = vshrl.u32 %v14386_v40, 16  ;;  %v1397_v53 = vshll.u32 %v14386_v40, 16  ;;  %vm21990_vm14 = vnez %v21989_v9  ;;  %v21992_v20 = vmov 0  ;;  %1729 = vst [vmem:[#allocation2 + $0x18] sm:$0xf] %v1371_v61 }
 0x108   :  { %v21991_v12 = vsel %vm21990_vm14, %v17156_v62, %v17114_v5  ;;  %v1374_v13 = vshrl.u32 %v14384_v49, 16  ;;  %v1377_v43 = vshll.u32 %v14384_v49, 16  ;;  %v1424_v36 = vshrl.u32 %v14389_v3, 16 }
 0x109   :  { %vm18064_vm6 = vcmp.lt.s32.totalorder %v21991_v12, 16  ;;  %v1427_v55 = vshll.u32 %v14389_v3, 16  ;;  %v1396_v59 = vrot.slane %v1394_v32, 6  ;;  %v1399_v29 = vrot.slane %v1397_v53, 7  ;;  %v977_v12 = vpop.f32.mrf.mxu0 }
 0x10a   :  { %v21993_v20 = vsel %vm18064_vm6, 4294967295, %v21992_v20  ;;  %v1185_v35 = vsel %vm18006_vm2, %v1077_v48, 0.0  ;;  %v1080_v54 = vmax.f32 %v970_v6, 0.0  ;;  %v1376_v27 = vrot.slane %v1374_v13, 6  ;;  %v22001_v48 = vld [vmem:[#allocation35_spill] sm:$0xff]  ;;  %v22002_v6 = vld [vmem:[#allocation30_spill] sm:$0xff] }
 0x10b   :  { %21994 = vst [vmem:[#allocation54_spill] sm:$0xff] %v21993_v20  ;;  %v1379_v52 = vrot.slane %v1377_v43, 7  ;;  %v1426_v5 = vrot.slane %v1424_v36, 6  ;;  %v1429_v62 = vrot.slane %v1427_v55, 7  ;;  %v1400_v40 = vor.u32 %v1399_v29, %v1396_v59 }
 0x10c   :  { %v14387_v39 = vpack.c.bf16 %v1185_v35, %v1185_v35  ;;  %v1188_v61 = vsel %vm18020_vm10, %v1080_v54, 0.0  ;;  %v1078_v9 = vmax.f32 %v962_v18, 0.0  ;;  %vm21995_vm14 = vnez %v21763_v30  ;;  %v16160_v35 = vld [vmem:[#allocation2 + $0x10] sm:$0xff]  }
 0x10d   :  { %v21996_v49 = vsel %vm21995_vm14, %v17207_v23, %v17159_v63  ;;  %v21997_v3 = vmov 0  ;;  %vm22000_vm2 = vnez %v21768_v47  ;;  %v22004_v53 = vmov 0  ;;  %v16188_v23 = vld [vmem:[%s21361_s3 + $0xb0] sm:$0xff]  }
 0x10e   :  { %vm18077_vm1 = vcmp.lt.s32.totalorder %v21996_v49, 16  ;;  %v22003_v32 = vsel %vm22000_vm2, %v22001_v48, %v22002_v6  ;;  %v1380_v18 = vor.u32 %v1379_v52, %v1376_v27  ;;  %v18090_v13 = vor.u32 %v1429_v62, %v1426_v5  ;;  %v16159_v5 = vld [vmem:[#allocation2 + $0x8] sm:$0xff]  }
 0x10f   :  { %v21998_v3 = vsel %vm18077_vm1, 4294967295, %v21997_v3  ;;  %vm18086_vm4 = vcmp.lt.s32.totalorder %v22003_v32, 16  ;;  %v14390_v30 = vpack.c.bf16 %v1188_v61, %v1188_v61  ;;  %v983_v63 = vadd.f32 %v15010_v1, %v17750_v11  ;;  %v18107_v1 = vpop.f32.mrf.mxu0  ;;  %15049 = vmatmul.mubr.bf16.vlgmr.msra.gmra.mxu1 %v16159_v5 }
 0x110   :  { %21999 = vst [vmem:[#allocation74_spill] sm:$0xff] %v21998_v3  ;;  %v22005_v53 = vsel %vm18086_vm4, 4294967295, %v22004_v53  ;;  %v1401_v47 = vsel %vm17995_vm15, %v1392_v16, %v1400_v40  ;;  %v1402_v43 = vrot.slane %v1400_v40, 4  ;;  %v1404_v36 = vshrl.u32 %v14387_v39, 16  ;;  %15052 = vmatprep.mubr.bf16.mxu1 %v16160_v35  ;;  %15137 = vmatpush3.bf16.msra.mxu1 %v17718_v25 }
 0x111   :  { %22006 = vst [vmem:[#allocation35_spill] sm:$0xff] %v22005_v53  ;;  %v1407_v55 = vshll.u32 %v14387_v39, 16  ;;  %vm22007_vm2 = vnez %v21772_v24  ;;  %v22009_v29 = vmov 0  ;;  %1732 = vst [vmem:[#allocation2 + $0x24] sm:$0xf] %v1401_v47  ;;  %v1381_v54 = vsel %vm17995_vm15, %v1372_v21, %v1380_v18  ;;  %v18114_v40 = vpop.f32.mrf.mxu0  ;;  %v22015_v47 = vld [vmem:[#allocation31_spill] sm:$0xff]  ;;  %15138 = vmatprep.subr.bf16.mxu1 %v16188_v23 }
 0x112   :  { %v22008_v59 = vsel %vm22007_vm2, %v17261_v57, %v17210_v0  ;;  %v1382_v16 = vrot.slane %v1380_v18, 4  ;;  %v1432_v27 = vrot.slane %v18090_v13, 4  ;;  %v1434_v52 = vshrl.u32 %v14390_v30, 16  ;;  %1730 = vst [vmem:[#allocation2 + $0x1c] sm:$0xf] %v1381_v54  ;;  %v16192_v54 = vld [vmem:[%s21361_s3 + $0xa8] sm:$0xff]  }
 0x113   :  { %vm18103_vm14 = vcmp.lt.s32.totalorder %v22008_v59, 16  ;;  %v1406_v24 = vrot.slane %v1404_v36, 6  ;;  %v1409_v62 = vrot.slane %v1407_v55, 7  ;;  %v1437_v0 = vshll.u32 %v14390_v30, 16  ;;  %v22012_v30 = vld [vmem:[#allocation56_spill] sm:$0xff] }
 0x114   :  { %v22010_v29 = vsel %vm18103_vm14, 4294967295, %v22009_v29  ;;  %v1186_v57 = vsel %vm18049_vm7, %v1078_v9, 0.0  ;;  %v1391_v39 = vsel %vm17995_vm15, %v1382_v16, %v18026_v7  ;;  %v1436_v61 = vrot.slane %v1434_v52, 6  ;;  %v22014_v9 = vld [vmem:[#allocation40_spill] sm:$0xff]  ;;  %v18130_v7 = vpop.f32.mrf.mxu0  ;;  %15139 = vmatpush3.bf16.msra.mxu1 %v16188_v23 }
 0x115   :  { %22011 = vst [vmem:[#allocation30_spill] sm:$0xff] %v22010_v29  ;;  %v14388_v21 = vpack.c.bf16 %v1186_v57, %v1186_v57  ;;  %v1083_v49 = vmax.f32 %v983_v63, 0.0  ;;  %1731 = vst [vmem:[#allocation2 + $0x20] sm:$0xf] %v1391_v39  ;;  %v1410_v48 = vor.u32 %v1409_v62, %v1406_v24  ;;  %v1439_v6 = vrot.slane %v1437_v0, 7  ;;  %15140 = vmatprep.subr.bf16.mxu1 %v16192_v54 }
 0x116   :  { %v975_v32 = vadd.f32 %v17750_v11, %v974_v33  ;;  %v986_v18 = vadd.f32 %v15011_v19, %v17750_v11  ;;  %vm22013_vm2 = vnez %v22012_v30  ;;  %v22017_v55 = vmov 0  ;;  %v18143_v25 = vpop.f32.mrf.mxu0 }
 0x117   :  { %v22016_v36 = vsel %vm22013_vm2, %v22014_v9, %v22015_v47  ;;  %v1414_v63 = vshrl.u32 %v14388_v21, 16  ;;  %v1417_v59 = vshll.u32 %v14388_v21, 16  ;;  %v1191_v33 = vsel %vm18064_vm6, %v1083_v49, 0.0 }
 0x118   :  { %vm18126_vm7 = vcmp.lt.s32.totalorder %v22016_v36, 16  ;;  %v978_v19 = vadd.f32 %v17750_v11, %v977_v12  ;;  %v1411_v16 = vsel %vm17995_vm15, %v1402_v43, %v1410_v48  ;;  %v1412_v52 = vrot.slane %v1410_v48, 4  ;;  %v16195_v43 = vld [vmem:[%s21361_s3 + $0xa0] sm:$0xff]   ;;  %v22021_v36 = vld [vmem:[#allocation41_spill] sm:$0xff]  ;;  %15141 = vmatpush3.bf16.msra.mxu1 %v16192_v54 }
 0x119   :  { %v22018_v55 = vsel %vm18126_vm7, 4294967295, %v22017_v55  ;;  %v18141_v5 = vor.u32 %v1439_v6, %v1436_v61  ;;  %v14393_v35 = vpack.c.bf16 %v1191_v33, %v1191_v33  ;;  %1733 = vst [vmem:[#allocation2 + $0x28] sm:$0xf] %v1411_v16  ;;  %v1416_v24 = vrot.slane %v1414_v63, 6  ;;  %v22022_v63 = vld [vmem:[#allocation33_spill] sm:$0xff]  ;;  %15142 = vmatprep.subr.bf16.mxu1 %v16195_v43 }
 0x11a   :  { %22019 = vst [vmem:[#allocation56_spill] sm:$0xff] %v22018_v55  ;;  %v1419_v62 = vrot.slane %v1417_v59, 7  ;;  %v1081_v0 = vmax.f32 %v975_v32, 0.0  ;;  %v1084_v57 = vmax.f32 %v986_v18, 0.0  ;;  %v1082_v32 = vmax.f32 %v978_v19, 0.0  ;;  %v18156_v18 = vpop.f32.mrf.mxu0 }
 0x11b   :  { %v1441_v12 = vsel %vm17995_vm15, %v1432_v27, %v18141_v5  ;;  %v1442_v39 = vrot.slane %v18141_v5, 4  ;;  %v1464_v21 = vshrl.u32 %v14393_v35, 16  ;;  %v1467_v49 = vshll.u32 %v14393_v35, 16  ;;  %v16164_v27 = vld [vmem:[#allocation2 + $0x18] sm:$0xff]  }
 0x11c   :  { %1736 = vst [vmem:[#allocation2 + $0x34] sm:$0xf] %v1441_v12  ;;  %v1420_v61 = vor.u32 %v1419_v62, %v1416_v24  ;;  %v1189_v48 = vsel %vm18077_vm1, %v1081_v0, 0.0  ;;  %v1192_v6 = vsel %vm18086_vm4, %v1084_v57, 0.0  ;;  %vm22020_vm2 = vnez %v21783_v37  ;;  %v22028_v37 = vld [vmem:[#allocation43_spill] sm:$0xff]  ;;  %v22029_v62 = vld [vmem:[#allocation34_spill] sm:$0xff]  ;;  %15053 = vmatmul.mubr.bf16.gmra.mxu1 %v16164_v27  ;;  %v18199_v27 = vpop.f32.mrf.mxu0 }
 0x11d   :  { %v1466_v30 = vrot.slane %v1464_v21, 6  ;;  %v1469_v9 = vrot.slane %v1467_v49, 7  ;;  %v14391_v23 = vpack.c.bf16 %v1189_v48, %v1189_v48  ;;  %v14394_v47 = vpack.c.bf16 %v1192_v6, %v1192_v6  ;;  %15143 = vmatpush3.bf16.msra.mxu1 %v16195_v43 }
 0x11e   :  { %v22023_v59 = vsel %vm22020_vm2, %v22021_v36, %v22022_v63  ;;  %v22024_v33 = vmov 0  ;;  %v1421_v19 = vsel %vm17995_vm15, %v1412_v52, %v1420_v61  ;;  %v1422_v16 = vrot.slane %v1420_v61, 4  ;;  %v22035_v52 = vld [vmem:[#allocation36_spill] sm:$0xff] }
 0x11f   :  { %vm18163_vm6 = vcmp.lt.s32.totalorder %v22023_v59, 16  ;;  %v1190_v35 = vsel %vm18103_vm14, %v1082_v32, 0.0  ;;  %v999_v24 = vadd.f32 %v18107_v1, %v17750_v11  ;;  %vm22027_vm4 = vnez %v21788_v26  ;;  %v16166_v1 = vld [vmem:[#allocation2 + $0x20] sm:$0xff]   ;;  %1734 = vst [vmem:[#allocation2 + $0x2c] sm:$0xf] %v1421_v19 }
 0x120   :  { %v22025_v33 = vsel %vm18163_vm6, 4294967295, %v22024_v33  ;;  %v22030_v0 = vsel %vm22027_vm4, %v22028_v37, %v22029_v62  ;;  %v22031_v57 = vmov 0  ;;  %vm22034_vm1 = vnez %v21793_v51  ;;  %v16199_v51 = vld [vmem:[%s21361_s3 + $0x98] sm:$0xff]   ;;  %15056 = vmatprep.mubr.bf16.mxu1 %v16166_v1  ;;  %v16201_v1 = vld [vmem:[%s21361_s3 + $0x90] sm:$0xff]  }
 0x121   :  { %22026 = vst [vmem:[#allocation40_spill] sm:$0xff] %v22025_v33  ;;  %vm18178_vm2 = vcmp.lt.s32.totalorder %v22030_v0, 16  ;;  %v22036_v12 = vsel %vm22034_vm1, %v21822_v31, %v22035_v52  ;;  %v22037_v21 = vmov 0  ;;  %v18191_v26 = vor.u32 %v1469_v9, %v1466_v30  ;;  %15144 = vmatprep.subr.bf16.mxu1 %v16199_v51 }
 0x122   :  { %v22032_v57 = vsel %vm18178_vm2, 4294967295, %v22031_v57  ;;  %vm18187_vm10 = vcmp.lt.s32.totalorder %v22036_v12, 16  ;;  %v1444_v49 = vshrl.u32 %v14391_v23, 16  ;;  %v1447_v61 = vshll.u32 %v14391_v23, 16  ;;  %15145 = vmatpush3.bf16.msra.mxu1 %v16199_v51 }
 0x123   :  { %22033 = vst [vmem:[#allocation31_spill] sm:$0xff] %v22032_v57  ;;  %v22038_v21 = vsel %vm18187_vm10, 4294967295, %v22037_v21  ;;  %v1474_v48 = vshrl.u32 %v14394_v47, 16  ;;  %v1431_v31 = vsel %vm17995_vm15, %v1422_v16, %v18090_v13  ;;  %v1477_v6 = vshll.u32 %v14394_v47, 16  ;;  %v22040_v13 = vld [vmem:[#allocation61_spill] sm:$0xff]  ;;  %v22042_v47 = vld [vmem:[#allocation46_spill] sm:$0xff]  ;;  %15146 = vmatprep.subr.bf16.mxu1 %v16201_v1 }
 0x124   :  { %22039 = vst [vmem:[#allocation41_spill] sm:$0xff] %v22038_v21  ;;  %v14392_v32 = vpack.c.bf16 %v1190_v35, %v1190_v35  ;;  %v1087_v36 = vmax.f32 %v999_v24, 0.0  ;;  %1735 = vst [vmem:[#allocation2 + $0x30] sm:$0xf] %v1431_v31  ;;  %v1472_v30 = vrot.slane %v18191_v26, 4  ;;  %v1446_v9 = vrot.slane %v1444_v49, 6 }
 0x125   :  { %v1449_v54 = vrot.slane %v1447_v61, 7  ;;  %v1476_v23 = vrot.slane %v1474_v48, 6  ;;  %v1479_v63 = vrot.slane %v1477_v6, 7  ;;  %vm22041_vm1 = vnez %v22040_v13  ;;  %v22043_v16 = vld [vmem:[#allocation37_spill] sm:$0xff]  ;;  %v18224_v6 = vpop.f32.mrf.mxu0 }
 0x126   :  { %v1454_v59 = vshrl.u32 %v14392_v32, 16  ;;  %v1457_v19 = vshll.u32 %v14392_v32, 16  ;;  %v1195_v37 = vsel %vm18126_vm7, %v1087_v36, 0.0  ;;  %v22044_v35 = vsel %vm22041_vm1, %v22042_v47, %v22043_v16  ;;  %15147 = vmatpush3.bf16.msra.mxu1 %v16201_v1 }
 0x127   :  { %vm18209_vm4 = vcmp.lt.s32.totalorder %v22044_v35, 16  ;;  %v22045_v24 = vmov 0  ;;  %v1450_v62 = vor.u32 %v1449_v54, %v1446_v9  ;;  %v14397_v0 = vpack.c.bf16 %v1195_v37, %v1195_v37  ;;  %v18242_v16 = vpop.f32.mrf.mxu0  ;;  %v22064_v9 = vld [vmem:[#allocation65_spill] sm:$0xff] }
 0x128   :  { %v22046_v24 = vsel %vm18209_vm4, 4294967295, %v22045_v24  ;;  %v991_v52 = vadd.f32 %v17750_v11, %v18114_v40  ;;  %v1002_v12 = vadd.f32 %v18130_v7, %v17750_v11  ;;  %v18220_v49 = vor.u32 %v1479_v63, %v1476_v23  ;;  %v18234_v23 = vld [vmem:[#allocation2 + $0x8] sm:$0xff]  }
 0x129   :  { %22047 = vst [vmem:[#allocation33_spill] sm:$0xff] %v22046_v24  ;;  %v1456_v61 = vrot.slane %v1454_v59, 6  ;;  %v1459_v48 = vrot.slane %v1457_v19, 7  ;;  %v994_v31 = vadd.f32 %v17750_v11, %v18143_v25  ;;  %v1451_v40 = vsel %vm17995_vm15, %v1442_v39, %v1450_v62  ;;  %v16169_v63 = vld [vmem:[#allocation2 + $0x28] sm:$0xff]  }
 0x12a   :  { %v1452_v7 = vrot.slane %v1450_v62, 4  ;;  %v1504_v43 = vshrl.u32 %v14397_v0, 16  ;;  %v1507_v32 = vshll.u32 %v14397_v0, 16  ;;  %1737 = vst [vmem:[#allocation2 + $0x38] sm:$0xf] %v1451_v40  ;;  %v1481_v36 = vsel %vm17995_vm15, %v1472_v30, %v18220_v49  ;;  %15057 = vmatmul.mubr.bf16.gmra.mxu1 %v16169_v63  ;;  %v16206_v62 = vld [vmem:[%s21361_s3 + $0x88] sm:$0xff]  }
 0x12b   :  { %v1460_v25 = vor.u32 %v1459_v48, %v1456_v61  ;;  %v1085_v54 = vmax.f32 %v991_v52, 0.0  ;;  %1740 = vst [vmem:[#allocation2 + $0x44] sm:$0xf] %v1481_v36  ;;  %v1088_v19 = vmax.f32 %v1002_v12, 0.0  ;;  %v1086_v39 = vmax.f32 %v994_v31, 0.0  ;;  %v16171_v35 = vld [vmem:[#allocation2 + $0x30] sm:$0xff]   ;;  %15148 = vmatprep.subr.bf16.mxu1 %v16206_v62 }
 0x12c   :  { %v1506_v5 = vrot.slane %v1504_v43, 6  ;;  %v1509_v59 = vrot.slane %v1507_v32, 7  ;;  %v1015_v47 = vadd.f32 %v18156_v18, %v17750_v11  ;;  %v22048_v40 = vld [vmem:[#allocation63_spill] sm:$0xff]  ;;  %v22051_v43 = vld [vmem:[#allocation38_spill] sm:$0xff]  ;;  %v22053_v36 = vmov 0  ;;  %15060 = vmatprep.mubr.bf16.mxu1 %v16171_v35  ;;  %15149 = vmatpush3.bf16.msra.mxu1 %v16206_v62 }
 0x12d   :  { %v1461_v37 = vsel %vm17995_vm15, %v1452_v7, %v1460_v25  ;;  %v1462_v13 = vrot.slane %v1460_v25, 4  ;;  %v1193_v30 = vsel %vm18163_vm6, %v1085_v54, 0.0  ;;  %v1196_v52 = vsel %vm18178_vm2, %v1088_v19, 0.0  ;;  %v22050_v7 = vld [vmem:[#allocation48_spill] sm:$0xff]  ;;  %v18265_v25 = vld [vmem:[#allocation2 + $0x10] sm:$0xff]   ;;  %v16208_v54 = vld [vmem:[%s21361_s3 + $0x80] sm:$0xff]  }
 0x12e   :  { %1738 = vst [vmem:[#allocation2 + $0x3c] sm:$0xf] %v1461_v37  ;;  %v18247_v51 = vor.u32 %v1509_v59, %v1506_v5  ;;  %v14395_v0 = vpack.c.bf16 %v1193_v30, %v1193_v30  ;;  %v1194_v12 = vsel %vm18187_vm10, %v1086_v39, 0.0  ;;  %v14398_v61 = vpack.c.bf16 %v1196_v52, %v1196_v52  ;;  %v18272_v30 = vpop.f32.mrf.mxu0  ;;  %15150 = vmatprep.subr.bf16.mxu1 %v16208_v54 }
 0x12f   :  { %v1471_v18 = vsel %vm17995_vm15, %v1462_v13, %v18191_v26  ;;  %v14396_v48 = vpack.c.bf16 %v1194_v12, %v1194_v12  ;;  %v1091_v31 = vmax.f32 %v1015_v47, 0.0  ;;  %vm22049_vm1 = vnez %v22048_v40  ;;  %v22058_v40 = vld [vmem:[#allocation53_spill] sm:$0xff] }
 0x130   :  { %v22052_v32 = vsel %vm22049_vm1, %v22050_v7, %v22051_v43  ;;  %1739 = vst [vmem:[#allocation2 + $0x40] sm:$0xf] %v1471_v18  ;;  %v1512_v26 = vrot.slane %v18247_v51, 4  ;;  %v1484_v63 = vshrl.u32 %v14395_v0, 16  ;;  %v1487_v5 = vshll.u32 %v14395_v0, 16  ;;  %v22056_v18 = vld [vmem:[#allocation64_spill] sm:$0xff]  ;;  %15151 = vmatpush3.bf16.msra.mxu1 %v16208_v54 }
 0x131   :  { %vm18261_vm6 = vcmp.lt.s32.totalorder %v22052_v32, 16  ;;  %v2353_v59 = vshll.u32 %v18234_v23, 16  ;;  %v1514_v19 = vshrl.u32 %v14398_v61, 16  ;;  %v1517_v39 = vshll.u32 %v14398_v61, 16  ;;  %v22059_v0 = vld [vmem:[#allocation47_spill] sm:$0xff] }
 0x132   :  { %v22054_v36 = vsel %vm18261_vm6, 4294967295, %v22053_v36  ;;  %v1494_v37 = vshrl.u32 %v14396_v48, 16  ;;  %v1497_v13 = vshll.u32 %v14396_v48, 16  ;;  %v1486_v47 = vrot.slane %v1484_v63, 6  ;;  %v22066_v63 = vld [vmem:[#allocation57_spill] sm:$0xff] }
 0x133   :  { %22055 = vst [vmem:[#allocation43_spill] sm:$0xff] %v22054_v36  ;;  %v1489_v35 = vrot.slane %v1487_v5, 7  ;;  %v1199_v52 = vsel %vm18209_vm4, %v1091_v31, 0.0  ;;  %v2355_v12 = vrot.slane %v2353_v59, 1  ;;  %vm22057_vm1 = vnez %v22056_v18  ;;  %v22067_v5 = vld [vmem:[#allocation51_spill] sm:$0xff] }
 0x134   :  { %v22060_v7 = vsel %vm22057_vm1, %v22058_v40, %v22059_v0  ;;  %v22061_v1 = vmov 0  ;;  %v1516_v61 = vrot.slane %v1514_v19, 6  ;;  %v1519_v48 = vrot.slane %v1517_v39, 7  ;;  %v22072_v40 = vld [vmem:[#allocation66_spill] sm:$0xff] }
 0x135   :  { %vm18281_vm10 = vcmp.lt.s32.totalorder %v22060_v7, 16  ;;  %v1496_v43 = vrot.slane %v1494_v37, 6  ;;  %v1499_v32 = vrot.slane %v1497_v13, 7  ;;  %vm22065_vm2 = vnez %v22064_v9  ;;  %v22074_v37 = vld [vmem:[#allocation67_spill] sm:$0xff]  ;;  %v22076_v13 = vld [vmem:[#allocation60_spill] sm:$0xff]  ;;  %v16173_v62 = vld [vmem:[#allocation2 + $0x38] sm:$0xff]  }
 0x136   :  { %v22062_v1 = vsel %vm18281_vm10, 4294967295, %v22061_v1  ;;  %v22068_v24 = vsel %vm22065_vm2, %v22066_v63, %v22067_v5  ;;  %v22069_v31 = vmov 0  ;;  %v1490_v59 = vor.u32 %v1489_v35, %v1486_v47  ;;  %v22077_v47 = vld [vmem:[#allocation55_spill] sm:$0xff]  ;;  %v18315_v63 = vld [vmem:[#allocation2 + $0x18] sm:$0xff]   ;;  %15061 = vmatmul.mubr.bf16.gmra.mxu1 %v16173_v62 }
 0x137   :  { %22063 = vst [vmem:[#allocation34_spill] sm:$0xff] %v22062_v1  ;;  %vm18290_vm4 = vcmp.lt.s32.totalorder %v22068_v24, 16  ;;  %v14401_v18 = vpack.c.bf16 %v1199_v52, %v1199_v52  ;;  %vm22073_vm1 = vsmask.f32 7424  ;;  %v2357_v7 = vshrl.u32 %v18234_v23, 16  ;;  %v1022_v23 = vpop.f32.mrf.mxu0  ;;  %v16331_v17 = vld [vmem:[#allocation2 + $0x38] sm:$0xff]  }
 0x138   :  { %v22070_v31 = vsel %vm18290_vm4, 4294967295, %v22069_v31  ;;  %v2356_v0 = vsel %vm22073_vm1, %v22072_v40, %v2355_v12  ;;  %v18297_v19 = vor.u32 %v1519_v48, %v1516_v61  ;;  %v1500_v39 = vor.u32 %v1499_v32, %v1496_v43 }
 0x139   :  { %22071 = vst [vmem:[#allocation36_spill] sm:$0xff] %v22070_v31  ;;  %15100 = vmatprep.mubr.bf16.mxu0 %v2356_v0  ;;  %v1007_v9 = vadd.f32 %v17750_v11, %v18199_v27  ;;  %v2361_v24 = vshll.u32 %v18265_v25, 16  ;;  %vm22075_vm2 = vnez %v22074_v37  ;;  %v22079_v52 = vmov 0 }
 0x13a   :  { %v22078_v35 = vsel %vm22075_vm2, %v22076_v13, %v22077_v47  ;;  %v22082_v61 = vrot.slane %v18220_v49, 4  ;;  %v1492_v27 = vrot.slane %v1490_v59, 4  ;;  %v1544_v43 = vshrl.u32 %v14401_v18, 16  ;;  %v22083_v13 = vld [vmem:[#allocation45_spill] sm:$0xff]  ;;  %v22085_v49 = vld [vmem:[#allocation62_spill] sm:$0xff] }
 0x13b   :  { %vm18307_vm7 = vcmp.lt.s32.totalorder %v22078_v35, 16  ;;  %v1547_v32 = vshll.u32 %v14401_v18, 16  ;;  %v1521_v5 = vsel %vm17995_vm15, %v1512_v26, %v18297_v19  ;;  %v1502_v0 = vrot.slane %v1500_v39, 4  ;;  %v22086_v47 = vld [vmem:[#allocation58_spill] sm:$0xff]  ;;  %v16176_v18 = vld [vmem:[#allocation2 + $0x40] sm:$0xff]  }
 0x13c   :  { %v22080_v52 = vsel %vm18307_vm7, 4294967295, %v22079_v52  ;;  %v1491_v48 = vsel %vm17995_vm15, %v22082_v61, %v1490_v59  ;;  %v2359_v37 = vor.u32 %v2357_v7, %v2355_v12  ;;  %vm22084_vm1 = vnez %v22083_v13  ;;  %1744 = vst [vmem:[#allocation2 + $0x54] sm:$0xf] %v1521_v5  ;;  %v16168_v12 = vld [vmem:[%s21361_s3 + $0xf0] sm:$0xff]   ;;  %15064 = vmatprep.mubr.bf16.mxu1 %v16176_v18  ;;  %v16659_v18 = vld [vmem:[%s21361_s3 + $0xf8] sm:$0xff]  }
 0x13d   :  { %22081 = vst [vmem:[#allocation61_spill] sm:$0xff] %v22080_v52  ;;  %1741 = vst [vmem:[#allocation2 + $0x48] sm:$0xf] %v1491_v48  ;;  %v22087_v35 = vsel %vm22084_vm1, %v22085_v49, %v22086_v47  ;;  %v22088_v59 = vmov 0  ;;  %v1501_v61 = vsel %vm17995_vm15, %v1492_v27, %v1500_v39  ;;  %v1546_v26 = vrot.slane %v1544_v43, 6  ;;  %v18341_v39 = vpop.f32.mrf.mxu0 }
 0x13e   :  { %vm18326_vm2 = vcmp.lt.s32.totalorder %v22087_v35, 16  ;;  %v1549_v48 = vrot.slane %v1547_v32, 7  ;;  %v1089_v40 = vmax.f32 %v1007_v9, 0.0  ;;  %v1511_v7 = vsel %vm17995_vm15, %v1502_v0, %v18247_v51  ;;  %1742 = vst [vmem:[#allocation2 + $0x4c] sm:$0xf] %v1501_v61 }
 0x13f   :  { %v22089_v59 = vsel %vm18326_vm2, 4294967295, %v22088_v59  ;;  %v2363_v13 = vrot.slane %v2361_v24, 1  ;;  %v1018_v62 = vadd.f32 %v18224_v6, %v17750_v11  ;;  %v2365_v5 = vshrl.u32 %v18265_v25, 16  ;;  %1743 = vst [vmem:[#allocation2 + $0x50] sm:$0xf] %v1511_v7  ;;  %v18360_v61 = vpop.f32.mrf.mxu0 }
 0x140   :  { %22090 = vst [vmem:[#allocation46_spill] sm:$0xff] %v22089_v59  ;;  %v18343_v9 = vor.u32 %v1549_v48, %v1546_v26  ;;  %v1197_v54 = vsel %vm18261_vm6, %v1089_v40, 0.0  ;;  %v2369_v27 = vshll.u32 %v18315_v63, 16  ;;  %v1010_v51 = vadd.f32 %v17750_v11, %v18242_v16  ;;  %v16175_v26 = vld [vmem:[%s21361_s3 + $0xe8] sm:$0xff]  }
 0x141   :  { %v14399_v24 = vpack.c.bf16 %v1197_v54, %v1197_v54  ;;  %vm22091_vm1 = vsmask.f32 7424  ;;  %v1092_v6 = vmax.f32 %v1018_v62, 0.0  ;;  %v2367_v32 = vor.u32 %v2365_v5, %v2363_v13 }
 0x142   :  { %v2364_v43 = vsel %vm22091_vm1, %v2359_v37, %v2363_v13  ;;  %v1552_v25 = vrot.slane %v18343_v9, 4  ;;  %v2371_v0 = vrot.slane %v2369_v27, 1  ;;  %v1090_v49 = vmax.f32 %v1010_v51, 0.0  ;;  %v22095_v51 = vld [vmem:[#allocation59_spill] sm:$0xff] }
 0x143   :  { %15101 = vmatmul.mubr.bf16.vlgmr.msra.gmra.mxu0 %v2364_v43  ;;  %v1031_v47 = vadd.f32 %v18272_v30, %v17750_v11  ;;  %v1524_v35 = vshrl.u32 %v14399_v24, 16  ;;  %v1527_v40 = vshll.u32 %v14399_v24, 16  ;;  %v1200_v16 = vsel %vm18281_vm10, %v1092_v6, 0.0 }
 0x144   :  { %15189 = vmatpush3.bf16.msra.mxu0 %v16659_v18  ;;  %v1023_v37 = vadd.f32 %v17750_v11, %v1022_v23  ;;  %v14402_v48 = vpack.c.bf16 %v1200_v16, %v1200_v16  ;;  %v2372_v30 = vsel %vm22091_vm1, %v2367_v32, %v2371_v0  ;;  %v1198_v7 = vsel %vm18290_vm4, %v1090_v49, 0.0  ;;  %v22092_v11 = vld [vmem:[#allocation14_spill] sm:$0xff]  ;;  %v22094_v23 = vld [vmem:[#allocation44_spill] sm:$0xff] }
 0x145   :  { %v1095_v13 = vmax.f32 %v1031_v47, 0.0  ;;  %15190 = vmatprep.subr.bf16.mxu0 %v16168_v12  ;;  %v1526_v62 = vrot.slane %v1524_v35, 6  ;;  %v1529_v5 = vrot.slane %v1527_v40, 7  ;;  %15104 = vmatprep.mubr.bf16.mxu0 %v2372_v30  ;;  %v14400_v54 = vpack.c.bf16 %v1198_v7, %v1198_v7  ;;  %v16181_v35 = vld [vmem:[%s21361_s3 + $0xe0] sm:$0xff]   ;;  %v18383_v7 = vpop.f32.mrf.mxu0 }
 0x146   :  { %v1093_v27 = vmax.f32 %v1023_v37, 0.0  ;;  %vm22093_vm10 = vnez %v22092_v11  ;;  %v22097_v43 = vmov 0  ;;  %v1554_v6 = vshrl.u32 %v14402_v48, 16  ;;  %v16167_v30 = vld [vmem:[#allocation2 + $0x20] sm:$0xff]   ;;  %v16178_v11 = vld [vmem:[#allocation2 + $0x48] sm:$0xff]  }
 0x147   :  { %v22096_v24 = vsel %vm22093_vm10, %v22094_v23, %v22095_v51  ;;  %v1557_v32 = vshll.u32 %v14402_v48, 16  ;;  %v1203_v49 = vsel %vm18307_vm7, %v1095_v13, 0.0  ;;  %v2373_v47 = vshrl.u32 %v18315_v63, 16  ;;  %v16180_v63 = vld [vmem:[#allocation2 + $0x50] sm:$0xff]   ;;  %15065 = vmatmul.mubr.bf16.gmra.mxu1 %v16178_v11  ;;  %v22111_v11 = vld [vmem:[#allocation12_spill] sm:$0xff] }
 0x148   :  { %vm18373_vm6 = vcmp.lt.s32.totalorder %v22096_v24, 16  ;;  %v1530_v40 = vor.u32 %v1529_v5, %v1526_v62  ;;  %v1534_v18 = vshrl.u32 %v14400_v54, 16  ;;  %v1537_v16 = vshll.u32 %v14400_v54, 16  ;;  %15191 = vmatpush3.bf16.msra.mxu0 %v16168_v12  ;;  %v18391_v12 = vld [vmem:[#allocation2 + $0x28] sm:$0xff]   ;;  %15068 = vmatprep.mubr.bf16.mxu1 %v16180_v63 }
 0x149   :  { %v22098_v43 = vsel %vm18373_vm6, 4294967295, %v22097_v43  ;;  %v14405_v37 = vpack.c.bf16 %v1203_v49, %v1203_v49  ;;  %v1556_v23 = vrot.slane %v1554_v6, 6  ;;  %v1559_v48 = vrot.slane %v1557_v32, 7  ;;  %15192 = vmatprep.subr.bf16.mxu0 %v16175_v26 }
 0x14a   :  { %22099 = vst [vmem:[#allocation37_spill] sm:$0xff] %v22098_v43  ;;  %v1201_v13 = vsel %vm18326_vm2, %v1093_v27, 0.0  ;;  %v2375_v51 = vor.u32 %v2373_v47, %v2371_v0  ;;  %v22100_v24 = vrot.slane %v18297_v19, 4  ;;  %v1532_v5 = vrot.slane %v1530_v40, 4 }
 0x14b   :  { %v1536_v54 = vrot.slane %v1534_v18, 6  ;;  %v1539_v49 = vrot.slane %v1537_v16, 7  ;;  %vm22101_vm10 = vnez %v21868_v8  ;;  %v22103_v27 = vmov 0  ;;  %v18405_v8 = vld [vmem:[%s21360_s2] ss:$0 sm:$0xff] }
 0x14c   :  { %v1531_v62 = vsel %vm17995_vm15, %v22100_v24, %v1530_v40  ;;  %v22102_v6 = vsel %vm22101_vm10, %v17739_v15, %v17618_v10  ;;  %v1560_v19 = vor.u32 %v1559_v48, %v1556_v23  ;;  %v1584_v0 = vshrl.u32 %v14405_v37, 16  ;;  %v22113_v23 = vld [vmem:[#allocation32_spill] sm:$0xff]  ;;  %15193 = vmatpush3.bf16.msra.mxu0 %v16175_v26  ;;  %v16187_v24 = vld [vmem:[%s21361_s3 + $0xd8] sm:$0xff]  }
 0x14d   :  { %vm18398_vm1 = vcmp.lt.s32.totalorder %v22102_v6, 16  ;;  %1745 = vst [vmem:[#allocation2 + $0x58] sm:$0xf] %v1531_v62  ;;  %v1587_v32 = vshll.u32 %v14405_v37, 16  ;;  %v14403_v47 = vpack.c.bf16 %v1201_v13, %v1201_v13  ;;  %v1540_v40 = vor.u32 %v1539_v49, %v1536_v54  ;;  %v22114_v48 = vld [vmem:[#allocation68_spill] sm:$0xff]  ;;  %15194 = vmatprep.subr.bf16.mxu0 %v16181_v35 }
 0x14e   :  { %v22104_v27 = vsel %vm18398_vm1, 4294967295, %v22103_v27  ;;  %v2377_v18 = vshll.u32 %v16167_v30, 16  ;;  %v1034_v10 = vadd.f32 %v18405_v8, %v18341_v39  ;;  %v2381_v15 = vshrl.u32 %v16167_v30, 16  ;;  %v1038_v39 = vpop.f32.mrf.mxu0 }
 0x14f   :  { %22105 = vst [vmem:[#allocation63_spill] sm:$0xff] %v22104_v27  ;;  %vm22106_vm10 = vnez %v21873_v14  ;;  %v22108_v37 = vmov 0  ;;  %vm22112_vm7 = vnez %v22111_v11  ;;  %v22116_v63 = vmov 0 }
 0x150   :  { %v22107_v16 = vsel %vm22106_vm10, %v17787_v46, %v17662_v34  ;;  %v22115_v13 = vsel %vm22112_vm7, %v22113_v23, %v22114_v48  ;;  %v1561_v34 = vsel %vm17995_vm15, %v1552_v25, %v1560_v19  ;;  %v1562_v14 = vrot.slane %v1560_v19, 4  ;;  %15195 = vmatpush3.bf16.msra.mxu0 %v16181_v35 }
 0x151   :  { %vm18414_vm2 = vcmp.lt.s32.totalorder %v22107_v16, 16  ;;  %vm18423_vm4 = vcmp.lt.s32.totalorder %v22115_v13, 16  ;;  %v1586_v46 = vrot.slane %v1584_v0, 6  ;;  %v1589_v30 = vrot.slane %v1587_v32, 7  ;;  %1748 = vst [vmem:[#allocation2 + $0x64] sm:$0xf] %v1561_v34  ;;  %15196 = vmatprep.subr.bf16.mxu0 %v16187_v24 }
 0x152   :  { %v22109_v37 = vsel %vm18414_vm2, 4294967295, %v22108_v37  ;;  %v22117_v63 = vsel %vm18423_vm4, 4294967295, %v22116_v63  ;;  %v1541_v62 = vsel %vm17995_vm15, %v1532_v5, %v1540_v40  ;;  %v1542_v54 = vrot.slane %v1540_v40, 4  ;;  %v18439_v0 = vld [vmem:[#allocation2 + $0x30] sm:$0xff]   ;;  %v15027_v40 = vpop.f32.mrf.mxu0 }
 0x153   :  { %22110 = vst [vmem:[#allocation48_spill] sm:$0xff] %v22109_v37  ;;  %22118 = vst [vmem:[#allocation38_spill] sm:$0xff] %v22117_v63  ;;  %v1564_v49 = vshrl.u32 %v14403_v47, 16  ;;  %v1567_v26 = vshll.u32 %v14403_v47, 16  ;;  %v18436_v6 = vor.u32 %v1589_v30, %v1586_v46  ;;  %v2379_v16 = vrot.slane %v2377_v18, 1 }
 0x154   :  { %1746 = vst [vmem:[#allocation2 + $0x5c] sm:$0xf] %v1541_v62  ;;  %v1096_v25 = vmax.f32 %v1034_v10, 0.0  ;;  %v2385_v19 = vshll.u32 %v18391_v12, 16  ;;  %v1551_v32 = vsel %vm17995_vm15, %v1542_v54, %v18343_v9  ;;  %v1026_v5 = vadd.f32 %v18405_v8, %v18360_v61  ;;  %v16194_v61 = vld [vmem:[%s21361_s3 + $0xd0] sm:$0xff]   ;;  %15197 = vmatpush3.bf16.msra.mxu0 %v16187_v24 }
 0x155   :  { %v1566_v11 = vrot.slane %v1564_v49, 6  ;;  %v1569_v23 = vrot.slane %v1567_v26, 7  ;;  %1747 = vst [vmem:[#allocation2 + $0x60] sm:$0xf] %v1551_v32  ;;  %v1592_v47 = vrot.slane %v18436_v6, 4  ;;  %v2383_v48 = vor.u32 %v2381_v15, %v2379_v16  ;;  %v18473_v26 = vpop.f32.mrf.mxu0  ;;  %15198 = vmatprep.subr.bf16.mxu0 %v16194_v61 }
 0x156   :  { %vm22119_vm7 = vsmask.f32 7424  ;;  %v1204_v10 = vsel %vm18373_vm6, %v1096_v25, 0.0  ;;  %v22120_v9 = vsel %vm17824_vm5, %v17815_v45, %v17702_v2  ;;  %v22121_v13 = vmov 0 }
 0x157   :  { %v2380_v18 = vsel %vm22119_vm7, %v2375_v51, %v2379_v16  ;;  %vm18455_vm10 = vcmp.lt.s32.totalorder %v22120_v9, 16  ;;  %v18462_v35 = vor.u32 %v1569_v23, %v1566_v11  ;;  %v14406_v51 = vpack.c.bf16 %v1204_v10, %v1204_v10  ;;  %vm22124_vm5 = vmmov %vm22119_vm7 }
 0x158   :  { %v22122_v13 = vsel %vm18455_vm10, 4294967295, %v22121_v13  ;;  %15105 = vmatmul.mubr.bf16.gmra.mxu0 %v2380_v18  ;;  %v2387_v34 = vrot.slane %v2385_v19, 1  ;;  %v1094_v15 = vmax.f32 %v1026_v5, 0.0  ;;  %v1047_v50 = vadd.f32 %v18405_v8, %v18383_v7 }
 0x159   :  { %22123 = vst [vmem:[#allocation64_spill] sm:$0xff] %v22122_v13  ;;  %v1039_v2 = vadd.f32 %v18405_v8, %v1038_v39  ;;  %v2389_v45 = vshrl.u32 %v18391_v12, 16  ;;  %v2393_v46 = vshll.u32 %v18439_v0, 16  ;;  %v1571_v30 = vsel %vm17995_vm15, %v1562_v14, %v18462_v35  ;;  %v16202_v14 = vld [vmem:[%s21361_s3 + $0xc8] sm:$0xff]   ;;  %15199 = vmatpush3.bf16.msra.mxu0 %v16194_v61 }
 0x15a   :  { %v1572_v62 = vrot.slane %v18462_v35, 4  ;;  %v1594_v54 = vshrl.u32 %v14406_v51, 16  ;;  %v1597_v49 = vshll.u32 %v14406_v51, 16  ;;  %1749 = vst [vmem:[#allocation2 + $0x68] sm:$0xf] %v1571_v30  ;;  %v2388_v7 = vsel %vm22124_vm5, %v2383_v48, %v2387_v34  ;;  %v16209_v48 = vld [vmem:[%s21361_s3 + $0xc0] sm:$0xff]   ;;  %15200 = vmatprep.subr.bf16.mxu0 %v16202_v14 }
 0x15b   :  { %v1202_v39 = vsel %vm18398_vm1, %v1094_v15, 0.0  ;;  %v1099_v12 = vmax.f32 %v1047_v50, 0.0  ;;  %v1097_v16 = vmax.f32 %v1039_v2, 0.0  ;;  %15108 = vmatprep.mubr.bf16.mxu0 %v2388_v7  ;;  %v2391_v11 = vor.u32 %v2389_v45, %v2387_v34  ;;  %v16183_v23 = vld [vmem:[#allocation2 + $0x58] sm:$0xff]  }
 0x15c   :  { %v1596_v25 = vrot.slane %v1594_v54, 6  ;;  %v1599_v19 = vrot.slane %v1597_v49, 7  ;;  %v14404_v32 = vpack.c.bf16 %v1202_v39, %v1202_v39  ;;  %v2395_v18 = vrot.slane %v2393_v46, 1  ;;  %v18489_v2 = vld [vmem:[#allocation2 + $0x38] sm:$0xff]   ;;  %15069 = vmatmul.mubr.bf16.gmra.mxu1 %v16183_v23  ;;  %v16186_v46 = vld [vmem:[#allocation2 + $0x60] sm:$0xff]  }
 0x15d   :  { %v1207_v24 = vsel %vm18414_vm2, %v1099_v12, 0.0  ;;  %v1205_v5 = vsel %vm18423_vm4, %v1097_v16, 0.0  ;;  %v1050_v10 = vadd.f32 %v18405_v8, %v15027_v40  ;;  %v22126_v45 = vld [vmem:[#allocation10_spill] sm:$0xff]  ;;  %v22128_v54 = vmov 0  ;;  %v15030_v40 = vpop.f32.mrf.mxu0  ;;  %15072 = vmatprep.mubr.bf16.mxu1 %v16186_v46  ;;  %v22140_v46 = vld [vmem:[#allocation28_spill] sm:$0xff]  ;;  %15201 = vmatpush3.bf16.msra.mxu0 %v16202_v14 }
 0x15e   :  { %v1600_v9 = vor.u32 %v1599_v19, %v1596_v25  ;;  %v1574_v51 = vshrl.u32 %v14404_v32, 16  ;;  %v1577_v15 = vshll.u32 %v14404_v32, 16  ;;  %v14409_v50 = vpack.c.bf16 %v1207_v24, %v1207_v24  ;;  %v22132_v25 = vld [vmem:[#allocation42_spill] sm:$0xff]  ;;  %v22133_v19 = vld [vmem:[#allocation52_spill] sm:$0xff]  ;;  %15202 = vmatprep.subr.bf16.mxu0 %v16209_v48 }
 0x15f   :  { %v22127_v30 = vsel %vm17846_vm9, %v17829_v41, %v22126_v45  ;;  %v14407_v49 = vpack.c.bf16 %v1205_v5, %v1205_v5  ;;  %v2396_v7 = vsel %vm22124_vm5, %v2391_v11, %v2395_v18  ;;  %v1100_v39 = vmax.f32 %v1050_v10, 0.0  ;;  %v18516_v45 = vld [vmem:[%s21361_s3 + $0x178] sm:$0xff]  }
 0x160   :  { %vm18496_vm7 = vcmp.lt.s32.totalorder %v22127_v30, 16  ;;  %v2397_v12 = vshrl.u32 %v18439_v0, 16  ;;  %v22134_v32 = vsel %vm17863_vm13, %v22132_v25, %v22133_v19  ;;  %v22135_v41 = vmov 0  ;;  %15109 = vmatmul.mubr.bf16.gmra.mxu0 %v2396_v7 }
 0x161   :  { %v22129_v54 = vsel %vm18496_vm7, 4294967295, %v22128_v54  ;;  %vm18507_vm9 = vcmp.lt.s32.totalorder %v22134_v32, 16  ;;  %v1601_v23 = vsel %vm17995_vm15, %v1592_v47, %v1600_v9  ;;  %v1602_v61 = vrot.slane %v1600_v9, 4  ;;  %15203 = vmatpush3.bf16.msra.mxu0 %v16209_v48 }
 0x162   :  { %22130 = vst [vmem:[#allocation53_spill] sm:$0xff] %v22129_v54  ;;  %v22136_v41 = vsel %vm18507_vm9, 4294967295, %v22135_v41  ;;  %v1576_v24 = vrot.slane %v1574_v51, 6  ;;  %v1579_v5 = vrot.slane %v1577_v15, 7  ;;  %1752 = vst [vmem:[#allocation2 + $0x74] sm:$0xf] %v1601_v23  ;;  %v2399_v47 = vor.u32 %v2397_v12, %v2395_v18  ;;  %15292 = vmatprep.subr.bf16.mxu0 %v18516_v45 }
 0x163   :  { %22137 = vst [vmem:[#allocation47_spill] sm:$0xff] %v22136_v41  ;;  %v1624_v0 = vshrl.u32 %v14409_v50, 16  ;;  %v1627_v11 = vshll.u32 %v14409_v50, 16  ;;  %v1604_v10 = vshrl.u32 %v14407_v49, 16  ;;  %v1607_v34 = vshll.u32 %v14407_v49, 16  ;;  %v22139_v15 = vld [vmem:[#allocation21_spill] sm:$0xff]  ;;  %v1054_v49 = vpop.f32.mrf.mxu0 }
 0x164   :  { %v1580_v30 = vor.u32 %v1579_v5, %v1576_v24  ;;  %v1208_v16 = vsel %vm18455_vm10, %v1100_v39, 0.0  ;;  %v2401_v9 = vshll.u32 %v18489_v2, 16  ;;  %v22141_v7 = vsel %vm17894_vm0, %v22139_v15, %v22140_v46  ;;  %v22145_v18 = vld [vmem:[#allocation16_spill] sm:$0xff]  ;;  %v22146_v39 = vld [vmem:[#allocation11_spill] sm:$0xff] }
 0x165   :  { %vm18526_vm13 = vcmp.lt.s32.totalorder %v22141_v7, 16  ;;  %v22142_v50 = vmov 0  ;;  %v1626_v25 = vrot.slane %v1624_v0, 6  ;;  %v1629_v19 = vrot.slane %v1627_v11, 7  ;;  %v18550_v15 = vld [vmem:[#allocation2 + $0x40] sm:$0xff]  }
 0x166   :  { %v22143_v50 = vsel %vm18526_vm13, 4294967295, %v22142_v50  ;;  %v1606_v32 = vrot.slane %v1604_v10, 6  ;;  %v1609_v23 = vrot.slane %v1607_v34, 7  ;;  %v22147_v12 = vsel %vm17908_vm3, %v22145_v18, %v22146_v39  ;;  %v18571_v18 = vld [vmem:[%s21361_s3 + $0x138] sm:$0xff]  }
 0x167   :  { %22144 = vst [vmem:[#allocation65_spill] sm:$0xff] %v22143_v50  ;;  %vm18535_vm5 = vcmp.lt.s32.totalorder %v22147_v12, 16  ;;  %v22148_v24 = vmov 0  ;;  %v1581_v5 = vsel %vm17995_vm15, %v1572_v62, %v1580_v30  ;;  %v1582_v14 = vrot.slane %v1580_v30, 4  ;;  %15240 = vmatprep.subr.bf16.mxu1 %v18571_v18  ;;  %v16317_v50 = vld [vmem:[%s21361_s3 + $0x1c0] sm:$0xff]  }
 0x168   :  { %v22149_v24 = vsel %vm18535_vm5, 4294967295, %v22148_v24  ;;  %v14410_v0 = vpack.c.bf16 %v1208_v16, %v1208_v16  ;;  %v2403_v11 = vrot.slane %v2401_v9, 1  ;;  %1750 = vst [vmem:[#allocation2 + $0x6c] sm:$0xf] %v1581_v5  ;;  %v18543_v10 = vor.u32 %v1629_v19, %v1626_v25  ;;  %v15031_v9 = vpop.f32.mrf.mxu0 }
 0x169   :  { %22150 = vst [vmem:[#allocation57_spill] sm:$0xff] %v22149_v24  ;;  %v18545_v56 = vor.u32 %v1609_v23, %v1606_v32  ;;  %v1042_v34 = vadd.f32 %v18405_v8, %v18473_v26  ;;  %v1063_v51 = vadd.f32 %v18405_v8, %v15030_v40  ;;  %v1591_v35 = vsel %vm17995_vm15, %v1582_v14, %v18436_v6 }
 0x16a   :  { %v1634_v62 = vshrl.u32 %v14410_v0, 16  ;;  %v1637_v30 = vshll.u32 %v14410_v0, 16  ;;  %vm22151_vm3 = vsmask.f32 7424  ;;  %1751 = vst [vmem:[#allocation2 + $0x70] sm:$0xf] %v1591_v35 }
 0x16b   :  { %v2404_v16 = vsel %vm22151_vm3, %v2399_v47, %v2403_v11  ;;  %v1632_v46 = vrot.slane %v18543_v10, 4  ;;  %v1611_v26 = vsel %vm17995_vm15, %v1602_v61, %v18545_v56  ;;  %v1612_v40 = vrot.slane %v18545_v56, 4  ;;  %vm22152_vm0 = vmmov %vm22151_vm3 }
 0x16c   :  { %15112 = vmatprep.mubr.bf16.mxu0 %v2404_v16  ;;  %v1098_v7 = vmax.f32 %v1042_v34, 0.0  ;;  %1753 = vst [vmem:[#allocation2 + $0x78] sm:$0xf] %v1611_v26  ;;  %v1636_v6 = vrot.slane %v1634_v62, 6  ;;  %v1639_v25 = vrot.slane %v1637_v30, 7  ;;  %v1103_v19 = vmax.f32 %v1063_v51, 0.0  ;;  %vm22153_vm3 = vmmov %vm22152_vm0 }
 0x16d   :  { %v1055_v47 = vadd.f32 %v18405_v8, %v1054_v49  ;;  %v2405_v32 = vshrl.u32 %v18489_v2, 16  ;;  %v2409_v23 = vshll.u32 %v18550_v15, 16  ;;  %v1066_v61 = vadd.f32 %v18405_v8, %v15031_v9  ;;  %v16179_v34 = vld [vmem:[#allocation2 + $0x48] sm:$0xff]  }
 0x16e   :  { %v1206_v48 = vsel %vm18496_vm7, %v1098_v7, 0.0  ;;  %v18573_v39 = vor.u32 %v1639_v25, %v1636_v6  ;;  %v1211_v49 = vsel %vm18507_vm9, %v1103_v19, 0.0 }
 0x16f   :  { %v14408_v12 = vpack.c.bf16 %v1206_v48, %v1206_v48  ;;  %v1101_v5 = vmax.f32 %v1055_v47, 0.0  ;;  %v14413_v14 = vpack.c.bf16 %v1211_v49, %v1211_v49  ;;  %v2407_v0 = vor.u32 %v2405_v32, %v2403_v11  ;;  %v16190_v16 = vld [vmem:[#allocation2 + $0x68] sm:$0xff]  }
 0x170   :  { %v2411_v56 = vrot.slane %v2409_v23, 1  ;;  %v1104_v2 = vmax.f32 %v1066_v61, 0.0  ;;  %v1641_v51 = vsel %vm17995_vm15, %v1632_v46, %v18573_v39  ;;  %v1642_v35 = vrot.slane %v18573_v39, 4  ;;  %15073 = vmatmul.mubr.bf16.gmra.mxu1 %v16190_v16 }
 0x171   :  { %v1614_v62 = vshrl.u32 %v14408_v12, 16  ;;  %v1617_v30 = vshll.u32 %v14408_v12, 16  ;;  %1756 = vst [vmem:[#allocation2 + $0x84] sm:$0xf] %v1641_v51  ;;  %v1664_v9 = vshrl.u32 %v14413_v14, 16  ;;  %v1667_v26 = vshll.u32 %v14413_v14, 16 }
 0x172   :  { %v1209_v11 = vsel %vm18526_vm13, %v1101_v5, 0.0  ;;  %v2412_v7 = vsel %vm22152_vm0, %v2407_v0, %v2411_v56  ;;  %v1212_v46 = vsel %vm18535_vm5, %v1104_v2, 0.0  ;;  %v16193_v47 = vld [vmem:[#allocation2 + $0x70] sm:$0xff]   ;;  %v2413_v61 = vshrl.u32 %v18550_v15, 16 }
 0x173   :  { %v1616_v6 = vrot.slane %v1614_v62, 6  ;;  %v1619_v25 = vrot.slane %v1617_v30, 7  ;;  %v14411_v19 = vpack.c.bf16 %v1209_v11, %v1209_v11  ;;  %15113 = vmatmul.mubr.bf16.gmra.mxu0 %v2412_v7  ;;  %v1666_v48 = vrot.slane %v1664_v9, 6  ;;  %v16182_v14 = vld [vmem:[#allocation2 + $0x50] sm:$0xff]   ;;  %15076 = vmatprep.mubr.bf16.mxu1 %v16193_v47  ;;  %v1057_v11 = vpop.f32.mrf.mxu0  ;;  %v16184_v7 = vld [vmem:[#allocation2 + $0x58] sm:$0xff]  }
 0x174   :  { %v1669_v32 = vrot.slane %v1667_v26, 7  ;;  %v14414_v23 = vpack.c.bf16 %v1212_v46, %v1212_v46  ;;  %v2417_v5 = vshll.u32 %v16179_v34, 16  ;;  %v2415_v30 = vor.u32 %v2413_v61, %v2411_v56 }
 0x175   :  { %v1620_v39 = vor.u32 %v1619_v25, %v1616_v6  ;;  %v1644_v12 = vshrl.u32 %v14411_v19, 16  ;;  %v1647_v49 = vshll.u32 %v14411_v19, 16  ;;  %v1058_v56 = vadd.f32 %v18405_v8, %v1057_v11  ;;  %v1763_v8 = vld [vmem:[#allocation2 + $0x98] sm:$0x3]  ;;  %v16191_v11 = vld [vmem:[#allocation2 + $0x68] sm:$0xff]  }
 0x176   :  { %v18588_v0 = vor.u32 %v1669_v32, %v1666_v48  ;;  %v1674_v51 = vshrl.u32 %v14414_v23, 16  ;;  %v1677_v62 = vshll.u32 %v14414_v23, 16  ;;  %v2419_v19 = vrot.slane %v2417_v5, 1  ;;  %v16189_v32 = vld [vmem:[#allocation2 + $0x60] sm:$0xff]  }
 0x177   :  { %v1621_v2 = vsel %vm17995_vm15, %v1612_v40, %v1620_v39  ;;  %v1622_v16 = vrot.slane %v1620_v39, 4  ;;  %v1646_v9 = vrot.slane %v1644_v12, 6  ;;  %v1649_v26 = vrot.slane %v1647_v49, 7  ;;  %v22155_v39 = vld [vmem:[#allocation69_spill] sm:$0xff] }
 0x178   :  { %1754 = vst [vmem:[#allocation2 + $0x7c] sm:$0xf] %v1621_v2  ;;  %v1672_v15 = vrot.slane %v18588_v0, 4  ;;  %v1676_v6 = vrot.slane %v1674_v51, 6  ;;  %v1679_v25 = vrot.slane %v1677_v62, 7  ;;  %v2421_v48 = vshrl.u32 %v16179_v34, 16 }
 0x179   :  { %v1631_v46 = vsel %vm17995_vm15, %v1622_v16, %v18543_v10  ;;  %v1650_v47 = vor.u32 %v1649_v26, %v1646_v9  ;;  %v2420_v23 = vsel %vm22153_vm3, %v2415_v30, %v2419_v19  ;;  %v22156_v12 = vld [vmem:[#allocation29_spill] sm:$0xff]  ;;  %v22158_v5 = vmov 0 }
 0x17a   :  { %1755 = vst [vmem:[#allocation2 + $0x80] sm:$0xf] %v1631_v46  ;;  %v1680_v40 = vor.u32 %v1679_v25, %v1676_v6  ;;  %v22157_v49 = vsel %vm17931_vm11, %v22155_v39, %v22156_v12  ;;  %v2425_v51 = vshll.u32 %v16182_v14, 16  ;;  %15116 = vmatprep.mubr.bf16.mxu0 %v2420_v23  ;;  %v1102_v34 = vmax.f32 %v1058_v56, 0.0  ;;  %vm22161_vm11 = vmmov %vm22153_vm3  ;;  %v16196_v23 = vld [vmem:[#allocation2 + $0x70] sm:$0xff]  }
 0x17b   :  { %vm18603_vm0 = vcmp.lt.s32.totalorder %v22157_v49, 16  ;;  %v1651_v10 = vsel %vm17995_vm15, %v1642_v35, %v1650_v47  ;;  %v2423_v62 = vor.u32 %v2421_v48, %v2419_v19  ;;  %v2433_v9 = vshll.u32 %v16184_v7, 16 }
 0x17c   :  { %v22159_v5 = vsel %vm18603_vm0, 4294967295, %v22158_v5  ;;  %1757 = vst [vmem:[#allocation2 + $0x88] sm:$0xf] %v1651_v10  ;;  %v1681_v30 = vsel %vm17995_vm15, %v1672_v15, %v1680_v40  ;;  %v1682_v2 = vrot.slane %v1680_v40, 4  ;;  %v2427_v16 = vrot.slane %v2425_v51, 1 }
 0x17d   :  { %22160 = vst [vmem:[#allocation51_spill] sm:$0xff] %v22159_v5  ;;  %1760 = vst [vmem:[#allocation2 + $0x94] sm:$0xf] %v1681_v30  ;;  %v1210_v26 = vsel %vm18603_vm0, %v1102_v34, 0.0  ;;  %v2429_v6 = vshrl.u32 %v16182_v14, 16  ;;  %v2441_v25 = vshll.u32 %v16189_v32, 16 }
 0x17e   :  { %v1764_v35 = vsel %vm18030_vm12, %v1682_v2, %v1763_v8  ;;  %v14412_v46 = vpack.c.bf16 %v1210_v26, %v1210_v26  ;;  %v2428_v19 = vsel %vm22161_vm11, %v2423_v62, %v2427_v16  ;;  %v2435_v48 = vrot.slane %v2433_v9, 1  ;;  %vm22162_vm11 = vmmov %vm22153_vm3  ;;  %v18813_v5 = vld [vmem:[#allocation2 + $0x50] sm:$0xff]  }
 0x17f   :  { %1765 = vst [vmem:[#allocation2 + $0x98] sm:$0x3] %v1764_v35  ;;  %15117 = vmatmul.mubr.bf16.gmra.mxu0 %v2428_v19  ;;  %v2431_v56 = vor.u32 %v2429_v6, %v2427_v16  ;;  %v2443_v15 = vrot.slane %v2441_v25, 1  ;;  %v2449_v40 = vshll.u32 %v16191_v11, 16  ;;  %v2437_v12 = vshrl.u32 %v16184_v7, 16  ;;  %v16197_v49 = vld [vmem:[#allocation2 + $0x78] sm:$0xff]  }
 0x180   :  { %v1654_v61 = vshrl.u32 %v14412_v46, 16  ;;  %v1657_v39 = vshll.u32 %v14412_v46, 16  ;;  %v2445_v51 = vshrl.u32 %v16189_v32, 16  ;;  %v16198_v34 = vld [vmem:[#allocation2 + $0x78] sm:$0xff]   ;;  %v1652_v30 = vrot.slane %v1650_v47, 4  ;;  %15077 = vmatmul.mubr.bf16.gmra.mxu1 %v16197_v49 }
 0x181   :  { %v2436_v14 = vsel %vm22153_vm3, %v2431_v56, %v2435_v48  ;;  %v2451_v10 = vrot.slane %v2449_v40, 1  ;;  %v16200_v8 = vld [vmem:[#allocation2 + $0x80] sm:$0xff]   ;;  %v2439_v26 = vor.u32 %v2437_v12, %v2435_v48  ;;  %v2457_v9 = vshll.u32 %v16196_v23, 16  ;;  %v16303_v21 = vld [vmem:[#allocation2 + $0x78] sm:$0xff]  }
 0x182   :  { %v1656_v2 = vrot.slane %v1654_v61, 6  ;;  %v1659_v62 = vrot.slane %v1657_v39, 7  ;;  %15120 = vmatprep.mubr.bf16.mxu0 %v2436_v14  ;;  %v2447_v16 = vor.u32 %v2445_v51, %v2443_v15  ;;  %15080 = vmatprep.mubr.bf16.mxu1 %v16200_v8  ;;  %v2465_v7 = vshll.u32 %v16198_v34, 16  ;;  %v16203_v48 = vld [vmem:[#allocation2 + $0x80] sm:$0xff]   ;;  %v16207_v39 = vld [vmem:[#allocation2 + $0x8] sm:$0xff]  }
 0x183   :  { %v2444_v19 = vsel %vm22153_vm3, %v2439_v26, %v2443_v15  ;;  %v2459_v56 = vrot.slane %v2457_v9, 1  ;;  %v2453_v61 = vshrl.u32 %v16191_v11, 16  ;;  %v2461_v12 = vshrl.u32 %v16196_v23, 16  ;;  %v22163_v8 = vld [vmem:[#allocation8_spill] sm:$0xff] }
 0x184   :  { %v1660_v6 = vor.u32 %v1659_v62, %v1656_v2  ;;  %v2452_v25 = vsel %vm22162_vm11, %v2447_v16, %v2451_v10  ;;  %v2467_v49 = vrot.slane %v2465_v7, 1  ;;  %v2473_v51 = vshll.u32 %v16203_v48, 16  ;;  %vm22166_vm11 = vmmov %vm22153_vm3 }
 0x185   :  { %v2455_v14 = vor.u32 %v2453_v61, %v2451_v10  ;;  %v2463_v15 = vor.u32 %v2461_v12, %v2459_v56  ;;  %v2993_v26 = vrot.slane %v16207_v39, 1  ;;  %vm21603_vm3 = vcmask 1046528   ;;  %vm22167_vm0 = vmmov %vm22166_vm11 }
 0x186   :  { %v1771_v35 = vld [vmem:[#allocation2 + $0x98] sm:$0xe]  ;;  %v1661_v32 = vsel %vm17995_vm15, %v1652_v30, %v1660_v6  ;;  %v1662_v46 = vrot.slane %v1660_v6, 4  ;;  %v22164_v30 = vld [vmem:[#allocation9_spill] sm:$0xff]  ;;  %v2475_v11 = vrot.slane %v2473_v51, 1  ;;  %v2469_v23 = vshrl.u32 %v16198_v34, 16 }
 0x187   :  { %v1772_v47 = vsel %vm17985_vm8, 0, %v1771_v35  ;;  %1758 = vst [vmem:[#allocation2 + $0x8c] sm:$0xf] %v1661_v32  ;;  %15121 = vmatmul.mubr.bf16.gmra.mxu0 %v2444_v19  ;;  %v22165_v2 = vcombine.low %v22163_v8, %v22164_v30  ;;  %v2468_v16 = vsel %vm22166_vm11, %v2463_v15, %v2467_v49  ;;  %v2460_v9 = vsel %vm22167_vm0, %v2455_v14, %v2459_v56  ;;  %v16211_v32 = vld [vmem:[#allocation2 + $0x10] sm:$0xff]   ;;  %vm22168_vm11 = vmmov %vm22167_vm0  ;;  %v16212_v15 = vld [vmem:[#allocation2 + $0x8] sm:$0xfe]  }
 0x188   :  { %1773 = vst [vmem:[#allocation2 + $0x98] sm:$0xe] %v1772_v47  ;;  %v1671_v40 = vsel %vm17995_vm15, %v1662_v46, %v18588_v0  ;;  %15124 = vmatprep.mubr.bf16.mxu0 %v2452_v25  ;;  %v16214_v25 = vld [vmem:[#allocation2 + $0x18] sm:$0xff]   ;;  %v2477_v7 = vshrl.u32 %v16203_v48, 16  ;;  %v2471_v46 = vor.u32 %v2469_v23, %v2467_v49  ;;  %v2995_v39 = vrot.slane %v16211_v32, 1  ;;  %v16241_v34 = vld [vmem:[%s21361_s3 + $0x130] sm:$0xff]  }
 0x189   :  { %1759 = vst [vmem:[#allocation2 + $0x90] sm:$0xf] %v1671_v40  ;;  %v2992_v62 = vrot.slane %v22165_v2, 1  ;;  %v2997_v61 = vrot.slane %v16214_v25, 1  ;;  %v16217_v51 = vld [vmem:[#allocation2 + $0x20] sm:$0xff]   ;;  %v16219_v30 = vld [vmem:[#allocation2 + $0x28] sm:$0xff]  }
 0x18a   :  { %v2479_v47 = vor.u32 %v2477_v7, %v2475_v11  ;;  %v2476_v12 = vsel %vm22168_vm11, %v2471_v46, %v2475_v11  ;;  %v2996_v48 = vsel %vm21603_vm3, %v2993_v26, %v2995_v39  ;;  %v16213_v2 = vld [vmem:[#allocation2 + $0x10] sm:$0xff]   ;;  %v3001_v11 = vrot.slane %v16219_v30, 1  ;;  %v16311_v52 = vld [vmem:[#allocation2 + $0x98] ss:$0 sps:$4 sm:$0x33]  }
 0x18b   :  { %v2994_v10 = vsel %vm21603_vm3, %v2992_v62, %v2993_v26  ;;  %v2998_v8 = vsel %vm21603_vm3, %v2995_v39, %v2997_v61  ;;  %v3527_v26 = vrot.slane %v16212_v15, 1  ;;  %v3528_v23 = vrot.slane %v16213_v2, 1  ;;  %v16222_v46 = vld [vmem:[#allocation2 + $0x30] sm:$0xff]   ;;  %v16228_v2 = vld [vmem:[%s21361_s3 + $0x168] sm:$0xff]  }
 0x18c   :  { %v3003_v39 = vrot.slane %v16222_v46, 1  ;;  %v16223_v15 = vld [vmem:[#allocation2 + $0x30] sm:$0xff]   ;;  %v16233_v46 = vld [vmem:[#allocation2 + $0x58] sm:$0xff]   ;;  %vm21584_vm11 = vsmask.f32 6400  ;;  %v4225_v36 = vshrl.u32 %v16311_v52, 16 }
 0x18d   :  { %v3529_v25 = vsel %vm21603_vm3, %v3527_v26, %v3528_v23 }
 0x18e   :  { %v16204_v0 = vld [vmem:[#allocation2 + $0x88] sm:$0xff]  }
 0x18f   :  { %15125 = vmatmul.mubr.bf16.gmra.mxu0 %v2460_v9  ;;  %v16205_v6 = vld [vmem:[#allocation2 + $0x88] sm:$0xff]   ;;  %15081 = vmatmul.mubr.bf16.gmra.mxu1 %v16204_v0  ;;  %v2999_v0 = vrot.slane %v16217_v51, 1  ;;  %v16254_v51 = vld [vmem:[%s21361_s3 + $0x110] sm:$0xff]   ;;  %v18859_v27 = vld [vmem:[#allocation2 + $0x98] sm:$0xff]  }
 0x190   :  { %15128 = vmatprep.mubr.bf16.mxu0 %v2468_v16  ;;  %v2481_v35 = vshll.u32 %v16205_v6, 16  ;;  %15152 = vmatprep.mubr.bf16.mxu1 %v2994_v10  ;;  %v16210_v19 = vld [vmem:[#allocation2 + $0x90] ss:$0 sps:$4 sm:$0x11]   ;;  %v2485_v49 = vshrl.u32 %v16205_v6, 16  ;;  %v16245_v9 = vld [vmem:[%s21361_s3 + $0x128] sm:$0xff]  }
 0x191   :  { %v2489_v14 = vshll.u32 %v16210_v19, 16  ;;  %v16216_v10 = vld [vmem:[#allocation2 + $0x18] sm:$0xff]   ;;  %v3000_v7 = vsel %vm21603_vm3, %v2997_v61, %v2999_v0  ;;  %v3002_v32 = vsel %vm21603_vm3, %v2999_v0, %v3001_v11  ;;  %v16221_v61 = vld [vmem:[%s21361_s3 + $0x170] sm:$0xff]  }
 0x192   :  { %v2483_v40 = vrot.slane %v2481_v35, 1  ;;  %v16218_v35 = vld [vmem:[#allocation2 + $0x20] sm:$0xff]   ;;  %v16224_v19 = vld [vmem:[#allocation2 + $0x38] sm:$0xff]  }
 0x193   :  { %v2491_v16 = vrot.slane %v2489_v14, 1 }
 0x194   :  { %v2484_v56 = vsel %vm22167_vm0, %v2479_v47, %v2483_v40  ;;  %v2487_v62 = vor.u32 %v2485_v49, %v2483_v40  ;;  %v3530_v47 = vrot.slane %v16216_v10, 1  ;;  %v16252_v40 = vld [vmem:[%s21361_s3 + $0x118] sm:$0xff]   ;;  %v3004_v49 = vsel %vm21603_vm3, %v3001_v11, %v3003_v39  ;;  %v16234_v11 = vld [vmem:[%s21361_s3 + $0x160] sm:$0xff]  }
 0x196   :  { %v2492_v6 = vsel %vm22167_vm0, %v2487_v62, %v2491_v16  ;;  %v3531_v14 = vsel %vm21603_vm3, %v3528_v23, %v3530_v47  ;;  %v16229_v62 = vld [vmem:[#allocation2 + $0x48] sm:$0xff]   ;;  %vm21607_vm0 = vcmask 1045504  }
 0x197   :  { %15129 = vmatmul.mubr.bf16.gmra.mxu0 %v2476_v12  ;;  %15153 = vmatmul.mubr.bf16.vlgmr.msra.gmra.mxu1 %v2996_v48  ;;  %v3005_v12 = vrot.slane %v16224_v19, 1  ;;  %v3009_v0 = vrot.slane %v16229_v62, 1  ;;  %v16240_v19 = vld [vmem:[%s21361_s3 + $0x158] sm:$0xff]  }
 0x198   :  { %15132 = vmatprep.mubr.bf16.mxu0 %v2484_v56  ;;  %15156 = vmatprep.mubr.bf16.mxu1 %v2998_v8  ;;  %v3532_v56 = vrot.slane %v16218_v35, 1  ;;  %v16226_v8 = vld [vmem:[#allocation2 + $0x40] sm:$0xff]   ;;  %v16231_v35 = vld [vmem:[#allocation2 + $0x50] sm:$0xff]  }
 0x199   :  { %15241 = vmatpush3.bf16.msra.mxu1 %v18571_v18  ;;  %v16248_v18 = vld [vmem:[%s21361_s3 + $0x120] sm:$0xff]   ;;  %v3006_v30 = vsel %vm21603_vm3, %v3003_v39, %v3005_v12  ;;  %v3007_v26 = vrot.slane %v16226_v8, 1  ;;  %v18686_v39 = vld [vmem:[%s21361_s3 + $0x1b8] sm:$0xff]   ;;  %v16239_v8 = vld [vmem:[#allocation2 + $0x68] sm:$0xff]  }
 0x19a   :  { %15242 = vmatprep.subr.bf16.mxu1 %v16241_v34  ;;  %v3533_v48 = vsel %vm21603_vm3, %v3530_v47, %v3532_v56 }
 0x19d   :  { %15243 = vmatpush3.bf16.msra.mxu1 %v16241_v34  ;;  %v16220_v34 = vld [vmem:[#allocation2 + $0x28] sm:$0xff]  }
 0x19e   :  { %15244 = vmatprep.subr.bf16.mxu1 %v16245_v9  ;;  %v3534_v16 = vrot.slane %v16220_v34, 1  ;;  %v16230_v34 = vld [vmem:[#allocation2 + $0x48] sm:$0xff]  }
 0x19f   :  { %15133 = vmatmul.mubr.bf16.gmra.mxu0 %v2492_v6  ;;  %15157 = vmatmul.mubr.bf16.gmra.mxu1 %v3000_v7  ;;  %v16225_v6 = vld [vmem:[#allocation2 + $0x38] sm:$0xff]   ;;  %v3008_v7 = vsel %vm21603_vm3, %v3005_v12, %v3007_v26  ;;  %v16247_v12 = vld [vmem:[%s21361_s3 + $0x150] sm:$0xff]   ;;  %v3542_v62 = vrot.slane %v16230_v34, 1  ;;  %v16250_v34 = vld [vmem:[#allocation2 + $0x80] sm:$0xff]  }
 0x1a0   :  { %15204 = vmatprep.mubr.bf16.mxu0 %v3529_v25  ;;  %15160 = vmatprep.mubr.bf16.mxu1 %v3002_v32  ;;  %v3535_v23 = vsel %vm21603_vm3, %v3532_v56, %v3534_v16  ;;  %v16262_v25 = vld [vmem:[%s21361_s3 + $0x100] sm:$0xff]   ;;  %v3010_v32 = vsel %vm21603_vm3, %v3007_v26, %v3009_v0  ;;  %v3538_v47 = vrot.slane %v16225_v6, 1  ;;  %v3011_v56 = vrot.slane %v16231_v35, 1  ;;  %v18709_v35 = vld [vmem:[%s21361_s3 + $0x1f8] sm:$0xff]  }
 0x1a1   :  { %15245 = vmatpush3.bf16.msra.mxu1 %v16245_v9  ;;  %v3536_v9 = vrot.slane %v16223_v15, 1  ;;  %v16232_v15 = vld [vmem:[#allocation2 + $0x50] sm:$0xff]   ;;  %v16263_v26 = vld [vmem:[%s21361_s3 + $0x140] sm:$0xff]  }
 0x1a2   :  { %15246 = vmatprep.subr.bf16.mxu1 %v16248_v18  ;;  %v16237_v6 = vld [vmem:[#allocation2 + $0x60] sm:$0xff]  }
 0x1a3   :  { %v3537_v10 = vsel %vm21603_vm3, %v3534_v16, %v3536_v9  ;;  %v3544_v16 = vrot.slane %v16232_v15, 1 }
 0x1a5   :  { %15247 = vmatpush3.bf16.msra.mxu1 %v16248_v18  ;;  %v16227_v18 = vld [vmem:[#allocation2 + $0x40] sm:$0xff]  }
 0x1a6   :  { %15248 = vmatprep.subr.bf16.mxu1 %v16252_v40 }
 0x1a7   :  { %15205 = vmatmul.mubr.bf16.vlgmr.msra.gmra.mxu0 %v3531_v14  ;;  %15161 = vmatmul.mubr.bf16.gmra.mxu1 %v3004_v49  ;;  %v3539_v14 = vsel %vm21603_vm3, %v3536_v9, %v3538_v47  ;;  %v3012_v49 = vsel %vm21603_vm3, %v3009_v0, %v3011_v56 }
 0x1a8   :  { %15293 = vmatpush3.bf16.msra.mxu0 %v18516_v45  ;;  %15208 = vmatprep.mubr.bf16.mxu0 %v3533_v48  ;;  %v16259_v45 = vld [vmem:[%s21361_s3 + $0x108] sm:$0xff]  }
 0x1a9   :  { %15294 = vmatprep.subr.bf16.mxu0 %v16221_v61  ;;  %15164 = vmatprep.mubr.bf16.mxu1 %v3006_v30 }
 0x1aa   :  { %15249 = vmatpush3.bf16.msra.mxu1 %v16252_v40  ;;  %v3540_v40 = vrot.slane %v16227_v18, 1  ;;  %v16243_v18 = vld [vmem:[#allocation2 + $0x70] sm:$0xff]  }
 0x1ab   :  { %15250 = vmatprep.subr.bf16.mxu1 %v16254_v51 }
 0x1ac   :  { %15295 = vmatpush3.bf16.msra.mxu0 %v16221_v61  ;;  %v3013_v61 = vrot.slane %v16233_v46, 1  ;;  %v3541_v48 = vsel %vm21603_vm3, %v3538_v47, %v3540_v40  ;;  %v3543_v0 = vsel %vm21603_vm3, %v3540_v40, %v3542_v62  ;;  %v3548_v46 = vrot.slane %v16237_v6, 1 }
 0x1ad   :  { %15296 = vmatprep.subr.bf16.mxu0 %v16228_v2 }
 0x1ae   :  { %15251 = vmatpush3.bf16.msra.mxu1 %v16254_v51  ;;  %v16236_v51 = vld [vmem:[#allocation2 + $0x60] sm:$0xff]   ;;  %v3014_v30 = vsel %vm21603_vm3, %v3011_v56, %v3013_v61  ;;  %v16242_v56 = vld [vmem:[#allocation2 + $0x68] sm:$0xff]  }
 0x1af   :  { %15209 = vmatmul.mubr.bf16.gmra.mxu0 %v3535_v23  ;;  %15252 = vmatprep.subr.bf16.mxu1 %v16259_v45  ;;  %v3015_v9 = vrot.slane %v16236_v51, 1  ;;  %v3545_v23 = vsel %vm21603_vm3, %v3542_v62, %v3544_v16  ;;  %v16260_v51 = vld [vmem:[#allocation2 + $0x8] sm:$0xfe]  }
 0x1b0   :  { %15212 = vmatprep.mubr.bf16.mxu0 %v3537_v10  ;;  %15297 = vmatpush3.bf16.msra.mxu0 %v16228_v2  ;;  %v16255_v2 = vld [vmem:[%s21361_s3 + $0x148] sm:$0xff]  }
 0x1b1   :  { %15165 = vmatmul.mubr.bf16.gmra.mxu1 %v3008_v7  ;;  %15298 = vmatprep.subr.bf16.mxu0 %v16234_v11  ;;  %v3016_v10 = vsel %vm21603_vm3, %v3013_v61, %v3015_v9 }
 0x1b2   :  { %15168 = vmatprep.mubr.bf16.mxu1 %v3010_v32  ;;  %15253 = vmatpush3.bf16.msra.mxu1 %v16259_v45  ;;  %v3017_v45 = vrot.slane %v16239_v8, 1 }
 0x1b3   :  { %15254 = vmatprep.subr.bf16.mxu1 %v16262_v25 }
 0x1b4   :  { %15299 = vmatpush3.bf16.msra.mxu0 %v16234_v11  ;;  %v16235_v11 = vld [vmem:[#allocation2 + $0x58] sm:$0xff]   ;;  %v3018_v7 = vsel %vm21603_vm3, %v3015_v9, %v3017_v45  ;;  %v4064_v9 = vshrl.u32 %v16260_v51, 16 }
 0x1b5   :  { %15300 = vmatprep.subr.bf16.mxu0 %v16240_v19  ;;  %v3546_v32 = vrot.slane %v16235_v11, 1  ;;  %v16249_v11 = vld [vmem:[#allocation2 + $0x78] sm:$0xff]  }
 0x1b6   :  { %15255 = vmatpush3.bf16.msra.mxu1 %v16262_v25  ;;  %v16246_v25 = vld [vmem:[#allocation2 + $0x78] sm:$0xff]  }
 0x1b7   :  { %15213 = vmatmul.mubr.bf16.gmra.mxu0 %v3539_v14  ;;  %15344 = vmatprep.subr.bf16.mxu1 %v18686_v39  ;;  %v3021_v47 = vrot.slane %v16246_v25, 1  ;;  %v3547_v40 = vsel %vm21603_vm3, %v3544_v16, %v3546_v32  ;;  %v3549_v61 = vsel %vm21603_vm3, %v3546_v32, %v3548_v46  ;;  %v16257_v16 = vld [vmem:[#allocation2 + $0x90] ss:$0 sps:$4 sm:$0x11]   ;;  %v16265_v25 = vld [vmem:[#allocation2 + $0x18] sm:$0xff]   ;;  %v4066_v32 = vrot.slane %v4064_v9, 1 }
 0x1b8   :  { %15216 = vmatprep.mubr.bf16.mxu0 %v3541_v48  ;;  %15301 = vmatpush3.bf16.msra.mxu0 %v16240_v19  ;;  %v3019_v19 = vrot.slane %v16243_v18, 1  ;;  %v16253_v48 = vld [vmem:[#allocation2 + $0x88] sm:$0xff]  }
 0x1b9   :  { %15169 = vmatmul.mubr.bf16.gmra.mxu1 %v3012_v49  ;;  %15302 = vmatprep.subr.bf16.mxu0 %v16247_v12  ;;  %v3550_v49 = vrot.slane %v16242_v56, 1  ;;  %v3025_v62 = vrot.slane %v16253_v48, 1  ;;  %v3554_v56 = vrot.slane %v16249_v11, 1  ;;  %v4084_v48 = vshll.u32 %v16265_v25, 16 }
 0x1ba   :  { %15172 = vmatprep.mubr.bf16.mxu1 %v3014_v30  ;;  %v3020_v14 = vsel %vm21603_vm3, %v3017_v45, %v3019_v19  ;;  %v3022_v15 = vsel %vm21603_vm3, %v3019_v19, %v3021_v47  ;;  %v16261_v30 = vld [vmem:[#allocation2 + $0x10] sm:$0xff]  }
 0x1bb   :  { %v4072_v6 = vshrl.u32 %v16261_v30, 16 }
 0x1bc   :  { %15303 = vmatpush3.bf16.msra.mxu0 %v16247_v12  ;;  %v16244_v12 = vld [vmem:[#allocation2 + $0x70] sm:$0xff]  }
 0x1bd   :  { %15304 = vmatprep.subr.bf16.mxu0 %v16255_v2  ;;  %v3552_v8 = vrot.slane %v16244_v12, 1  ;;  %v4074_v12 = vrot.slane %v4072_v6, 1 }
 0x1bf   :  { %15217 = vmatmul.mubr.bf16.gmra.mxu0 %v3543_v0  ;;  %v3551_v0 = vsel %vm21603_vm3, %v3548_v46, %v3550_v49  ;;  %v3553_v45 = vsel %vm21603_vm3, %v3550_v49, %v3552_v8 }
 0x1c0   :  { %15220 = vmatprep.mubr.bf16.mxu0 %v3545_v23  ;;  %15305 = vmatpush3.bf16.msra.mxu0 %v16255_v2  ;;  %v3023_v2 = vrot.slane %v16250_v34, 1  ;;  %v16251_v23 = vld [vmem:[#allocation2 + $0x80] sm:$0xff]   ;;  %v4081_v34 = vshrl.u32 %v16265_v25, 16 }
 0x1c1   :  { %15173 = vmatmul.mubr.bf16.gmra.mxu1 %v3016_v10  ;;  %15306 = vmatprep.subr.bf16.mxu0 %v16263_v26  ;;  %v4075_v10 = vshll.u32 %v16261_v30, 16  ;;  %v3556_v46 = vrot.slane %v16251_v23, 1 }
 0x1c2   :  { %15176 = vmatprep.mubr.bf16.mxu1 %v3018_v7  ;;  %v3024_v18 = vsel %vm21603_vm3, %v3021_v47, %v3023_v2  ;;  %v3026_v7 = vsel %vm21603_vm3, %v3023_v2, %v3025_v62  ;;  %v4083_v11 = vrot.slane %v4081_v34, 1  ;;  %v16266_v34 = vld [vmem:[#allocation2 + $0x8] sm:$0xfc]  }
 0x1c3   :  { %v3557_v2 = vsel %vm21603_vm3, %v3554_v56, %v3556_v46 }
 0x1c4   :  { %15307 = vmatpush3.bf16.msra.mxu0 %v16263_v26  ;;  %v4067_v26 = vshll.u32 %v16260_v51, 16  ;;  %v16258_v51 = vld [vmem:[#allocation2 + $0x90] sm:$0xff]  }
 0x1c5   :  { %15396 = vmatprep.subr.bf16.mxu0 %v18709_v35 }
 0x1c6   :  { %v4069_v19 = vrot.slane %v4067_v26, 2  ;;  %v16271_v26 = vld [vmem:[#allocation2 + $0x28] sm:$0xff]  }
 0x1c7   :  { %15221 = vmatmul.mubr.bf16.gmra.mxu0 %v3547_v40  ;;  %v16268_v40 = vld [vmem:[#allocation2 + $0x20] sm:$0xff]  }
 0x1c8   :  { %15224 = vmatprep.mubr.bf16.mxu0 %v3549_v61  ;;  %v3027_v61 = vrot.slane %v16257_v16, 1  ;;  %v4070_v49 = vor.u32 %v4069_v19, %v4066_v32  ;;  %v4090_v30 = vshrl.u32 %v16268_v40, 16  ;;  %v4093_v47 = vshll.u32 %v16268_v40, 16 }
 0x1c9   :  { %15177 = vmatmul.mubr.bf16.gmra.mxu1 %v3020_v14  ;;  %v4077_v14 = vrot.slane %v4075_v10, 2  ;;  %v4099_v19 = vshrl.u32 %v16271_v26, 16  ;;  %v4102_v40 = vshll.u32 %v16271_v26, 16 }
 0x1ca   :  { %15180 = vmatprep.mubr.bf16.mxu1 %v3022_v15  ;;  %v16256_v15 = vld [vmem:[#allocation2 + $0x88] sm:$0xff]   ;;  %v3028_v16 = vsel %vm21603_vm3, %v3025_v62, %v3027_v61  ;;  %v4092_v6 = vrot.slane %v4090_v30, 1  ;;  %v4095_v10 = vrot.slane %v4093_v47, 2 }
 0x1cb   :  { %v4078_v9 = vor.u32 %v4077_v14, %v4074_v12  ;;  %v3558_v25 = vrot.slane %v16256_v15, 1  ;;  %v16295_v15 = vld [vmem:[%s21361_s3 + $0x1b0] sm:$0xff]   ;;  %v4101_v30 = vrot.slane %v4099_v19, 1  ;;  %v4104_v47 = vrot.slane %v4102_v40, 2  ;;  %v18739_v40 = vld [vmem:[#allocation2 + $0x20] sm:$0xff]  }
 0x1cc   :  { %v4096_v12 = vor.u32 %v4095_v10, %v4092_v6 }
 0x1cd   :  { %v4079_v23 = vsel %vm21584_vm11, %v4070_v49, %v4078_v9  ;;  %v3559_v61 = vsel %vm21603_vm3, %v3556_v46, %v3558_v25  ;;  %v16276_v49 = vld [vmem:[#allocation2 + $0x38] sm:$0xff]   ;;  %v16278_v46 = vld [vmem:[#allocation2 + $0x40] sm:$0xff]   ;;  %v4105_v6 = vor.u32 %v4104_v47, %v4101_v30  ;;  %v4737_v30 = vrot.slane %v18739_v40, 2  ;;  %v16308_v40 = vld [vmem:[%s21361_s3 + $0x190] sm:$0xff]  }
 0x1ce   :  { %v4117_v10 = vshrl.u32 %v16276_v49, 16  ;;  %v4129_v19 = vshll.u32 %v16278_v46, 16 }
 0x1cf   :  { %15225 = vmatmul.mubr.bf16.gmra.mxu0 %v3551_v0  ;;  %v3555_v0 = vsel %vm21603_vm3, %v3552_v8, %v3554_v56  ;;  %v3560_v8 = vrot.slane %v16258_v51, 1  ;;  %v18724_v56 = vld [vmem:[#allocation2 + $0x10] sm:$0xff]  }
 0x1d0   :  { %15228 = vmatprep.mubr.bf16.mxu0 %v3553_v45  ;;  %v4086_v45 = vrot.slane %v4084_v48, 2 }
 0x1d1   :  { %15181 = vmatmul.mubr.bf16.gmra.mxu1 %v3024_v18  ;;  %v16273_v18 = vld [vmem:[#allocation2 + $0x30] sm:$0xff]   ;;  %v3561_v48 = vsel %vm21603_vm3, %v3558_v25, %v3560_v8 }
 0x1d2   :  { %15184 = vmatprep.mubr.bf16.mxu1 %v3026_v7  ;;  %v16264_v7 = vld [vmem:[#allocation2 + $0x98] ss:$0 sps:$4 sm:$0x11]   ;;  %v4087_v32 = vor.u32 %v4086_v45, %v4083_v11  ;;  %v4108_v14 = vshrl.u32 %v16273_v18, 16  ;;  %v4111_v62 = vshll.u32 %v16273_v18, 16  ;;  %v4733_v11 = vrot.slane %v18724_v56, 2 }
 0x1d3   :  { %v4732_v45 = vrot.slane %v16266_v34, 2  ;;  %v4120_v18 = vshll.u32 %v16276_v49, 16  ;;  %v16280_v56 = vld [vmem:[#allocation2 + $0x48] sm:$0xff]   ;;  %v4131_v49 = vrot.slane %v4129_v19, 2  ;;  %v16285_v19 = vld [vmem:[#allocation2 + $0x58] sm:$0xff]  }
 0x1d4   :  { %v4088_v51 = vsel %vm21584_vm11, %v4078_v9, %v4087_v32  ;;  %v4113_v26 = vrot.slane %v4111_v62, 2  ;;  %v16299_v9 = vld [vmem:[%s21361_s3 + $0x1a8] sm:$0xff]   ;;  %v4106_v62 = vsel %vm21584_vm11, %v4096_v12, %v4105_v6  ;;  %v4135_v47 = vshrl.u32 %v16280_v56, 16 }
 0x1d5   :  { %v4122_v34 = vrot.slane %v4120_v18, 2  ;;  %v18758_v18 = vld [vmem:[#allocation2 + $0x30] sm:$0xff]  }
 0x1d7   :  { %15229 = vmatmul.mubr.bf16.gmra.mxu0 %v3555_v0  ;;  %v4097_v0 = vsel %vm21584_vm11, %v4087_v32, %v4096_v12  ;;  %v4126_v32 = vshrl.u32 %v16278_v46, 16 }
 0x1d8   :  { %15232 = vmatprep.mubr.bf16.mxu0 %v3557_v2  ;;  %v4110_v2 = vrot.slane %v4108_v14, 1  ;;  %v16302_v14 = vld [vmem:[%s21361_s3 + $0x1a0] sm:$0xff]  }
 0x1d9   :  { %15185 = vmatmul.mubr.bf16.gmra.mxu1 %v3028_v16  ;;  %v3562_v16 = vrot.slane %v16264_v7, 1 }
 0x1da   :  { %15256 = vmatprep.mubr.bf16.mxu1 %v4079_v23  ;;  %v16270_v23 = vld [vmem:[#allocation2 + $0x18] sm:$0xff]   ;;  %v4114_v25 = vor.u32 %v4113_v26, %v4110_v2  ;;  %v4138_v2 = vshll.u32 %v16280_v56, 16  ;;  %v16275_v26 = vld [vmem:[%s21361_s3 + $0x1f0] sm:$0xff]   ;;  %v16287_v56 = vld [vmem:[#allocation2 + $0x60] sm:$0xff]  }
 0x1db   :  { %v3563_v7 = vsel %vm21603_vm3, %v3560_v8, %v3562_v16  ;;  %vm21605_vm3 = vcmask 1044480  }
 0x1dc   :  { %v4115_v8 = vsel %vm21584_vm11, %v4105_v6, %v4114_v25  ;;  %v16274_v6 = vld [vmem:[#allocation2 + $0x28] sm:$0xff]  }
 0x1df   :  { %15233 = vmatmul.mubr.bf16.gmra.mxu0 %v3559_v61  ;;  %v4119_v61 = vrot.slane %v4117_v10, 1 }
 0x1e0   :  { %15236 = vmatprep.mubr.bf16.mxu0 %v3561_v48  ;;  %v4128_v48 = vrot.slane %v4126_v32, 1  ;;  %v4137_v32 = vrot.slane %v4135_v47, 1  ;;  %v4156_v47 = vshll.u32 %v16285_v19, 16 }
 0x1e1   :  { %15257 = vmatmul.mubr.bf16.vlgmr.msra.gmra.mxu1 %v4088_v51  ;;  %v4735_v51 = vrot.slane %v16270_v23, 2  ;;  %v4123_v12 = vor.u32 %v4122_v34, %v4119_v61  ;;  %v18754_v23 = vpop.f32.mrf.mxu1 }
 0x1e2   :  { %15260 = vmatprep.mubr.bf16.mxu1 %v4097_v0  ;;  %15345 = vmatpush3.bf16.msra.mxu1 %v18686_v39  ;;  %v4734_v39 = vsel %vm21607_vm0, %v4732_v45, %v4733_v11  ;;  %v16306_v0 = vld [vmem:[%s21361_s3 + $0x198] sm:$0xff]   ;;  %v4132_v46 = vor.u32 %v4131_v49, %v4128_v48  ;;  %v4739_v48 = vrot.slane %v16274_v6, 2 }
 0x1e3   :  { %15346 = vmatprep.subr.bf16.mxu1 %v16295_v15  ;;  %v4738_v10 = vsel %vm21607_vm0, %v4735_v51, %v4737_v30  ;;  %v16279_v6 = vld [vmem:[#allocation2 + $0x38] sm:$0xff]  }
 0x1e6   :  { %15347 = vmatpush3.bf16.msra.mxu1 %v16295_v15  ;;  %v16283_v15 = vld [vmem:[#allocation2 + $0x50] sm:$0xff]  }
 0x1e7   :  { %15237 = vmatmul.mubr.bf16.gmra.mxu0 %v3563_v7  ;;  %15348 = vmatprep.subr.bf16.mxu1 %v16299_v9  ;;  %v4144_v16 = vshrl.u32 %v16283_v15, 16  ;;  %v4147_v45 = vshll.u32 %v16283_v15, 16  ;;  %v18760_v7 = vpop.f32.mrf.mxu1  ;;  %v16313_v15 = vld [vmem:[%s21361_s3 + $0x188] sm:$0xff]  }
 0x1e8   :  { %15308 = vmatprep.mubr.bf16.mxu0 %v4734_v39  ;;  %v4140_v39 = vrot.slane %v4138_v2, 2 }
 0x1e9   :  { %15261 = vmatmul.mubr.bf16.gmra.mxu1 %v4106_v62  ;;  %v16282_v62 = vld [vmem:[%s21361_s3 + $0x1e8] sm:$0xff]   ;;  %v4146_v61 = vrot.slane %v4144_v16, 1  ;;  %v4149_v34 = vrot.slane %v4147_v45, 2  ;;  %v4165_v16 = vshll.u32 %v16287_v56, 16 }
 0x1ea   :  { %15264 = vmatprep.mubr.bf16.mxu1 %v4115_v8  ;;  %15349 = vmatpush3.bf16.msra.mxu1 %v16299_v9  ;;  %v4736_v9 = vsel %vm21607_vm0, %v4733_v11, %v4735_v51  ;;  %v4124_v11 = vsel %vm21584_vm11, %v4114_v25, %v4123_v12  ;;  %v18771_v8 = vpop.f32.mrf.mxu1  ;;  %v4153_v25 = vshrl.u32 %v16285_v19, 16  ;;  %v4141_v51 = vor.u32 %v4140_v39, %v4137_v32  ;;  %v16316_v19 = vld [vmem:[%s21361_s3 + $0x180] sm:$0xff]  }
 0x1eb   :  { %15350 = vmatprep.subr.bf16.mxu1 %v16302_v14  ;;  %v4150_v2 = vor.u32 %v4149_v34, %v4146_v61  ;;  %v4167_v61 = vrot.slane %v4165_v16, 2  ;;  %v16294_v34 = vld [vmem:[%s21361_s3 + $0x1d8] sm:$0xff]  }
 0x1ec   :  { %v18774_v49 = vpop.f32.mrf.mxu1 }
 0x1ee   :  { %15351 = vmatpush3.bf16.msra.mxu1 %v16302_v14  ;;  %v4133_v14 = vsel %vm21584_vm11, %v4123_v12, %v4132_v46  ;;  %v4162_v12 = vshrl.u32 %v16287_v56, 16  ;;  %v18782_v45 = vpop.f32.mrf.mxu1  ;;  %v16293_v56 = vld [vmem:[#allocation2 + $0x70] sm:$0xff]  }
 0x1ef   :  { %15309 = vmatmul.mubr.bf16.vlgmr.msra.gmra.mxu0 %v4736_v9  ;;  %15352 = vmatprep.subr.bf16.mxu1 %v16306_v0  ;;  %v4740_v9 = vsel %vm21607_vm0, %v4737_v30, %v4739_v48  ;;  %v4158_v30 = vrot.slane %v4156_v47, 2 }
 0x1f0   :  { %15397 = vmatpush3.bf16.msra.mxu0 %v18709_v35  ;;  %15312 = vmatprep.mubr.bf16.mxu0 %v4738_v10  ;;  %v4741_v35 = vrot.slane %v18758_v18, 2  ;;  %v4155_v18 = vrot.slane %v4153_v25, 1  ;;  %v18788_v32 = vpop.f32.mrf.mxu1  ;;  %v4164_v39 = vrot.slane %v4162_v12, 1  ;;  %v4743_v25 = vrot.slane %v16279_v6, 2 }
 0x1f1   :  { %15398 = vmatprep.subr.bf16.mxu0 %v16275_v26  ;;  %15265 = vmatmul.mubr.bf16.gmra.mxu1 %v4124_v11  ;;  %v4142_v11 = vsel %vm21584_vm11, %v4132_v46, %v4141_v51 }
 0x1f2   :  { %15268 = vmatprep.mubr.bf16.mxu1 %v4133_v14  ;;  %15353 = vmatpush3.bf16.msra.mxu1 %v16306_v0  ;;  %v16288_v0 = vld [vmem:[%s21361_s3 + $0x1e0] sm:$0xff]   ;;  %v4742_v10 = vsel %vm21607_vm0, %v4739_v48, %v4741_v35  ;;  %v4151_v14 = vsel %vm21584_vm11, %v4141_v51, %v4150_v2  ;;  %v18798_v48 = vpop.f32.mrf.mxu1  ;;  %v18806_v51 = vld [vmem:[%s21361_s3 + $0x238] sm:$0xff]   ;;  %v4159_v47 = vor.u32 %v4158_v30, %v4155_v18 }
 0x1f3   :  { %15354 = vmatprep.subr.bf16.mxu1 %v16308_v40  ;;  %v4744_v6 = vsel %vm21607_vm0, %v4741_v35, %v4743_v25  ;;  %v16300_v35 = vld [vmem:[#allocation2 + $0x80] sm:$0xff]  }
 0x1f4   :  { %15399 = vmatpush3.bf16.msra.mxu0 %v16275_v26  ;;  %v18786_v26 = vld [vmem:[#allocation2 + $0x40] sm:$0xff]   ;;  %v4160_v30 = vsel %vm21584_vm11, %v4150_v2, %v4159_v47  ;;  %v4749_v2 = vrot.slane %v18813_v5, 2 }
 0x1f5   :  { %15400 = vmatprep.subr.bf16.mxu0 %v16282_v62  ;;  %v4745_v46 = vrot.slane %v18786_v26, 2  ;;  %v16284_v26 = vld [vmem:[#allocation2 + $0x48] sm:$0xff]   ;;  %v18834_v5 = vld [vmem:[#allocation2 + $0x60] sm:$0xff]  }
 0x1f6   :  { %15355 = vmatpush3.bf16.msra.mxu1 %v16308_v40  ;;  %v16290_v40 = vld [vmem:[#allocation2 + $0x68] sm:$0xff]   ;;  %v4747_v24 = vrot.slane %v16284_v26, 2 }
 0x1f7   :  { %15313 = vmatmul.mubr.bf16.gmra.mxu0 %v4740_v9  ;;  %15356 = vmatprep.subr.bf16.mxu1 %v16313_v15  ;;  %v4171_v12 = vshrl.u32 %v16290_v40, 16  ;;  %v4174_v16 = vshll.u32 %v16290_v40, 16  ;;  %v4180_v9 = vshrl.u32 %v16293_v56, 16 }
 0x1f8   :  { %15316 = vmatprep.mubr.bf16.mxu0 %v4742_v10  ;;  %15401 = vmatpush3.bf16.msra.mxu0 %v16282_v62  ;;  %v18801_v62 = vpop.f32.mrf.mxu1  ;;  %v4168_v10 = vor.u32 %v4167_v61, %v4164_v39  ;;  %v4748_v26 = vsel %vm21607_vm0, %v4745_v46, %v4747_v24 }
 0x1f9   :  { %15269 = vmatmul.mubr.bf16.gmra.mxu1 %v4142_v11  ;;  %15402 = vmatprep.subr.bf16.mxu0 %v16288_v0  ;;  %v4183_v11 = vshll.u32 %v16293_v56, 16  ;;  %v4173_v39 = vrot.slane %v4171_v12, 1  ;;  %v4176_v40 = vrot.slane %v4174_v16, 2  ;;  %v4182_v56 = vrot.slane %v4180_v9, 1 }
 0x1fa   :  { %15272 = vmatprep.mubr.bf16.mxu1 %v4151_v14  ;;  %15357 = vmatpush3.bf16.msra.mxu1 %v16313_v15  ;;  %v16301_v15 = vld [vmem:[%s21361_s3 + $0x1d0] sm:$0xff]   ;;  %v4746_v14 = vsel %vm21607_vm0, %v4743_v25, %v4745_v46  ;;  %v18815_v18 = vpop.f32.mrf.mxu1  ;;  %v16309_v25 = vld [vmem:[%s21361_s3 + $0x1c8] sm:$0xff]  }
 0x1fb   :  { %15358 = vmatprep.subr.bf16.mxu1 %v16316_v19  ;;  %v4185_v61 = vrot.slane %v4183_v11, 2  ;;  %v4177_v9 = vor.u32 %v4176_v40, %v4173_v39  ;;  %v4201_v11 = vshll.u32 %v16300_v35, 16  ;;  %v16304_v39 = vld [vmem:[#allocation2 + $0x88] sm:$0xff]  }
 0x1fc   :  { %15403 = vmatpush3.bf16.msra.mxu0 %v16288_v0  ;;  %v16297_v0 = vld [vmem:[#allocation2 + $0x78] sm:$0xff]  }
 0x1fd   :  { %15404 = vmatprep.subr.bf16.mxu0 %v16294_v34  ;;  %v4189_v12 = vshrl.u32 %v16297_v0, 16  ;;  %v4203_v54 = vrot.slane %v4201_v11, 2  ;;  %v18849_v11 = vld [vmem:[#allocation2 + $0xa0] ss:$0 sps:$4 sm:$0x33]  }
 0x1fe   :  { %15359 = vmatpush3.bf16.msra.mxu1 %v16316_v19  ;;  %v4169_v19 = vsel %vm21584_vm11, %v4159_v47, %v4168_v10  ;;  %v4186_v47 = vor.u32 %v4185_v61, %v4182_v56 }
 0x1ff   :  { %15317 = vmatmul.mubr.bf16.gmra.mxu0 %v4744_v6  ;;  %15448 = vmatprep.subr.bf16.mxu1 %v18806_v51  ;;  %v18823_v6 = vpop.f32.mrf.mxu1 }
 0x200   :  { %15320 = vmatprep.mubr.bf16.mxu0 %v4746_v14  ;;  %15405 = vmatpush3.bf16.msra.mxu0 %v16294_v34  ;;  %v16289_v34 = vld [vmem:[#allocation2 + $0x58] sm:$0xff]   ;;  %v4192_v14 = vshll.u32 %v16297_v0, 16  ;;  %v4191_v0 = vrot.slane %v4189_v12, 1  ;;  %v4187_v61 = vsel %vm21584_vm11, %v4177_v9, %v4186_v47  ;;  %v4207_v12 = vshrl.u32 %v16304_v39, 16 }
 0x201   :  { %15273 = vmatmul.mubr.bf16.gmra.mxu1 %v4160_v30  ;;  %15406 = vmatprep.subr.bf16.mxu0 %v16301_v15  ;;  %v18826_v16 = vpop.f32.mrf.mxu1  ;;  %v4198_v30 = vshrl.u32 %v16300_v35, 16  ;;  %v16307_v35 = vld [vmem:[#allocation2 + $0x90] sm:$0xff]  }
 0x202   :  { %15276 = vmatprep.mubr.bf16.mxu1 %v4169_v19  ;;  %v4750_v19 = vsel %vm21607_vm0, %v4747_v24, %v4749_v2  ;;  %v4194_v40 = vrot.slane %v4192_v14, 2  ;;  %v18844_v24 = vld [vmem:[%s21359_s1 + $0x38] sm:$0xff]   ;;  %v4219_v63 = vshll.u32 %v16307_v35, 16 }
 0x203   :  { %v18831_v41 = vpop.f32.mrf.mxu1  ;;  %v4200_v56 = vrot.slane %v4198_v30, 1 }
 0x204   :  { %15407 = vmatpush3.bf16.msra.mxu0 %v16301_v15  ;;  %v4178_v15 = vsel %vm21584_vm11, %v4168_v10, %v4177_v9  ;;  %v4753_v10 = vrot.slane %v18834_v5, 2  ;;  %v4195_v30 = vor.u32 %v4194_v40, %v4191_v0  ;;  %v4216_v9 = vshrl.u32 %v16307_v35, 16 }
 0x205   :  { %15408 = vmatprep.subr.bf16.mxu0 %v16309_v25  ;;  %v18839_v46 = vpop.f32.mrf.mxu1  ;;  %v4204_v13 = vor.u32 %v4203_v54, %v4200_v56  ;;  %v16298_v54 = vld [vmem:[#allocation2 + $0x70] sm:$0xff]   ;;  %v22171_v56 = vmov 0   ;;  %v4209_v35 = vrot.slane %v4207_v12, 1 }
 0x206   :  { %v4218_v31 = vrot.slane %v4216_v9, 1 }
 0x207   :  { %15321 = vmatmul.mubr.bf16.gmra.mxu0 %v4748_v26  ;;  %v4751_v26 = vrot.slane %v16289_v34, 2  ;;  %v18847_v14 = vpop.f32.mrf.mxu1  ;;  %v18856_v34 = vld [vmem:[#allocation2 + $0x98] sm:$0xff]  }
 0x208   :  { %15324 = vmatprep.mubr.bf16.mxu0 %v4750_v19  ;;  %15409 = vmatpush3.bf16.msra.mxu0 %v16309_v25  ;;  %v16296_v25 = vld [vmem:[#allocation2 + $0x68] sm:$0xff]   ;;  %v4210_v19 = vshll.u32 %v16304_v39, 16  ;;  %v18861_v39 = vld [vmem:[#allocation2 + $0x98] sm:$0xff]  }
 0x209   :  { %15277 = vmatmul.mubr.bf16.gmra.mxu1 %v4178_v15  ;;  %15410 = vmatprep.subr.bf16.mxu0 %v16317_v50  ;;  %v18851_v15 = vld [vmem:[#allocation2 + $0xa0] ss:$0 sps:$4 sm:$0x77]   ;;  %v18853_v37 = vpop.f32.mrf.mxu1  ;;  %v4752_v5 = vsel %vm21607_vm0, %v4749_v2, %v4751_v26  ;;  %22169 = vst [vmem:[#allocation66_spill] sm:$0xff] %v18861_v39  ;;  %v4754_v0 = vsel %vm21607_vm0, %v4751_v26, %v4753_v10  ;;  %8072 = vst [vmem:[#allocation2 + $0x9c] sm:$0xf] %v22171_v56 }
 0x20a   :  { %15280 = vmatprep.mubr.bf16.mxu1 %v4187_v61  ;;  %v15102_v61 = vpop.f32.mrf.mxu0  ;;  %v4196_v2 = vsel %vm21584_vm11, %v4186_v47, %v4195_v30  ;;  %v4212_v43 = vrot.slane %v4210_v19, 2  ;;  %v4755_v1 = vrot.slane %v16296_v25, 2  ;;  %v16305_v25 = vld [vmem:[#allocation2 + $0x80] sm:$0xff]  }
 0x20b   :  { %v18867_v40 = vadd.f32 %v15102_v61, %v18754_v23  ;;  %v4221_v23 = vrot.slane %v4219_v63, 2  ;;  %v18876_v61 = vpop.f32.mrf.mxu1 }
 0x20c   :  { %15411 = vmatpush3.bf16.msra.mxu0 %v16317_v50  ;;  %v18863_v50 = vld [vmem:[#allocation2 + $0xa0] ss:$0 sps:$4 sm:$0x77]   ;;  %v2593_v59 = vpop.f32.mrf.mxu0  ;;  %v4213_v12 = vor.u32 %v4212_v43, %v4209_v35  ;;  %v4756_v63 = vsel %vm21607_vm0, %v4753_v10, %v4755_v1  ;;  %v4759_v35 = vrot.slane %v16303_v21, 2 }
 0x20d   :  { %15500 = vmatprep.subr.bf16.mxu0 %v18844_v24  ;;  %22170 = vst [vmem:[#allocation67_spill] sm:$0xff] %v18863_v50  ;;  %8073 = vst [vmem:[#allocation2 + $0xa0] sm:$0xf] %v22171_v56  ;;  %v18874_v26 = vadd.f32 %v2593_v59, %v18760_v7  ;;  %v18884_v7 = vpop.f32.mrf.mxu1 }
 0x20e   :  { %v15103_v56 = vpop.f32.mrf.mxu0  ;;  %v4214_v43 = vsel %vm21584_vm11, %v4204_v13, %v4213_v12 }
 0x20f   :  { %15325 = vmatmul.mubr.bf16.gmra.mxu0 %v4752_v5  ;;  %v4205_v5 = vsel %vm21584_vm11, %v4195_v30, %v4204_v13  ;;  %v18879_v47 = vadd.f32 %v15103_v56, %v18771_v8  ;;  %v4222_v30 = vor.u32 %v4221_v23, %v4218_v31  ;;  %v4227_v8 = vrot.slane %v4225_v36, 1  ;;  %v16314_v23 = vld [vmem:[#allocation2 + $0x10] sm:$0xfc]   ;;  %v16310_v36 = vld [vmem:[#allocation2 + $0x88] sm:$0xff]  }
 0x210   :  { %15328 = vmatprep.mubr.bf16.mxu0 %v4754_v0  ;;  %v4757_v0 = vrot.slane %v16298_v54, 2  ;;  %v2596_v19 = vpop.f32.mrf.mxu0  ;;  %v18888_v54 = vpop.f32.mrf.mxu1 }
 0x211   :  { %15281 = vmatmul.mubr.bf16.gmra.mxu1 %v4196_v2  ;;  %v4228_v2 = vshll.u32 %v16311_v52, 16  ;;  %v18882_v59 = vadd.f32 %v2596_v19, %v18774_v49  ;;  %v4223_v31 = vsel %vm21584_vm11, %v4213_v12, %v4222_v30  ;;  %v16315_v49 = vld [vmem:[#allocation2 + $0x18] sm:$0xff]   ;;  %v18899_v12 = vld [vmem:[#allocation2 + $0x90] sm:$0xff]  }
 0x212   :  { %15284 = vmatprep.mubr.bf16.mxu1 %v4205_v5  ;;  %v4758_v9 = vsel %vm21607_vm0, %v4755_v1, %v4757_v0  ;;  %v4761_v5 = vrot.slane %v16305_v25, 2  ;;  %v18892_v10 = vpop.f32.mrf.mxu1  ;;  %v5268_v1 = vrot.slane %v16315_v49, 2  ;;  %v16321_v25 = vld [vmem:[#allocation2 + $0x18] sm:$0xff]   ;;  %v16320_v49 = vld [vmem:[#allocation2 + $0x10] sm:$0xfc]  }
 0x213   :  { %v4230_v52 = vrot.slane %v4228_v2, 2  ;;  %v5267_v2 = vrot.slane %v16314_v23, 2  ;;  %v5804_v57 = vshrl.u32 %v16320_v49, 16  ;;  %v5807_v33 = vshll.u32 %v16320_v49, 16  ;;  %v16349_v49 = vld [vmem:[%s21361_s3 + $0x230] sm:$0xff]  }
 0x214   :  { %v4762_v13 = vsel %vm21607_vm0, %v4759_v35, %v4761_v5 }
 0x215   :  { %v4231_v56 = vor.u32 %v4230_v52, %v4227_v8 }
 0x217   :  { %15329 = vmatmul.mubr.bf16.gmra.mxu0 %v4756_v63  ;;  %v4760_v63 = vsel %vm21607_vm0, %v4757_v0, %v4759_v35  ;;  %v4232_v8 = vsel %vm21584_vm11, %v4222_v30, %v4231_v56  ;;  %v16319_v0 = vld [vmem:[#allocation2 + $0x20] sm:$0xff]   ;;  %v18908_v35 = vld [vmem:[#allocation2 + $0x28] sm:$0xff]   ;;  %v5812_v30 = vshrl.u32 %v16321_v25, 16  ;;  %v5815_v56 = vshll.u32 %v16321_v25, 16 }
 0x218   :  { %15332 = vmatprep.mubr.bf16.mxu0 %v4758_v9  ;;  %v15106_v19 = vpop.f32.mrf.mxu0  ;;  %vm21606_vm11 = vsmask.f32 5376 }
 0x219   :  { %15285 = vmatmul.mubr.bf16.gmra.mxu1 %v4214_v43  ;;  %v18896_v9 = vadd.f32 %v15106_v19, %v18782_v45  ;;  %v18901_v43 = vpop.f32.mrf.mxu1  ;;  %v5269_v45 = vsel %vm21607_vm0, %v5267_v2, %v5268_v1  ;;  %v4763_v19 = vrot.slane %v16310_v36, 2  ;;  %v5270_v2 = vrot.slane %v16319_v0, 2 }
 0x21a   :  { %15288 = vmatprep.mubr.bf16.mxu1 %v4223_v31  ;;  %v2609_v21 = vpop.f32.mrf.mxu0  ;;  %v5272_v36 = vrot.slane %v18908_v35, 2  ;;  %v5814_v55 = vrot.slane %v5812_v30, 2  ;;  %v5817_v29 = vrot.slane %v5815_v56, 3  ;;  %v16325_v35 = vld [vmem:[#allocation2 + $0x30] sm:$0xff]  }
 0x21b   :  { %v18905_v52 = vadd.f32 %v2609_v21, %v18788_v32 }
 0x21c   :  { %v15107_v31 = vpop.f32.mrf.mxu0  ;;  %v18914_v32 = vpop.f32.mrf.mxu1  ;;  %v5273_v30 = vsel %vm21607_vm0, %v5270_v2, %v5272_v36 }
 0x21d   :  { %v18911_v23 = vadd.f32 %v15107_v31, %v18798_v48  ;;  %v16324_v31 = vld [vmem:[#allocation2 + $0x20] sm:$0xff]  }
 0x21e   :  { %v18925_v0 = vpop.f32.mrf.mxu1  ;;  %v5824_v20 = vshll.u32 %v16324_v31, 16 }
 0x21f   :  { %15333 = vmatmul.mubr.bf16.gmra.mxu0 %v4760_v63  ;;  %v4765_v63 = vrot.slane %v18899_v12, 2  ;;  %v16318_v12 = vld [vmem:[#allocation2 + $0x98] ss:$0 sps:$4 sm:$0x33]  }
 0x220   :  { %15336 = vmatprep.mubr.bf16.mxu0 %v4762_v13  ;;  %v2612_v13 = vpop.f32.mrf.mxu0  ;;  %v4767_v53 = vrot.slane %v16318_v12, 2 }
 0x221   :  { %15289 = vmatmul.mubr.bf16.gmra.mxu1 %v4232_v8  ;;  %v18917_v21 = vadd.f32 %v2612_v13, %v18801_v62  ;;  %v4766_v25 = vsel %vm21607_vm0, %v4763_v19, %v4765_v63  ;;  %v16326_v13 = vld [vmem:[#allocation2 + $0x28] sm:$0xff]  }
 0x222   :  { %15360 = vmatprep.mubr.bf16.mxu1 %v5269_v45  ;;  %v15110_v8 = vpop.f32.mrf.mxu0  ;;  %v4764_v45 = vsel %vm21607_vm0, %v4761_v5, %v4763_v19  ;;  %v5271_v5 = vsel %vm21607_vm0, %v5268_v1, %v5270_v2  ;;  %v5809_v19 = vrot.slane %v5807_v33, 3  ;;  %v16353_v33 = vld [vmem:[%s21361_s3 + $0x228] sm:$0xff]  }
 0x223   :  { %v18922_v48 = vadd.f32 %v15110_v8, %v18815_v18  ;;  %v5806_v8 = vrot.slane %v5804_v57, 2  ;;  %v18941_v57 = vpop.f32.mrf.mxu1 }
 0x224   :  { %v2625_v62 = vpop.f32.mrf.mxu0 }
 0x225   :  { %v18932_v18 = vadd.f32 %v2625_v62, %v18823_v6  ;;  %v5818_v6 = vor.u32 %v5817_v29, %v5814_v55  ;;  %v5830_v62 = vshrl.u32 %v16326_v13, 16  ;;  %v5810_v12 = vor.u32 %v5809_v19, %v5806_v8  ;;  %v18952_v58 = vpop.f32.mrf.mxu1 }
 0x226   :  { %v15111_v56 = vpop.f32.mrf.mxu0  ;;  %v4768_v29 = vsel %vm21607_vm0, %v4765_v63, %v4767_v53  ;;  %v16330_v63 = vld [vmem:[#allocation2 + $0x40] sm:$0xff]  }
 0x227   :  { %15337 = vmatmul.mubr.bf16.gmra.mxu0 %v4764_v45  ;;  %v18935_v45 = vld [vmem:[#allocation2 + $0x38] sm:$0xff]   ;;  %v18938_v3 = vadd.f32 %v15111_v56, %v18826_v16  ;;  %v5274_v16 = vrot.slane %v16325_v35, 2  ;;  %v5832_v56 = vrot.slane %v5830_v62, 2  ;;  %v5851_v62 = vshll.u32 %v16331_v17, 16 }
 0x228   :  { %15340 = vmatprep.mubr.bf16.mxu0 %v4766_v25  ;;  %v5821_v25 = vshrl.u32 %v16324_v31, 16  ;;  %v2628_v1 = vpop.f32.mrf.mxu0  ;;  %v5276_v31 = vrot.slane %v18935_v45, 2 }
 0x229   :  { %15361 = vmatmul.mubr.bf16.vlgmr.msra.gmra.mxu1 %v5271_v5  ;;  %v5833_v5 = vshll.u32 %v16326_v13, 16  ;;  %v18947_v2 = vadd.f32 %v2628_v1, %v18831_v41  ;;  %v16328_v13 = vld [vmem:[#allocation2 + $0x30] sm:$0xff]   ;;  %v16356_v41 = vld [vmem:[%s21361_s3 + $0x220] sm:$0xff]   ;;  %v5275_v53 = vsel %vm21607_vm0, %v5272_v36, %v5274_v16  ;;  %v5848_v1 = vshrl.u32 %v16331_v17, 16  ;;  %v16360_v36 = vld [vmem:[%s21361_s3 + $0x218] sm:$0xff]  }
 0x22a   :  { %15364 = vmatprep.mubr.bf16.mxu1 %v5273_v30  ;;  %15449 = vmatpush3.bf16.msra.mxu1 %v18806_v51  ;;  %v5823_v55 = vrot.slane %v5821_v25, 2  ;;  %v5826_v51 = vrot.slane %v5824_v20, 3  ;;  %v5819_v30 = vsel %vm21606_vm11, %v5810_v12, %v5818_v6  ;;  %v5277_v20 = vsel %vm21607_vm0, %v5274_v16, %v5276_v31 }
 0x22b   :  { %15450 = vmatprep.subr.bf16.mxu1 %v16349_v49  ;;  %v5835_v4 = vrot.slane %v5833_v5, 3  ;;  %v5839_v8 = vshrl.u32 %v16328_v13, 16  ;;  %v5842_v19 = vshll.u32 %v16328_v13, 16  ;;  %v5278_v12 = vrot.slane %v16330_v63, 2 }
 0x22c   :  { %v5827_v35 = vor.u32 %v5826_v51, %v5823_v55  ;;  %v5850_v63 = vrot.slane %v5848_v1, 2  ;;  %v18992_v1 = vld [vmem:[#allocation2 + $0x58] sm:$0xff]  }
 0x22d   :  { %v5836_v25 = vor.u32 %v5835_v4, %v5832_v56  ;;  %v5841_v51 = vrot.slane %v5839_v8, 2  ;;  %v5844_v13 = vrot.slane %v5842_v19, 3  ;;  %v16336_v19 = vld [vmem:[%s21359_s1 + $0x28] sm:$0xff]  }
 0x22e   :  { %15451 = vmatpush3.bf16.msra.mxu1 %v16349_v49  ;;  %v18959_v49 = vld [vmem:[#allocation2 + $0x48] sm:$0xff]   ;;  %v5828_v17 = vsel %vm21606_vm11, %v5818_v6, %v5827_v35  ;;  %v16362_v6 = vld [vmem:[%s21361_s3 + $0x210] sm:$0xff]  }
 0x22f   :  { %15341 = vmatmul.mubr.bf16.gmra.mxu0 %v4768_v29  ;;  %15452 = vmatprep.subr.bf16.mxu1 %v16353_v33  ;;  %v5280_v4 = vrot.slane %v18959_v49, 2  ;;  %v16334_v49 = vld [vmem:[#allocation2 + $0x50] sm:$0xff]  }
 0x230   :  { %15412 = vmatprep.mubr.bf16.mxu0 %v5819_v30  ;;  %v18961_v5 = vpop.f32.mrf.mxu1  ;;  %v16333_v30 = vld [vmem:[#allocation2 + $0x40] sm:$0xff]  }
 0x231   :  { %15365 = vmatmul.mubr.bf16.gmra.mxu1 %v5275_v53 }
 0x232   :  { %15368 = vmatprep.mubr.bf16.mxu1 %v5277_v20  ;;  %15453 = vmatpush3.bf16.msra.mxu1 %v16353_v33  ;;  %v16329_v33 = vld [vmem:[%s21359_s1 + $0x30] sm:$0xff]   ;;  %v18977_v56 = vpop.f32.mrf.mxu1  ;;  %v5853_v20 = vrot.slane %v5851_v62, 3  ;;  %v5845_v62 = vor.u32 %v5844_v13, %v5841_v51  ;;  %v16342_v51 = vld [vmem:[%s21359_s1 + $0x20] sm:$0xff]  }
 0x233   :  { %v15114_v45 = vpop.f32.mrf.mxu0  ;;  %15454 = vmatprep.subr.bf16.mxu1 %v16356_v41 }
 0x234   :  { %v18967_v16 = vadd.f32 %v15114_v45, %v18839_v46  ;;  %v5837_v46 = vsel %vm21606_vm11, %v5827_v35, %v5836_v25  ;;  %v16335_v45 = vld [vmem:[#allocation2 + $0x48] sm:$0xff]   ;;  %v5281_v35 = vsel %vm21607_vm0, %v5278_v12, %v5280_v4  ;;  %v5846_v13 = vsel %vm21606_vm11, %v5836_v25, %v5845_v62 }
 0x235   :  { %v2641_v29 = vpop.f32.mrf.mxu0 }
 0x236   :  { %v18975_v55 = vadd.f32 %v2641_v29, %v18847_v14  ;;  %15455 = vmatpush3.bf16.msra.mxu1 %v16356_v41  ;;  %v5279_v41 = vsel %vm21607_vm0, %v5276_v31, %v5278_v12  ;;  %v5860_v29 = vshll.u32 %v16333_v30, 16  ;;  %v18997_v31 = vpop.f32.mrf.mxu1  ;;  %v16367_v12 = vld [vmem:[%s21361_s3 + $0x208] sm:$0xff]  }
 0x237   :  { %15413 = vmatmul.mubr.bf16.vlgmr.msra.gmra.mxu0 %v5828_v17  ;;  %v15115_v53 = vpop.f32.mrf.mxu0  ;;  %15456 = vmatprep.subr.bf16.mxu1 %v16360_v36  ;;  %v5854_v17 = vor.u32 %v5853_v20, %v5850_v63  ;;  %v16338_v20 = vld [vmem:[#allocation2 + $0x50] sm:$0xff]  }
 0x238   :  { %15501 = vmatpush3.bf16.msra.mxu0 %v18844_v24  ;;  %15416 = vmatprep.mubr.bf16.mxu0 %v5837_v46  ;;  %v18985_v14 = vadd.f32 %v15115_v53, %v18853_v37  ;;  %v5857_v37 = vshrl.u32 %v16333_v30, 16  ;;  %v5866_v46 = vshrl.u32 %v16335_v45, 16  ;;  %v5869_v53 = vshll.u32 %v16335_v45, 16  ;;  %v19007_v63 = vpop.f32.mrf.mxu1 }
 0x239   :  { %v2644_v8 = vpop.f32.mrf.mxu0  ;;  %15502 = vmatprep.subr.bf16.mxu0 %v16329_v33  ;;  %15369 = vmatmul.mubr.bf16.gmra.mxu1 %v5279_v41  ;;  %v5282_v41 = vrot.slane %v16334_v49, 2  ;;  %v5862_v30 = vrot.slane %v5860_v29, 3 }
 0x23a   :  { %v18995_v24 = vadd.f32 %v2644_v8, %v18876_v61  ;;  %15372 = vmatprep.mubr.bf16.mxu1 %v5281_v35  ;;  %15457 = vmatpush3.bf16.msra.mxu1 %v16360_v36  ;;  %v5284_v61 = vrot.slane %v18992_v1, 2  ;;  %v5859_v36 = vrot.slane %v5857_v37, 2  ;;  %v5868_v49 = vrot.slane %v5866_v46, 2  ;;  %v16340_v35 = vld [vmem:[#allocation2 + $0x58] sm:$0xff]   ;;  %v16370_v1 = vld [vmem:[%s21361_s3 + $0x200] sm:$0xff]   ;;  %v19018_v46 = vld [vmem:[#allocation2 + $0x68] sm:$0xff]  }
 0x23b   :  { %15458 = vmatprep.subr.bf16.mxu1 %v16362_v6  ;;  %v5871_v8 = vrot.slane %v5869_v53, 3  ;;  %v5283_v37 = vsel %vm21607_vm0, %v5280_v4, %v5282_v41  ;;  %v16348_v53 = vld [vmem:[%s21359_s1 + $0x18] sm:$0xff]   ;;  %v5878_v4 = vshll.u32 %v16338_v20, 16  ;;  %v5887_v60 = vshll.u32 %v16340_v35, 16 }
 0x23c   :  { %15503 = vmatpush3.bf16.msra.mxu0 %v16329_v33  ;;  %v5855_v33 = vsel %vm21606_vm11, %v5845_v62, %v5854_v17  ;;  %v5285_v62 = vsel %vm21607_vm0, %v5282_v41, %v5284_v61  ;;  %v5884_v41 = vshrl.u32 %v16340_v35, 16 }
 0x23d   :  { %15504 = vmatprep.subr.bf16.mxu0 %v16336_v19 }
 0x23e   :  { %15459 = vmatpush3.bf16.msra.mxu1 %v16362_v6  ;;  %v16339_v6 = vld [vmem:[#allocation2 + $0x60] sm:$0xff]  }
 0x23f   :  { %v15118_v45 = vpop.f32.mrf.mxu0  ;;  %15417 = vmatmul.mubr.bf16.gmra.mxu0 %v5846_v13  ;;  %15460 = vmatprep.subr.bf16.mxu1 %v16367_v12  ;;  %v5286_v28 = vrot.slane %v16339_v6, 2  ;;  %v5886_v6 = vrot.slane %v5884_v41, 2 }
 0x240   :  { %v19014_v25 = vadd.f32 %v15118_v45, %v18884_v7  ;;  %15420 = vmatprep.mubr.bf16.mxu0 %v5855_v33  ;;  %15505 = vmatpush3.bf16.msra.mxu0 %v16336_v19  ;;  %v5863_v7 = vor.u32 %v5862_v30, %v5859_v36  ;;  %v5875_v45 = vshrl.u32 %v16338_v20, 16  ;;  %v19026_v19 = vpop.f32.mrf.mxu1  ;;  %v5288_v36 = vrot.slane %v19018_v46, 2 }
 0x241   :  { %v2657_v29 = vpop.f32.mrf.mxu0  ;;  %15373 = vmatmul.mubr.bf16.gmra.mxu1 %v5283_v37  ;;  %15506 = vmatprep.subr.bf16.mxu0 %v16342_v51  ;;  %v5872_v37 = vor.u32 %v5871_v8, %v5868_v49  ;;  %v16343_v8 = vld [vmem:[#allocation2 + $0x60] sm:$0xff]  }
 0x242   :  { %v19024_v13 = vadd.f32 %v2657_v29, %v18888_v54  ;;  %15376 = vmatprep.mubr.bf16.mxu1 %v5285_v62  ;;  %15461 = vmatpush3.bf16.msra.mxu1 %v16367_v12  ;;  %v19031_v44 = vpop.f32.mrf.mxu1  ;;  %v16355_v12 = vld [vmem:[%s21359_s1 + $0x10] sm:$0xff]   ;;  %v5864_v20 = vsel %vm21606_vm11, %v5854_v17, %v5863_v7  ;;  %v5877_v49 = vrot.slane %v5875_v45, 2  ;;  %v5889_v29 = vrot.slane %v5887_v60, 3  ;;  %v16345_v62 = vld [vmem:[#allocation2 + $0x68] sm:$0xff]  }
 0x243   :  { %v15119_v33 = vpop.f32.mrf.mxu0  ;;  %15462 = vmatprep.subr.bf16.mxu1 %v16370_v1  ;;  %v16344_v17 = vld [vmem:[#allocation2 + $0x70] sm:$0xff]   ;;  %v16363_v60 = vld [vmem:[%s21359_s1 + $0x8] sm:$0xff]   ;;  %v5896_v41 = vshll.u32 %v16343_v8, 16 }
 0x244   :  { %v19029_v38 = vadd.f32 %v15119_v33, %v18892_v10  ;;  %15507 = vmatpush3.bf16.msra.mxu0 %v16342_v51  ;;  %v5880_v10 = vrot.slane %v5878_v4, 3  ;;  %v5873_v51 = vsel %vm21606_vm11, %v5863_v7, %v5872_v37  ;;  %v19046_v33 = vpop.f32.mrf.mxu1  ;;  %v19049_v4 = vld [vmem:[#allocation2 + $0x78] sm:$0xff]  }
 0x245   :  { %v2660_v54 = vpop.f32.mrf.mxu0  ;;  %15508 = vmatprep.subr.bf16.mxu0 %v16348_v53  ;;  %v5292_v22 = vrot.slane %v19049_v4, 2 }
 0x246   :  { %v19038_v30 = vadd.f32 %v2660_v54, %v18901_v43  ;;  %15463 = vmatpush3.bf16.msra.mxu1 %v16370_v1  ;;  %v5287_v43 = vsel %vm21607_vm0, %v5284_v61, %v5286_v28  ;;  %v5289_v1 = vsel %vm21607_vm0, %v5286_v28, %v5288_v36  ;;  %v5881_v7 = vor.u32 %v5880_v10, %v5877_v49  ;;  %v16371_v49 = vld [vmem:[%s21359_s1] sm:$0xff]  }
 0x247   :  { %v15122_v35 = vpop.f32.mrf.mxu0  ;;  %15421 = vmatmul.mubr.bf16.gmra.mxu0 %v5864_v20  ;;  %v5893_v61 = vshrl.u32 %v16343_v8, 16  ;;  %v5902_v20 = vshrl.u32 %v16345_v62, 16 }
 0x248   :  { %v19043_v46 = vadd.f32 %v15122_v35, %v18914_v32  ;;  %15424 = vmatprep.mubr.bf16.mxu0 %v5873_v51  ;;  %15509 = vmatpush3.bf16.msra.mxu0 %v16348_v53  ;;  %v5890_v53 = vor.u32 %v5889_v29, %v5886_v6  ;;  %v5905_v35 = vshll.u32 %v16345_v62, 16  ;;  %v19060_v51 = vpop.f32.mrf.mxu1  ;;  %v5882_v8 = vsel %vm21606_vm11, %v5872_v37, %v5881_v7 }
 0x249   :  { %v2673_v45 = vpop.f32.mrf.mxu0  ;;  %15377 = vmatmul.mubr.bf16.gmra.mxu1 %v5287_v43  ;;  %15510 = vmatprep.subr.bf16.mxu0 %v16355_v12  ;;  %v5290_v43 = vrot.slane %v16344_v17, 2  ;;  %v5898_v6 = vrot.slane %v5896_v41, 3  ;;  %v5904_v62 = vrot.slane %v5902_v20, 2 }
 0x24a   :  { %v19055_v32 = vadd.f32 %v2673_v45, %v18925_v0  ;;  %15380 = vmatprep.mubr.bf16.mxu1 %v5289_v1  ;;  %v16350_v0 = vld [vmem:[#allocation2 + $0x70] sm:$0xff]   ;;  %v5907_v17 = vrot.slane %v5905_v35, 3  ;;  %v16352_v45 = vld [vmem:[#allocation2 + $0x78] sm:$0xff]  }
 0x24b   :  { %v15123_v54 = vpop.f32.mrf.mxu0  ;;  %v5911_v41 = vshrl.u32 %v16350_v0, 16 }
 0x24c   :  { %v19058_v28 = vadd.f32 %v15123_v54, %v18941_v57  ;;  %15511 = vmatpush3.bf16.msra.mxu0 %v16355_v12  ;;  %v5895_v57 = vrot.slane %v5893_v61, 2  ;;  %v5891_v12 = vsel %vm21606_vm11, %v5881_v7, %v5890_v53  ;;  %v5293_v61 = vsel %vm21607_vm0, %v5290_v43, %v5292_v22  ;;  %v19078_v7 = vld [vmem:[#allocation2 + $0x88] sm:$0xff]  }
 0x24d   :  { %v2676_v42 = vpop.f32.mrf.mxu0  ;;  %15512 = vmatprep.subr.bf16.mxu0 %v16363_v60  ;;  %v5914_v54 = vshll.u32 %v16350_v0, 16  ;;  %v5913_v50 = vrot.slane %v5911_v41, 2 }
 0x24e   :  { %v19067_v10 = vadd.f32 %v2676_v42, %v18952_v58  ;;  %v5291_v42 = vsel %vm21607_vm0, %v5288_v36, %v5290_v43  ;;  %v16351_v58 = vld [vmem:[#allocation2 + $0x80] sm:$0xff]   ;;  %v5908_v36 = vor.u32 %v5907_v17, %v5904_v62 }
 0x24f   :  { %v15126_v29 = vpop.f32.mrf.mxu0  ;;  %15425 = vmatmul.mubr.bf16.gmra.mxu0 %v5882_v8  ;;  %v19074_v4 = vpop.f32.mrf.mxu1  ;;  %v5294_v0 = vrot.slane %v16351_v58, 2  ;;  %v5916_v39 = vrot.slane %v5914_v54, 3 }
 0x250   :  { %v19072_v1 = vadd.f32 %v15126_v29, %v18961_v5  ;;  %15428 = vmatprep.mubr.bf16.mxu0 %v5891_v12  ;;  %15513 = vmatpush3.bf16.msra.mxu0 %v16363_v60  ;;  %v5899_v5 = vor.u32 %v5898_v6, %v5895_v57  ;;  %v5920_v29 = vshrl.u32 %v16352_v45, 16  ;;  %v5923_v60 = vshll.u32 %v16352_v45, 16  ;;  %v16357_v57 = vld [vmem:[#allocation2 + $0x80] sm:$0xff]   ;;  %v16359_v45 = vld [vmem:[#allocation2 + $0x88] sm:$0xff]  }
 0x251   :  { %v2689_v37 = vpop.f32.mrf.mxu0  ;;  %15381 = vmatmul.mubr.bf16.gmra.mxu1 %v5291_v42  ;;  %15514 = vmatprep.subr.bf16.mxu0 %v16371_v49  ;;  %v19083_v35 = vpop.f32.mrf.mxu1  ;;  %v5295_v54 = vsel %vm21607_vm0, %v5292_v22, %v5294_v0 }
 0x252   :  { %v19081_v20 = vadd.f32 %v2689_v37, %v18977_v56  ;;  %15384 = vmatprep.mubr.bf16.mxu1 %v5293_v61  ;;  %v5296_v56 = vrot.slane %v19078_v7, 2  ;;  %v5900_v62 = vsel %vm21606_vm11, %v5890_v53, %v5899_v5  ;;  %v5909_v37 = vsel %vm21606_vm11, %v5899_v5, %v5908_v36 }
 0x253   :  { %v15127_v8 = vpop.f32.mrf.mxu0  ;;  %v19088_v43 = vpop.f32.mrf.mxu1  ;;  %v5922_v58 = vrot.slane %v5920_v29, 2  ;;  %v5932_v29 = vshll.u32 %v16357_v57, 16 }
 0x254   :  { %v19086_v12 = vadd.f32 %v15127_v8, %v18997_v31  ;;  %15515 = vmatpush3.bf16.msra.mxu0 %v16371_v49  ;;  %v5925_v49 = vrot.slane %v5923_v60, 3  ;;  %v5917_v8 = vor.u32 %v5916_v39, %v5913_v50  ;;  %v5938_v60 = vshrl.u32 %v16359_v45, 16 }
 0x255   :  { %v2692_v42 = vpop.f32.mrf.mxu0  ;;  %v19095_v17 = vpop.f32.mrf.mxu1 }
 0x256   :  { %v19092_v6 = vadd.f32 %v2692_v42, %v19007_v63  ;;  %v16358_v63 = vld [vmem:[#allocation2 + $0x90] sm:$0xff]   ;;  %v5297_v42 = vsel %vm21607_vm0, %v5294_v0, %v5296_v56  ;;  %v5926_v22 = vor.u32 %v5925_v49, %v5922_v58  ;;  %v5934_v49 = vrot.slane %v5932_v29, 3 }
 0x257   :  { %v15130_v31 = vpop.f32.mrf.mxu0  ;;  %15429 = vmatmul.mubr.bf16.gmra.mxu0 %v5900_v62  ;;  %v15154_v41 = vpop.f32.mrf.mxu1  ;;  %v5929_v62 = vshrl.u32 %v16357_v57, 16  ;;  %v5300_v57 = vrot.slane %v18856_v34, 2 }
 0x258   :  { %v19099_v61 = vadd.f32 %v15130_v31, %v19026_v19  ;;  %15432 = vmatprep.mubr.bf16.mxu0 %v5909_v37  ;;  %v19103_v53 = vadd.f32 %v15154_v41, %v18867_v40  ;;  %v5941_v31 = vshll.u32 %v16359_v45, 16  ;;  %v5298_v40 = vrot.slane %v16358_v63, 2  ;;  %v16364_v45 = vld [vmem:[#allocation2 + $0x90] sm:$0xff]  }
 0x259   :  { %v2705_v7 = vpop.f32.mrf.mxu0  ;;  %15385 = vmatmul.mubr.bf16.gmra.mxu1 %v5295_v54  ;;  %v3129_v19 = vpop.f32.mrf.mxu1  ;;  %v5918_v41 = vsel %vm21606_vm11, %v5908_v36, %v5917_v8  ;;  %v5931_v54 = vrot.slane %v5929_v62, 2  ;;  %v5927_v63 = vsel %vm21606_vm11, %v5917_v8, %v5926_v22  ;;  %v19135_v8 = vld [vmem:[#allocation2 + $0x18] sm:$0xff]  }
 0x25a   :  { %22172 = vst [vmem:[#allocation60_spill] sm:$0xff] %v19099_v61  ;;  %v19107_v5 = vadd.f32 %v2705_v7, %v19031_v44  ;;  %15388 = vmatprep.mubr.bf16.mxu1 %v5297_v42  ;;  %v19110_v61 = vadd.f32 %v3129_v19, %v18874_v26  ;;  %v5940_v7 = vrot.slane %v5938_v60, 2  ;;  %v5299_v62 = vsel %vm21607_vm0, %v5296_v56, %v5298_v40 }
 0x25b   :  { %v15131_v37 = vpop.f32.mrf.mxu0  ;;  %v15155_v50 = vpop.f32.mrf.mxu1  ;;  %v5301_v29 = vsel %vm21607_vm0, %v5298_v40, %v5300_v57  ;;  %v5947_v60 = vshrl.u32 %v16364_v45, 16  ;;  %v16368_v40 = vld [vmem:[#allocation2 + $0x10] sm:$0xf8]  }
 0x25c   :  { %v19113_v39 = vadd.f32 %v15131_v37, %v19046_v33  ;;  %v19117_v44 = vadd.f32 %v15155_v50, %v18879_v47  ;;  %v5943_v33 = vrot.slane %v5941_v31, 3  ;;  %v5950_v31 = vshll.u32 %v16364_v45, 16 }
 0x25d   :  { %v2708_v0 = vpop.f32.mrf.mxu0  ;;  %v3132_v26 = vpop.f32.mrf.mxu1 }
 0x25e   :  { %v19121_v58 = vadd.f32 %v2708_v0, %v19060_v51  ;;  %v19125_v36 = vadd.f32 %v3132_v26, %v18882_v59  ;;  %v5944_v37 = vor.u32 %v5943_v33, %v5940_v7  ;;  %v5952_v7 = vrot.slane %v5950_v31, 3 }
 0x25f   :  { %v15134_v42 = vpop.f32.mrf.mxu0  ;;  %15433 = vmatmul.mubr.bf16.gmra.mxu0 %v5918_v41  ;;  %v15158_v34 = vpop.f32.mrf.mxu1  ;;  %v5959_v41 = vshll.u32 %v18859_v27, 16 }
 0x260   :  { %v19128_v47 = vadd.f32 %v15134_v42, %v19074_v4  ;;  %15436 = vmatprep.mubr.bf16.mxu0 %v5927_v63  ;;  %v19132_v19 = vadd.f32 %v15158_v34, %v18896_v9  ;;  %v5935_v4 = vor.u32 %v5934_v49, %v5931_v54  ;;  %v5956_v9 = vshrl.u32 %v18859_v27, 16 }
 0x261   :  { %v2721_v51 = vpop.f32.mrf.mxu0  ;;  %15389 = vmatmul.mubr.bf16.gmra.mxu1 %v5299_v62  ;;  %v3145_v50 = vpop.f32.mrf.mxu1  ;;  %v5949_v49 = vrot.slane %v5947_v60, 2  ;;  %v16373_v60 = vld [vmem:[#allocation2 + $0x20] sm:$0xff]  }
 0x262   :  { %v19138_v59 = vadd.f32 %v2721_v51, %v19083_v35  ;;  %15392 = vmatprep.mubr.bf16.mxu1 %v5301_v29  ;;  %v19141_v56 = vadd.f32 %v3145_v50, %v18905_v52  ;;  %v5302_v35 = vrot.slane %v18849_v11, 2  ;;  %v6473_v52 = vrot.slane %v19135_v8, 3  ;;  %v16374_v50 = vld [vmem:[#allocation2 + $0x28] sm:$0xff]  }
 0x263   :  { %v15135_v0 = vpop.f32.mrf.mxu0  ;;  %v15159_v26 = vpop.f32.mrf.mxu1  ;;  %v5936_v27 = vsel %vm21606_vm11, %v5926_v22, %v5935_v4  ;;  %v5945_v63 = vsel %vm21606_vm11, %v5935_v4, %v5944_v37  ;;  %v5958_v62 = vrot.slane %v5956_v9, 2  ;;  %v6472_v51 = vrot.slane %v16368_v40, 3 }
 0x264   :  { %v19146_v45 = vadd.f32 %v15135_v0, %v19088_v43  ;;  %v19150_v54 = vadd.f32 %v15159_v26, %v18911_v23  ;;  %v5961_v23 = vrot.slane %v5959_v41, 3  ;;  %v5953_v22 = vor.u32 %v5952_v7, %v5949_v49 }
 0x265   :  { %v2724_v42 = vpop.f32.mrf.mxu0  ;;  %v3148_v43 = vpop.f32.mrf.mxu1  ;;  %v6474_v4 = vsel %vm21605_vm3, %v6472_v51, %v6473_v52  ;;  %v5968_v9 = vshll.u32 %v18851_v15, 16  ;;  %v16377_v51 = vld [vmem:[#allocation2 + $0x30] sm:$0xff]  }
 0x266   :  { %v19154_v33 = vadd.f32 %v2724_v42, %v19095_v17  ;;  %v3313_v11 = vadd.f32 %v3148_v43, %v18917_v21  ;;  %v5303_v17 = vsel %vm21607_vm0, %v5300_v57, %v5302_v35  ;;  %v5962_v57 = vor.u32 %v5961_v23, %v5958_v62 }
 0x267   :  { %v15206_v34 = vpop.f32.mrf.mxu0  ;;  %15437 = vmatmul.mubr.bf16.gmra.mxu0 %v5936_v27  ;;  %v15162_v8 = vpop.f32.mrf.mxu1  ;;  %v6475_v42 = vrot.slane %v16373_v60, 3  ;;  %v6477_v27 = vrot.slane %v16374_v50, 3  ;;  %v5970_v43 = vrot.slane %v5968_v9, 3  ;;  %v16378_v60 = vld [vmem:[#allocation2 + $0x38] sm:$0xff]   ;;  %v16375_v50 = vld [vmem:[%s21358_s0 + $0x90] sm:$0xff]  }
 0x268   :  { %v19160_v29 = vadd.f32 %v15206_v34, %v19103_v53  ;;  %15440 = vmatprep.mubr.bf16.mxu0 %v5945_v63  ;;  %v3318_v21 = vadd.f32 %v15162_v8, %v18922_v48  ;;  %v5965_v53 = vshrl.u32 %v18851_v15, 16 }
 0x269   :  { %v3664_v31 = vpop.f32.mrf.mxu0  ;;  %15393 = vmatmul.mubr.bf16.gmra.mxu1 %v5303_v17  ;;  %v3161_v40 = vpop.f32.mrf.mxu1  ;;  %v6476_v23 = vsel %vm21605_vm3, %v6473_v52, %v6475_v42 }
 0x26a   :  { %v19165_v0 = vadd.f32 %v3664_v31, %v19110_v61  ;;  %15464 = vmatprep.mubr.bf16.mxu1 %v6474_v4  ;;  %v3316_v35 = vadd.f32 %v3161_v40, %v18932_v18  ;;  %v5954_v61 = vsel %vm21606_vm11, %v5944_v37, %v5953_v22  ;;  %v5967_v15 = vrot.slane %v5965_v53, 2 }
 0x26b   :  { %v15207_v41 = vpop.f32.mrf.mxu0  ;;  %v15163_v7 = vpop.f32.mrf.mxu1  ;;  %v6479_v53 = vrot.slane %v16377_v51, 3  ;;  %v16379_v51 = vld [vmem:[%s21358_s0 + $0xa0] sm:$0xff]  }
 0x26c   :  { %v19171_v26 = vadd.f32 %v15207_v41, %v19117_v44  ;;  %v3319_v63 = vadd.f32 %v15163_v7, %v18938_v3  ;;  %v5963_v44 = vsel %vm21606_vm11, %v5953_v22, %v5962_v57  ;;  %v6478_v3 = vsel %vm21605_vm3, %v6475_v42, %v6477_v27 }
 0x26d   :  { %v3667_v49 = vpop.f32.mrf.mxu0  ;;  %v3164_v62 = vpop.f32.mrf.mxu1  ;;  %v5971_v22 = vor.u32 %v5970_v43, %v5967_v15  ;;  %v6480_v7 = vsel %vm21605_vm3, %v6477_v27, %v6479_v53  ;;  %v16381_v15 = vld [vmem:[#allocation2 + $0x40] sm:$0xff]  }
 0x26e   :  { %v19176_v48 = vadd.f32 %v3667_v49, %v19125_v36  ;;  %v3317_v37 = vadd.f32 %v3164_v62, %v18947_v2 }
 0x26f   :  { %v15210_v34 = vpop.f32.mrf.mxu0  ;;  %15441 = vmatmul.mubr.bf16.gmra.mxu0 %v5954_v61 }
 0x270   :  { %v19181_v18 = vadd.f32 %v15210_v34, %v19132_v19  ;;  %15444 = vmatprep.mubr.bf16.mxu0 %v5963_v44  ;;  %v16382_v44 = vld [vmem:[#allocation2 + $0x48] sm:$0xff]  }
 0x271   :  { %v3680_v36 = vpop.f32.mrf.mxu0  ;;  %v15166_v17 = vpop.f32.mrf.mxu1  ;;  %15465 = vmatmul.mubr.bf16.vlgmr.msra.gmra.mxu1 %v6476_v23 }
 0x272   :  { %v19187_v31 = vadd.f32 %v3680_v36, %v19141_v56  ;;  %v3322_v8 = vadd.f32 %v15166_v17, %v18967_v16  ;;  %15468 = vmatprep.mubr.bf16.mxu1 %v6478_v3  ;;  %v6481_v56 = vrot.slane %v16378_v60, 3  ;;  %v5972_v16 = vsel %vm21606_vm11, %v5962_v57, %v5971_v22 }
 0x273   :  { %v15211_v19 = vpop.f32.mrf.mxu0  ;;  %v3177_v4 = vpop.f32.mrf.mxu1  ;;  %v6483_v36 = vrot.slane %v16381_v15, 3  ;;  %v6485_v3 = vrot.slane %v16382_v44, 3 }
 0x274   :  { %v19191_v2 = vadd.f32 %v15211_v19, %v19150_v54  ;;  %v3320_v52 = vadd.f32 %v3177_v4, %v18975_v55 }
 0x275   :  { %v3683_v9 = vpop.f32.mrf.mxu0  ;;  %v15167_v41 = vpop.f32.mrf.mxu1 }
 0x276   :  { %v19197_v40 = vadd.f32 %v3683_v9, %v3313_v11  ;;  %v3323_v42 = vadd.f32 %v15167_v41, %v18985_v14  ;;  %v6482_v11 = vsel %vm21605_vm3, %v6479_v53, %v6481_v56  ;;  %v6486_v41 = vsel %vm21605_vm3, %v6483_v36, %v6485_v3 }
 0x277   :  { %v15214_v49 = vpop.f32.mrf.mxu0  ;;  %15445 = vmatmul.mubr.bf16.gmra.mxu0 %v5972_v16  ;;  %v3180_v54 = vpop.f32.mrf.mxu1 }
 0x278   :  { %v19201_v61 = vadd.f32 %v15214_v49, %v3318_v21  ;;  %v3321_v55 = vadd.f32 %v3180_v54, %v18995_v24  ;;  %15516 = vmatprep.mubr.bf16.mxu0 %v16375_v50  ;;  %v16376_v24 = vld [vmem:[%s21358_s0 + $0x98] sm:$0xff]   ;;  %v16385_v50 = vld [vmem:[#allocation2 + $0x50] sm:$0xff]  }
 0x279   :  { %v3696_v43 = vpop.f32.mrf.mxu0  ;;  %v15170_v34 = vpop.f32.mrf.mxu1  ;;  %15469 = vmatmul.mubr.bf16.gmra.mxu1 %v6480_v7  ;;  %v16383_v7 = vld [vmem:[%s21358_s0 + $0xb0] sm:$0xff]   ;;  %v6487_v15 = vrot.slane %v16385_v50, 3 }
 0x27a   :  { %v19206_v57 = vadd.f32 %v3696_v43, %v3316_v35  ;;  %v3326_v14 = vadd.f32 %v15170_v34, %v19014_v25  ;;  %15472 = vmatprep.mubr.bf16.mxu1 %v6482_v11 }
 0x27b   :  { %v15215_v62 = vpop.f32.mrf.mxu0  ;;  %v3193_v21 = vpop.f32.mrf.mxu1 }
 0x27c   :  { %v19212_v23 = vadd.f32 %v15215_v62, %v3319_v63  ;;  %v3324_v27 = vadd.f32 %v3193_v21, %v19024_v13  ;;  %v6484_v13 = vsel %vm21605_vm3, %v6481_v56, %v6483_v36  ;;  %v16389_v21 = vld [vmem:[#allocation2 + $0x60] sm:$0xff]  }
 0x27d   :  { %v3699_v35 = vpop.f32.mrf.mxu0  ;;  %v15171_v17 = vpop.f32.mrf.mxu1  ;;  %v6491_v50 = vrot.slane %v16389_v21, 3  ;;  %v16391_v21 = vld [vmem:[%s21358_s0 + $0xd0] sm:$0xff]  }
 0x27e   :  { %v19218_v25 = vadd.f32 %v3699_v35, %v3317_v37  ;;  %v3327_v60 = vadd.f32 %v15171_v17, %v19029_v38  ;;  %v16386_v37 = vld [vmem:[#allocation2 + $0x58] sm:$0xff]  }
 0x27f   :  { %v15218_v22 = vpop.f32.mrf.mxu0  ;;  %15517 = vmatmul.mubr.bf16.vlgmr.msra.gmra.mxu0 %v16376_v24  ;;  %v3196_v19 = vpop.f32.mrf.mxu1  ;;  %v6489_v34 = vrot.slane %v16386_v37, 3 }
 0x280   :  { %v19221_v4 = vadd.f32 %v15218_v22, %v3322_v8  ;;  %v3325_v63 = vadd.f32 %v3196_v19, %v19038_v30  ;;  %15520 = vmatprep.mubr.bf16.mxu0 %v16379_v51  ;;  %v16380_v30 = vld [vmem:[%s21358_s0 + $0xa8] sm:$0xff]  }
 0x281   :  { %v3712_v53 = vpop.f32.mrf.mxu0  ;;  %v15174_v9 = vpop.f32.mrf.mxu1  ;;  %15473 = vmatmul.mubr.bf16.gmra.mxu1 %v6484_v13  ;;  %v6490_v35 = vsel %vm21605_vm3, %v6487_v15, %v6489_v34  ;;  %v16387_v13 = vld [vmem:[%s21358_s0 + $0xc0] sm:$0xff]  }
 0x282   :  { %v19226_v16 = vadd.f32 %v3712_v53, %v3320_v52  ;;  %v3330_v38 = vadd.f32 %v15174_v9, %v19043_v46  ;;  %15476 = vmatprep.mubr.bf16.mxu1 %v6486_v41 }
 0x283   :  { %v15219_v49 = vpop.f32.mrf.mxu0  ;;  %v3209_v8 = vpop.f32.mrf.mxu1 }
 0x284   :  { %v19232_v54 = vadd.f32 %v15219_v49, %v3323_v42  ;;  %v3328_v56 = vadd.f32 %v3209_v8, %v19055_v32  ;;  %v6488_v32 = vsel %vm21605_vm3, %v6485_v3, %v6487_v15  ;;  %v16393_v8 = vld [vmem:[#allocation2 + $0x70] sm:$0xff]  }
 0x285   :  { %v3715_v52 = vpop.f32.mrf.mxu0  ;;  %v15175_v43 = vpop.f32.mrf.mxu1 }
 0x286   :  { %v19238_v46 = vadd.f32 %v3715_v52, %v3321_v55  ;;  %v3331_v11 = vadd.f32 %v15175_v43, %v19058_v28  ;;  %v16390_v55 = vld [vmem:[#allocation2 + $0x68] sm:$0xff]  }
 0x287   :  { %v15222_v44 = vpop.f32.mrf.mxu0  ;;  %15521 = vmatmul.mubr.bf16.gmra.mxu0 %v16380_v30  ;;  %v3212_v62 = vpop.f32.mrf.mxu1  ;;  %v6493_v9 = vrot.slane %v16390_v55, 3 }
 0x288   :  { %v19241_v24 = vadd.f32 %v15222_v44, %v3326_v14  ;;  %v3329_v42 = vadd.f32 %v3212_v62, %v19067_v10  ;;  %15524 = vmatprep.mubr.bf16.mxu0 %v16383_v7  ;;  %v16384_v10 = vld [vmem:[%s21358_s0 + $0xb8] sm:$0xff]  }
 0x289   :  { %v3728_v51 = vpop.f32.mrf.mxu0  ;;  %v15178_v36 = vpop.f32.mrf.mxu1  ;;  %15477 = vmatmul.mubr.bf16.gmra.mxu1 %v6488_v32  ;;  %v6494_v52 = vsel %vm21605_vm3, %v6491_v50, %v6493_v9 }
 0x28a   :  { %v19246_v17 = vadd.f32 %v3728_v51, %v3324_v27  ;;  %v3334_v28 = vadd.f32 %v15178_v36, %v19072_v1  ;;  %15480 = vmatprep.mubr.bf16.mxu1 %v6490_v35  ;;  %v6495_v51 = vrot.slane %v16393_v8, 3 }
 0x28b   :  { %v15223_v22 = vpop.f32.mrf.mxu0  ;;  %v3225_v14 = vpop.f32.mrf.mxu1 }
 0x28c   :  { %v19252_v19 = vadd.f32 %v15223_v22, %v3327_v60  ;;  %v3332_v3 = vadd.f32 %v3225_v14, %v19081_v20  ;;  %v6492_v20 = vsel %vm21605_vm3, %v6489_v34, %v6491_v50  ;;  %v16397_v50 = vld [vmem:[#allocation2 + $0x80] sm:$0xff]  }
 0x28d   :  { %v3731_v27 = vpop.f32.mrf.mxu0  ;;  %v15179_v53 = vpop.f32.mrf.mxu1 }
 0x28e   :  { %v19258_v1 = vadd.f32 %v3731_v27, %v3325_v63  ;;  %v3335_v41 = vadd.f32 %v15179_v53, %v19086_v12  ;;  %v16394_v63 = vld [vmem:[#allocation2 + $0x78] sm:$0xff]   ;;  %v22173_v12 = vld [vmem:[#allocation60_spill] sm:$0xff] }
 0x28f   :  { %v15226_v37 = vpop.f32.mrf.mxu0  ;;  %15525 = vmatmul.mubr.bf16.gmra.mxu0 %v16384_v10  ;;  %v3228_v49 = vpop.f32.mrf.mxu1  ;;  %v6497_v35 = vrot.slane %v16394_v63, 3 }
 0x290   :  { %v19261_v30 = vadd.f32 %v15226_v37, %v3330_v38  ;;  %v3333_v60 = vadd.f32 %v3228_v49, %v19092_v6  ;;  %15528 = vmatprep.mubr.bf16.mxu0 %v16387_v13  ;;  %v16388_v6 = vld [vmem:[%s21358_s0 + $0xc8] sm:$0xff]  }
 0x291   :  { %v3744_v7 = vpop.f32.mrf.mxu0  ;;  %v15182_v15 = vpop.f32.mrf.mxu1  ;;  %15481 = vmatmul.mubr.bf16.gmra.mxu1 %v6492_v20  ;;  %v6498_v37 = vsel %vm21605_vm3, %v6495_v51, %v6497_v35 }
 0x292   :  { %v19266_v43 = vadd.f32 %v3744_v7, %v3328_v56  ;;  %v3338_v44 = vadd.f32 %v15182_v15, %v22173_v12  ;;  %15484 = vmatprep.mubr.bf16.mxu1 %v6494_v52 }
 0x293   :  { %v15227_v62 = vpop.f32.mrf.mxu0  ;;  %v3241_v38 = vpop.f32.mrf.mxu1 }
 0x294   :  { %v19272_v32 = vadd.f32 %v15227_v62, %v3331_v11  ;;  %v3336_v34 = vadd.f32 %v3241_v38, %v19107_v5  ;;  %v6496_v5 = vsel %vm21605_vm3, %v6493_v9, %v6495_v51  ;;  %v16392_v9 = vld [vmem:[%s21358_s0 + $0xd8] sm:$0xff]  }
 0x295   :  { %v3747_v56 = vpop.f32.mrf.mxu0  ;;  %v15183_v36 = vpop.f32.mrf.mxu1 }
 0x296   :  { %v19278_v55 = vadd.f32 %v3747_v56, %v3329_v42  ;;  %v3339_v22 = vadd.f32 %v15183_v36, %v19113_v39  ;;  %v16398_v42 = vld [vmem:[#allocation2 + $0x88] sm:$0xff]  }
 0x297   :  { %v15230_v10 = vpop.f32.mrf.mxu0  ;;  %15529 = vmatmul.mubr.bf16.gmra.mxu0 %v16388_v6  ;;  %v3244_v14 = vpop.f32.mrf.mxu1  ;;  %v6501_v63 = vrot.slane %v16398_v42, 3 }
 0x298   :  { %v19281_v13 = vadd.f32 %v15230_v10, %v3334_v28  ;;  %v3337_v11 = vadd.f32 %v3244_v14, %v19121_v58  ;;  %15532 = vmatprep.mubr.bf16.mxu0 %v16391_v21  ;;  %v16408_v28 = vld [vmem:[%s21361_s3 + $0x38] sm:$0xff]   ;;  %v16401_v21 = vld [vmem:[#allocation2 + $0x90] sm:$0xff]  }
 0x299   :  { %v3760_v27 = vpop.f32.mrf.mxu0  ;;  %v15186_v53 = vpop.f32.mrf.mxu1  ;;  %15485 = vmatmul.mubr.bf16.gmra.mxu1 %v6496_v5  ;;  %15552 = vmatprep.subr.bf16.mxu1 %v16408_v28 }
 0x29a   :  { %v19286_v49 = vadd.f32 %v3760_v27, %v3332_v3  ;;  %v3342_v39 = vadd.f32 %v15186_v53, %v19128_v47  ;;  %15488 = vmatprep.mubr.bf16.mxu1 %v6498_v37  ;;  %v16395_v3 = vld [vmem:[%s21358_s0 + $0xe0] sm:$0xff]   ;;  %v6499_v47 = vrot.slane %v16397_v50, 3  ;;  %15553 = vmatpush3.bf16.msra.mxu1 %v16408_v28  ;;  %v16399_v50 = vld [vmem:[%s21358_s0 + $0xf0] sm:$0xff]   ;;  %v6503_v27 = vrot.slane %v16401_v21, 3  ;;  %v22174_v37 = vld [vmem:[#allocation66_spill] sm:$0xff] }
 0x29b   :  { %v15231_v58 = vpop.f32.mrf.mxu0  ;;  %v3257_v20 = vpop.f32.mrf.mxu1  ;;  %v6505_v42 = vrot.slane %v22174_v37, 3  ;;  %v16403_v21 = vld [vmem:[%s21358_s0 + $0x100] sm:$0xff]  }
 0x29c   :  { %v19295_v8 = vadd.f32 %v15231_v58, %v3335_v41  ;;  %v3340_v7 = vadd.f32 %v3257_v20, %v19138_v59  ;;  %v6500_v59 = vsel %vm21605_vm3, %v6497_v35, %v6499_v47  ;;  %v6502_v36 = vsel %vm21605_vm3, %v6499_v47, %v6501_v63 }
 0x29d   :  { %v3763_v15 = vpop.f32.mrf.mxu0  ;;  %v15187_v52 = vpop.f32.mrf.mxu1  ;;  %v6504_v20 = vsel %vm21605_vm3, %v6501_v63, %v6503_v27 }
 0x29e   :  { %v19301_v12 = vadd.f32 %v3763_v15, %v3333_v60  ;;  %v3343_v62 = vadd.f32 %v15187_v52, %v19146_v45  ;;  %v6506_v15 = vsel %vm21605_vm3, %v6503_v27, %v6505_v42 }
 0x29f   :  { %v15234_v6 = vpop.f32.mrf.mxu0  ;;  %15533 = vmatmul.mubr.bf16.gmra.mxu0 %v16392_v9  ;;  %v19304_v41 = vpop.f32.mrf.mxu1 }
 0x2a0   :  { %v19306_v38 = vadd.f32 %v15234_v6, %v3338_v44  ;;  %15536 = vmatprep.mubr.bf16.mxu0 %v16395_v3  ;;  %v16396_v44 = vld [vmem:[%s21358_s0 + $0xe8] sm:$0xff]   ;;  %v16400_v6 = vld [vmem:[%s21358_s0 + $0xf8] sm:$0xff]  }
 0x2a1   :  { %v3776_v51 = vpop.f32.mrf.mxu0  ;;  %v15258_v56 = vpop.f32.mrf.mxu1  ;;  %15489 = vmatmul.mubr.bf16.gmra.mxu1 %v6500_v59 }
 0x2a2   :  { %v19310_v10 = vadd.f32 %v3776_v51, %v3336_v34  ;;  %v4514_v60 = vadd.f32 %v15258_v56, %v19160_v29  ;;  %15492 = vmatprep.mubr.bf16.mxu1 %v6502_v36  ;;  %v16409_v29 = vld [vmem:[%s21361_s3 + $0x30] sm:$0xff]   ;;  %v22175_v51 = vld [vmem:[#allocation67_spill] sm:$0xff] }
 0x2a3   :  { %v15235_v45 = vpop.f32.mrf.mxu0  ;;  %v4333_v14 = vpop.f32.mrf.mxu1  ;;  %15554 = vmatprep.subr.bf16.mxu1 %v16409_v29 }
 0x2a4   :  { %v19316_v5 = vadd.f32 %v15235_v45, %v3339_v22  ;;  %v4512_v35 = vadd.f32 %v4333_v14, %v19165_v0  ;;  %15555 = vmatpush3.bf16.msra.mxu1 %v16409_v29 }
 0x2a5   :  { %v3779_v34 = vpop.f32.mrf.mxu0  ;;  %v15259_v53 = vpop.f32.mrf.mxu1 }
 0x2a6   :  { %v19326_v28 = vadd.f32 %v3779_v34, %v3337_v11  ;;  %v4515_v22 = vadd.f32 %v15259_v53, %v19171_v26 }
 0x2a7   :  { %v15238_v58 = vpop.f32.mrf.mxu0  ;;  %15537 = vmatmul.mubr.bf16.gmra.mxu0 %v16396_v44  ;;  %v19329_v0 = vpop.f32.mrf.mxu1 }
 0x2a8   :  { %v19331_v9 = vadd.f32 %v15238_v58, %v3342_v39  ;;  %15540 = vmatprep.mubr.bf16.mxu0 %v16399_v50 }
 0x2a9   :  { %v3792_v3 = vpop.f32.mrf.mxu0  ;;  %v15262_v47 = vpop.f32.mrf.mxu1  ;;  %15493 = vmatmul.mubr.bf16.gmra.mxu1 %v6504_v20 }
 0x2aa   :  { %v19335_v11 = vadd.f32 %v3792_v3, %v3340_v7  ;;  %v4518_v26 = vadd.f32 %v15262_v47, %v19181_v18  ;;  %15496 = vmatprep.mubr.bf16.mxu1 %v6506_v15  ;;  %v6507_v7 = vrot.slane %v22175_v51, 3  ;;  %v16410_v18 = vld [vmem:[%s21361_s3 + $0x28] sm:$0xff]  }
 0x2ab   :  { %v15239_v52 = vpop.f32.mrf.mxu0  ;;  %v4349_v39 = vpop.f32.mrf.mxu1  ;;  %15556 = vmatprep.subr.bf16.mxu1 %v16410_v18 }
 0x2ac   :  { %v19341_v59 = vadd.f32 %v15239_v52, %v3343_v62  ;;  %v4516_v63 = vadd.f32 %v4349_v39, %v19187_v31  ;;  %15557 = vmatpush3.bf16.msra.mxu1 %v16410_v18  ;;  %v6508_v14 = vsel %vm21605_vm3, %v6505_v42, %v6507_v7  ;;  %v16406_v42 = vld [vmem:[%s21358_s0 + $0x110] sm:$0xff]  }
 0x2ad   :  { %v19351_v56 = vpop.f32.mrf.mxu0  ;;  %v15263_v36 = vpop.f32.mrf.mxu1 }
 0x2ae   :  { %v4519_v45 = vadd.f32 %v15263_v36, %v19191_v2  ;;  %v16404_v2 = vld [vmem:[%s21358_s0 + $0x108] sm:$0xff]  }
 0x2af   :  { %v15310_v62 = vpop.f32.mrf.mxu0  ;;  %15541 = vmatmul.mubr.bf16.gmra.mxu0 %v16400_v6  ;;  %v19354_v44 = vpop.f32.mrf.mxu1 }
 0x2b0   :  { %v19356_v31 = vadd.f32 %v15310_v62, %v4514_v60  ;;  %15544 = vmatprep.mubr.bf16.mxu0 %v16403_v21  ;;  %v16407_v21 = vld [vmem:[%s21358_s0 + $0x118] sm:$0xff]  }
 0x2b1   :  { %v4869_v50 = vpop.f32.mrf.mxu0  ;;  %v15266_v27 = vpop.f32.mrf.mxu1  ;;  %15497 = vmatmul.mubr.bf16.gmra.mxu1 %v6508_v14 }
 0x2b2   :  { %v19359_v29 = vadd.f32 %v4869_v50, %v4512_v35  ;;  %v4522_v34 = vadd.f32 %v15266_v27, %v19201_v61  ;;  %v16411_v61 = vld [vmem:[%s21361_s3 + $0x20] sm:$0xff]  }
 0x2b3   :  { %v15311_v53 = vpop.f32.mrf.mxu0  ;;  %v4365_v37 = vpop.f32.mrf.mxu1  ;;  %15558 = vmatprep.subr.bf16.mxu1 %v16411_v61 }
 0x2b4   :  { %v19365_v58 = vadd.f32 %v15311_v53, %v4515_v22  ;;  %v4520_v60 = vadd.f32 %v4365_v37, %v19206_v57  ;;  %15559 = vmatpush3.bf16.msra.mxu1 %v16411_v61 }
 0x2b5   :  { %v19371_v20 = vpop.f32.mrf.mxu0  ;;  %v15267_v35 = vpop.f32.mrf.mxu1 }
 0x2b6   :  { %v4523_v3 = vadd.f32 %v15267_v35, %v19212_v23 }
 0x2b7   :  { %v15314_v47 = vpop.f32.mrf.mxu0  ;;  %15545 = vmatmul.mubr.bf16.gmra.mxu0 %v16404_v2  ;;  %v19377_v15 = vpop.f32.mrf.mxu1 }
 0x2b8   :  { %v19379_v22 = vadd.f32 %v15314_v47, %v4518_v26  ;;  %15548 = vmatprep.mubr.bf16.mxu0 %v16406_v42 }
 0x2b9   :  { %v4885_v57 = vpop.f32.mrf.mxu0  ;;  %v15270_v52 = vpop.f32.mrf.mxu1 }
 0x2ba   :  { %v19381_v6 = vadd.f32 %v4885_v57, %v4516_v63  ;;  %v4526_v39 = vadd.f32 %v15270_v52, %v19221_v4 }
 0x2bb   :  { %v15315_v23 = vpop.f32.mrf.mxu0  ;;  %v4381_v51 = vpop.f32.mrf.mxu1 }
 0x2bc   :  { %v19387_v7 = vadd.f32 %v15315_v23, %v4519_v45  ;;  %v4524_v26 = vadd.f32 %v4381_v51, %v19226_v16  ;;  %v16412_v16 = vld [vmem:[%s21361_s3 + $0x18] sm:$0xff]  }
 0x2bd   :  { %v19390_v18 = vpop.f32.mrf.mxu0  ;;  %v15271_v36 = vpop.f32.mrf.mxu1  ;;  %15560 = vmatprep.subr.bf16.mxu1 %v16412_v16 }
 0x2be   :  { %v4527_v62 = vadd.f32 %v15271_v36, %v19232_v54  ;;  %15561 = vmatpush3.bf16.msra.mxu1 %v16412_v16 }
 0x2bf   :  { %v15318_v14 = vpop.f32.mrf.mxu0  ;;  %15549 = vmatmul.mubr.bf16.gmra.mxu0 %v16407_v21  ;;  %v19393_v63 = vpop.f32.mrf.mxu1 }
 0x2c0   :  { %v19395_v4 = vadd.f32 %v15318_v14, %v4522_v34 }
 0x2c1   :  { %v4901_v50 = vpop.f32.mrf.mxu0  ;;  %v15274_v27 = vpop.f32.mrf.mxu1 }
 0x2c2   :  { %v19397_v53 = vadd.f32 %v4901_v50, %v4520_v60  ;;  %v4530_v45 = vadd.f32 %v15274_v27, %v19241_v24 }
 0x2c3   :  { %v15319_v2 = vpop.f32.mrf.mxu0  ;;  %v4397_v37 = vpop.f32.mrf.mxu1 }
 0x2c4   :  { %v19403_v42 = vadd.f32 %v15319_v2, %v4523_v3  ;;  %v4528_v54 = vadd.f32 %v4397_v37, %v19246_v17 }
 0x2c5   :  { %v19406_v35 = vpop.f32.mrf.mxu0  ;;  %v15275_v34 = vpop.f32.mrf.mxu1 }
 0x2c6   :  { %v4531_v60 = vadd.f32 %v15275_v34, %v19252_v19 }
 0x2c7   :  { %v15322_v61 = vpop.f32.mrf.mxu0  ;;  %v19409_v47 = vpop.f32.mrf.mxu1 }
 0x2c8   :  { %v19411_v24 = vadd.f32 %v15322_v61, %v4526_v39 }
 0x2c9   :  { %v4917_v57 = vpop.f32.mrf.mxu0  ;;  %v15278_v52 = vpop.f32.mrf.mxu1 }
 0x2ca   :  { %v19413_v23 = vadd.f32 %v4917_v57, %v4524_v26  ;;  %v4534_v3 = vadd.f32 %v15278_v52, %v19261_v30 }
 0x2cb   :  { %v15323_v21 = vpop.f32.mrf.mxu0  ;;  %v4413_v17 = vpop.f32.mrf.mxu1 }
 0x2cc   :  { %v19416_v51 = vadd.f32 %v15323_v21, %v4527_v62  ;;  %v4532_v36 = vadd.f32 %v4413_v17, %v19266_v43 }
 0x2cd   :  { %v19419_v14 = vpop.f32.mrf.mxu0  ;;  %v15279_v19 = vpop.f32.mrf.mxu1 }
 0x2ce   :  { %v4535_v50 = vadd.f32 %v15279_v19, %v19272_v32 }
 0x2cf   :  { %v15326_v27 = vpop.f32.mrf.mxu0  ;;  %v19422_v39 = vpop.f32.mrf.mxu1 }
 0x2d0   :  { %v19424_v16 = vadd.f32 %v15326_v27, %v4530_v45 }
 0x2d1   :  { %v4933_v26 = vpop.f32.mrf.mxu0  ;;  %v15282_v2 = vpop.f32.mrf.mxu1 }
 0x2d2   :  { %v19426_v37 = vadd.f32 %v4933_v26, %v4528_v54  ;;  %v4538_v30 = vadd.f32 %v15282_v2, %v19281_v13  ;;  %v16413_v13 = vld [vmem:[%s21361_s3 + $0x10] sm:$0xff]  }
 0x2d3   :  { %v15327_v62 = vpop.f32.mrf.mxu0  ;;  %v4429_v34 = vpop.f32.mrf.mxu1  ;;  %15562 = vmatprep.subr.bf16.mxu1 %v16413_v13 }
 0x2d4   :  { %v19429_v61 = vadd.f32 %v15327_v62, %v4531_v60  ;;  %v4536_v43 = vadd.f32 %v4429_v34, %v19286_v49  ;;  %15563 = vmatpush3.bf16.msra.mxu1 %v16413_v13 }
 0x2d5   :  { %v19432_v57 = vpop.f32.mrf.mxu0  ;;  %v15283_v32 = vpop.f32.mrf.mxu1 }
 0x2d6   :  { %v4539_v52 = vadd.f32 %v15283_v32, %v19295_v8 }
 0x2d7   :  { %v15330_v21 = vpop.f32.mrf.mxu0  ;;  %v19435_v45 = vpop.f32.mrf.mxu1 }
 0x2d8   :  { %v19437_v17 = vadd.f32 %v15330_v21, %v4534_v3 }
 0x2d9   :  { %v4949_v54 = vpop.f32.mrf.mxu0  ;;  %v15286_v19 = vpop.f32.mrf.mxu1 }
 0x2da   :  { %v19442_v60 = vadd.f32 %v4949_v54, %v4532_v36  ;;  %v4542_v49 = vadd.f32 %v15286_v19, %v19306_v38  ;;  %v16414_v38 = vld [vmem:[%s21361_s3 + $0x78] sm:$0xff]  }
 0x2db   :  { %v15331_v27 = vpop.f32.mrf.mxu0  ;;  %v4445_v26 = vpop.f32.mrf.mxu1  ;;  %15604 = vmatprep.subr.bf16.mxu0 %v16414_v38 }
 0x2dc   :  { %v19445_v2 = vadd.f32 %v15331_v27, %v4535_v50  ;;  %v4540_v8 = vadd.f32 %v4445_v26, %v19310_v10  ;;  %15605 = vmatpush3.bf16.msra.mxu0 %v16414_v38 }
 0x2dd   :  { %v19448_v3 = vpop.f32.mrf.mxu0  ;;  %v15287_v62 = vpop.f32.mrf.mxu1 }
 0x2de   :  { %22176 = vst [vmem:[#allocation55_spill] sm:$0xff] %v19448_v3  ;;  %v4543_v34 = vadd.f32 %v15287_v62, %v19316_v5 }
 0x2df   :  { %v15334_v32 = vpop.f32.mrf.mxu0  ;;  %v19451_v21 = vpop.f32.mrf.mxu1 }
 0x2e0   :  { %22177 = vst [vmem:[#allocation45_spill] sm:$0xff] %v19451_v21  ;;  %v19456_v36 = vadd.f32 %v15334_v32, %v4538_v30  ;;  %v16415_v30 = vld [vmem:[%s21361_s3 + $0x70] sm:$0xff]  }
 0x2e1   :  { %v4965_v54 = vpop.f32.mrf.mxu0  ;;  %v15290_v50 = vpop.f32.mrf.mxu1  ;;  %15606 = vmatprep.subr.bf16.mxu0 %v16415_v30 }
 0x2e2   :  { %v19458_v19 = vadd.f32 %v4965_v54, %v4536_v43  ;;  %v4546_v10 = vadd.f32 %v15290_v50, %v19331_v9  ;;  %15607 = vmatpush3.bf16.msra.mxu0 %v16415_v30 }
 0x2e3   :  { %v15335_v13 = vpop.f32.mrf.mxu0  ;;  %v4461_v27 = vpop.f32.mrf.mxu1 }
 0x2e4   :  { %v19461_v5 = vadd.f32 %v15335_v13, %v4539_v52  ;;  %v4544_v26 = vadd.f32 %v4461_v27, %v19335_v11  ;;  %v16416_v11 = vld [vmem:[%s21361_s3 + $0x8] sm:$0xff]  }
 0x2e5   :  { %v19464_v62 = vpop.f32.mrf.mxu0  ;;  %v15291_v3 = vpop.f32.mrf.mxu1  ;;  %15564 = vmatprep.subr.bf16.mxu1 %v16416_v11 }
 0x2e6   :  { %22178 = vst [vmem:[#allocation62_spill] sm:$0xff] %v19464_v62  ;;  %v4547_v32 = vadd.f32 %v15291_v3, %v19341_v59  ;;  %15565 = vmatpush3.bf16.msra.mxu1 %v16416_v11 }
 0x2e7   :  { %v15338_v43 = vpop.f32.mrf.mxu0  ;;  %v19470_v54 = vpop.f32.mrf.mxu1 }
 0x2e8   :  { %22179 = vst [vmem:[#allocation58_spill] sm:$0xff] %v19470_v54  ;;  %v19472_v9 = vadd.f32 %v15338_v43, %v4542_v49 }
 0x2e9   :  { %v4981_v52 = vpop.f32.mrf.mxu0  ;;  %v15362_v38 = vpop.f32.mrf.mxu1 }
 0x2ea   :  { %v19477_v50 = vadd.f32 %v4981_v52, %v4540_v8  ;;  %v5585_v13 = vadd.f32 %v15362_v38, %v19356_v31  ;;  %v16417_v31 = vld [vmem:[%s21361_s3 + $0x68] sm:$0xff]  }
 0x2eb   :  { %v15339_v27 = vpop.f32.mrf.mxu0  ;;  %v5404_v59 = vpop.f32.mrf.mxu1  ;;  %15608 = vmatprep.subr.bf16.mxu0 %v16417_v31 }
 0x2ec   :  { %v19480_v3 = vadd.f32 %v15339_v27, %v4543_v34  ;;  %v5583_v49 = vadd.f32 %v5404_v59, %v19359_v29  ;;  %15609 = vmatpush3.bf16.msra.mxu0 %v16417_v31 }
 0x2ed   :  { %v19483_v43 = vpop.f32.mrf.mxu0  ;;  %v15363_v30 = vpop.f32.mrf.mxu1 }
 0x2ee   :  { %22180 = vst [vmem:[#allocation14_spill] sm:$0xff] %v19483_v43  ;;  %v5586_v62 = vadd.f32 %v15363_v30, %v19365_v58 }
 0x2ef   :  { %v15342_v54 = vpop.f32.mrf.mxu0  ;;  %v19486_v21 = vpop.f32.mrf.mxu1 }
 0x2f0   :  { %22181 = vst [vmem:[#allocation44_spill] sm:$0xff] %v19486_v21  ;;  %v19491_v8 = vadd.f32 %v15342_v54, %v4546_v10 }
 0x2f1   :  { %v4997_v52 = vpop.f32.mrf.mxu0  ;;  %v15366_v11 = vpop.f32.mrf.mxu1 }
 0x2f2   :  { %v19493_v34 = vadd.f32 %v4997_v52, %v4544_v26  ;;  %v5589_v29 = vadd.f32 %v15366_v11, %v19379_v22  ;;  %v16418_v26 = vld [vmem:[%s21361_s3 + $0x60] sm:$0xff]  }
 0x2f3   :  { %v15343_v38 = vpop.f32.mrf.mxu0  ;;  %v5420_v27 = vpop.f32.mrf.mxu1  ;;  %15610 = vmatprep.subr.bf16.mxu0 %v16418_v26 }
 0x2f4   :  { %v19496_v58 = vadd.f32 %v15343_v38, %v4547_v32  ;;  %v5587_v59 = vadd.f32 %v5420_v27, %v19381_v6  ;;  %15611 = vmatpush3.bf16.msra.mxu0 %v16418_v26 }
 0x2f5   :  { %v19499_v30 = vpop.f32.mrf.mxu0  ;;  %v15367_v43 = vpop.f32.mrf.mxu1 }
 0x2f6   :  { %v5590_v10 = vadd.f32 %v15367_v43, %v19387_v7 }
 0x2f7   :  { %v15414_v54 = vpop.f32.mrf.mxu0  ;;  %v19502_v21 = vpop.f32.mrf.mxu1 }
 0x2f8   :  { %22182 = vst [vmem:[#allocation59_spill] sm:$0xff] %v19502_v21  ;;  %v19507_v22 = vadd.f32 %v15414_v54, %v5585_v13  ;;  %v16419_v13 = vld [vmem:[%s21361_s3] sm:$0xff]  }
 0x2f9   :  { %v6073_v31 = vpop.f32.mrf.mxu0  ;;  %v15370_v52 = vpop.f32.mrf.mxu1  ;;  %15566 = vmatprep.subr.bf16.mxu1 %v16419_v13 }
 0x2fa   :  { %v19509_v32 = vadd.f32 %v6073_v31, %v5583_v49  ;;  %v5593_v6 = vadd.f32 %v15370_v52, %v19395_v4  ;;  %v16420_v49 = vld [vmem:[%s21361_s3 + $0x58] sm:$0xff]   ;;  %15567 = vmatpush3.bf16.msra.mxu1 %v16419_v13 }
 0x2fb   :  { %v15415_v11 = vpop.f32.mrf.mxu0  ;;  %v5436_v38 = vpop.f32.mrf.mxu1  ;;  %15612 = vmatprep.subr.bf16.mxu0 %v16420_v49 }
 0x2fc   :  { %v19512_v7 = vadd.f32 %v15415_v11, %v5586_v62  ;;  %v5591_v43 = vadd.f32 %v5436_v38, %v19397_v53  ;;  %15613 = vmatpush3.bf16.msra.mxu0 %v16420_v49 }
 0x2fd   :  { %v19515_v27 = vpop.f32.mrf.mxu0  ;;  %v15371_v21 = vpop.f32.mrf.mxu1 }
 0x2fe   :  { %22183 = vst [vmem:[#allocation12_spill] sm:$0xff] %v19512_v7  ;;  %22184 = vst [vmem:[#allocation32_spill] sm:$0xff] %v19515_v27  ;;  %v5594_v4 = vadd.f32 %v15371_v21, %v19403_v42 }
 0x2ff   :  { %v15418_v54 = vpop.f32.mrf.mxu0  ;;  %v19524_v26 = vpop.f32.mrf.mxu1 }
 0x300   :  { %22185 = vst [vmem:[#allocation68_spill] sm:$0xff] %v19524_v26  ;;  %v19526_v62 = vadd.f32 %v15418_v54, %v5589_v29 }
 0x301   :  { %v6089_v53 = vpop.f32.mrf.mxu0  ;;  %v15374_v31 = vpop.f32.mrf.mxu1 }
 0x302   :  { %v19528_v52 = vadd.f32 %v6089_v53, %v5587_v59  ;;  %v5597_v11 = vadd.f32 %v15374_v31, %v19411_v24  ;;  %v16421_v24 = vld [vmem:[%s21361_s3 + $0x50] sm:$0xff]  }
 0x303   :  { %v15419_v38 = vpop.f32.mrf.mxu0  ;;  %v5452_v7 = vpop.f32.mrf.mxu1  ;;  %15614 = vmatprep.subr.bf16.mxu0 %v16421_v24 }
 0x304   :  { %v19531_v27 = vadd.f32 %v15419_v38, %v5590_v10  ;;  %v5595_v42 = vadd.f32 %v5452_v7, %v19413_v23  ;;  %15615 = vmatpush3.bf16.msra.mxu0 %v16421_v24 }
 0x305   :  { %v19534_v21 = vpop.f32.mrf.mxu0  ;;  %v15375_v26 = vpop.f32.mrf.mxu1 }
 0x306   :  { %22186 = vst [vmem:[#allocation13_spill] sm:$0xff] %v19531_v27  ;;  %v5598_v29 = vadd.f32 %v15375_v26, %v19416_v51 }
 0x307   :  { %v15422_v54 = vpop.f32.mrf.mxu0  ;;  %v19537_v13 = vpop.f32.mrf.mxu1 }
 0x308   :  { %v19539_v49 = vadd.f32 %v15422_v54, %v5593_v6  ;;  %v16422_v54 = vld [vmem:[#allocation2] sm:$0xff]  }
 0x309   :  { %v6105_v59 = vpop.f32.mrf.mxu0  ;;  %v15378_v53 = vpop.f32.mrf.mxu1  ;;  %15568 = vmatprep.mubr.bf16.mxu1 %v16422_v54 }
 0x30a   :  { %22187 = vst [vmem:[#allocation10_spill] sm:$0xff] %v19539_v49  ;;  %v19544_v10 = vadd.f32 %v6105_v59, %v5591_v43  ;;  %v5601_v23 = vadd.f32 %v15378_v53, %v19424_v16  ;;  %v16423_v49 = vld [vmem:[%s21361_s3 + $0x48] sm:$0xff]   ;;  %v19558_v16 = vld [vmem:[%s21361_s3 + $0xb8] sm:$0xff]  }
 0x30b   :  { %v15423_v7 = vpop.f32.mrf.mxu0  ;;  %v5468_v31 = vpop.f32.mrf.mxu1  ;;  %22190 = vst [vmem:[#allocation52_spill] sm:$0xff] %v19558_v16  ;;  %15616 = vmatprep.subr.bf16.mxu0 %v16423_v49  ;;  %15656 = vmatprep.subr.bf16.mxu1 %v19558_v16 }
 0x30c   :  { %22188 = vst [vmem:[#allocation15_spill] sm:$0xff] %v19544_v10  ;;  %v19547_v51 = vadd.f32 %v15423_v7, %v5594_v4  ;;  %v5599_v26 = vadd.f32 %v5468_v31, %v19426_v37  ;;  %15617 = vmatpush3.bf16.msra.mxu0 %v16423_v49  ;;  %v16427_v49 = vld [vmem:[%s21361_s3 + $0x40] sm:$0xff]  }
 0x30d   :  { %v19550_v6 = vpop.f32.mrf.mxu0  ;;  %v15379_v38 = vpop.f32.mrf.mxu1  ;;  %15618 = vmatprep.subr.bf16.mxu0 %v16427_v49 }
 0x30e   :  { %22189 = vst [vmem:[#allocation42_spill] sm:$0xff] %v19547_v51  ;;  %v5602_v43 = vadd.f32 %v15379_v38, %v19429_v61 }
 0x30f   :  { %v15426_v24 = vpop.f32.mrf.mxu0  ;;  %v19561_v4 = vpop.f32.mrf.mxu1 }
 0x310   :  { %v19563_v37 = vadd.f32 %v15426_v24, %v5597_v11  ;;  %15619 = vmatpush3.bf16.msra.mxu0 %v16427_v49 }
 0x311   :  { %v6121_v59 = vpop.f32.mrf.mxu0  ;;  %v15382_v53 = vpop.f32.mrf.mxu1 }
 0x312   :  { %v19566_v7 = vadd.f32 %v6121_v59, %v5595_v42  ;;  %v5605_v31 = vadd.f32 %v15382_v53, %v19437_v17 }
 0x313   :  { %v15427_v51 = vpop.f32.mrf.mxu0  ;;  %v5484_v10 = vpop.f32.mrf.mxu1 }
 0x314   :  { %22191 = vst [vmem:[#allocation22_spill] sm:$0xff] %v19566_v7  ;;  %v19569_v27 = vadd.f32 %v15427_v51, %v5598_v29  ;;  %v5603_v61 = vadd.f32 %v5484_v10, %v19442_v60 }
 0x315   :  { %v19572_v38 = vpop.f32.mrf.mxu0  ;;  %v15383_v54 = vpop.f32.mrf.mxu1 }
 0x316   :  { %22192 = vst [vmem:[#allocation21_spill] sm:$0xff] %v19569_v27  ;;  %v5606_v11 = vadd.f32 %v15383_v54, %v19445_v2 }
 0x317   :  { %v15430_v24 = vpop.f32.mrf.mxu0  ;;  %v19578_v42 = vpop.f32.mrf.mxu1 }
 0x318   :  { %v19580_v59 = vadd.f32 %v15430_v24, %v5601_v23 }
 0x319   :  { %v6137_v17 = vpop.f32.mrf.mxu0  ;;  %v15386_v29 = vpop.f32.mrf.mxu1 }
 0x31a   :  { %22193 = vst [vmem:[#allocation28_spill] sm:$0xff] %v19580_v59  ;;  %v19582_v51 = vadd.f32 %v6137_v17, %v5599_v26  ;;  %v5609_v60 = vadd.f32 %v15386_v29, %v19456_v36 }
 0x31b   :  { %v15431_v10 = vpop.f32.mrf.mxu0  ;;  %v5500_v53 = vpop.f32.mrf.mxu1 }
 0x31c   :  { %v19585_v2 = vadd.f32 %v15431_v10, %v5602_v43  ;;  %v5607_v54 = vadd.f32 %v5500_v53, %v19458_v19 }
 0x31d   :  { %v19588_v16 = vpop.f32.mrf.mxu0  ;;  %v15387_v27 = vpop.f32.mrf.mxu1 }
 0x31e   :  { %22194 = vst [vmem:[#allocation16_spill] sm:$0xff] %v19585_v2  ;;  %v5610_v23 = vadd.f32 %v15387_v27, %v19461_v5 }
 0x31f   :  { %v15434_v24 = vpop.f32.mrf.mxu0  ;;  %v19591_v59 = vpop.f32.mrf.mxu1 }
 0x320   :  { %v19593_v7 = vadd.f32 %v15434_v24, %v5605_v31 }
 0x321   :  { %v6153_v26 = vpop.f32.mrf.mxu0  ;;  %v15390_v49 = vpop.f32.mrf.mxu1 }
 0x322   :  { %v19595_v17 = vadd.f32 %v6153_v26, %v5603_v61  ;;  %v5613_v36 = vadd.f32 %v15390_v49, %v19472_v9 }
 0x323   :  { %v15435_v43 = vpop.f32.mrf.mxu0  ;;  %v5516_v29 = vpop.f32.mrf.mxu1 }
 0x324   :  { %22195 = vst [vmem:[#allocation11_spill] sm:$0xff] %v19595_v17  ;;  %v19598_v10 = vadd.f32 %v15435_v43, %v5606_v11  ;;  %v5611_v19 = vadd.f32 %v5516_v29, %v19477_v50 }
 0x325   :  { %v19601_v53 = vpop.f32.mrf.mxu0  ;;  %v15391_v5 = vpop.f32.mrf.mxu1 }
 0x326   :  { %v5614_v27 = vadd.f32 %v15391_v5, %v19480_v3 }
 0x327   :  { %v15438_v2 = vpop.f32.mrf.mxu0  ;;  %v19604_v31 = vpop.f32.mrf.mxu1 }
 0x328   :  { %v19606_v24 = vadd.f32 %v15438_v2, %v5609_v60  ;;  %v3341_v60 = vadd.f32 %v19304_v41, %v19154_v33  ;;  %v4513_v2 = vadd.f32 %v19329_v0, %v19176_v48 }
 0x329   :  { %v6169_v61 = vpop.f32.mrf.mxu0  ;;  %v15394_v26 = vpop.f32.mrf.mxu1 }
 0x32a   :  { %v19608_v17 = vadd.f32 %v6169_v61, %v5607_v54  ;;  %v5617_v9 = vadd.f32 %v15394_v26, %v19491_v8  ;;  %v4517_v8 = vadd.f32 %v19354_v44, %v19197_v40  ;;  %v4521_v54 = vadd.f32 %v19377_v15, %v19218_v25  ;;  %v16428_v61 = vld [vmem:[#allocation2] sm:$0xff]  }
 0x32b   :  { %v15439_v11 = vpop.f32.mrf.mxu0  ;;  %v5532_v49 = vpop.f32.mrf.mxu1  ;;  %v4529_v26 = vadd.f32 %v19409_v47, %v19258_v1  ;;  %v3876_v48 = vadd.f32 %v19351_v56, %v3341_v60  ;;  %v5049_v41 = vadd.f32 %v19371_v20, %v4513_v2  ;;  %v4537_v56 = vadd.f32 %v19435_v45, %v19301_v12  ;;  %v22196_v20 = vld [vmem:[#allocation45_spill] sm:$0xff]  ;;  %v22200_v2 = vld [vmem:[#allocation62_spill] sm:$0xff] }
 0x32c   :  { %v19611_v43 = vadd.f32 %v15439_v11, %v5610_v23  ;;  %v19614_v50 = vadd.f32 %v5532_v49, %v19493_v34  ;;  %v5053_v40 = vadd.f32 %v19390_v18, %v4517_v8  ;;  %v5057_v25 = vadd.f32 %v19406_v35, %v4521_v54  ;;  %v22197_v18 = vld [vmem:[#allocation58_spill] sm:$0xff] }
 0x32d   :  { %v19616_v29 = vpop.f32.mrf.mxu0  ;;  %v15395_v3 = vpop.f32.mrf.mxu1  ;;  %v5065_v11 = vadd.f32 %v19432_v57, %v4529_v26  ;;  %v4545_v47 = vadd.f32 %v22197_v18, %v3876_v48  ;;  %v8644_v49 = vshll.u32 %v16428_v61, 16  ;;  %v5073_v12 = vadd.f32 %v22200_v2, %v4537_v56  ;;  %v22201_v45 = vld [vmem:[#allocation14_spill] sm:$0xff] }
 0x32e   :  { %v19619_v5 = vadd.f32 %v15395_v3, %v19496_v58  ;;  %v4525_v58 = vadd.f32 %v19393_v63, %v19238_v46  ;;  %v4533_v46 = vadd.f32 %v19422_v39, %v19278_v55  ;;  %v4541_v63 = vadd.f32 %v22196_v20, %v19326_v28  ;;  %v22198_v3 = vld [vmem:[#allocation44_spill] sm:$0xff]  ;;  %v22199_v39 = vld [vmem:[#allocation55_spill] sm:$0xff] }
 0x32f   :  { %v15442_v34 = vpop.f32.mrf.mxu0  ;;  %v19629_v23 = vpop.f32.mrf.mxu1  ;;  %v5081_v28 = vadd.f32 %v19499_v30, %v4545_v47  ;;  %v8646_v18 = vrot.slane %v8644_v49, 1 }
 0x330   :  { %v19635_v33 = vadd.f32 %v15442_v34, %v5613_v36  ;;  %v5061_v15 = vadd.f32 %v19419_v14, %v4525_v58  ;;  %v5584_v14 = vadd.f32 %v22198_v3, %v5049_v41  ;;  %v5077_v8 = vadd.f32 %v22201_v45, %v4541_v63  ;;  %v19664_v34 = vld [vmem:[%s21362_s4] ss:$0 sm:$0xff]  ;;  %v22202_v58 = vld [vmem:[#allocation32_spill] sm:$0xff] }
 0x331   :  { %v6185_v0 = vpop.f32.mrf.mxu0  ;;  %v15466_v44 = vpop.f32.mrf.mxu1  ;;  %v8642_v63 = vshrl.u32 %v16428_v61, 16 }
 0x332   :  { %v19645_v1 = vadd.f32 %v6185_v0, %v5611_v19  ;;  %v6790_v57 = vadd.f32 %v15466_v44, %v19507_v22  ;;  %v5069_v19 = vadd.f32 %v22199_v39, %v4533_v46  ;;  %v6253_v26 = vadd.f32 %v22202_v58, %v5584_v14  ;;  %v22203_v22 = vld [vmem:[#allocation59_spill] sm:$0xff]  ;;  %v22205_v0 = vld [vmem:[#allocation12_spill] sm:$0xff] }
 0x333   :  { %v15443_v35 = vpop.f32.mrf.mxu0  ;;  %v6609_v36 = vpop.f32.mrf.mxu1  ;;  %v5588_v48 = vadd.f32 %v22203_v22, %v5053_v40  ;;  %v5596_v46 = vadd.f32 %v19537_v13, %v5061_v15  ;;  %v19694_v39 = vor.u32 %v8646_v18, %v8642_v63  ;;  %v22206_v22 = vld [vmem:[#allocation13_spill] sm:$0xff] }
 0x334   :  { %v19653_v60 = vadd.f32 %v15443_v35, %v5614_v27  ;;  %v6788_v55 = vadd.f32 %v6609_v36, %v19509_v32  ;;  %v22204_v32 = vld [vmem:[#allocation68_spill] sm:$0xff]  ;;  %v5600_v35 = vadd.f32 %v19561_v4, %v5065_v11  ;;  %v6905_v40 = vadd.f32 %v19664_v34, %v6790_v57  ;;  %v22213_v18 = vld [vmem:[#allocation17_spill] sm:$0xff] }
 0x335   :  { %v6188_v54 = vpop.f32.mrf.mxu0  ;;  %v15467_v27 = vpop.f32.mrf.mxu1  ;;  %v5592_v41 = vadd.f32 %v22204_v32, %v5057_v25  ;;  %v6257_v47 = vadd.f32 %v19534_v21, %v5588_v48  ;;  %v19681_v3 = vadd.f32 %v19572_v38, %v5596_v46  ;;  %v5604_v21 = vadd.f32 %v19578_v42, %v5069_v19 }
 0x336   :  { %v6791_v44 = vadd.f32 %v15467_v27, %v22205_v0  ;;  %v6903_v30 = vadd.f32 %v19664_v34, %v6788_v55  ;;  %v19685_v49 = vadd.f32 %v19588_v16, %v5600_v35  ;;  %v6941_v2 = vmax.f32 %v6905_v40, 0.0  ;;  %v19708_v27 = vld [vmem:[%s21360_s2] ss:$0 sm:$0xff] }
 0x337   :  { %v15446_v56 = vpop.f32.mrf.mxu0  ;;  %v6612_v20 = vpop.f32.mrf.mxu1  ;;  %v19678_v25 = vadd.f32 %v19550_v6, %v5592_v41  ;;  %v5608_v6 = vadd.f32 %v19591_v59, %v5073_v12  ;;  %v19702_v19 = vadd.f32 %v19601_v53, %v5604_v21  ;;  %v22209_v41 = vld [vmem:[#allocation18_spill] sm:$0xff]  ;;  %vm22214_vm5 = vnez %v22213_v18 }
 0x338   :  { %v19674_v36 = vadd.f32 %v15446_v56, %v5617_v9  ;;  %v6906_v15 = vadd.f32 %v19664_v34, %v6791_v44  ;;  %v6789_v14 = vadd.f32 %v6612_v20, %v6253_v26  ;;  %v6939_v11 = vmax.f32 %v6903_v30, 0.0  ;;  %v22211_v56 = vld [vmem:[#allocation27_spill] sm:$0xff] }
 0x339   :  { %v6201_v13 = vpop.f32.mrf.mxu0  ;;  %v15470_v61 = vpop.f32.mrf.mxu1  ;;  %vm22210_vm11 = vnez %v22209_v41  ;;  %vm22212_vm0 = vnez %v22211_v56 }
 0x33a   :  { %v19689_v4 = vadd.f32 %v6201_v13, %v19614_v50  ;;  %v6794_v9 = vadd.f32 %v15470_v61, %v19526_v62  ;;  %v6904_v57 = vadd.f32 %v19664_v34, %v6789_v14  ;;  %v5612_v62 = vadd.f32 %v19604_v31, %v5077_v8  ;;  %v22207_v8 = vld [vmem:[#allocation49_spill] sm:$0xff]  ;;  %v22215_v61 = vld [vmem:[#allocation19_spill] sm:$0xff] }
 0x33b   :  { %v15447_v38 = vpop.f32.mrf.mxu0  ;;  %v6625_v55 = vpop.f32.mrf.mxu1  ;;  %v6942_v59 = vmax.f32 %v6906_v15, 0.0  ;;  %v5616_v31 = vadd.f32 %v19629_v23, %v5081_v28  ;;  %vm22208_vm3 = vnez %v22207_v8  ;;  %vm22216_vm13 = vnez %v22215_v61  ;;  %v22233_v61 = vld [vmem:[#allocation25_spill] sm:$0xff] }
 0x33c   :  { %v19697_v16 = vadd.f32 %v15447_v38, %v19619_v5  ;;  %v6909_v42 = vadd.f32 %v19664_v34, %v6794_v9  ;;  %v6792_v50 = vadd.f32 %v6625_v55, %v19528_v52  ;;  %v6940_v45 = vmax.f32 %v6904_v57, 0.0 }
 0x33d   :  { %v6204_v12 = vpop.f32.mrf.mxu0  ;;  %v15471_v58 = vpop.f32.mrf.mxu1  ;;  %v19711_v5 = vadd.f32 %v19616_v29, %v5608_v6  ;;  %v19715_v48 = vadd.f32 %v6188_v54, %v5612_v62  ;;  %v6975_v32 = vsel %vm22208_vm3, %v6939_v11, 0.0  ;;  %v6977_v29 = vsel %vm22212_vm0, %v6941_v2, 0.0  ;;  %v22217_v6 = vld [vmem:[#allocation39_spill] sm:$0xff]  ;;  %v22219_v2 = vld [vmem:[#allocation10_spill] sm:$0xff] }
 0x33e   :  { %v6945_v26 = vmax.f32 %v6909_v42, 0.0  ;;  %v6907_v52 = vadd.f32 %v19664_v34, %v6792_v50  ;;  %v6795_v53 = vadd.f32 %v15471_v58, %v22206_v22  ;;  %v6976_v0 = vsel %vm22210_vm11, %v6940_v45, 0.0  ;;  %v22220_v45 = vld [vmem:[#allocation71_spill] sm:$0xff] }
 0x33f   :  { %v15518_v44 = vpop.f32.mrf.mxu0  ;;  %v6628_v46 = vpop.f32.mrf.mxu1  ;;  %v7011_v30 = vadd.f32 %v6976_v0, %v6975_v32  ;;  %v6978_v54 = vsel %vm22214_vm5, %v6942_v59, 0.0  ;;  %v19727_v35 = vadd.f32 %v6204_v12, %v5616_v31  ;;  %vm22218_vm9 = vnez %v22217_v6 }
 0x340   :  { %v7313_v20 = vadd.f32 %v15518_v44, %v19708_v27  ;;  %v6943_v63 = vmax.f32 %v6907_v52, 0.0  ;;  %v6910_v28 = vadd.f32 %v19664_v34, %v6795_v53  ;;  %v6793_v40 = vadd.f32 %v6628_v46, %v6257_v47 }
 0x341   :  { %v7304_v23 = vpop.f32.mrf.mxu0  ;;  %v15474_v13 = vpop.f32.mrf.mxu1  ;;  %v7012_v15 = vadd.f32 %v7011_v30, %v6977_v29  ;;  %v6981_v21 = vsel %vm22216_vm13, %v6945_v26, 0.0  ;;  %vm22221_vm7 = vnez %v22220_v45  ;;  %v22222_v30 = vld [vmem:[#allocation20_spill] sm:$0xff] }
 0x342   :  { %v7449_v14 = vmax.f32 %v7313_v20, 0.0  ;;  %v7305_v9 = vadd.f32 %v19708_v27, %v7304_v23  ;;  %v6979_v11 = vsel %vm22218_vm9, %v6943_v63, 0.0  ;;  %v6946_v57 = vmax.f32 %v6910_v28, 0.0 }
 0x343   :  { %v15519_v38 = vpop.f32.mrf.mxu0  ;;  %v6908_v55 = vadd.f32 %v19664_v34, %v6793_v40  ;;  %v6798_v42 = vadd.f32 %v15474_v13, %v22219_v2  ;;  %v7013_v62 = vadd.f32 %v7012_v15, %v6978_v54 }
 0x344   :  { %v7485_v47 = vsel %vm22212_vm0, %v7449_v14, 0.0  ;;  %v7447_v50 = vmax.f32 %v7305_v9, 0.0  ;;  %v7316_v59 = vadd.f32 %v15519_v38, %v19708_v27  ;;  %v6982_v58 = vsel %vm22221_vm7, %v6946_v57, 0.0 }
 0x345   :  { %v14417_v12 = vpack.c.bf16 %v7485_v47, %v7485_v47  ;;  %v7307_v26 = vpop.f32.mrf.mxu0  ;;  %v6944_v52 = vmax.f32 %v6908_v55, 0.0  ;;  %v6913_v22 = vadd.f32 %v19664_v34, %v6798_v42  ;;  %v7014_v31 = vadd.f32 %v7013_v62, %v6979_v11  ;;  %v6641_v42 = vpop.f32.mrf.mxu1 }
 0x346   :  { %v7483_v53 = vsel %vm22208_vm3, %v7447_v50, 0.0  ;;  %v7450_v32 = vmax.f32 %v7316_v59, 0.0  ;;  %v7308_v0 = vadd.f32 %v19708_v27, %v7307_v26  ;;  %vm22223_vm0 = vnez %v22222_v30 }
 0x347   :  { %v7647_v44 = vshrl.u32 %v14417_v12, 16  ;;  %v7650_v46 = vshll.u32 %v14417_v12, 16  ;;  %v14415_v29 = vpack.c.bf16 %v7483_v53, %v7483_v53  ;;  %v6980_v20 = vsel %vm22223_vm0, %v6944_v52, 0.0  ;;  %v15522_v63 = vpop.f32.mrf.mxu0 }
 0x348   :  { %v7486_v54 = vsel %vm22214_vm5, %v7450_v32, 0.0  ;;  %v7448_v23 = vmax.f32 %v7308_v0, 0.0  ;;  %v7015_v28 = vadd.f32 %v7014_v31, %v6980_v20  ;;  %v7329_v40 = vadd.f32 %v15522_v63, %v19708_v27 }
 0x349   :  { %v7649_v13 = vrot.slane %v7647_v44, 6  ;;  %v7652_v15 = vrot.slane %v7650_v46, 7  ;;  %v7628_v14 = vshrl.u32 %v14415_v29, 16  ;;  %v7631_v9 = vshll.u32 %v14415_v29, 16  ;;  %v7320_v11 = vpop.f32.mrf.mxu0  ;;  %v8023_v29 = vld [vmem:[#allocation2 + $0x8] sm:$0xe] }
 0x34a   :  { %v14418_v38 = vpack.c.bf16 %v7486_v54, %v7486_v54  ;;  %v7484_v57 = vsel %vm22210_vm11, %v7448_v23, 0.0  ;;  %v7016_v55 = vadd.f32 %v7015_v28, %v6981_v21  ;;  %v7453_v2 = vmax.f32 %v7329_v40, 0.0  ;;  %v22224_v54 = vld [vmem:[#allocation26_spill] sm:$0xff]  ;;  %v15475_v28 = vpop.f32.mrf.mxu1 }
 0x34b   :  { %v7653_v47 = vor.u32 %v7652_v15, %v7649_v13  ;;  %v7630_v50 = vrot.slane %v7628_v14, 6  ;;  %v7633_v62 = vrot.slane %v7631_v9, 7  ;;  %v14416_v59 = vpack.c.bf16 %v7484_v57, %v7484_v57  ;;  %v15523_v31 = vpop.f32.mrf.mxu0 }
 0x34c   :  { %v7657_v12 = vshrl.u32 %v14418_v38, 16  ;;  %v7660_v26 = vshll.u32 %v14418_v38, 16  ;;  %v7489_v52 = vsel %vm22216_vm13, %v7453_v2, 0.0  ;;  %v6949_v53 = vmax.f32 %v6913_v22, 0.0 }
 0x34d   :  { %v7655_v32 = vrot.slane %v7653_v47, 4  ;;  %v7634_v0 = vor.u32 %v7633_v62, %v7630_v50  ;;  %v7637_v44 = vshrl.u32 %v14416_v59, 16  ;;  %v7640_v46 = vshll.u32 %v14416_v59, 16  ;;  %v7323_v50 = vpop.f32.mrf.mxu0  ;;  %v22227_v59 = vld [vmem:[#allocation15_spill] sm:$0xff] }
 0x34e   :  { %v7659_v20 = vrot.slane %v7657_v12, 6  ;;  %v7662_v21 = vrot.slane %v7660_v26, 7  ;;  %v14421_v63 = vpack.c.bf16 %v7489_v52, %v7489_v52  ;;  %vm22225_vm5 = vnez %v22224_v54  ;;  %v22246_v54 = vld [vmem:[#allocation28_spill] sm:$0xff] }
 0x34f   :  { %v19757_v23 = vsel %vm22225_vm5, %v6949_v53, 0.0  ;;  %v7635_v40 = vrot.slane %v7634_v0, 4  ;;  %v8024_v15 = vsel %vm17985_vm8, %v7634_v0, %v8023_v29  ;;  %v7639_v14 = vrot.slane %v7637_v44, 6 }
 0x350   :  { %v7642_v22 = vrot.slane %v7640_v46, 7  ;;  %8025 = vst [vmem:[#allocation2 + $0x8] sm:$0xe] %v8024_v15  ;;  %v19761_v9 = vor.u32 %v7662_v21, %v7659_v20  ;;  %v7687_v38 = vshrl.u32 %v14421_v63, 16  ;;  %v7690_v57 = vshll.u32 %v14421_v63, 16  ;;  %v6644_v20 = vpop.f32.mrf.mxu1 }
 0x351   :  { %v7321_v2 = vadd.f32 %v19708_v27, %v7320_v11  ;;  %v6796_v12 = vadd.f32 %v6641_v42, %v22227_v59  ;;  %v7017_v26 = vadd.f32 %v7016_v55, %v6982_v58  ;;  %v7332_v52 = vadd.f32 %v15523_v31, %v19708_v27  ;;  %v22229_v31 = vld [vmem:[#allocation42_spill] sm:$0xff] }
 0x352   :  { %v7643_v62 = vor.u32 %v7642_v22, %v7639_v14  ;;  %v7664_v0 = vsel %vm17995_vm15, %v7655_v32, %v19761_v9  ;;  %v7665_v44 = vrot.slane %v19761_v9, 4  ;;  %v7689_v46 = vrot.slane %v7687_v38, 6  ;;  %v15526_v14 = vpop.f32.mrf.mxu0 }
 0x353   :  { %v7692_v29 = vrot.slane %v7690_v57, 7  ;;  %8028 = vst [vmem:[#allocation2 + $0x14] sm:$0xf] %v7664_v0  ;;  %v7451_v63 = vmax.f32 %v7321_v2, 0.0  ;;  %v6911_v42 = vadd.f32 %v19664_v34, %v6796_v12  ;;  %v7454_v55 = vmax.f32 %v7332_v52, 0.0  ;;  %v22230_v12 = vld [vmem:[#allocation50_spill] sm:$0xff] }
 0x354   :  { %v7644_v11 = vsel %vm17995_vm15, %v7635_v40, %v7643_v62  ;;  %v7645_v21 = vrot.slane %v7643_v62, 4  ;;  %v6799_v15 = vadd.f32 %v15475_v28, %v22229_v31  ;;  %v7324_v32 = vadd.f32 %v19708_v27, %v7323_v50  ;;  %v15478_v50 = vpop.f32.mrf.mxu1 }
 0x355   :  { %8026 = vst [vmem:[#allocation2 + $0xc] sm:$0xf] %v7644_v11  ;;  %v19773_v58 = vor.u32 %v7692_v29, %v7689_v46  ;;  %v7487_v9 = vsel %vm22218_vm9, %v7451_v63, 0.0  ;;  %v6947_v40 = vmax.f32 %v6911_v42, 0.0  ;;  %v6797_v38 = vadd.f32 %v6644_v20, %v19678_v25  ;;  %v7336_v63 = vpop.f32.mrf.mxu0 }
 0x356   :  { %v7654_v22 = vsel %vm17995_vm15, %v7645_v21, %v7653_v47  ;;  %v14419_v2 = vpack.c.bf16 %v7487_v9, %v7487_v9  ;;  %v7490_v62 = vsel %vm22221_vm7, %v7454_v55, 0.0  ;;  %v6914_v28 = vadd.f32 %v19664_v34, %v6799_v15 }
 0x357   :  { %8027 = vst [vmem:[#allocation2 + $0x10] sm:$0xf] %v7654_v22  ;;  %v7695_v57 = vrot.slane %v19773_v58, 4  ;;  %v8066_v59 = vld [vmem:[#allocation2 + $0x8] sm:$0x3]  ;;  %vm22231_vm13 = vnez %v22230_v12  ;;  %v14422_v52 = vpack.c.bf16 %v7490_v62, %v7490_v62  ;;  %v7452_v0 = vmax.f32 %v7324_v32, 0.0  ;;  %v6657_v62 = vpop.f32.mrf.mxu1  ;;  %v15527_v30 = vpop.f32.mrf.mxu0 }
 0x358   :  { %v6983_v47 = vsel %vm22231_vm13, %v6947_v40, 0.0  ;;  %v6912_v46 = vadd.f32 %v19664_v34, %v6797_v38  ;;  %v8067_v25 = vsel %vm18030_vm12, 0, %v8066_v59  ;;  %v7667_v20 = vshrl.u32 %v14419_v2, 16 }
 0x359   :  { %v7670_v11 = vshll.u32 %v14419_v2, 16  ;;  %v7018_v21 = vadd.f32 %v7017_v26, %v6983_v47  ;;  %8068 = vst [vmem:[#allocation2 + $0x8] sm:$0x3] %v8067_v25  ;;  %v7697_v42 = vshrl.u32 %v14422_v52, 16  ;;  %v7700_v55 = vshll.u32 %v14422_v52, 16  ;;  %v22235_v52 = vld [vmem:[#allocation73_spill] sm:$0xff] }
 0x35a   :  { %v6950_v31 = vmax.f32 %v6914_v28, 0.0  ;;  %v7488_v15 = vsel %vm22223_vm0, %v7452_v0, 0.0  ;;  %v7669_v22 = vrot.slane %v7667_v20, 6  ;;  %v6948_v32 = vmax.f32 %v6912_v46, 0.0 }
 0x35b   :  { %v7672_v9 = vrot.slane %v7670_v11, 7  ;;  %v14420_v40 = vpack.c.bf16 %v7488_v15, %v7488_v15  ;;  %v7699_v38 = vrot.slane %v7697_v42, 6  ;;  %v7702_v45 = vrot.slane %v7700_v55, 7 }
 0x35c   :  { %vm22234_vm7 = vnez %v22233_v61  ;;  %v7345_v26 = vadd.f32 %v15526_v14, %v19708_v27  ;;  %vm22236_vm9 = vnez %v22235_v52  ;;  %v6802_v46 = vadd.f32 %v15478_v50, %v19563_v37  ;;  %v15479_v14 = vpop.f32.mrf.mxu1 }
 0x35d   :  { %v6986_v59 = vsel %vm22234_vm7, %v6950_v31, 0.0  ;;  %v7673_v2 = vor.u32 %v7672_v9, %v7669_v22  ;;  %v7677_v47 = vshrl.u32 %v14420_v40, 16  ;;  %v7680_v25 = vshll.u32 %v14420_v40, 16  ;;  %v16433_v22 = vld [vmem:[%s21361_s3 + $0xb0] sm:$0xff]  }
 0x35e   :  { %v6984_v28 = vsel %vm22236_vm9, %v6948_v32, 0.0  ;;  %v19798_v0 = vor.u32 %v7702_v45, %v7699_v38  ;;  %v7457_v11 = vmax.f32 %v7345_v26, 0.0  ;;  %v6917_v40 = vadd.f32 %v19664_v34, %v6802_v46  ;;  %v7339_v38 = vpop.f32.mrf.mxu0 }
 0x35f   :  { %v7019_v20 = vadd.f32 %v7018_v21, %v6984_v28  ;;  %v7674_v42 = vsel %vm17995_vm15, %v7665_v44, %v7673_v2  ;;  %v7675_v55 = vrot.slane %v7673_v2, 4  ;;  %v7679_v31 = vrot.slane %v7677_v47, 6  ;;  %v22237_v2 = vld [vmem:[#allocation22_spill] sm:$0xff]  ;;  %v22238_v28 = vld [vmem:[#allocation21_spill] sm:$0xff] }
 0x360   :  { %v7682_v15 = vrot.slane %v7680_v25, 7  ;;  %8029 = vst [vmem:[#allocation2 + $0x18] sm:$0xf] %v7674_v42  ;;  %v7704_v45 = vsel %vm17995_vm15, %v7695_v57, %v19798_v0  ;;  %v7493_v44 = vsel %vm22225_vm5, %v7457_v11, 0.0  ;;  %v7337_v32 = vadd.f32 %v19708_v27, %v7336_v63  ;;  %v16425_v26 = vld [vmem:[#allocation2 + $0x8] sm:$0xff]   ;;  %v19823_v63 = vld [vmem:[%s21361_s3 + $0xf8] sm:$0xff]  }
 0x361   :  { %v7020_v37 = vadd.f32 %v7019_v20, %v19757_v23  ;;  %8032 = vst [vmem:[#allocation2 + $0x24] sm:$0xf] %v7704_v45  ;;  %v14425_v9 = vpack.c.bf16 %v7493_v44, %v7493_v44  ;;  %v6800_v47 = vadd.f32 %v6657_v62, %v22237_v2  ;;  %v7348_v57 = vadd.f32 %v15527_v30, %v19708_v27  ;;  %v16426_v23 = vld [vmem:[#allocation2 + $0x10] sm:$0xff]   ;;  %v6660_v45 = vpop.f32.mrf.mxu1 }
 0x362   :  { %v7683_v50 = vor.u32 %v7682_v15, %v7679_v31  ;;  %v6803_v42 = vadd.f32 %v15479_v14, %v22238_v28  ;;  %15569 = vmatmul.mubr.bf16.vlgmr.msra.gmra.mxu1 %v16425_v26  ;;  %v6953_v62 = vmax.f32 %v6917_v40, 0.0  ;;  %v22239_v14 = vld [vmem:[#allocation52_spill] sm:$0xff]  ;;  %v15530_v40 = vpop.f32.mrf.mxu0  ;;  %15708 = vmatprep.subr.bf16.mxu0 %v19823_v63 }
 0x363   :  { %v7021_v25 = vadd.f32 %v7020_v37, %v6986_v59  ;;  %v7727_v31 = vshrl.u32 %v14425_v9, 16  ;;  %v7730_v15 = vshll.u32 %v14425_v9, 16  ;;  %v7455_v59 = vmax.f32 %v7337_v32, 0.0  ;;  %15657 = vmatpush3.bf16.msra.mxu1 %v22239_v14  ;;  %15572 = vmatprep.mubr.bf16.mxu1 %v16426_v23  ;;  %v22240_v32 = vld [vmem:[#allocation54_spill] sm:$0xff] }
 0x364   :  { %v7684_v20 = vsel %vm17995_vm15, %v7675_v55, %v7683_v50  ;;  %v7685_v11 = vrot.slane %v7683_v50, 4  ;;  %v6915_v30 = vadd.f32 %v19664_v34, %v6800_v47  ;;  %v7458_v46 = vmax.f32 %v7348_v57, 0.0  ;;  %v16439_v55 = vld [vmem:[%s21361_s3 + $0xa8] sm:$0xff]   ;;  %15658 = vmatprep.subr.bf16.mxu1 %v16433_v22 }
 0x365   :  { %8030 = vst [vmem:[#allocation2 + $0x1c] sm:$0xf] %v7684_v20  ;;  %v7729_v44 = vrot.slane %v7727_v31, 6  ;;  %v7732_v50 = vrot.slane %v7730_v15, 7  ;;  %v6918_v9 = vadd.f32 %v19664_v34, %v6803_v42  ;;  %vm22241_vm5 = vnez %v22240_v32  ;;  %v15482_v20 = vpop.f32.mrf.mxu1 }
 0x366   :  { %v7694_v37 = vsel %vm17995_vm15, %v7685_v11, %v19773_v58  ;;  %v19837_v26 = vsel %vm22241_vm5, %v6953_v62, 0.0  ;;  %v7491_v2 = vsel %vm22231_vm13, %v7455_v59, 0.0  ;;  %v6951_v47 = vmax.f32 %v6915_v30, 0.0  ;;  %v22242_v11 = vld [vmem:[#allocation74_spill] sm:$0xff] }
 0x367   :  { %8031 = vst [vmem:[#allocation2 + $0x20] sm:$0xf] %v7694_v37  ;;  %v7494_v58 = vsel %vm22234_vm7, %v7458_v46, 0.0  ;;  %v19843_v57 = vor.u32 %v7732_v50, %v7729_v44  ;;  %v14423_v28 = vpack.c.bf16 %v7491_v2, %v7491_v2  ;;  %v6954_v23 = vmax.f32 %v6918_v9, 0.0  ;;  %15659 = vmatpush3.bf16.msra.mxu1 %v16433_v22  ;;  %v7352_v44 = vpop.f32.mrf.mxu0  ;;  %v16444_v50 = vld [vmem:[%s21361_s3 + $0xa0] sm:$0xff]  }
 0x368   :  { %v14426_v42 = vpack.c.bf16 %v7494_v58, %v7494_v58  ;;  %vm22243_vm0 = vnez %v22242_v11  ;;  %v7340_v15 = vadd.f32 %v19708_v27, %v7339_v38  ;;  %v6801_v62 = vadd.f32 %v6660_v45, %v19681_v3  ;;  %15660 = vmatprep.subr.bf16.mxu1 %v16439_v55 }
 0x369   :  { %v6987_v31 = vsel %vm22243_vm0, %v6951_v47, 0.0  ;;  %v7361_v14 = vadd.f32 %v15530_v40, %v19708_v27  ;;  %v7735_v59 = vrot.slane %v19843_v57, 4  ;;  %v7707_v30 = vshrl.u32 %v14423_v28, 16  ;;  %v22244_v47 = vld [vmem:[#allocation35_spill] sm:$0xff] }
 0x36a   :  { %v7710_v46 = vshll.u32 %v14423_v28, 16  ;;  %v7022_v37 = vadd.f32 %v7021_v25, %v6987_v31  ;;  %v7737_v9 = vshrl.u32 %v14426_v42, 16  ;;  %v7740_v2 = vshll.u32 %v14426_v42, 16  ;;  %v6673_v28 = vpop.f32.mrf.mxu1 }
 0x36b   :  { %vm22245_vm7 = vnez %v22244_v47  ;;  %v7456_v3 = vmax.f32 %v7340_v15, 0.0  ;;  %v7709_v45 = vrot.slane %v7707_v30, 6  ;;  %v6916_v40 = vadd.f32 %v19664_v34, %v6801_v62  ;;  %15661 = vmatpush3.bf16.msra.mxu1 %v16439_v55  ;;  %v15531_v30 = vpop.f32.mrf.mxu0 }
 0x36c   :  { %v19856_v38 = vsel %vm22245_vm7, %v6954_v23, 0.0  ;;  %v7712_v22 = vrot.slane %v7710_v46, 7  ;;  %v7461_v58 = vmax.f32 %v7361_v14, 0.0  ;;  %v16431_v25 = vld [vmem:[#allocation2 + $0x18] sm:$0xff]   ;;  %v7739_v31 = vrot.slane %v7737_v9, 6  ;;  %15662 = vmatprep.subr.bf16.mxu1 %v16444_v50 }
 0x36d   :  { %v7742_v21 = vrot.slane %v7740_v2, 7  ;;  %v7492_v61 = vsel %vm22236_vm9, %v7456_v3, 0.0  ;;  %v6806_v12 = vadd.f32 %v15482_v20, %v22246_v54  ;;  %v6952_v23 = vmax.f32 %v6916_v40, 0.0  ;;  %15573 = vmatmul.mubr.bf16.gmra.mxu1 %v16431_v25  ;;  %v16449_v14 = vld [vmem:[%s21361_s3 + $0x98] sm:$0xff]  }
 0x36e   :  { %v7713_v42 = vor.u32 %v7712_v22, %v7709_v45  ;;  %v14424_v6 = vpack.c.bf16 %v7492_v61, %v7492_v61  ;;  %v7497_v15 = vsel %vm22241_vm5, %v7461_v58, 0.0  ;;  %v16434_v62 = vld [vmem:[#allocation2 + $0x20] sm:$0xff]   ;;  %v7353_v55 = vadd.f32 %v19708_v27, %v7352_v44  ;;  %v15483_v22 = vpop.f32.mrf.mxu1 }
 0x36f   :  { %v19867_v46 = vor.u32 %v7742_v21, %v7739_v31  ;;  %v14429_v9 = vpack.c.bf16 %v7497_v15, %v7497_v15  ;;  %v6921_v54 = vadd.f32 %v19664_v34, %v6806_v12  ;;  %v22247_v61 = vrot.slane %v19798_v0, 4  ;;  %15576 = vmatprep.mubr.bf16.mxu1 %v16434_v62  ;;  %15663 = vmatpush3.bf16.msra.mxu1 %v16444_v50  ;;  %v16454_v15 = vld [vmem:[%s21361_s3 + $0x90] sm:$0xff]  }
 0x370   :  { %v7715_v2 = vrot.slane %v7713_v42, 4  ;;  %v7717_v3 = vshrl.u32 %v14424_v6, 16  ;;  %v7720_v45 = vshll.u32 %v14424_v6, 16  ;;  %v6988_v44 = vsel %vm18103_vm14, %v6952_v23, 0.0  ;;  %v7355_v6 = vpop.f32.mrf.mxu0  ;;  %15664 = vmatprep.subr.bf16.mxu1 %v16449_v14 }
 0x371   :  { %v7714_v20 = vsel %vm17995_vm15, %v22247_v61, %v7713_v42  ;;  %v7744_v21 = vsel %vm17995_vm15, %v7735_v59, %v19867_v46  ;;  %v7767_v58 = vshrl.u32 %v14429_v9, 16  ;;  %v7023_v31 = vadd.f32 %v7022_v37, %v6988_v44  ;;  %v22249_v37 = vld [vmem:[#allocation56_spill] sm:$0xff] }
 0x372   :  { %8033 = vst [vmem:[#allocation2 + $0x28] sm:$0xf] %v7714_v20  ;;  %8036 = vst [vmem:[#allocation2 + $0x34] sm:$0xf] %v7744_v21  ;;  %v7719_v0 = vrot.slane %v7717_v3, 6  ;;  %v7722_v25 = vrot.slane %v7720_v45, 7  ;;  %v6804_v20 = vadd.f32 %v6673_v28, %v19582_v51  ;;  %v7364_v3 = vadd.f32 %v15531_v30, %v19708_v27  ;;  %v6676_v45 = vpop.f32.mrf.mxu1 }
 0x373   :  { %v7770_v42 = vshll.u32 %v14429_v9, 16  ;;  %v7769_v62 = vrot.slane %v7767_v58, 6  ;;  %v6957_v59 = vmax.f32 %v6921_v54, 0.0  ;;  %v7459_v61 = vmax.f32 %v7353_v55, 0.0  ;;  %v22251_v54 = vld [vmem:[#allocation16_spill] sm:$0xff]  ;;  %15665 = vmatpush3.bf16.msra.mxu1 %v16449_v14  ;;  %v15534_v58 = vpop.f32.mrf.mxu0 }
 0x374   :  { %v7723_v40 = vor.u32 %v7722_v25, %v7719_v0  ;;  %v7024_v23 = vadd.f32 %v7023_v31, %v19837_v26  ;;  %vm22250_vm5 = vnez %v22249_v37  ;;  %v6919_v44 = vadd.f32 %v19664_v34, %v6804_v20  ;;  %15666 = vmatprep.subr.bf16.mxu1 %v16454_v15  ;;  %v16461_v0 = vld [vmem:[%s21361_s3 + $0x88] sm:$0xff]  }
 0x375   :  { %v7772_v50 = vrot.slane %v7770_v42, 7  ;;  %v19889_v9 = vsel %vm22250_vm5, %v6957_v59, 0.0  ;;  %v7495_v21 = vsel %vm22243_vm0, %v7459_v61, 0.0  ;;  %v6807_v55 = vadd.f32 %v15483_v22, %v22251_v54  ;;  %v15486_v59 = vpop.f32.mrf.mxu1  ;;  %v22252_v61 = vld [vmem:[#allocation40_spill] sm:$0xff] }
 0x376   :  { %v7724_v51 = vsel %vm17995_vm15, %v7715_v2, %v7723_v40  ;;  %v7725_v26 = vrot.slane %v7723_v40, 4  ;;  %v14427_v30 = vpack.c.bf16 %v7495_v21, %v7495_v21  ;;  %v6955_v25 = vmax.f32 %v6919_v44, 0.0 }
 0x377   :  { %v19897_v28 = vor.u32 %v7772_v50, %v7769_v62  ;;  %8034 = vst [vmem:[#allocation2 + $0x2c] sm:$0xf] %v7724_v51  ;;  %v7025_v31 = vadd.f32 %v7024_v23, %v19856_v38  ;;  %v7462_v42 = vmax.f32 %v7364_v3, 0.0  ;;  %v6922_v14 = vadd.f32 %v19664_v34, %v6807_v55  ;;  %15667 = vmatpush3.bf16.msra.mxu1 %v16454_v15  ;;  %v7368_v55 = vpop.f32.mrf.mxu0  ;;  %v22254_v51 = vld [vmem:[#allocation31_spill] sm:$0xff]  ;;  %v6689_v47 = vpop.f32.mrf.mxu1 }
 0x378   :  { %v7734_v2 = vsel %vm17995_vm15, %v7725_v26, %v19843_v57  ;;  %v7747_v40 = vshrl.u32 %v14427_v30, 16  ;;  %v7750_v62 = vshll.u32 %v14427_v30, 16  ;;  %vm22253_vm0 = vnez %v22252_v61  ;;  %v16468_v57 = vld [vmem:[%s21361_s3 + $0x80] sm:$0xff]   ;;  %15668 = vmatprep.subr.bf16.mxu1 %v16461_v0 }
 0x379   :  { %v7775_v22 = vrot.slane %v19897_v28, 4  ;;  %8035 = vst [vmem:[#allocation2 + $0x30] sm:$0xf] %v7734_v2  ;;  %v6991_v20 = vsel %vm22253_vm0, %v6955_v25, 0.0  ;;  %v7498_v50 = vsel %vm22245_vm7, %v7462_v42, 0.0  ;;  %v6958_v38 = vmax.f32 %v6922_v14, 0.0 }
 0x37a   :  { %v7356_v23 = vadd.f32 %v19708_v27, %v7355_v6  ;;  %v7749_v3 = vrot.slane %v7747_v40, 6  ;;  %v7752_v21 = vrot.slane %v7750_v62, 7  ;;  %v7026_v44 = vadd.f32 %v7025_v31, %v6991_v20 }
 0x37b   :  { %v14430_v54 = vpack.c.bf16 %v7498_v50, %v7498_v50  ;;  %vm22255_vm9 = vnez %v22254_v51  ;;  %v6805_v25 = vadd.f32 %v6676_v45, %v19685_v49  ;;  %v7377_v42 = vadd.f32 %v15534_v58, %v19708_v27  ;;  %15669 = vmatpush3.bf16.msra.mxu1 %v16461_v0  ;;  %v16478_v49 = vld [vmem:[%s21361_s3 + $0x138] sm:$0xff]  }
 0x37c   :  { %v6994_v26 = vsel %vm22255_vm9, %v6958_v38, 0.0  ;;  %v7460_v30 = vmax.f32 %v7356_v23, 0.0  ;;  %v7753_v6 = vor.u32 %v7752_v21, %v7749_v3  ;;  %v6810_v2 = vadd.f32 %v15486_v59, %v19593_v7  ;;  %15670 = vmatprep.subr.bf16.mxu1 %v16468_v57 }
 0x37d   :  { %v7777_v15 = vshrl.u32 %v14430_v54, 16  ;;  %v7780_v14 = vshll.u32 %v14430_v54, 16  ;;  %v6920_v40 = vadd.f32 %v19664_v34, %v6805_v25  ;;  %v7465_v62 = vmax.f32 %v7377_v42, 0.0  ;;  %v15535_v54 = vpop.f32.mrf.mxu0  ;;  %v22257_v25 = vld [vmem:[#allocation11_spill] sm:$0xff] }
 0x37e   :  { %v7496_v31 = vsel %vm18103_vm14, %v7460_v30, 0.0  ;;  %v7369_v20 = vadd.f32 %v19708_v27, %v7368_v55  ;;  %v22256_v45 = vrot.slane %v19867_v46, 4  ;;  %v7755_v7 = vrot.slane %v7753_v6, 4  ;;  %v16436_v38 = vld [vmem:[#allocation2 + $0x28] sm:$0xff]  }
 0x37f   :  { %v7779_v59 = vrot.slane %v7777_v15, 6  ;;  %v7782_v50 = vrot.slane %v7780_v14, 7  ;;  %v14428_v23 = vpack.c.bf16 %v7496_v31, %v7496_v31  ;;  %v6956_v3 = vmax.f32 %v6920_v40, 0.0  ;;  %15577 = vmatmul.mubr.bf16.gmra.mxu1 %v16436_v38 }
 0x380   :  { %v7754_v58 = vsel %vm17995_vm15, %v22256_v45, %v7753_v6  ;;  %v7501_v0 = vsel %vm22250_vm5, %v7465_v62, 0.0  ;;  %v6925_v21 = vadd.f32 %v19664_v34, %v6810_v2  ;;  %v7463_v30 = vmax.f32 %v7369_v20, 0.0  ;;  %v15487_v6 = vpop.f32.mrf.mxu1  ;;  %v16438_v15 = vld [vmem:[#allocation2 + $0x30] sm:$0xff]   ;;  %15671 = vmatpush3.bf16.msra.mxu1 %v16468_v57 }
 0x381   :  { %8037 = vst [vmem:[#allocation2 + $0x38] sm:$0xf] %v7754_v58  ;;  %v19935_v55 = vor.u32 %v7782_v50, %v7779_v59  ;;  %v14433_v46 = vpack.c.bf16 %v7501_v0, %v7501_v0  ;;  %v6808_v42 = vadd.f32 %v6689_v47, %v22257_v25  ;;  %v7757_v14 = vshrl.u32 %v14428_v23, 16  ;;  %v22258_v58 = vld [vmem:[#allocation41_spill] sm:$0xff]  ;;  %15580 = vmatprep.mubr.bf16.mxu1 %v16438_v15 }
 0x382   :  { %v7760_v45 = vshll.u32 %v14428_v23, 16  ;;  %vm22259_vm7 = vnez %v22258_v58  ;;  %v6961_v40 = vmax.f32 %v6925_v21, 0.0  ;;  %15760 = vmatprep.subr.bf16.mxu1 %v16478_v49  ;;  %v22260_v23 = vld [vmem:[#allocation33_spill] sm:$0xff] }
 0x383   :  { %v6992_v31 = vsel %vm22259_vm7, %v6956_v3, 0.0  ;;  %v7784_v2 = vsel %vm17995_vm15, %v7775_v22, %v19935_v55  ;;  %v7785_v62 = vrot.slane %v19935_v55, 4  ;;  %v7807_v20 = vshrl.u32 %v14433_v46, 16  ;;  %v7371_v3 = vpop.f32.mrf.mxu0  ;;  %v6692_v55 = vpop.f32.mrf.mxu1  ;;  %v16491_v13 = vld [vmem:[#allocation2 + $0x30] sm:$0xff]  }
 0x384   :  { %v7027_v59 = vadd.f32 %v7026_v44, %v6992_v31  ;;  %8040 = vst [vmem:[#allocation2 + $0x44] sm:$0xf] %v7784_v2  ;;  %v7759_v47 = vrot.slane %v7757_v14, 6  ;;  %v7762_v50 = vrot.slane %v7760_v45, 7  ;;  %v7810_v38 = vshll.u32 %v14433_v46, 16 }
 0x385   :  { %vm22261_vm5 = vnez %v22260_v23  ;;  %v7809_v21 = vrot.slane %v7807_v20, 6  ;;  %v7499_v22 = vsel %vm22253_vm0, %v7463_v30, 0.0  ;;  %v6923_v44 = vadd.f32 %v19664_v34, %v6808_v42  ;;  %v22262_v20 = vld [vmem:[#allocation43_spill] sm:$0xff] }
 0x386   :  { %v19946_v0 = vsel %vm22261_vm5, %v6961_v40, 0.0  ;;  %v7028_v57 = vadd.f32 %v7027_v59, %v19889_v9  ;;  %v7763_v25 = vor.u32 %v7762_v50, %v7759_v47  ;;  %v7812_v49 = vrot.slane %v7810_v38, 7  ;;  %v16429_v38 = vld [vmem:[#allocation2 + $0x8] sm:$0xff]  }
 0x387   :  { %v14431_v15 = vpack.c.bf16 %v7499_v22, %v7499_v22  ;;  %v7380_v14 = vadd.f32 %v15535_v54, %v19708_v27  ;;  %v6959_v46 = vmax.f32 %v6923_v44, 0.0  ;;  %v6811_v31 = vadd.f32 %v15487_v6, %v19598_v10 }
 0x388   :  { %v7029_v45 = vadd.f32 %v7028_v57, %v6994_v26  ;;  %v7372_v40 = vadd.f32 %v19708_v27, %v7371_v3  ;;  %v7764_v9 = vsel %vm17995_vm15, %v7755_v7, %v7763_v25  ;;  %v7765_v2 = vrot.slane %v7763_v25, 4  ;;  %v15490_v26 = vpop.f32.mrf.mxu1  ;;  %v15538_v25 = vpop.f32.mrf.mxu0 }
 0x389   :  { %v19957_v59 = vor.u32 %v7812_v49, %v7809_v21  ;;  %v7787_v30 = vshrl.u32 %v14431_v15, 16  ;;  %8038 = vst [vmem:[#allocation2 + $0x3c] sm:$0xf] %v7764_v9  ;;  %v7790_v42 = vshll.u32 %v14431_v15, 16  ;;  %vm22263_vm0 = vnez %v22262_v20  ;;  %v16597_v20 = vld [vmem:[#allocation2 + $0x30] sm:$0xff]  }
 0x38a   :  { %v6995_v47 = vsel %vm22263_vm0, %v6959_v46, 0.0  ;;  %v7466_v50 = vmax.f32 %v7380_v14, 0.0  ;;  %v6926_v54 = vadd.f32 %v19664_v34, %v6811_v31  ;;  %v7774_v10 = vsel %vm17995_vm15, %v7765_v2, %v19897_v28  ;;  %v22264_v46 = vld [vmem:[#allocation34_spill] sm:$0xff] }
 0x38b   :  { %v7815_v7 = vrot.slane %v19957_v59, 4  ;;  %v7789_v6 = vrot.slane %v7787_v30, 6  ;;  %v7030_v3 = vadd.f32 %v7029_v45, %v6995_v47  ;;  %8039 = vst [vmem:[#allocation2 + $0x40] sm:$0xf] %v7774_v10  ;;  %v7792_v57 = vrot.slane %v7790_v42, 7 }
 0x38c   :  { %v7502_v21 = vsel %vm22255_vm9, %v7466_v50, 0.0  ;;  %v6962_v22 = vmax.f32 %v6926_v54, 0.0  ;;  %v7464_v44 = vmax.f32 %v7372_v40, 0.0  ;;  %v6809_v34 = vadd.f32 %v6692_v55, %v19702_v19  ;;  %v19978_v40 = vld [vmem:[%s21362_s4] ss:$0 sm:$0xff] }
 0x38d   :  { %v14434_v49 = vpack.c.bf16 %v7502_v21, %v7502_v21  ;;  %v7393_v15 = vadd.f32 %v15538_v25, %v19708_v27  ;;  %v6814_v14 = vadd.f32 %v15490_v26, %v19606_v24  ;;  %v7793_v28 = vor.u32 %v7792_v57, %v7789_v6  ;;  %v6705_v25 = vpop.f32.mrf.mxu1 }
 0x38e   :  { %vm22265_vm14 = vnez %v22264_v46  ;;  %v7500_v45 = vsel %vm22259_vm7, %v7464_v44, 0.0  ;;  %v8649_v9 = vshll.u32 %v16429_v38, 16  ;;  %v6924_v19 = vadd.f32 %v19978_v40, %v6809_v34  ;;  %v7384_v44 = vpop.f32.mrf.mxu0 }
 0x38f   :  { %v6998_v31 = vsel %vm22265_vm14, %v6962_v22, 0.0  ;;  %v7817_v2 = vshrl.u32 %v14434_v49, 16  ;;  %v7820_v30 = vshll.u32 %v14434_v49, 16  ;;  %v14432_v42 = vpack.c.bf16 %v7500_v45, %v7500_v45  ;;  %v16430_v49 = vld [vmem:[#allocation2 + $0x10] sm:$0xff]   ;;  %v22266_v45 = vld [vmem:[#allocation36_spill] sm:$0xff] }
 0x390   :  { %v7794_v24 = vsel %vm17995_vm15, %v7785_v62, %v7793_v28  ;;  %v7795_v27 = vrot.slane %v7793_v28, 4  ;;  %v7469_v55 = vmax.f32 %v7393_v15, 0.0  ;;  %v6929_v47 = vadd.f32 %v19978_v40, %v6814_v14  ;;  %v16441_v34 = vld [vmem:[#allocation2 + $0x38] sm:$0xff]  }
 0x391   :  { %8041 = vst [vmem:[#allocation2 + $0x48] sm:$0xf] %v7794_v24  ;;  %v7819_v50 = vrot.slane %v7817_v2, 6  ;;  %v7822_v54 = vrot.slane %v7820_v30, 7  ;;  %v7797_v26 = vshrl.u32 %v14432_v42, 16  ;;  %v7800_v10 = vshll.u32 %v14432_v42, 16  ;;  %15581 = vmatmul.mubr.bf16.gmra.mxu1 %v16441_v34 }
 0x392   :  { %v6960_v6 = vmax.f32 %v6924_v19, 0.0  ;;  %v7505_v57 = vsel %vm22261_vm5, %v7469_v55, 0.0  ;;  %v6965_v21 = vmax.f32 %v6929_v47, 0.0  ;;  %v8651_v22 = vrot.slane %v8649_v9, 1  ;;  %v22268_v30 = vld [vmem:[#allocation61_spill] sm:$0xff]  ;;  %v16443_v24 = vld [vmem:[#allocation2 + $0x40] sm:$0xff]  }
 0x393   :  { %v19986_v62 = vor.u32 %v7822_v54, %v7819_v50  ;;  %v7799_v15 = vrot.slane %v7797_v26, 6  ;;  %v7802_v28 = vrot.slane %v7800_v10, 7  ;;  %v14437_v14 = vpack.c.bf16 %v7505_v57, %v7505_v57  ;;  %v15539_v57 = vpop.f32.mrf.mxu0  ;;  %15584 = vmatprep.mubr.bf16.mxu1 %v16443_v24  ;;  %v16598_v51 = vld [vmem:[#allocation2 + $0x40] sm:$0xff]  }
 0x394   :  { %vm22267_vm9 = vnez %v22266_v45  ;;  %vm22269_vm7 = vnez %v22268_v30  ;;  %vm22270_vm5 = vsmask.f32 7424  ;;  %v8653_v9 = vshrl.u32 %v16429_v38, 16  ;;  %v16593_v30 = vld [vmem:[#allocation2 + $0x30] sm:$0xff]  }
 0x395   :  { %v6996_v2 = vsel %vm22267_vm9, %v6960_v6, 0.0  ;;  %v19992_v42 = vsel %vm22269_vm7, %v6965_v21, 0.0  ;;  %v8652_v19 = vsel %vm22270_vm5, %v19694_v39, %v8651_v22  ;;  %v7824_v55 = vsel %vm17995_vm15, %v7815_v7, %v19986_v62  ;;  %v20003_v39 = vld [vmem:[%s21360_s2] ss:$0 sm:$0xff]  ;;  %v15491_v21 = vpop.f32.mrf.mxu1 }
 0x396   :  { %v7803_v50 = vor.u32 %v7802_v28, %v7799_v15  ;;  %v7031_v54 = vadd.f32 %v7030_v3, %v6996_v2  ;;  %15620 = vmatprep.mubr.bf16.mxu0 %v8652_v19  ;;  %8044 = vst [vmem:[#allocation2 + $0x54] sm:$0xf] %v7824_v55  ;;  %v7847_v26 = vshrl.u32 %v14437_v14, 16  ;;  %v7850_v10 = vshll.u32 %v14437_v14, 16  ;;  %v20010_v28 = vld [vmem:[#allocation2 + $0x18] sm:$0xff]  }
 0x397   :  { %v8655_v6 = vor.u32 %v8653_v9, %v8651_v22  ;;  %v7385_v38 = vadd.f32 %v20003_v39, %v7384_v44  ;;  %v6812_v15 = vadd.f32 %v6705_v25, %v19608_v17  ;;  %v8657_v19 = vshll.u32 %v16430_v49, 16 }
 0x398   :  { %v7804_v7 = vsel %vm17995_vm15, %v7795_v27, %v7803_v50  ;;  %v7805_v34 = vrot.slane %v7803_v50, 4  ;;  %v7032_v3 = vadd.f32 %v7031_v54, %v19946_v0  ;;  %v7849_v22 = vrot.slane %v7847_v26, 6  ;;  %v7387_v50 = vpop.f32.mrf.mxu0  ;;  %v6708_v54 = vpop.f32.mrf.mxu1 }
 0x399   :  { %8042 = vst [vmem:[#allocation2 + $0x4c] sm:$0xf] %v7804_v7  ;;  %v7852_v14 = vrot.slane %v7850_v10, 7  ;;  %v7467_v2 = vmax.f32 %v7385_v38, 0.0  ;;  %v6927_v9 = vadd.f32 %v19978_v40, %v6812_v15  ;;  %v7396_v27 = vadd.f32 %v20003_v39, %v15539_v57 }
 0x39a   :  { %v7814_v44 = vsel %vm17995_vm15, %v7805_v34, %v19957_v59  ;;  %v7033_v24 = vadd.f32 %v7032_v3, %v6998_v31  ;;  %v8659_v25 = vrot.slane %v8657_v19, 1  ;;  %v8661_v55 = vshrl.u32 %v16430_v49, 16  ;;  %v16460_v31 = vld [vmem:[%s21361_s3 + $0xf0] sm:$0xff]  }
 0x39b   :  { %8043 = vst [vmem:[#allocation2 + $0x50] sm:$0xf] %v7814_v44  ;;  %v20017_v0 = vor.u32 %v7852_v14, %v7849_v22  ;;  %v7503_v17 = vsel %vm22263_vm0, %v7467_v2, 0.0  ;;  %v6963_v10 = vmax.f32 %v6927_v9, 0.0  ;;  %v7470_v38 = vmax.f32 %v7396_v27, 0.0  ;;  %v22271_v22 = vld [vmem:[#allocation46_spill] sm:$0xff] }
 0x39c   :  { %v14435_v26 = vpack.c.bf16 %v7503_v17, %v7503_v17  ;;  %v8665_v59 = vshll.u32 %v20010_v28, 16  ;;  %v8660_v7 = vsel %vm22270_vm5, %v8655_v6, %v8659_v25  ;;  %v8663_v34 = vor.u32 %v8661_v55, %v8659_v25  ;;  %v15542_v17 = vpop.f32.mrf.mxu0  ;;  %v15494_v6 = vpop.f32.mrf.mxu1 }
 0x39d   :  { %v7855_v57 = vrot.slane %v20017_v0, 4  ;;  %v6815_v3 = vadd.f32 %v15491_v21, %v19611_v43  ;;  %vm22272_vm0 = vnez %v22271_v22  ;;  %15621 = vmatmul.mubr.bf16.vlgmr.msra.gmra.mxu0 %v8660_v7  ;;  %v7506_v2 = vsel %vm22265_vm14, %v7470_v38, 0.0  ;;  %v16596_v22 = vld [vmem:[#allocation2 + $0x38] sm:$0xff]  }
 0x39e   :  { %v7827_v15 = vshrl.u32 %v14435_v26, 16  ;;  %v7830_v49 = vshll.u32 %v14435_v26, 16  ;;  %v6999_v14 = vsel %vm22272_vm0, %v6963_v10, 0.0  ;;  %v14438_v44 = vpack.c.bf16 %v7506_v2, %v7506_v2  ;;  %15709 = vmatpush3.bf16.msra.mxu0 %v19823_v63  ;;  %v7400_v47 = vpop.f32.mrf.mxu0 }
 0x39f   :  { %v7034_v19 = vadd.f32 %v7033_v24, %v6999_v14  ;;  %v20032_v9 = vrot.slane %v8665_v59, 1  ;;  %v6930_v27 = vadd.f32 %v19978_v40, %v6815_v3  ;;  %v7388_v25 = vadd.f32 %v20003_v39, %v7387_v50  ;;  %15710 = vmatprep.subr.bf16.mxu0 %v16460_v31  ;;  %v16463_v24 = vld [vmem:[%s21361_s3 + $0xe8] sm:$0xff]   ;;  %v16592_v14 = vld [vmem:[#allocation2 + $0x20] sm:$0xff]  }
 0x3a0   :  { %v7829_v43 = vrot.slane %v7827_v15, 6  ;;  %v7832_v21 = vrot.slane %v7830_v49, 7  ;;  %v6813_v55 = vadd.f32 %v6708_v54, %v19711_v5  ;;  %v16446_v26 = vld [vmem:[#allocation2 + $0x48] sm:$0xff]   ;;  %v7857_v10 = vshrl.u32 %v14438_v44, 16 }
 0x3a1   :  { %v7860_v38 = vshll.u32 %v14438_v44, 16  ;;  %v8668_v59 = vsel %vm22270_vm5, %v8663_v34, %v20032_v9  ;;  %v6966_v7 = vmax.f32 %v6930_v27, 0.0  ;;  %v7468_v63 = vmax.f32 %v7388_v25, 0.0  ;;  %15585 = vmatmul.mubr.bf16.gmra.mxu1 %v16446_v26  ;;  %v6721_v34 = vpop.f32.mrf.mxu1  ;;  %v16594_v26 = vld [vmem:[#allocation2 + $0x28] sm:$0xff]  }
 0x3a2   :  { %v20043_v3 = vor.u32 %v7832_v21, %v7829_v43  ;;  %15624 = vmatprep.mubr.bf16.mxu0 %v8668_v59  ;;  %v6928_v50 = vadd.f32 %v19978_v40, %v6813_v55  ;;  %v7409_v5 = vadd.f32 %v20003_v39, %v15542_v17  ;;  %v16448_v54 = vld [vmem:[#allocation2 + $0x50] sm:$0xff]   ;;  %v7859_v15 = vrot.slane %v7857_v10, 6  ;;  %15711 = vmatpush3.bf16.msra.mxu0 %v16460_v31 }
 0x3a3   :  { %v7862_v49 = vrot.slane %v7860_v38, 7  ;;  %v7002_v2 = vsel %vm18373_vm6, %v6966_v7, 0.0  ;;  %v6818_v44 = vadd.f32 %v15494_v6, %v19635_v33  ;;  %v22274_v27 = vrot.slane %v19986_v62, 4  ;;  %15588 = vmatprep.mubr.bf16.mxu1 %v16448_v54  ;;  %15712 = vmatprep.subr.bf16.mxu0 %v16463_v24  ;;  %v16467_v33 = vld [vmem:[%s21361_s3 + $0xe0] sm:$0xff]  }
 0x3a4   :  { %v7835_v17 = vrot.slane %v20043_v3, 4  ;;  %v7504_v21 = vsel %vm22267_vm9, %v7468_v63, 0.0  ;;  %v6964_v25 = vmax.f32 %v6928_v50, 0.0  ;;  %v7473_v62 = vmax.f32 %v7409_v5, 0.0  ;;  %v20073_v5 = vld [vmem:[#allocation2 + $0x20] sm:$0xff]   ;;  %v20096_v63 = vld [vmem:[#allocation2 + $0x28] sm:$0xff]  }
 0x3a5   :  { %v7834_v43 = vsel %vm17995_vm15, %v22274_v27, %v20043_v3  ;;  %v20061_v31 = vor.u32 %v7862_v49, %v7859_v15  ;;  %v14436_v6 = vpack.c.bf16 %v7504_v21, %v7504_v21  ;;  %v6933_v55 = vadd.f32 %v19978_v40, %v6818_v44  ;;  %v15543_v44 = vpop.f32.mrf.mxu0 }
 0x3a6   :  { %8045 = vst [vmem:[#allocation2 + $0x58] sm:$0xf] %v7834_v43  ;;  %v7000_v10 = vsel %vm18398_vm1, %v6964_v25, 0.0  ;;  %v7401_v38 = vadd.f32 %v20003_v39, %v7400_v47  ;;  %v6816_v59 = vadd.f32 %v6721_v34, %v19645_v1  ;;  %v8669_v7 = vshrl.u32 %v20010_v28, 16  ;;  %15713 = vmatpush3.bf16.msra.mxu0 %v16463_v24  ;;  %v16470_v28 = vld [vmem:[%s21361_s3 + $0xd8] sm:$0xff]  }
 0x3a7   :  { %v7864_v3 = vsel %vm17995_vm15, %v7855_v57, %v20061_v31  ;;  %v7837_v50 = vshrl.u32 %v14436_v6, 16  ;;  %v7840_v54 = vshll.u32 %v14436_v6, 16  ;;  %v7035_v15 = vadd.f32 %v7034_v19, %v7000_v10  ;;  %15714 = vmatprep.subr.bf16.mxu0 %v16467_v33 }
 0x3a8   :  { %8048 = vst [vmem:[#allocation2 + $0x64] sm:$0xf] %v7864_v3  ;;  %v7509_v47 = vsel %vm22269_vm7, %v7473_v62, 0.0  ;;  %v6969_v49 = vmax.f32 %v6933_v55, 0.0  ;;  %v7471_v1 = vmax.f32 %v7401_v38, 0.0  ;;  %v6931_v43 = vadd.f32 %v19978_v40, %v6816_v59  ;;  %v15495_v62 = vpop.f32.mrf.mxu1  ;;  %v16475_v55 = vld [vmem:[%s21361_s3 + $0xd0] sm:$0xff]  }
 0x3a9   :  { %v7839_v57 = vrot.slane %v7837_v50, 6  ;;  %v7842_v34 = vrot.slane %v7840_v54, 7  ;;  %v14441_v27 = vpack.c.bf16 %v7509_v47, %v7509_v47  ;;  %v7036_v24 = vadd.f32 %v7035_v15, %v19992_v42  ;;  %v7403_v47 = vpop.f32.mrf.mxu0 }
 0x3aa   :  { %v20084_v19 = vsel %vm18414_vm2, %v6969_v49, 0.0  ;;  %v7507_v25 = vsel %vm22272_vm0, %v7471_v1, 0.0  ;;  %v8671_v6 = vor.u32 %v8669_v7, %v20032_v9  ;;  %15715 = vmatpush3.bf16.msra.mxu0 %v16467_v33  ;;  %v6967_v42 = vmax.f32 %v6931_v43, 0.0  ;;  %v6724_v43 = vpop.f32.mrf.mxu1 }
 0x3ab   :  { %v7843_v10 = vor.u32 %v7842_v34, %v7839_v57  ;;  %v7887_v38 = vshrl.u32 %v14441_v27, 16  ;;  %v7890_v3 = vshll.u32 %v14441_v27, 16  ;;  %v14439_v59 = vpack.c.bf16 %v7507_v25, %v7507_v25  ;;  %15716 = vmatprep.subr.bf16.mxu0 %v16470_v28 }
 0x3ac   :  { %v7037_v50 = vadd.f32 %v7036_v24, %v7002_v2  ;;  %v8673_v54 = vshll.u32 %v20073_v5, 16  ;;  %v7412_v15 = vadd.f32 %v20003_v39, %v15543_v44  ;;  %v7003_v2 = vsel %vm18423_vm4, %v6967_v42, 0.0  ;;  %v15546_v42 = vpop.f32.mrf.mxu0 }
 0x3ad   :  { %v7844_v9 = vsel %vm17995_vm15, %v7835_v17, %v7843_v10  ;;  %v7845_v7 = vrot.slane %v7843_v10, 4  ;;  %v7889_v49 = vrot.slane %v7887_v38, 6  ;;  %v7892_v1 = vrot.slane %v7890_v3, 7 }
 0x3ae   :  { %8046 = vst [vmem:[#allocation2 + $0x5c] sm:$0xf] %v7844_v9  ;;  %v7867_v57 = vshrl.u32 %v14439_v59, 16  ;;  %v7870_v34 = vshll.u32 %v14439_v59, 16  ;;  %v8675_v27 = vrot.slane %v8673_v54, 1  ;;  %v20105_v17 = vadd.f32 %v7037_v50, %v7003_v2  ;;  %15717 = vmatpush3.bf16.msra.mxu0 %v16470_v28  ;;  %v16477_v54 = vld [vmem:[%s21361_s3 + $0xc8] sm:$0xff]  }
 0x3af   :  { %v7854_v44 = vsel %vm17995_vm15, %v7845_v7, %v20017_v0  ;;  %v20103_v24 = vor.u32 %v7892_v1, %v7889_v49  ;;  %v7474_v25 = vmax.f32 %v7412_v15, 0.0  ;;  %v8677_v59 = vshrl.u32 %v20073_v5, 16  ;;  %15718 = vmatprep.subr.bf16.mxu0 %v16475_v55  ;;  %v15498_v49 = vpop.f32.mrf.mxu1 }
 0x3b0   :  { %8047 = vst [vmem:[#allocation2 + $0x60] sm:$0xf] %v7854_v44  ;;  %v7869_v10 = vrot.slane %v7867_v57, 6  ;;  %v7872_v38 = vrot.slane %v7870_v34, 7  ;;  %v8676_v3 = vsel %vm22270_vm5, %v8671_v6, %v8675_v27  ;;  %v8681_v28 = vshll.u32 %v20096_v63, 16 }
 0x3b1   :  { %v7895_v0 = vrot.slane %v20103_v24, 4  ;;  %15625 = vmatmul.mubr.bf16.gmra.mxu0 %v8676_v3  ;;  %v7510_v50 = vsel %vm18373_vm6, %v7474_v25, 0.0  ;;  %v6819_v15 = vadd.f32 %v15495_v62, %v19653_v60  ;;  %v8679_v5 = vor.u32 %v8677_v59, %v8675_v27  ;;  %v7416_v25 = vpop.f32.mrf.mxu0 }
 0x3b2   :  { %v20117_v9 = vor.u32 %v7872_v38, %v7869_v10  ;;  %v14442_v6 = vpack.c.bf16 %v7510_v50, %v7510_v50  ;;  %v7404_v7 = vadd.f32 %v20003_v39, %v7403_v47  ;;  %v20120_v1 = vrot.slane %v8681_v28, 1  ;;  %15719 = vmatpush3.bf16.msra.mxu0 %v16475_v55  ;;  %v16483_v10 = vld [vmem:[%s21361_s3 + $0xc0] sm:$0xff]   ;;  %v6737_v28 = vpop.f32.mrf.mxu1 }
 0x3b3   :  { %v6934_v57 = vadd.f32 %v19978_v40, %v6819_v15  ;;  %v6817_v34 = vadd.f32 %v6724_v43, %v19715_v48  ;;  %v7425_v2 = vadd.f32 %v20003_v39, %v15546_v42  ;;  %v22278_v44 = vrot.slane %v20061_v31, 4  ;;  %15720 = vmatprep.subr.bf16.mxu0 %v16477_v54 }
 0x3b4   :  { %v7897_v27 = vshrl.u32 %v14442_v6, 16  ;;  %v7900_v47 = vshll.u32 %v14442_v6, 16  ;;  %v8684_v48 = vsel %vm22270_vm5, %v8679_v5, %v20120_v1  ;;  %v7472_v43 = vmax.f32 %v7404_v7, 0.0 }
 0x3b5   :  { %v7874_v60 = vsel %vm17995_vm15, %v22278_v44, %v20117_v9  ;;  %v6970_v55 = vmax.f32 %v6934_v57, 0.0  ;;  %v6932_v31 = vadd.f32 %v19978_v40, %v6817_v34  ;;  %v16451_v38 = vld [vmem:[#allocation2 + $0x58] sm:$0xff]   ;;  %15628 = vmatprep.mubr.bf16.mxu0 %v8684_v48  ;;  %v7477_v42 = vmax.f32 %v7425_v2, 0.0 }
 0x3b6   :  { %8049 = vst [vmem:[#allocation2 + $0x68] sm:$0xf] %v7874_v60  ;;  %v7899_v3 = vrot.slane %v7897_v27, 6  ;;  %v7902_v59 = vrot.slane %v7900_v47, 7  ;;  %v6822_v50 = vadd.f32 %v15498_v49, %v19674_v36  ;;  %v7508_v44 = vsel %vm18398_vm1, %v7472_v43, 0.0  ;;  %15589 = vmatmul.mubr.bf16.gmra.mxu1 %v16451_v38  ;;  %15721 = vmatpush3.bf16.msra.mxu0 %v16477_v54  ;;  %v20151_v49 = vld [vmem:[%s21361_s3 + $0x178] sm:$0xff]  }
 0x3b7   :  { %v7006_v6 = vsel %vm18455_vm10, %v6970_v55, 0.0  ;;  %v6968_v60 = vmax.f32 %v6932_v31, 0.0  ;;  %v7417_v5 = vadd.f32 %v20003_v39, %v7416_v25  ;;  %v16453_v7 = vld [vmem:[#allocation2 + $0x60] sm:$0xff]   ;;  %v14440_v34 = vpack.c.bf16 %v7508_v44, %v7508_v44  ;;  %15722 = vmatprep.subr.bf16.mxu0 %v16483_v10  ;;  %v22280_v27 = vld [vmem:[#allocation53_spill] sm:$0xff]  ;;  %v15547_v55 = vpop.f32.mrf.mxu0 }
 0x3b8   :  { %v20143_v57 = vor.u32 %v7902_v59, %v7899_v3  ;;  %v7513_v2 = vsel %vm18414_vm2, %v7477_v42, 0.0  ;;  %v6937_v36 = vadd.f32 %v19978_v40, %v6822_v50  ;;  %vm22281_vm5 = vnez %v22280_v27  ;;  %15592 = vmatprep.mubr.bf16.mxu1 %v16453_v7  ;;  %v16587_v27 = vld [vmem:[#allocation2 + $0x20] sm:$0xff]  }
 0x3b9   :  { %v7004_v47 = vsel %vm22281_vm5, %v6968_v60, 0.0  ;;  %v14445_v25 = vpack.c.bf16 %v7513_v2, %v7513_v2  ;;  %v7475_v48 = vmax.f32 %v7417_v5, 0.0  ;;  %v6820_v54 = vadd.f32 %v6737_v28, %v19689_v4  ;;  %v16440_v60 = vld [vmem:[#allocation2 + $0x30] sm:$0xff]   ;;  %v22282_v2 = vld [vmem:[#allocation47_spill] sm:$0xff] }
 0x3ba   :  { %v7904_v43 = vsel %vm17995_vm15, %v7895_v0, %v20143_v57  ;;  %v7905_v31 = vrot.slane %v20143_v57, 4  ;;  %v7877_v38 = vshrl.u32 %v14440_v34, 16  ;;  %v7880_v3 = vshll.u32 %v14440_v34, 16  ;;  %15723 = vmatpush3.bf16.msra.mxu0 %v16483_v10 }
 0x3bb   :  { %8052 = vst [vmem:[#allocation2 + $0x74] sm:$0xf] %v7904_v43  ;;  %v7039_v59 = vadd.f32 %v20105_v17, %v7004_v47  ;;  %v7927_v42 = vshrl.u32 %v14445_v25, 16  ;;  %v7930_v50 = vshll.u32 %v14445_v25, 16  ;;  %v6973_v44 = vmax.f32 %v6937_v36, 0.0  ;;  %15812 = vmatprep.subr.bf16.mxu0 %v20151_v49  ;;  %v15499_v36 = vpop.f32.mrf.mxu1  ;;  %v7419_v47 = vpop.f32.mrf.mxu0 }
 0x3bc   :  { %v7879_v5 = vrot.slane %v7877_v38, 6  ;;  %v7882_v4 = vrot.slane %v7880_v3, 7  ;;  %v7511_v28 = vsel %vm18423_vm4, %v7475_v48, 0.0  ;;  %v6935_v7 = vadd.f32 %v19978_v40, %v6820_v54 }
 0x3bd   :  { %v7040_v0 = vadd.f32 %v7039_v59, %v20084_v19  ;;  %v7929_v57 = vrot.slane %v7927_v42, 6  ;;  %v7932_v34 = vrot.slane %v7930_v50, 7  ;;  %vm22283_vm2 = vnez %v22282_v2  ;;  %v16442_v19 = vld [vmem:[#allocation2 + $0x38] sm:$0xff]  }
 0x3be   :  { %v20168_v17 = vsel %vm22283_vm2, %v6973_v44, 0.0  ;;  %v7883_v10 = vor.u32 %v7882_v4, %v7879_v5  ;;  %v14443_v25 = vpack.c.bf16 %v7511_v28, %v7511_v28  ;;  %v6971_v43 = vmax.f32 %v6935_v7, 0.0  ;;  %v22285_v4 = vld [vmem:[#allocation65_spill] sm:$0xff]  ;;  %v6740_v7 = vpop.f32.mrf.mxu1 }
 0x3bf   :  { %v8685_v38 = vshrl.u32 %v20096_v63, 16  ;;  %v20171_v48 = vor.u32 %v7932_v34, %v7929_v57  ;;  %v7041_v54 = vadd.f32 %v7040_v0, %v7006_v6  ;;  %v8689_v3 = vshll.u32 %v16440_v60, 16 }
 0x3c0   :  { %v7428_v62 = vadd.f32 %v20003_v39, %v15547_v55  ;;  %v22284_v59 = vrot.slane %v20117_v9, 4  ;;  %v7885_v50 = vrot.slane %v7883_v10, 4  ;;  %v7907_v44 = vshrl.u32 %v14443_v25, 16  ;;  %v15550_v55 = vpop.f32.mrf.mxu0 }
 0x3c1   :  { %v7910_v21 = vshll.u32 %v14443_v25, 16  ;;  %vm22286_vm4 = vnez %v22285_v4  ;;  %v8687_v6 = vor.u32 %v8685_v38, %v20120_v1  ;;  %v8691_v28 = vrot.slane %v8689_v3, 1 }
 0x3c2   :  { %v7884_v42 = vsel %vm17995_vm15, %v22284_v59, %v7883_v10  ;;  %v7007_v63 = vsel %vm22286_vm4, %v6971_v43, 0.0  ;;  %v7894_v9 = vsel %vm17995_vm15, %v7885_v50, %v20103_v24  ;;  %v7909_v0 = vrot.slane %v7907_v44, 6  ;;  %v7432_v50 = vpop.f32.mrf.mxu0 }
 0x3c3   :  { %8050 = vst [vmem:[#allocation2 + $0x6c] sm:$0xf] %v7884_v42  ;;  %v7912_v57 = vrot.slane %v7910_v21, 7  ;;  %v7042_v34 = vadd.f32 %v7041_v54, %v7007_v63  ;;  %8051 = vst [vmem:[#allocation2 + $0x70] sm:$0xf] %v7894_v9  ;;  %v7478_v25 = vmax.f32 %v7428_v62, 0.0  ;;  %v6823_v1 = vadd.f32 %v15499_v36, %v19697_v16 }
 0x3c4   :  { %vm22287_vm6 = vsmask.f32 7424  ;;  %v8693_v59 = vshrl.u32 %v16440_v60, 16  ;;  %v8697_v42 = vshll.u32 %v16442_v19, 16  ;;  %v7420_v43 = vadd.f32 %v20003_v39, %v7419_v47 }
 0x3c5   :  { %v8692_v10 = vsel %vm22287_vm6, %v8687_v6, %v8691_v28  ;;  %v20186_v5 = vor.u32 %v7912_v57, %v7909_v0  ;;  %v6821_v38 = vadd.f32 %v6740_v7, %v19727_v35  ;;  %v7514_v24 = vsel %vm18455_vm10, %v7478_v25, 0.0  ;;  %v20201_v6 = vld [vmem:[#allocation2 + $0x40] sm:$0xff]  }
 0x3c6   :  { %15629 = vmatmul.mubr.bf16.gmra.mxu0 %v8692_v10  ;;  %v8695_v21 = vor.u32 %v8693_v59, %v8691_v28  ;;  %v8699_v54 = vrot.slane %v8697_v42, 1  ;;  %v7441_v3 = vadd.f32 %v20003_v39, %v15550_v55  ;;  %v14446_v44 = vpack.c.bf16 %v7514_v24, %v7514_v24  ;;  %v22288_v59 = vld [vmem:[#allocation57_spill] sm:$0xff] }
 0x3c7   :  { %v7914_v62 = vsel %vm17995_vm15, %v7905_v31, %v20186_v5  ;;  %v7915_v60 = vrot.slane %v20186_v5, 4  ;;  %v6938_v16 = vadd.f32 %v19978_v40, %v6823_v1  ;;  %v7476_v36 = vmax.f32 %v7420_v43, 0.0  ;;  %v22290_v43 = vld [vmem:[#allocation51_spill] sm:$0xff] }
 0x3c8   :  { %8053 = vst [vmem:[#allocation2 + $0x78] sm:$0xf] %v7914_v62  ;;  %v8700_v35 = vsel %vm22287_vm6, %v8695_v21, %v8699_v54  ;;  %v6936_v47 = vadd.f32 %v19978_v40, %v6821_v38  ;;  %v7481_v63 = vmax.f32 %v7441_v3, 0.0  ;;  %v7937_v28 = vshrl.u32 %v14446_v44, 16 }
 0x3c9   :  { %v7940_v7 = vshll.u32 %v14446_v44, 16  ;;  %15632 = vmatprep.mubr.bf16.mxu0 %v8700_v35  ;;  %v6974_v55 = vmax.f32 %v6938_v16, 0.0  ;;  %v7433_v31 = vadd.f32 %v20003_v39, %v7432_v50  ;;  %v7512_v5 = vsel %vm22281_vm5, %v7476_v36, 0.0 }
 0x3ca   :  { %v16457_v9 = vld [vmem:[#allocation2 + $0x68] sm:$0xff]   ;;  %v6972_v0 = vmax.f32 %v6936_v47, 0.0  ;;  %v7517_v57 = vsel %vm22283_vm2, %v7481_v63, 0.0  ;;  %v8701_v10 = vshrl.u32 %v16442_v19, 16  ;;  %v7939_v25 = vrot.slane %v7937_v28, 6  ;;  %v16459_v50 = vld [vmem:[#allocation2 + $0x70] sm:$0xff]   ;;  %v15551_v28 = vpop.f32.mrf.mxu0 }
 0x3cb   :  { %v7942_v40 = vrot.slane %v7940_v7, 7  ;;  %vm22289_vm6 = vnez %v22288_v59  ;;  %v14444_v1 = vpack.c.bf16 %v7512_v5, %v7512_v5  ;;  %15593 = vmatmul.mubr.bf16.gmra.mxu1 %v16457_v9  ;;  %vm22291_vm10 = vnez %v22290_v43  ;;  %v20608_v61 = vld [vmem:[#allocation2 + $0x68] sm:$0xff]  }
 0x3cc   :  { %v7010_v42 = vsel %vm22289_vm6, %v6974_v55, 0.0  ;;  %v7008_v38 = vsel %vm22291_vm10, %v6972_v0, 0.0  ;;  %v14449_v24 = vpack.c.bf16 %v7517_v57, %v7517_v57  ;;  %v7479_v21 = vmax.f32 %v7433_v31, 0.0  ;;  %15596 = vmatprep.mubr.bf16.mxu1 %v16459_v50 }
 0x3cd   :  { %v8703_v3 = vor.u32 %v8701_v10, %v8699_v54  ;;  %v7943_v62 = vor.u32 %v7942_v40, %v7939_v25  ;;  %v7917_v44 = vshrl.u32 %v14444_v1, 16  ;;  %v7920_v16 = vshll.u32 %v14444_v1, 16  ;;  %v16447_v1 = vld [vmem:[#allocation2 + $0x48] sm:$0xff]  }
 0x3ce   :  { %v7043_v35 = vadd.f32 %v7042_v34, %v7008_v38  ;;  %v7967_v36 = vshrl.u32 %v14449_v24, 16  ;;  %v7970_v19 = vshll.u32 %v14449_v24, 16  ;;  %v7515_v47 = vsel %vm22286_vm4, %v7479_v21, 0.0  ;;  %v16450_v24 = vld [vmem:[#allocation2 + $0x50] sm:$0xff]  }
 0x3cf   :  { %v8705_v63 = vshll.u32 %v20201_v6, 16  ;;  %v22292_v7 = vrot.slane %v20171_v48, 4  ;;  %v7945_v54 = vrot.slane %v7943_v62, 4  ;;  %v7919_v31 = vrot.slane %v7917_v44, 6 }
 0x3d0   :  { %v7922_v9 = vrot.slane %v7920_v16, 7  ;;  %v7044_v34 = vadd.f32 %v7043_v35, %v20168_v17  ;;  %v7969_v5 = vrot.slane %v7967_v36, 6  ;;  %v7972_v0 = vrot.slane %v7970_v19, 7  ;;  %v7435_v19 = vpop.f32.mrf.mxu0 }
 0x3d1   :  { %v7944_v55 = vsel %vm17995_vm15, %v22292_v7, %v7943_v62  ;;  %v14447_v57 = vpack.c.bf16 %v7515_v47, %v7515_v47  ;;  %v8707_v25 = vrot.slane %v8705_v63, 1  ;;  %v7444_v40 = vadd.f32 %v20003_v39, %v15551_v28 }
 0x3d2   :  { %8056 = vst [vmem:[#allocation2 + $0x84] sm:$0xf] %v7944_v55  ;;  %v7923_v10 = vor.u32 %v7922_v9, %v7919_v31  ;;  %v8709_v38 = vshrl.u32 %v20201_v6, 16  ;;  %v7045_v21 = vadd.f32 %v7044_v34, %v7010_v42  ;;  %v20222_v50 = vor.u32 %v7972_v0, %v7969_v5  ;;  %v16452_v34 = vld [vmem:[#allocation2 + $0x58] sm:$0xff]  }
 0x3d3   :  { %v7947_v62 = vshrl.u32 %v14447_v57, 16  ;;  %v7950_v44 = vshll.u32 %v14447_v57, 16  ;;  %vm22293_vm2 = vsmask.f32 7424  ;;  %v7482_v36 = vmax.f32 %v7444_v40, 0.0  ;;  %v16455_v40 = vld [vmem:[#allocation2 + $0x60] sm:$0xff]  }
 0x3d4   :  { %v7924_v16 = vsel %vm17995_vm15, %v7915_v60, %v7923_v10  ;;  %v7925_v17 = vrot.slane %v7923_v10, 4  ;;  %v8708_v35 = vsel %vm22293_vm2, %v8703_v3, %v8707_v25  ;;  %v7046_v47 = vrot.slane %v7045_v21, 4 }
 0x3d5   :  { %8054 = vst [vmem:[#allocation2 + $0x7c] sm:$0xf] %v7924_v16  ;;  %v7975_v63 = vrot.slane %v20222_v50, 4  ;;  %v7949_v28 = vrot.slane %v7947_v62, 6  ;;  %v7952_v6 = vrot.slane %v7950_v44, 7  ;;  %15633 = vmatmul.mubr.bf16.gmra.mxu0 %v8708_v35  ;;  %v7518_v7 = vsel %vm22289_vm6, %v7482_v36, 0.0  ;;  %vm22294_vm6 = vmmov %vm22293_vm2 }
 0x3d6   :  { %v7934_v42 = vsel %vm17995_vm15, %v7925_v17, %v20171_v48  ;;  %v8713_v60 = vshll.u32 %v16447_v1, 16  ;;  %v7047_v55 = vadd.f32 %v7046_v47, %v7045_v21  ;;  %v14450_v31 = vpack.c.bf16 %v7518_v7, %v7518_v7 }
 0x3d7   :  { %8055 = vst [vmem:[#allocation2 + $0x80] sm:$0xf] %v7934_v42  ;;  %v20233_v3 = vor.u32 %v7952_v6, %v7949_v28  ;;  %v7436_v9 = vadd.f32 %v20003_v39, %v7435_v19  ;;  %v8711_v5 = vor.u32 %v8709_v38, %v8707_v25  ;;  %v8717_v57 = vshrl.u32 %v16447_v1, 16  ;;  %v16458_v38 = vld [vmem:[#allocation2 + $0x68] sm:$0xff]  }
 0x3d8   :  { %v8715_v0 = vrot.slane %v8713_v60, 1  ;;  %v8721_v10 = vshll.u32 %v16450_v24, 16  ;;  %v7048_v62 = vrot.slane %v7047_v55, 2  ;;  %v7977_v44 = vshrl.u32 %v14450_v31, 16 }
 0x3d9   :  { %v7954_v48 = vsel %vm17995_vm15, %v7945_v54, %v20233_v3  ;;  %v8725_v16 = vshrl.u32 %v16450_v24, 16  ;;  %v7980_v21 = vshll.u32 %v14450_v31, 16  ;;  %v7480_v35 = vmax.f32 %v7436_v9, 0.0 }
 0x3da   :  { %8057 = vst [vmem:[#allocation2 + $0x88] sm:$0xf] %v7954_v48  ;;  %v8716_v17 = vsel %vm22293_vm2, %v8711_v5, %v8715_v0  ;;  %v8719_v36 = vor.u32 %v8717_v57, %v8715_v0  ;;  %v7049_v39 = vadd.f32 %v7048_v62, %v7047_v55  ;;  %v7979_v19 = vrot.slane %v7977_v44, 6  ;;  %v16462_v57 = vld [vmem:[#allocation2 + $0x70] sm:$0xff]  }
 0x3db   :  { %15636 = vmatprep.mubr.bf16.mxu0 %v8716_v17  ;;  %v8723_v25 = vrot.slane %v8721_v10, 1  ;;  %v8729_v1 = vshll.u32 %v16452_v34, 16  ;;  %v7955_v47 = vrot.slane %v20233_v3, 4  ;;  %v7982_v28 = vrot.slane %v7980_v21, 7  ;;  %v8061_v3 = vld [vmem:[#allocation2 + $0x98] sm:$0x3] }
 0x3dc   :  { %v7516_v54 = vsel %vm22291_vm10, %v7480_v35, 0.0  ;;  %v8737_v6 = vshll.u32 %v16455_v40, 16  ;;  %v7050_v24 = vrot.slane %v7049_v39, 1  ;;  %v8733_v60 = vshrl.u32 %v16452_v34, 16  ;;  %v16464_v31 = vld [vmem:[#allocation2 + $0x78] sm:$0xff]  }
 0x3dd   :  { %v14448_v42 = vpack.c.bf16 %v7516_v54, %v7516_v54  ;;  %v8724_v7 = vsel %vm22294_vm6, %v8719_v36, %v8723_v25  ;;  %v7983_v9 = vor.u32 %v7982_v28, %v7979_v19  ;;  %v8727_v55 = vor.u32 %v8725_v16, %v8723_v25  ;;  %15597 = vmatmul.mubr.bf16.gmra.mxu1 %v16464_v31  ;;  %v16465_v17 = vld [vmem:[#allocation2 + $0x78] sm:$0xff]   ;;  %vm22295_vm6 = vmmov %vm22293_vm2 }
 0x3de   :  { %15637 = vmatmul.mubr.bf16.gmra.mxu0 %v8724_v7  ;;  %v8731_v5 = vrot.slane %v8729_v1, 1  ;;  %v8739_v0 = vrot.slane %v8737_v6, 1  ;;  %v16466_v10 = vld [vmem:[#allocation2 + $0x80] sm:$0xff]   ;;  %v7051_v62 = vadd.f32 %v7050_v24, %v7049_v39  ;;  %v8745_v21 = vshll.u32 %v16458_v38, 16 }
 0x3df   :  { %v7957_v48 = vshrl.u32 %v14448_v42, 16  ;;  %v7960_v44 = vshll.u32 %v14448_v42, 16  ;;  %v7984_v35 = vsel %vm17995_vm15, %v7975_v63, %v7983_v9  ;;  %v7985_v36 = vrot.slane %v7983_v9, 4  ;;  %15600 = vmatprep.mubr.bf16.mxu1 %v16466_v10  ;;  %v16474_v10 = vld [vmem:[#allocation2 + $0x8] sm:$0xff]  }
 0x3e0   :  { %v8732_v34 = vsel %vm22295_vm6, %v8727_v55, %v8731_v5  ;;  %v8741_v19 = vshrl.u32 %v16455_v40, 16  ;;  %v7052_v16 = vmul.f32 0.00390625, %v7051_v62  ;;  %8060 = vst [vmem:[#allocation2 + $0x94] sm:$0xf] %v7984_v35  ;;  %v8735_v39 = vor.u32 %v8733_v60, %v8731_v5  ;;  %vm22296_vm6 = vmmov %vm22293_vm2  ;;  %v16473_v55 = vld [vmem:[#allocation2] sm:$0xfe]  }
 0x3e1   :  { %v7959_v25 = vrot.slane %v7957_v48, 6  ;;  %v7962_v1 = vrot.slane %v7960_v44, 7  ;;  %15640 = vmatprep.mubr.bf16.mxu0 %v8732_v34  ;;  %v8062_v28 = vsel %vm18030_vm12, %v7985_v36, %v8061_v3  ;;  %v8747_v6 = vrot.slane %v8745_v21, 1  ;;  %v16469_v5 = vld [vmem:[#allocation2 + $0x80] sm:$0xff]   ;;  %vm22297_vm12 = vmmov %vm22293_vm2 }
 0x3e2   :  { %v8743_v54 = vor.u32 %v8741_v19, %v8739_v0  ;;  %7053 = vst [vmem:[#allocation4] sm:$0x1] %v7052_v16  ;;  %8063 = vst [vmem:[#allocation2 + $0x98] sm:$0x3] %v8062_v28  ;;  %v8753_v63 = vshll.u32 %v16462_v57, 16  ;;  %v8761_v7 = vshll.u32 %v16465_v17, 16  ;;  %v8740_v9 = vsel %vm22296_vm6, %v8735_v39, %v8739_v0 }
 0x3e3   :  { %v7963_v24 = vor.u32 %v7962_v1, %v7959_v25  ;;  %v8749_v29 = vshrl.u32 %v16458_v38, 16  ;;  %v8757_v3 = vshrl.u32 %v16462_v57, 16  ;;  %v8769_v21 = vshll.u32 %v16469_v5, 16  ;;  %v16479_v25 = vld [vmem:[#allocation2 + $0x10] sm:$0xff]   ;;  %v16482_v1 = vld [vmem:[#allocation2 + $0x18] sm:$0xff]   ;;  %vm22299_vm6 = vmmov %vm22293_vm2 }
 0x3e4   :  { %v8748_v42 = vsel %vm22293_vm2, %v8743_v54, %v8747_v6  ;;  %v8755_v60 = vrot.slane %v8753_v63, 1  ;;  %v8763_v48 = vrot.slane %v8761_v7, 1  ;;  %v9286_v35 = vrot.slane %v16473_v55, 1  ;;  %v16480_v55 = vld [vmem:[#allocation2 + $0x8] sm:$0xfe]  }
 0x3e5   :  { %v7964_v40 = vsel %vm17995_vm15, %v7955_v47, %v7963_v24  ;;  %v7965_v31 = vrot.slane %v7963_v24, 4  ;;  %v8751_v44 = vor.u32 %v8749_v29, %v8747_v6  ;;  %v9287_v0 = vrot.slane %v16474_v10, 1  ;;  %v16485_v29 = vld [vmem:[#allocation2 + $0x20] sm:$0xff]   ;;  %v16488_v10 = vld [vmem:[#allocation2 + $0x28] sm:$0xff]  }
 0x3e6   :  { %8058 = vst [vmem:[#allocation2 + $0x8c] sm:$0xf] %v7964_v40  ;;  %15641 = vmatmul.mubr.bf16.gmra.mxu0 %v8740_v9  ;;  %v8759_v47 = vor.u32 %v8757_v3, %v8755_v60  ;;  %v8771_v19 = vrot.slane %v8769_v21, 1  ;;  %v8765_v53 = vshrl.u32 %v16465_v17, 16  ;;  %v9289_v63 = vrot.slane %v16479_v25, 1  ;;  %v16487_v17 = vld [vmem:[%s21361_s3 + $0x130] sm:$0xff]  }
 0x3e7   :  { %v7974_v62 = vsel %vm17995_vm15, %v7965_v31, %v20222_v50  ;;  %15644 = vmatprep.mubr.bf16.mxu0 %v8748_v42  ;;  %v8756_v38 = vsel %vm22293_vm2, %v8751_v44, %v8755_v60  ;;  %v8773_v50 = vshrl.u32 %v16469_v5, 16  ;;  %vm22298_vm15 = vcmask 1046528   ;;  %v16663_v3 = vld [vmem:[%s21361_s3 + $0x138] sm:$0xff]   ;;  %v16490_v25 = vld [vmem:[#allocation2 + $0x30] sm:$0xff]  }
 0x3e8   :  { %8059 = vst [vmem:[#allocation2 + $0x90] sm:$0xf] %v7974_v62  ;;  %v8764_v36 = vsel %vm22297_vm12, %v8759_v47, %v8763_v48  ;;  %v9288_v57 = vsel %vm22298_vm15, %v9286_v35, %v9287_v0  ;;  %v8767_v54 = vor.u32 %v8765_v53, %v8763_v48  ;;  %v9291_v42 = vrot.slane %v16482_v1, 1  ;;  %vm22300_vm12 = vmmov %vm22293_vm2  ;;  %v16481_v62 = vld [vmem:[#allocation2 + $0x10] sm:$0xff]   ;;  %v16493_v47 = vld [vmem:[%s21361_s3 + $0x128] sm:$0xff]  }
 0x3e9   :  { %v8775_v6 = vor.u32 %v8773_v50, %v8771_v19  ;;  %vm22301_vm2 = vmmov %vm22298_vm15  ;;  %v9820_v21 = vrot.slane %v16480_v55, 1  ;;  %v9293_v35 = vrot.slane %v16485_v29, 1  ;;  %v16495_v55 = vld [vmem:[#allocation2 + $0x40] sm:$0xff]   ;;  %v16514_v29 = vld [vmem:[%s21361_s3 + $0x170] sm:$0xff]   ;;  %v11576_v12 = vrot.slane %v20608_v61, 2 }
 0x3ea   :  { %v8772_v40 = vsel %vm22300_vm12, %v8767_v54, %v8771_v19  ;;  %v9290_v9 = vsel %vm22301_vm2, %v9287_v0, %v9289_v63  ;;  %vm22302_vm15 = vmmov %vm22301_vm2  ;;  %v9295_v0 = vrot.slane %v16488_v10, 1  ;;  %v16484_v19 = vld [vmem:[#allocation2 + $0x18] sm:$0xff]  }
 0x3eb   :  { %v9292_v5 = vsel %vm22302_vm15, %v9289_v63, %v9291_v42  ;;  %vm22303_vm12 = vmmov %vm22301_vm2  ;;  %v9294_v50 = vsel %vm22301_vm2, %v9291_v42, %v9293_v35  ;;  %v9823_v54 = vrot.slane %v16484_v19, 1  ;;  %v9297_v63 = vrot.slane %v16490_v25, 1  ;;  %v16521_v19 = vld [vmem:[%s21361_s3 + $0x160] sm:$0xff]   ;;  %v20317_v25 = vld [vmem:[%s21361_s3 + $0x1b8] sm:$0xff]  }
 0x3ec   :  { %vm22304_vm15 = vmmov %vm22301_vm2  ;;  %v16584_v33 = vld [vmem:[#allocation2 + $0x98] ss:$0 sps:$4 sm:$0x33]  }
 0x3ed   :  { %v16471_v34 = vld [vmem:[#allocation2 + $0x88] sm:$0xff]  }
 0x3ee   :  { %15645 = vmatmul.mubr.bf16.gmra.mxu0 %v8756_v38  ;;  %v16472_v16 = vld [vmem:[#allocation2 + $0x88] sm:$0xff]   ;;  %15601 = vmatmul.mubr.bf16.gmra.mxu1 %v16471_v34  ;;  %v9821_v38 = vrot.slane %v16481_v62, 1 }
 0x3ef   :  { %15648 = vmatprep.mubr.bf16.mxu0 %v8764_v36  ;;  %v8777_v39 = vshll.u32 %v16472_v16, 16  ;;  %15672 = vmatprep.mubr.bf16.mxu1 %v9288_v57  ;;  %v16476_v28 = vld [vmem:[#allocation2 + $0x90] ss:$0 sps:$4 sm:$0x11]   ;;  %v8781_v60 = vshrl.u32 %v16472_v16, 16  ;;  %v16498_v16 = vld [vmem:[%s21361_s3 + $0x120] sm:$0xff]  }
 0x3f0   :  { %v8785_v31 = vshll.u32 %v16476_v28, 16  ;;  %v8069_v36 = vld [vmem:[#allocation2 + $0x98] sm:$0xe]  ;;  %v9822_v53 = vsel %vm22303_vm12, %v9820_v21, %v9821_v38  ;;  %v16486_v57 = vld [vmem:[#allocation2 + $0x20] sm:$0xff]   ;;  %vm22307_vm12 = vmmov %vm22301_vm2 }
 0x3f1   :  { %v8779_v24 = vrot.slane %v8777_v39, 1  ;;  %v8070_v1 = vsel %vm17985_vm8, 0, %v8069_v36  ;;  %v9296_v39 = vsel %vm22304_vm15, %v9293_v35, %v9295_v0  ;;  %v16492_v28 = vld [vmem:[#allocation2 + $0x38] sm:$0xff]   ;;  %vm22305_vm8 = vmmov %vm22301_vm2  ;;  %v16515_v62 = vld [vmem:[%s21361_s3 + $0x108] sm:$0xff]  }
 0x3f2   :  { %v8787_v44 = vrot.slane %v8785_v31, 1  ;;  %8071 = vst [vmem:[#allocation2 + $0x98] sm:$0xe] %v8070_v1  ;;  %v9299_v42 = vrot.slane %v16492_v28, 1  ;;  %v16508_v31 = vld [vmem:[%s21361_s3 + $0x110] sm:$0xff]   ;;  %v16494_v21 = vld [vmem:[#allocation2 + $0x38] sm:$0xff]   ;;  %vm22308_vm15 = vmmov %vm22301_vm2 }
 0x3f3   :  { %v8780_v7 = vsel %vm22299_vm6, %v8775_v6, %v8779_v24  ;;  %v8783_v48 = vor.u32 %v8781_v60, %v8779_v24  ;;  %v16503_v6 = vld [vmem:[%s21361_s3 + $0x118] sm:$0xff]   ;;  %v9825_v24 = vrot.slane %v16486_v57, 1  ;;  %v16624_v41 = vld [vmem:[#allocation2 + $0x88] sm:$0xff]  }
 0x3f4   :  { %v9300_v60 = vsel %vm22301_vm2, %v9297_v63, %v9299_v42  ;;  %v16524_v57 = vld [vmem:[%s21361_s3 + $0x158] sm:$0xff]  }
 0x3f5   :  { %v8788_v34 = vsel %vm22299_vm6, %v8783_v48, %v8787_v44  ;;  %vm22306_vm6 = vmmov %vm22301_vm2  ;;  %v9829_v48 = vrot.slane %v16491_v13, 1  ;;  %v9301_v44 = vrot.slane %v16495_v55, 1  ;;  %v16529_v13 = vld [vmem:[%s21361_s3 + $0x150] sm:$0xff]  }
 0x3f6   :  { %15649 = vmatmul.mubr.bf16.gmra.mxu0 %v8772_v40  ;;  %15673 = vmatmul.mubr.bf16.vlgmr.msra.gmra.mxu1 %v9290_v9  ;;  %v9824_v40 = vsel %vm22305_vm8, %v9821_v38, %v9823_v54  ;;  %v9298_v9 = vsel %vm22307_vm12, %v9295_v0, %v9297_v63  ;;  %vm22309_vm8 = vmmov %vm22301_vm2  ;;  %v16496_v38 = vld [vmem:[#allocation2 + $0x40] sm:$0xff]  }
 0x3f7   :  { %15652 = vmatprep.mubr.bf16.mxu0 %v8780_v7  ;;  %15761 = vmatpush3.bf16.msra.mxu1 %v16663_v3  ;;  %v16489_v7 = vld [vmem:[#allocation2 + $0x28] sm:$0xff]   ;;  %vm22311_vm12 = vmmov %vm22301_vm2  ;;  %v9833_v1 = vrot.slane %v16496_v38, 1  ;;  %v20340_v38 = vld [vmem:[%s21361_s3 + $0x1f8] sm:$0xff]  }
 0x3f8   :  { %15676 = vmatprep.mubr.bf16.mxu1 %v9292_v5  ;;  %15762 = vmatprep.subr.bf16.mxu1 %v16487_v17  ;;  %v16497_v5 = vld [vmem:[#allocation2 + $0x48] sm:$0xff]   ;;  %v9827_v10 = vrot.slane %v16489_v7, 1  ;;  %v16505_v7 = vld [vmem:[#allocation2 + $0x60] sm:$0xff]  }
 0x3f9   :  { %v16517_v3 = vld [vmem:[%s21361_s3 + $0x168] sm:$0xff]  }
 0x3fa   :  { %v9828_v35 = vsel %vm22308_vm15, %v9825_v24, %v9827_v10  ;;  %v9830_v0 = vsel %vm22309_vm8, %v9827_v10, %v9829_v48  ;;  %vm22312_vm15 = vmmov %vm22301_vm2  ;;  %v16504_v10 = vld [vmem:[#allocation2 + $0x58] sm:$0xff]  }
 0x3fb   :  { %15763 = vmatpush3.bf16.msra.mxu1 %v16487_v17  ;;  %v9826_v17 = vsel %vm22306_vm6, %v9823_v54, %v9825_v24  ;;  %vm22310_vm6 = vmmov %vm22301_vm2  ;;  %v16499_v54 = vld [vmem:[#allocation2 + $0x48] sm:$0xff]   ;;  %v16501_v24 = vld [vmem:[#allocation2 + $0x50] sm:$0xff]  }
 0x3fc   :  { %15764 = vmatprep.subr.bf16.mxu1 %v16493_v47  ;;  %v9302_v36 = vsel %vm22310_vm6, %v9299_v42, %v9301_v44  ;;  %vm22313_vm8 = vmmov %vm22301_vm2  ;;  %v9837_v55 = vrot.slane %v16501_v24, 1  ;;  %v16528_v24 = vld [vmem:[#allocation2 + $0x10] sm:$0xff]  }
 0x3fd   :  { %vm22314_vm6 = vmmov %vm22301_vm2 }
 0x3fe   :  { %15653 = vmatmul.mubr.bf16.gmra.mxu0 %v8788_v34  ;;  %15677 = vmatmul.mubr.bf16.gmra.mxu1 %v9294_v50  ;;  %v16500_v34 = vld [vmem:[#allocation2 + $0x50] sm:$0xff]   ;;  %v9831_v50 = vrot.slane %v16494_v21, 1 }
 0x3ff   :  { %15724 = vmatprep.mubr.bf16.mxu0 %v9822_v53  ;;  %15680 = vmatprep.mubr.bf16.mxu1 %v9296_v39  ;;  %v16502_v53 = vld [vmem:[#allocation2 + $0x58] sm:$0xff]   ;;  %v9305_v39 = vrot.slane %v16500_v34, 1 }
 0x400   :  { %15765 = vmatpush3.bf16.msra.mxu1 %v16493_v47  ;;  %v9303_v47 = vrot.slane %v16497_v5, 1  ;;  %v9307_v28 = vrot.slane %v16502_v53, 1  ;;  %v9834_v63 = vsel %vm22312_vm15, %v9831_v50, %v9833_v1  ;;  %vm22316_vm15 = vmmov %vm22301_vm2  ;;  %v16512_v53 = vld [vmem:[#allocation2 + $0x70] sm:$0xff]  }
 0x401   :  { %15766 = vmatprep.subr.bf16.mxu1 %v16498_v16 }
 0x402   :  { %v9306_v42 = vsel %vm22313_vm8, %v9303_v47, %v9305_v39  ;;  %vm22317_vm8 = vmmov %vm22301_vm2 }
 0x404   :  { %15767 = vmatpush3.bf16.msra.mxu1 %v16498_v16  ;;  %v9304_v16 = vsel %vm22311_vm12, %v9301_v44, %v9303_v47  ;;  %vm22315_vm12 = vmmov %vm22301_vm2  ;;  %v16511_v44 = vld [vmem:[#allocation2 + $0x70] sm:$0xff]   ;;  %v16537_v47 = vld [vmem:[%s21361_s3 + $0x140] sm:$0xff]  }
 0x405   :  { %15768 = vmatprep.subr.bf16.mxu1 %v16503_v6 }
 0x406   :  { %15725 = vmatmul.mubr.bf16.vlgmr.msra.gmra.mxu0 %v9824_v40  ;;  %15681 = vmatmul.mubr.bf16.gmra.mxu1 %v9298_v9  ;;  %v9308_v40 = vsel %vm22314_vm6, %v9305_v39, %v9307_v28  ;;  %v16531_v9 = vld [vmem:[%s21361_s3 + $0x148] sm:$0xff]   ;;  %vm22318_vm6 = vmmov %vm22301_vm2 }
 0x407   :  { %15728 = vmatprep.mubr.bf16.mxu0 %v9826_v17  ;;  %15684 = vmatprep.mubr.bf16.mxu1 %v9300_v60  ;;  %v9835_v17 = vrot.slane %v16499_v54, 1  ;;  %v16520_v39 = vld [vmem:[#allocation2 + $0x88] sm:$0xff]  }
 0x408   :  { %15769 = vmatpush3.bf16.msra.mxu1 %v16503_v6  ;;  %15813 = vmatpush3.bf16.msra.mxu0 %v20151_v49  ;;  %v16522_v49 = vld [vmem:[%s21361_s3 + $0x100] sm:$0xff]   ;;  %v9832_v6 = vsel %vm22301_vm2, %v9829_v48, %v9831_v50  ;;  %v16527_v54 = vld [vmem:[#allocation2 + $0x8] sm:$0xfe]  }
 0x409   :  { %15770 = vmatprep.subr.bf16.mxu1 %v16508_v31  ;;  %15814 = vmatprep.subr.bf16.mxu0 %v16514_v29  ;;  %v9836_v5 = vsel %vm22315_vm12, %v9833_v1, %v9835_v17  ;;  %vm22319_vm12 = vmmov %vm22301_vm2  ;;  %v16518_v1 = vld [vmem:[#allocation2 + $0x80] sm:$0xff]  }
 0x40c   :  { %15771 = vmatpush3.bf16.msra.mxu1 %v16508_v31  ;;  %15815 = vmatpush3.bf16.msra.mxu0 %v16514_v29  ;;  %v16507_v31 = vld [vmem:[#allocation2 + $0x68] sm:$0xff]   ;;  %v9309_v29 = vrot.slane %v16505_v7, 1  ;;  %v9319_v7 = vrot.slane %v16520_v39, 1 }
 0x40d   :  { %15772 = vmatprep.subr.bf16.mxu1 %v16515_v62  ;;  %15816 = vmatprep.subr.bf16.mxu0 %v16517_v3  ;;  %v9311_v60 = vrot.slane %v16507_v31, 1  ;;  %v16516_v31 = vld [vmem:[#allocation2 + $0x78] sm:$0xff]   ;;  %v16539_v39 = vld [vmem:[#allocation2 + $0x28] sm:$0xff]  }
 0x40e   :  { %15729 = vmatmul.mubr.bf16.gmra.mxu0 %v9828_v35  ;;  %15685 = vmatmul.mubr.bf16.gmra.mxu1 %v9302_v36  ;;  %v9310_v48 = vsel %vm22316_vm15, %v9307_v28, %v9309_v29  ;;  %v16513_v35 = vld [vmem:[#allocation2 + $0x78] sm:$0xff]   ;;  %v9313_v36 = vrot.slane %v16511_v44, 1  ;;  %vm22320_vm15 = vmmov %vm22301_vm2 }
 0x40f   :  { %15732 = vmatprep.mubr.bf16.mxu0 %v9830_v0  ;;  %15688 = vmatprep.mubr.bf16.mxu1 %v9304_v16  ;;  %v9312_v21 = vsel %vm22317_vm8, %v9309_v29, %v9311_v60  ;;  %v9315_v34 = vrot.slane %v16513_v35, 1  ;;  %v16509_v16 = vld [vmem:[#allocation2 + $0x68] sm:$0xff]   ;;  %vm22321_vm8 = vmmov %vm22301_vm2  ;;  %v10366_v29 = vshll.u32 %v16528_v24, 16  ;;  %v9847_v35 = vrot.slane %v16516_v31, 1 }
 0x410   :  { %15773 = vmatpush3.bf16.msra.mxu1 %v16515_v62  ;;  %15817 = vmatpush3.bf16.msra.mxu0 %v16517_v3  ;;  %v16506_v62 = vld [vmem:[#allocation2 + $0x60] sm:$0xff]   ;;  %v9838_v3 = vsel %vm22301_vm2, %v9835_v17, %v9837_v55  ;;  %v16525_v17 = vld [vmem:[#allocation2 + $0x90] ss:$0 sps:$4 sm:$0x11]  }
 0x411   :  { %15774 = vmatprep.subr.bf16.mxu1 %v16522_v49  ;;  %15818 = vmatprep.subr.bf16.mxu0 %v16521_v19  ;;  %v9841_v0 = vrot.slane %v16506_v62, 1  ;;  %v9316_v28 = vsel %vm22320_vm15, %v9313_v36, %v9315_v34  ;;  %v16519_v62 = vld [vmem:[#allocation2 + $0x80] sm:$0xff]   ;;  %vm22324_vm15 = vmmov %vm22301_vm2 }
 0x414   :  { %15775 = vmatpush3.bf16.msra.mxu1 %v16522_v49  ;;  %15819 = vmatpush3.bf16.msra.mxu0 %v16521_v19  ;;  %v9839_v49 = vrot.slane %v16504_v10, 1 }
 0x415   :  { %15864 = vmatprep.subr.bf16.mxu1 %v20317_v25  ;;  %15820 = vmatprep.subr.bf16.mxu0 %v16524_v57 }
 0x416   :  { %15733 = vmatmul.mubr.bf16.gmra.mxu0 %v9832_v6  ;;  %15689 = vmatmul.mubr.bf16.gmra.mxu1 %v9306_v42  ;;  %v9840_v19 = vsel %vm22318_vm6, %v9837_v55, %v9839_v49  ;;  %v9842_v50 = vsel %vm22319_vm12, %v9839_v49, %v9841_v0  ;;  %v9843_v6 = vrot.slane %v16509_v16, 1  ;;  %v9317_v42 = vrot.slane %v16518_v1, 1  ;;  %vm22322_vm6 = vmmov %vm22301_vm2 }
 0x417   :  { %15736 = vmatprep.mubr.bf16.mxu0 %v9834_v63  ;;  %15692 = vmatprep.mubr.bf16.mxu1 %v9308_v40  ;;  %v9845_v63 = vrot.slane %v16512_v53, 1  ;;  %v10358_v40 = vshll.u32 %v16527_v54, 16  ;;  %v10363_v55 = vshrl.u32 %v16528_v24, 16  ;;  %vm22323_vm12 = vmmov %vm22301_vm2 }
 0x418   :  { %15821 = vmatpush3.bf16.msra.mxu0 %v16524_v57  ;;  %v9314_v57 = vsel %vm22301_vm2, %v9311_v60, %v9313_v36  ;;  %v16533_v60 = vld [vmem:[#allocation2 + $0x18] sm:$0xff]   ;;  %v9318_v10 = vsel %vm22323_vm12, %v9315_v34, %v9317_v42  ;;  %v9849_v36 = vrot.slane %v16519_v62, 1  ;;  %vm22327_vm12 = vsmask.f32 6400 }
 0x419   :  { %15822 = vmatprep.subr.bf16.mxu0 %v16529_v13  ;;  %v10360_v44 = vrot.slane %v10358_v40, 2  ;;  %v10365_v49 = vrot.slane %v10363_v55, 1  ;;  %v10372_v16 = vshrl.u32 %v16533_v60, 16  ;;  %v10375_v53 = vshll.u32 %v16533_v60, 16 }
 0x41a   :  { %v10390_v62 = vshrl.u32 %v16539_v39, 16 }
 0x41b   :  { %v10374_v40 = vrot.slane %v10372_v16, 1  ;;  %v10377_v31 = vrot.slane %v10375_v53, 2  ;;  %v16541_v16 = vld [vmem:[%s21361_s3 + $0x1b0] sm:$0xff]  }
 0x41c   :  { %15823 = vmatpush3.bf16.msra.mxu0 %v16529_v13  ;;  %v10355_v13 = vshrl.u32 %v16527_v54, 16  ;;  %v16523_v54 = vld [vmem:[#allocation2 + $0x88] sm:$0xff]  }
 0x41d   :  { %15824 = vmatprep.subr.bf16.mxu0 %v16531_v9 }
 0x41e   :  { %15737 = vmatmul.mubr.bf16.gmra.mxu0 %v9836_v5  ;;  %15693 = vmatmul.mubr.bf16.gmra.mxu1 %v9310_v48  ;;  %v9846_v5 = vsel %vm22322_vm6, %v9843_v6, %v9845_v63  ;;  %v10357_v48 = vrot.slane %v10355_v13, 1  ;;  %vm22326_vm6 = vmmov %vm22301_vm2 }
 0x41f   :  { %15740 = vmatprep.mubr.bf16.mxu0 %v9838_v3  ;;  %15696 = vmatprep.mubr.bf16.mxu1 %v9312_v21  ;;  %v9320_v3 = vsel %vm22301_vm2, %v9317_v42, %v9319_v7 }
 0x420   :  { %15825 = vmatpush3.bf16.msra.mxu0 %v16531_v9  ;;  %v9844_v9 = vsel %vm22321_vm8, %v9841_v0, %v9843_v6  ;;  %v10368_v0 = vrot.slane %v10366_v29, 2  ;;  %v16526_v6 = vld [vmem:[#allocation2 + $0x90] sm:$0xff]   ;;  %vm22325_vm8 = vmmov %vm22301_vm2 }
 0x421   :  { %15826 = vmatprep.subr.bf16.mxu0 %v16537_v47  ;;  %v9850_v42 = vsel %vm22325_vm8, %v9847_v35, %v9849_v36  ;;  %v16542_v29 = vld [vmem:[#allocation2 + $0x30] sm:$0xff]   ;;  %vm22329_vm8 = vmmov %vm22327_vm12 }
 0x422   :  { %v20351_v21 = vpop.f32.mrf.mxu1  ;;  %v10369_v24 = vor.u32 %v10368_v0, %v10365_v49  ;;  %v16544_v49 = vld [vmem:[#allocation2 + $0x38] sm:$0xff]  }
 0x424   :  { %15827 = vmatpush3.bf16.msra.mxu0 %v16537_v47  ;;  %v16536_v47 = vld [vmem:[#allocation2 + $0x20] sm:$0xff]   ;;  %v20353_v1 = vpop.f32.mrf.mxu1 }
 0x425   :  { %15916 = vmatprep.subr.bf16.mxu0 %v20340_v38  ;;  %v10381_v34 = vshrl.u32 %v16536_v47, 16 }
 0x426   :  { %15741 = vmatmul.mubr.bf16.gmra.mxu0 %v9840_v19  ;;  %15697 = vmatmul.mubr.bf16.gmra.mxu1 %v9314_v57  ;;  %v9321_v19 = vrot.slane %v16525_v17, 1  ;;  %v10384_v57 = vshll.u32 %v16536_v47, 16  ;;  %v20359_v60 = vpop.f32.mrf.mxu1 }
 0x427   :  { %15744 = vmatprep.mubr.bf16.mxu0 %v9842_v50  ;;  %15700 = vmatprep.mubr.bf16.mxu1 %v9316_v28  ;;  %v10361_v50 = vor.u32 %v10360_v44, %v10357_v48  ;;  %v9848_v28 = vsel %vm22324_vm15, %v9845_v63, %v9847_v35  ;;  %v9851_v63 = vrot.slane %v16523_v54, 1  ;;  %v10399_v44 = vshrl.u32 %v16542_v29, 16  ;;  %v20363_v35 = vld [vmem:[#allocation2 + $0x10] sm:$0xff]   ;;  %vm22328_vm15 = vmmov %vm22301_vm2 }
 0x428   :  { %v9322_v13 = vsel %vm22326_vm6, %v9319_v7, %v9321_v19  ;;  %v10386_v55 = vrot.slane %v10384_v57, 2  ;;  %v10402_v7 = vshll.u32 %v16542_v29, 16  ;;  %v20361_v47 = vpop.f32.mrf.mxu1  ;;  %v16530_v19 = vld [vmem:[#allocation2 + $0x98] ss:$0 sps:$4 sm:$0x11]   ;;  %vm22330_vm6 = vmmov %vm22329_vm8 }
 0x429   :  { %v10370_v17 = vsel %vm22327_vm12, %v10361_v50, %v10369_v24  ;;  %v9852_v0 = vsel %vm22301_vm2, %v9849_v36, %v9851_v63  ;;  %vm22331_vm12 = vmmov %vm22301_vm2  ;;  %vm22332_vm2 = vcmask 1045504  }
 0x42a   :  { %v10404_v54 = vrot.slane %v10402_v7, 2  ;;  %v16549_v7 = vld [vmem:[#allocation2 + $0x48] sm:$0xff]  }
 0x42d   :  { %v20372_v36 = vpop.f32.mrf.mxu1 }
 0x42e   :  { %15745 = vmatmul.mubr.bf16.gmra.mxu0 %v9844_v9  ;;  %15701 = vmatmul.mubr.bf16.gmra.mxu1 %v9318_v10  ;;  %v10383_v9 = vrot.slane %v10381_v34, 1  ;;  %v10378_v10 = vor.u32 %v10377_v31, %v10374_v40  ;;  %v10392_v34 = vrot.slane %v10390_v62, 1  ;;  %v11022_v40 = vrot.slane %v20363_v35, 2  ;;  %v16552_v35 = vld [vmem:[%s21361_s3 + $0x1a0] sm:$0xff]  }
 0x42f   :  { %15748 = vmatprep.mubr.bf16.mxu0 %v9846_v5  ;;  %15704 = vmatprep.mubr.bf16.mxu1 %v9320_v3  ;;  %v9853_v5 = vrot.slane %v16526_v6, 1  ;;  %v10393_v3 = vshll.u32 %v16539_v39, 16  ;;  %v16546_v6 = vld [vmem:[#allocation2 + $0x40] sm:$0xff]  }
 0x430   :  { %v10387_v48 = vor.u32 %v10386_v55, %v10383_v9  ;;  %v10379_v50 = vsel %vm22329_vm8, %v10369_v24, %v10378_v10  ;;  %v16547_v24 = vld [vmem:[%s21361_s3 + $0x1a8] sm:$0xff]   ;;  %v10411_v9 = vshll.u32 %v16544_v49, 16  ;;  %v10417_v29 = vshrl.u32 %v16546_v6, 16  ;;  %vm22334_vm8 = vmmov %vm22330_vm6 }
 0x431   :  { %v9854_v53 = vsel %vm22328_vm15, %v9851_v63, %v9853_v5  ;;  %v10395_v57 = vrot.slane %v10393_v3, 2  ;;  %v10420_v63 = vshll.u32 %v16546_v6, 16  ;;  %v16538_v3 = vld [vmem:[#allocation2 + $0x18] sm:$0xff]   ;;  %vm22333_vm15 = vmmov %vm22330_vm6 }
 0x432   :  { %v10388_v39 = vsel %vm22330_vm6, %v10378_v10, %v10387_v48  ;;  %v20379_v10 = vpop.f32.mrf.mxu1  ;;  %vm22335_vm6 = vmmov %vm22332_vm2 }
 0x433   :  { %v10396_v31 = vor.u32 %v10395_v57, %v10392_v34  ;;  %v10419_v34 = vrot.slane %v10417_v29, 1 }
 0x434   :  { %v20390_v57 = vpop.f32.mrf.mxu1 }
 0x436   :  { %15749 = vmatmul.mubr.bf16.gmra.mxu0 %v9848_v28  ;;  %15705 = vmatmul.mubr.bf16.gmra.mxu1 %v9322_v13  ;;  %v10401_v28 = vrot.slane %v10399_v44, 1  ;;  %v9855_v13 = vrot.slane %v16530_v19, 1 }
 0x437   :  { %15752 = vmatprep.mubr.bf16.mxu0 %v9850_v42  ;;  %15776 = vmatprep.mubr.bf16.mxu1 %v10370_v17  ;;  %v16534_v42 = vld [vmem:[#allocation2 + $0x8] sm:$0xfc]   ;;  %v10408_v17 = vshrl.u32 %v16544_v49, 16 }
 0x438   :  { %v10405_v55 = vor.u32 %v10404_v54, %v10401_v28  ;;  %v11021_v62 = vrot.slane %v16534_v42, 2  ;;  %v9856_v44 = vsel %vm22331_vm12, %v9853_v5, %v9855_v13  ;;  %v10422_v5 = vrot.slane %v10420_v63, 2  ;;  %v16557_v28 = vld [vmem:[%s21361_s3 + $0x198] sm:$0xff]   ;;  %v20398_v63 = vpop.f32.mrf.mxu1  ;;  %vm22336_vm12 = vmmov %vm22332_vm2 }
 0x439   :  { %v10410_v19 = vrot.slane %v10408_v17, 1  ;;  %v10426_v54 = vshrl.u32 %v16549_v7, 16  ;;  %v10429_v42 = vshll.u32 %v16549_v7, 16 }
 0x43a   :  { %v11023_v49 = vsel %vm22332_vm2, %v11021_v62, %v11022_v40  ;;  %v10423_v29 = vor.u32 %v10422_v5, %v10419_v34  ;;  %v16562_v62 = vld [vmem:[%s21361_s3 + $0x190] sm:$0xff]   ;;  %vm22337_vm2 = vmmov %vm22334_vm8 }
 0x43e   :  { %15753 = vmatmul.mubr.bf16.gmra.mxu0 %v9852_v0  ;;  %15777 = vmatmul.mubr.bf16.vlgmr.msra.gmra.mxu1 %v10379_v50  ;;  %v10397_v0 = vsel %vm22333_vm15, %v10387_v48, %v10396_v31  ;;  %v16551_v50 = vld [vmem:[#allocation2 + $0x50] sm:$0xff]   ;;  %vm22338_vm15 = vmmov %vm22337_vm2 }
 0x43f   :  { %15756 = vmatprep.mubr.bf16.mxu0 %v9854_v53  ;;  %15865 = vmatpush3.bf16.msra.mxu1 %v20317_v25  ;;  %v20381_v25 = vld [vmem:[#allocation2 + $0x20] sm:$0xff]   ;;  %v10413_v53 = vrot.slane %v10411_v9, 2  ;;  %v10435_v13 = vshrl.u32 %v16551_v50, 16  ;;  %v10438_v17 = vshll.u32 %v16551_v50, 16  ;;  %v20396_v9 = vld [vmem:[#allocation2 + $0x30] sm:$0xff]  }
 0x440   :  { %15780 = vmatprep.mubr.bf16.mxu1 %v10388_v39  ;;  %15866 = vmatprep.subr.bf16.mxu1 %v16541_v16  ;;  %v11024_v39 = vrot.slane %v16538_v3, 2  ;;  %v11026_v48 = vrot.slane %v20381_v25, 2  ;;  %v16556_v25 = vld [vmem:[#allocation2 + $0x60] sm:$0xff]   ;;  %v11030_v5 = vrot.slane %v20396_v9, 2 }
 0x441   :  { %v10414_v6 = vor.u32 %v10413_v53, %v10410_v19  ;;  %v10437_v53 = vrot.slane %v10435_v13, 1  ;;  %v10440_v50 = vrot.slane %v10438_v17, 2  ;;  %v10453_v13 = vshrl.u32 %v16556_v25, 16 }
 0x442   :  { %v11025_v3 = vsel %vm22335_vm6, %v11022_v40, %v11024_v39  ;;  %v11027_v7 = vsel %vm22336_vm12, %v11024_v39, %v11026_v48  ;;  %v16569_v40 = vld [vmem:[%s21361_s3 + $0x188] sm:$0xff]   ;;  %v10456_v17 = vshll.u32 %v16556_v25, 16  ;;  %vm22340_vm12 = vmmov %vm22337_vm2 }
 0x443   :  { %15867 = vmatpush3.bf16.msra.mxu1 %v16541_v16  ;;  %v10406_v16 = vsel %vm22334_vm8, %v10396_v31, %v10405_v55  ;;  %v16543_v31 = vld [vmem:[#allocation2 + $0x28] sm:$0xff]   ;;  %v10424_v19 = vsel %vm22338_vm15, %v10414_v6, %v10423_v29  ;;  %vm22339_vm8 = vmmov %vm22335_vm6 }
 0x444   :  { %15868 = vmatprep.subr.bf16.mxu1 %v16547_v24  ;;  %v11028_v34 = vrot.slane %v16543_v31, 2  ;;  %v16576_v31 = vld [vmem:[%s21361_s3 + $0x180] sm:$0xff]   ;;  %vm22341_vm15 = vmmov %vm22335_vm6 }
 0x446   :  { %15757 = vmatmul.mubr.bf16.gmra.mxu0 %v9856_v44  ;;  %15781 = vmatmul.mubr.bf16.gmra.mxu1 %v10397_v0  ;;  %v16568_v44 = vld [vmem:[%s21361_s3 + $0x1f0] sm:$0xff]   ;;  %v10428_v0 = vrot.slane %v10426_v54, 1 }
 0x447   :  { %15828 = vmatprep.mubr.bf16.mxu0 %v11023_v49  ;;  %15784 = vmatprep.mubr.bf16.mxu1 %v10406_v16  ;;  %v10415_v49 = vsel %vm22337_vm2, %v10405_v55, %v10414_v6  ;;  %v20413_v16 = vpop.f32.mrf.mxu1  ;;  %v16571_v55 = vld [vmem:[%s21361_s3 + $0x1e8] sm:$0xff]  }
 0x448   :  { %15869 = vmatpush3.bf16.msra.mxu1 %v16547_v24  ;;  %v16554_v24 = vld [vmem:[#allocation2 + $0x58] sm:$0xff]  }
 0x449   :  { %15870 = vmatprep.subr.bf16.mxu1 %v16552_v35  ;;  %v10444_v54 = vshrl.u32 %v16554_v24, 16  ;;  %v10447_v6 = vshll.u32 %v16554_v24, 16  ;;  %v20428_v24 = vld [vmem:[#allocation2 + $0x40] sm:$0xff]  }
 0x44b   :  { %v10446_v25 = vrot.slane %v10444_v54, 1 }
 0x44c   :  { %15871 = vmatpush3.bf16.msra.mxu1 %v16552_v35  ;;  %v10431_v35 = vrot.slane %v10429_v42, 2  ;;  %v10441_v42 = vor.u32 %v10440_v50, %v10437_v53  ;;  %v20439_v50 = vld [vmem:[%s21361_s3 + $0x238] sm:$0xff]  }
 0x44d   :  { %15872 = vmatprep.subr.bf16.mxu1 %v16557_v28 }
 0x44e   :  { %15829 = vmatmul.mubr.bf16.vlgmr.msra.gmra.mxu0 %v11025_v3  ;;  %15785 = vmatmul.mubr.bf16.gmra.mxu1 %v10415_v49  ;;  %v10432_v39 = vor.u32 %v10431_v35, %v10428_v0  ;;  %v20420_v3 = vpop.f32.mrf.mxu1  ;;  %v10449_v49 = vrot.slane %v10447_v6, 2  ;;  %v16559_v0 = vld [vmem:[#allocation2 + $0x68] sm:$0xff]   ;;  %v10458_v35 = vrot.slane %v10456_v17, 2 }
 0x44f   :  { %15832 = vmatprep.mubr.bf16.mxu0 %v11027_v7  ;;  %15788 = vmatprep.mubr.bf16.mxu1 %v10424_v19  ;;  %v11029_v7 = vsel %vm22339_vm8, %v11026_v48, %v11028_v34  ;;  %v16575_v48 = vld [vmem:[%s21361_s3 + $0x1e0] sm:$0xff]   ;;  %v16561_v19 = vld [vmem:[#allocation2 + $0x70] sm:$0xff]   ;;  %v10462_v6 = vshrl.u32 %v16559_v0, 16  ;;  %vm22342_vm8 = vmmov %vm22335_vm6 }
 0x450   :  { %15873 = vmatpush3.bf16.msra.mxu1 %v16557_v28  ;;  %15917 = vmatpush3.bf16.msra.mxu0 %v20340_v38  ;;  %v16548_v28 = vld [vmem:[#allocation2 + $0x38] sm:$0xff]   ;;  %v11031_v38 = vsel %vm22335_vm6, %v11028_v34, %v11030_v5  ;;  %v10433_v9 = vsel %vm22340_vm12, %v10423_v29, %v10432_v39  ;;  %v20434_v53 = vpop.f32.mrf.mxu1  ;;  %v11034_v34 = vrot.slane %v20428_v24, 2  ;;  %v10450_v54 = vor.u32 %v10449_v49, %v10446_v25  ;;  %vm22343_vm6 = vmmov %vm22337_vm2  ;;  %v20451_v25 = vld [vmem:[#allocation2 + $0x50] sm:$0xff]  }
 0x451   :  { %15874 = vmatprep.subr.bf16.mxu1 %v16562_v62  ;;  %15918 = vmatprep.subr.bf16.mxu0 %v16568_v44  ;;  %v11032_v29 = vrot.slane %v16548_v28, 2  ;;  %v10474_v28 = vshll.u32 %v16561_v19, 16  ;;  %v10464_v49 = vrot.slane %v10462_v6, 1  ;;  %vm22344_vm12 = vmmov %vm22337_vm2 }
 0x452   :  { %v10451_v24 = vsel %vm22343_vm6, %v10441_v42, %v10450_v54 }
 0x454   :  { %15875 = vmatpush3.bf16.msra.mxu1 %v16562_v62  ;;  %15919 = vmatpush3.bf16.msra.mxu0 %v16568_v44  ;;  %v10442_v62 = vsel %vm22337_vm2, %v10432_v39, %v10441_v42  ;;  %v10455_v44 = vrot.slane %v10453_v13, 1  ;;  %v10465_v39 = vshll.u32 %v16559_v0, 16  ;;  %v16578_v13 = vld [vmem:[%s21361_s3 + $0x1d8] sm:$0xff]   ;;  %vm22345_vm2 = vmmov %vm22342_vm8 }
 0x455   :  { %15876 = vmatprep.subr.bf16.mxu1 %v16569_v40  ;;  %15920 = vmatprep.subr.bf16.mxu0 %v16571_v55 }
 0x456   :  { %15833 = vmatmul.mubr.bf16.gmra.mxu0 %v11029_v7  ;;  %15789 = vmatmul.mubr.bf16.gmra.mxu1 %v10433_v9  ;;  %v10459_v17 = vor.u32 %v10458_v35, %v10455_v44  ;;  %v11033_v7 = vsel %vm22341_vm15, %v11030_v5, %v11032_v29  ;;  %v11035_v9 = vsel %vm22342_vm8, %v11032_v29, %v11034_v34  ;;  %v10467_v0 = vrot.slane %v10465_v39, 2  ;;  %v16567_v35 = vld [vmem:[#allocation2 + $0x80] sm:$0xff]   ;;  %vm22346_vm15 = vmmov %vm22345_vm2 }
 0x457   :  { %15836 = vmatprep.mubr.bf16.mxu0 %v11031_v38  ;;  %15792 = vmatprep.mubr.bf16.mxu1 %v10442_v62  ;;  %v16553_v38 = vld [vmem:[#allocation2 + $0x48] sm:$0xff]   ;;  %v16565_v62 = vld [vmem:[#allocation2 + $0x78] sm:$0xff]   ;;  %v10476_v44 = vrot.slane %v10474_v28, 2  ;;  %v11038_v39 = vrot.slane %v20451_v25, 2  ;;  %v10489_v28 = vshrl.u32 %v16567_v35, 16  ;;  %vm22347_vm8 = vmmov %vm22343_vm6 }
 0x458   :  { %15877 = vmatpush3.bf16.msra.mxu1 %v16569_v40  ;;  %15921 = vmatpush3.bf16.msra.mxu0 %v16571_v55  ;;  %v10471_v40 = vshrl.u32 %v16561_v19, 16  ;;  %v20445_v55 = vpop.f32.mrf.mxu1  ;;  %v10460_v5 = vsel %vm22344_vm12, %v10450_v54, %v10459_v17  ;;  %v11036_v29 = vrot.slane %v16553_v38, 2  ;;  %v10480_v59 = vshrl.u32 %v16565_v62, 16  ;;  %v16585_v54 = vld [vmem:[%s21361_s3 + $0x1c8] sm:$0xff]   ;;  %vm22348_vm12 = vmmov %vm22345_vm2 }
 0x459   :  { %15878 = vmatprep.subr.bf16.mxu1 %v16576_v31  ;;  %15922 = vmatprep.subr.bf16.mxu0 %v16575_v48 }
 0x45a   :  { %v20457_v19 = vpop.f32.mrf.mxu1  ;;  %v11037_v25 = vsel %vm22345_vm2, %v11034_v34, %v11036_v29  ;;  %v10491_v34 = vrot.slane %v10489_v28, 1  ;;  %v16563_v28 = vld [vmem:[#allocation2 + $0x68] sm:$0xff]  }
 0x45c   :  { %15879 = vmatpush3.bf16.msra.mxu1 %v16576_v31  ;;  %15923 = vmatpush3.bf16.msra.mxu0 %v16575_v48  ;;  %v16583_v31 = vld [vmem:[%s21361_s3 + $0x1d0] sm:$0xff]   ;;  %v10473_v48 = vrot.slane %v10471_v40, 1 }
 0x45d   :  { %15968 = vmatprep.subr.bf16.mxu1 %v20439_v50  ;;  %15924 = vmatprep.subr.bf16.mxu0 %v16578_v13  ;;  %v15622_v42 = vpop.f32.mrf.mxu0 }
 0x45e   :  { %15837 = vmatmul.mubr.bf16.gmra.mxu0 %v11033_v7  ;;  %15793 = vmatmul.mubr.bf16.gmra.mxu1 %v10451_v24  ;;  %v20460_v6 = vadd.f32 %v15622_v42, %v20351_v21  ;;  %v10468_v7 = vor.u32 %v10467_v0, %v10464_v49  ;;  %v10477_v40 = vor.u32 %v10476_v44, %v10473_v48  ;;  %v20469_v21 = vpop.f32.mrf.mxu1  ;;  %v16558_v49 = vld [vmem:[#allocation2 + $0x58] sm:$0xff]   ;;  %v16560_v44 = vld [vmem:[#allocation2 + $0x60] sm:$0xff]  }
 0x45f   :  { %15840 = vmatprep.mubr.bf16.mxu0 %v11035_v9  ;;  %15796 = vmatprep.mubr.bf16.mxu1 %v10460_v5  ;;  %v10483_v9 = vshll.u32 %v16565_v62, 16  ;;  %v8889_v24 = vpop.f32.mrf.mxu0  ;;  %v10492_v5 = vshll.u32 %v16567_v35, 16  ;;  %v11039_v62 = vsel %vm22346_vm15, %v11036_v29, %v11038_v39  ;;  %v10482_v35 = vrot.slane %v10480_v59, 1  ;;  %vm22349_vm15 = vmmov %vm22343_vm6 }
 0x460   :  { %15925 = vmatpush3.bf16.msra.mxu0 %v16578_v13  ;;  %v20467_v38 = vadd.f32 %v8889_v24, %v20353_v1  ;;  %v10469_v48 = vsel %vm22347_vm8, %v10459_v17, %v10468_v7  ;;  %v16572_v1 = vld [vmem:[#allocation2 + $0x88] sm:$0xff]   ;;  %v16591_v24 = vld [vmem:[%s21361_s3 + $0x1c0] sm:$0xff]   ;;  %v11040_v17 = vrot.slane %v16558_v49, 2  ;;  %v11042_v59 = vrot.slane %v16560_v44, 2  ;;  %vm22350_vm8 = vmmov %vm22343_vm6 }
 0x461   :  { %15926 = vmatprep.subr.bf16.mxu0 %v16583_v31  ;;  %v15623_v13 = vpop.f32.mrf.mxu0  ;;  %v10485_v42 = vrot.slane %v10483_v9, 2  ;;  %v10498_v9 = vshrl.u32 %v16572_v1, 16  ;;  %v10501_v2 = vshll.u32 %v16572_v1, 16 }
 0x462   :  { %v20473_v0 = vadd.f32 %v15623_v13, %v20359_v60  ;;  %v10478_v60 = vsel %vm22343_vm6, %v10468_v7, %v10477_v40  ;;  %v16574_v13 = vld [vmem:[#allocation2 + $0x90] sm:$0xff]   ;;  %v11041_v7 = vsel %vm22348_vm12, %v11038_v39, %v11040_v17  ;;  %vm22351_vm6 = vmmov %vm22345_vm2 }
 0x463   :  { %v10486_v29 = vor.u32 %v10485_v42, %v10482_v35  ;;  %v10507_v4 = vshrl.u32 %v16574_v13, 16  ;;  %v10510_v15 = vshll.u32 %v16574_v13, 16  ;;  %v10500_v49 = vrot.slane %v10498_v9, 1  ;;  %v16579_v35 = vld [vmem:[#allocation2 + $0x98] ss:$0 sps:$4 sm:$0x33]   ;;  %vm22352_vm12 = vmmov %vm22345_vm2 }
 0x464   :  { %15927 = vmatpush3.bf16.msra.mxu0 %v16583_v31  ;;  %v10494_v31 = vrot.slane %v10492_v5, 2  ;;  %v16566_v5 = vld [vmem:[#allocation2 + $0x70] sm:$0xff]   ;;  %v10503_v44 = vrot.slane %v10501_v2, 2 }
 0x465   :  { %15928 = vmatprep.subr.bf16.mxu0 %v16585_v54  ;;  %v10509_v1 = vrot.slane %v10507_v4, 1 }
 0x466   :  { %15841 = vmatmul.mubr.bf16.gmra.mxu0 %v11037_v25  ;;  %15797 = vmatmul.mubr.bf16.gmra.mxu1 %v10469_v48  ;;  %v20481_v25 = vpop.f32.mrf.mxu1  ;;  %v10495_v43 = vor.u32 %v10494_v31, %v10491_v34  ;;  %v11043_v48 = vsel %vm22345_vm2, %v11040_v17, %v11042_v59  ;;  %v20489_v34 = vpop.f32.mrf.mxu0  ;;  %v11046_v31 = vrot.slane %v16566_v5, 2  ;;  %v10504_v13 = vor.u32 %v10503_v44, %v10500_v49  ;;  %vm22353_vm2 = vmmov %vm22350_vm8  ;;  %v16573_v5 = vld [vmem:[#allocation2 + $0x80] sm:$0xff]  }
 0x467   :  { %15844 = vmatprep.mubr.bf16.mxu0 %v11039_v62  ;;  %15800 = vmatprep.mubr.bf16.mxu1 %v10478_v60  ;;  %v10512_v60 = vrot.slane %v10510_v15, 2  ;;  %v10516_v17 = vshrl.u32 %v16579_v35, 16 }
 0x468   :  { %15929 = vmatpush3.bf16.msra.mxu0 %v16585_v54  ;;  %v20483_v62 = vpop.f32.mrf.mxu1  ;;  %v10487_v54 = vsel %vm22349_vm15, %v10477_v40, %v10486_v29  ;;  %v10496_v42 = vsel %vm22350_vm8, %v10486_v29, %v10495_v43  ;;  %v16570_v29 = vld [vmem:[#allocation2 + $0x78] sm:$0xff]   ;;  %vm22354_vm15 = vmmov %vm22353_vm2 }
 0x469   :  { %15930 = vmatprep.subr.bf16.mxu0 %v16591_v24  ;;  %v10513_v40 = vor.u32 %v10512_v60, %v10509_v1  ;;  %v10518_v49 = vrot.slane %v10516_v17, 1  ;;  %vm22355_vm8 = vmmov %vm22351_vm6 }
 0x46a   :  { %v20491_v39 = vpop.f32.mrf.mxu1 }
 0x46c   :  { %15931 = vmatpush3.bf16.msra.mxu0 %v16591_v24  ;;  %v11044_v24 = vrot.slane %v16563_v28, 2  ;;  %v20493_v2 = vpop.f32.mrf.mxu1  ;;  %v10505_v28 = vsel %vm22353_vm2, %v10495_v43, %v10504_v13  ;;  %v16581_v43 = vld [vmem:[#allocation2 + $0x10] sm:$0xfc]  }
 0x46e   :  { %15845 = vmatmul.mubr.bf16.gmra.mxu0 %v11041_v7  ;;  %15801 = vmatmul.mubr.bf16.gmra.mxu1 %v10487_v54  ;;  %v10519_v7 = vshll.u32 %v16579_v35, 16  ;;  %v11045_v4 = vsel %vm22351_vm6, %v11042_v59, %v11044_v24  ;;  %v11047_v15 = vsel %vm22352_vm12, %v11044_v24, %v11046_v31  ;;  %v20505_v59 = vpop.f32.mrf.mxu1  ;;  %v11048_v24 = vrot.slane %v16570_v29, 2  ;;  %vm22356_vm12 = vmmov %vm22353_vm2 }
 0x46f   :  { %15848 = vmatprep.mubr.bf16.mxu0 %v11043_v48  ;;  %15804 = vmatprep.mubr.bf16.mxu1 %v10496_v42  ;;  %v16582_v42 = vld [vmem:[#allocation2 + $0x18] sm:$0xff]   ;;  %vm22357_vm2 = vmmov %vm22351_vm6 }
 0x470   :  { %v10521_v44 = vrot.slane %v10519_v7, 2  ;;  %v11556_v7 = vrot.slane %v16582_v42, 2 }
 0x471   :  { %v15626_v9 = vpop.f32.mrf.mxu0 }
 0x472   :  { %v20496_v48 = vadd.f32 %v15626_v9, %v20372_v36  ;;  %v10514_v36 = vsel %vm22354_vm15, %v10504_v13, %v10513_v40  ;;  %v11050_v9 = vrot.slane %v16573_v5, 2  ;;  %v10522_v17 = vor.u32 %v10521_v44, %v10518_v49  ;;  %v20516_v5 = vld [vmem:[#allocation2 + $0x28] sm:$0xff]   ;;  %vm22358_vm15 = vmmov %vm22357_vm2 }
 0x473   :  { %v8905_v54 = vpop.f32.mrf.mxu0 }
 0x474   :  { %v20502_v35 = vadd.f32 %v8905_v54, %v20379_v10  ;;  %v11049_v10 = vsel %vm22355_vm8, %v11046_v31, %v11048_v24  ;;  %v11555_v54 = vrot.slane %v16581_v43, 2  ;;  %v11051_v13 = vsel %vm22351_vm6, %v11048_v24, %v11050_v9  ;;  %v16588_v31 = vld [vmem:[#allocation2 + $0x10] sm:$0xfc]   ;;  %vm22359_vm8 = vmmov %vm22357_vm2 }
 0x475   :  { %v15627_v1 = vpop.f32.mrf.mxu0  ;;  %v11558_v24 = vrot.slane %v16587_v27, 2  ;;  %vm22360_vm6 = vmmov %vm22357_vm2 }
 0x476   :  { %15849 = vmatmul.mubr.bf16.gmra.mxu0 %v11045_v4  ;;  %15805 = vmatmul.mubr.bf16.gmra.mxu1 %v10505_v28  ;;  %v20508_v60 = vadd.f32 %v15627_v1, %v20390_v57  ;;  %v20510_v4 = vpop.f32.mrf.mxu1  ;;  %v10523_v28 = vsel %vm22356_vm12, %v10513_v40, %v10522_v17  ;;  %v16589_v57 = vld [vmem:[#allocation2 + $0x18] sm:$0xff]   ;;  %v11557_v29 = vsel %vm22357_vm2, %v11555_v54, %v11556_v7  ;;  %v11560_v17 = vrot.slane %v20516_v5, 2  ;;  %vm22361_vm12 = vmmov %vm22357_vm2 }
 0x477   :  { %15852 = vmatprep.mubr.bf16.mxu0 %v11047_v15  ;;  %15808 = vmatprep.mubr.bf16.mxu1 %v10514_v36  ;;  %v16577_v15 = vld [vmem:[#allocation2 + $0x88] sm:$0xff]   ;;  %v16580_v36 = vld [vmem:[#allocation2 + $0x90] sm:$0xff]   ;;  %v20520_v1 = vpop.f32.mrf.mxu0  ;;  %v12098_v43 = vshrl.u32 %v16589_v57, 16  ;;  %v12101_v40 = vshll.u32 %v16589_v57, 16  ;;  %v11559_v57 = vsel %vm22360_vm6, %v11556_v7, %v11558_v24  ;;  %v11056_v7 = vrot.slane %v16584_v33, 2  ;;  %vm22364_vm6 = vmmov %vm22357_vm2 }
 0x478   :  { %v20518_v49 = vpop.f32.mrf.mxu1  ;;  %v11052_v44 = vrot.slane %v16577_v15, 2  ;;  %v11054_v42 = vrot.slane %v16580_v36, 2  ;;  %v16595_v15 = vld [vmem:[%s21361_s3 + $0x230] sm:$0xff]  }
 0x479   :  { %v12103_v5 = vrot.slane %v12101_v40, 3  ;;  %v12107_v40 = vshrl.u32 %v16592_v14, 16 }
 0x47a   :  { %v11053_v54 = vsel %vm22358_vm15, %v11050_v9, %v11052_v44  ;;  %v11055_v36 = vsel %vm22359_vm8, %v11052_v44, %v11054_v42  ;;  %v11561_v9 = vsel %vm22361_vm12, %v11558_v24, %v11560_v17  ;;  %vm22362_vm15 = vsmask.f32 5376  ;;  %vm22363_vm8 = vmmov %vm22357_vm2 }
 0x47b   :  { %vm22365_vm12 = vmmov %vm22362_vm15 }
 0x47e   :  { %15853 = vmatmul.mubr.bf16.gmra.mxu0 %v11049_v10  ;;  %15809 = vmatmul.mubr.bf16.gmra.mxu1 %v10523_v28  ;;  %v20523_v10 = vpop.f32.mrf.mxu1  ;;  %v12093_v28 = vshll.u32 %v16588_v31, 16 }
 0x47f   :  { %15856 = vmatprep.mubr.bf16.mxu0 %v11051_v13  ;;  %15880 = vmatprep.mubr.bf16.mxu1 %v11557_v29  ;;  %v12090_v13 = vshrl.u32 %v16588_v31, 16  ;;  %v12100_v29 = vrot.slane %v12098_v43, 2 }
 0x480   :  { %v20535_v46 = vpop.f32.mrf.mxu1  ;;  %v12095_v23 = vrot.slane %v12093_v28, 3  ;;  %v12119_v28 = vshll.u32 %v16594_v26, 16 }
 0x481   :  { %v12104_v24 = vor.u32 %v12103_v5, %v12100_v29 }
 0x482   :  { %v20547_v33 = vpop.f32.mrf.mxu1  ;;  %v12121_v29 = vrot.slane %v12119_v28, 3 }
 0x486   :  { %15857 = vmatmul.mubr.bf16.gmra.mxu0 %v11053_v54  ;;  %v15630_v27 = vpop.f32.mrf.mxu0  ;;  %15881 = vmatmul.mubr.bf16.vlgmr.msra.gmra.mxu1 %v11559_v57  ;;  %v12092_v54 = vrot.slane %v12090_v13, 2  ;;  %v11562_v57 = vrot.slane %v16593_v30, 2  ;;  %v12116_v13 = vshrl.u32 %v16594_v26, 16  ;;  %v16606_v30 = vld [vmem:[%s21361_s3 + $0x220] sm:$0xff]  }
 0x487   :  { %15860 = vmatprep.mubr.bf16.mxu0 %v11055_v36  ;;  %v20532_v31 = vadd.f32 %v15630_v27, %v20413_v16  ;;  %15969 = vmatpush3.bf16.msra.mxu1 %v20439_v50  ;;  %v12110_v36 = vshll.u32 %v16592_v14, 16  ;;  %v16601_v16 = vld [vmem:[%s21361_s3 + $0x228] sm:$0xff]   ;;  %v11057_v14 = vsel %vm22357_vm2, %v11054_v42, %v11056_v7 }
 0x488   :  { %v8921_v44 = vpop.f32.mrf.mxu0  ;;  %15884 = vmatprep.mubr.bf16.mxu1 %v11561_v9  ;;  %15970 = vmatprep.subr.bf16.mxu1 %v16595_v15  ;;  %v11564_v9 = vrot.slane %v16596_v22, 2  ;;  %v11563_v22 = vsel %vm22363_vm8, %v11560_v17, %v11562_v57  ;;  %v16611_v17 = vld [vmem:[%s21361_s3 + $0x218] sm:$0xff]   ;;  %vm22367_vm8 = vmmov %vm22357_vm2 }
 0x489   :  { %v20539_v43 = vadd.f32 %v8921_v44, %v20420_v3  ;;  %v12096_v3 = vor.u32 %v12095_v23, %v12092_v54  ;;  %v12109_v44 = vrot.slane %v12107_v40, 2  ;;  %v12112_v45 = vrot.slane %v12110_v36, 3  ;;  %v16599_v23 = vld [vmem:[#allocation2 + $0x38] sm:$0xff]  }
 0x48a   :  { %v15631_v27 = vpop.f32.mrf.mxu0  ;;  %v11565_v42 = vsel %vm22364_vm6, %v11562_v57, %v11564_v9  ;;  %v12125_v40 = vshrl.u32 %v16597_v20, 16  ;;  %v12128_v36 = vshll.u32 %v16597_v20, 16  ;;  %v12134_v28 = vshrl.u32 %v16599_v23, 16  ;;  %v16602_v20 = vld [vmem:[#allocation2 + $0x40] sm:$0xff]   ;;  %vm22368_vm6 = vmmov %vm22365_vm12 }
 0x48b   :  { %v20545_v50 = vadd.f32 %v15631_v27, %v20434_v53  ;;  %15971 = vmatpush3.bf16.msra.mxu1 %v16595_v15  ;;  %v12105_v26 = vsel %vm22362_vm15, %v12096_v3, %v12104_v24  ;;  %v12118_v53 = vrot.slane %v12116_v13, 2  ;;  %v20556_v15 = vld [vmem:[#allocation2 + $0x48] sm:$0xff]   ;;  %v20558_v5 = vpop.f32.mrf.mxu1  ;;  %v12113_v7 = vor.u32 %v12112_v45, %v12109_v44  ;;  %vm22366_vm15 = vmmov %vm22365_vm12 }
 0x48c   :  { %15972 = vmatprep.subr.bf16.mxu1 %v16601_v16  ;;  %v20560_v54 = vpop.f32.mrf.mxu0  ;;  %v11566_v27 = vrot.slane %v16598_v51, 2  ;;  %v12137_v57 = vshll.u32 %v16599_v23, 16  ;;  %v11568_v3 = vrot.slane %v20556_v15, 2  ;;  %v12127_v45 = vrot.slane %v12125_v40, 2  ;;  %v20578_v40 = vld [vmem:[#allocation2 + $0x58] sm:$0xff]  }
 0x48d   :  { %v12122_v13 = vor.u32 %v12121_v29, %v12118_v53  ;;  %v12130_v44 = vrot.slane %v12128_v36, 3  ;;  %v16616_v53 = vld [vmem:[%s21361_s3 + $0x210] sm:$0xff]   ;;  %v12136_v23 = vrot.slane %v12134_v28, 2  ;;  %v12146_v28 = vshll.u32 %v16602_v20, 16 }
 0x48e   :  { %15861 = vmatmul.mubr.bf16.gmra.mxu0 %v11057_v14  ;;  %15885 = vmatmul.mubr.bf16.gmra.mxu1 %v11563_v22  ;;  %v20566_v14 = vpop.f32.mrf.mxu1  ;;  %v11567_v51 = vsel %vm22357_vm2, %v11564_v9, %v11566_v27  ;;  %v16603_v22 = vld [vmem:[#allocation2 + $0x50] sm:$0xff]   ;;  %v11569_v9 = vsel %vm22367_vm8, %v11566_v27, %v11568_v3  ;;  %vm22371_vm8 = vmmov %vm22368_vm6 }
 0x48f   :  { %15932 = vmatprep.mubr.bf16.mxu0 %v12105_v26  ;;  %15888 = vmatprep.mubr.bf16.mxu1 %v11565_v42  ;;  %v12114_v26 = vsel %vm22365_vm12, %v12104_v24, %v12113_v7  ;;  %v12139_v42 = vrot.slane %v12137_v57, 3  ;;  %v16604_v24 = vld [vmem:[#allocation2 + $0x48] sm:$0xff]   ;;  %v11570_v57 = vrot.slane %v16603_v22, 2  ;;  %v16607_v22 = vld [vmem:[#allocation2 + $0x50] sm:$0xff]   ;;  %vm22369_vm12 = vmmov %vm22368_vm6 }
 0x490   :  { %15973 = vmatpush3.bf16.msra.mxu1 %v16601_v16  ;;  %v20580_v36 = vpop.f32.mrf.mxu1  ;;  %v12155_v58 = vshll.u32 %v16604_v24, 16 }
 0x491   :  { %15974 = vmatprep.subr.bf16.mxu1 %v16606_v30 }
 0x494   :  { %15975 = vmatpush3.bf16.msra.mxu1 %v16606_v30  ;;  %v12123_v30 = vsel %vm22366_vm15, %v12113_v7, %v12122_v13  ;;  %v12143_v7 = vshrl.u32 %v16602_v20, 16  ;;  %v12148_v20 = vrot.slane %v12146_v28, 3  ;;  %vm22370_vm15 = vmmov %vm22357_vm2 }
 0x495   :  { %v15634_v16 = vpop.f32.mrf.mxu0  ;;  %15976 = vmatprep.subr.bf16.mxu1 %v16611_v17 }
 0x496   :  { %v20574_v29 = vadd.f32 %v15634_v16, %v20457_v19  ;;  %15933 = vmatmul.mubr.bf16.vlgmr.msra.gmra.mxu0 %v12114_v26  ;;  %15889 = vmatmul.mubr.bf16.gmra.mxu1 %v11567_v51  ;;  %v12131_v16 = vor.u32 %v12130_v44, %v12127_v45  ;;  %v16621_v26 = vld [vmem:[%s21361_s3 + $0x208] sm:$0xff]   ;;  %v12140_v51 = vor.u32 %v12139_v42, %v12136_v23  ;;  %v12145_v44 = vrot.slane %v12143_v7, 2 }
 0x497   :  { %15936 = vmatprep.mubr.bf16.mxu0 %v12123_v30  ;;  %v8937_v15 = vpop.f32.mrf.mxu0  ;;  %15892 = vmatprep.mubr.bf16.mxu1 %v11569_v9  ;;  %v12152_v30 = vshrl.u32 %v16604_v24, 16  ;;  %v11571_v24 = vsel %vm22357_vm2, %v11568_v3, %v11570_v57 }
 0x498   :  { %v20583_v37 = vadd.f32 %v8937_v15, %v20469_v21  ;;  %15977 = vmatpush3.bf16.msra.mxu1 %v16611_v17  ;;  %v11572_v17 = vrot.slane %v20578_v40, 2  ;;  %v20594_v15 = vpop.f32.mrf.mxu1  ;;  %v12132_v45 = vsel %vm22368_vm6, %v12122_v13, %v12131_v16  ;;  %v12141_v42 = vsel %vm22369_vm12, %v12131_v16, %v12140_v51  ;;  %vm22372_vm12 = vmmov %vm22357_vm2 }
 0x499   :  { %v15635_v19 = vpop.f32.mrf.mxu0  ;;  %15978 = vmatprep.subr.bf16.mxu1 %v16616_v53  ;;  %v12154_v9 = vrot.slane %v12152_v30, 2  ;;  %v12157_v40 = vrot.slane %v12155_v58, 3  ;;  %v12149_v58 = vor.u32 %v12148_v20, %v12145_v44  ;;  %v12161_v16 = vshrl.u32 %v16607_v22, 16 }
 0x49a   :  { %v20589_v27 = vadd.f32 %v15635_v19, %v20481_v25  ;;  %v16626_v25 = vld [vmem:[%s21361_s3 + $0x200] sm:$0xff]   ;;  %v11573_v7 = vsel %vm22370_vm15, %v11570_v57, %v11572_v17  ;;  %v12164_v30 = vshll.u32 %v16607_v22, 16  ;;  %vm22373_vm15 = vmmov %vm22368_vm6 }
 0x49b   :  { %v20591_v21 = vpop.f32.mrf.mxu0  ;;  %v16608_v19 = vld [vmem:[#allocation2 + $0x60] sm:$0xff]   ;;  %v12150_v44 = vsel %vm22371_vm8, %v12140_v51, %v12149_v58  ;;  %v12163_v20 = vrot.slane %v12161_v16, 2  ;;  %v20631_v16 = vld [vmem:[#allocation2 + $0x78] sm:$0xff]   ;;  %vm22374_vm8 = vmmov %vm22368_vm6 }
 0x49c   :  { %15979 = vmatpush3.bf16.msra.mxu1 %v16616_v53  ;;  %v16609_v53 = vld [vmem:[#allocation2 + $0x58] sm:$0xff]   ;;  %v12166_v22 = vrot.slane %v12164_v30, 3 }
 0x49d   :  { %15980 = vmatprep.subr.bf16.mxu1 %v16621_v26  ;;  %v20606_v28 = vpop.f32.mrf.mxu1  ;;  %v12173_v32 = vshll.u32 %v16609_v53, 16 }
 0x49e   :  { %v15638_v23 = vpop.f32.mrf.mxu0  ;;  %15937 = vmatmul.mubr.bf16.gmra.mxu0 %v12132_v45  ;;  %15893 = vmatmul.mubr.bf16.gmra.mxu1 %v11571_v24  ;;  %v12170_v24 = vshrl.u32 %v16609_v53, 16 }
 0x49f   :  { %v20603_v13 = vadd.f32 %v15638_v23, %v20491_v39  ;;  %15940 = vmatprep.mubr.bf16.mxu0 %v12141_v42  ;;  %15896 = vmatprep.mubr.bf16.mxu1 %v11573_v7  ;;  %v12158_v23 = vor.u32 %v12157_v40, %v12154_v9  ;;  %v11574_v42 = vrot.slane %v16608_v19, 2  ;;  %v20617_v11 = vpop.f32.mrf.mxu1  ;;  %v16612_v9 = vld [vmem:[#allocation2 + $0x60] sm:$0xff]   ;;  %v12175_v61 = vrot.slane %v12173_v32, 3  ;;  %v16613_v7 = vld [vmem:[#allocation2 + $0x70] sm:$0xff]  }
 0x4a0   :  { %v8953_v45 = vpop.f32.mrf.mxu0  ;;  %15981 = vmatpush3.bf16.msra.mxu1 %v16621_v26  ;;  %v12172_v53 = vrot.slane %v12170_v24, 2  ;;  %v12179_v32 = vshrl.u32 %v16612_v9, 16 }
 0x4a1   :  { %v20611_v3 = vadd.f32 %v8953_v45, %v20493_v2  ;;  %15982 = vmatprep.subr.bf16.mxu1 %v16626_v25  ;;  %v12159_v19 = vsel %vm22368_vm6, %v12149_v58, %v12158_v23  ;;  %v16614_v45 = vld [vmem:[#allocation2 + $0x68] sm:$0xff]   ;;  %v20629_v51 = vpop.f32.mrf.mxu1  ;;  %vm22375_vm6 = vmmov %vm22357_vm2 }
 0x4a2   :  { %v15639_v39 = vpop.f32.mrf.mxu0 }
 0x4a3   :  { %v20614_v57 = vadd.f32 %v15639_v39, %v20505_v59  ;;  %v11575_v59 = vsel %vm22372_vm12, %v11572_v17, %v11574_v42  ;;  %v12167_v17 = vor.u32 %v12166_v22, %v12163_v20  ;;  %v12182_v39 = vshll.u32 %v16612_v9, 16  ;;  %v16617_v9 = vld [vmem:[#allocation2 + $0x70] sm:$0xff]   ;;  %vm22376_vm12 = vmmov %vm22357_vm2 }
 0x4a4   :  { %v8956_v26 = vpop.f32.mrf.mxu0  ;;  %15983 = vmatpush3.bf16.msra.mxu1 %v16626_v25  ;;  %v12181_v20 = vrot.slane %v12179_v32, 2 }
 0x4a5   :  { %v20620_v2 = vadd.f32 %v8956_v26, %v20510_v4  ;;  %v11577_v4 = vsel %vm22357_vm2, %v11574_v42, %v11576_v12  ;;  %v12176_v26 = vor.u32 %v12175_v61, %v12172_v53  ;;  %v20639_v42 = vpop.f32.mrf.mxu1  ;;  %v12184_v22 = vrot.slane %v12182_v39, 3  ;;  %vm22377_vm2 = vmmov %vm22374_vm8 }
 0x4a6   :  { %v15642_v40 = vpop.f32.mrf.mxu0  ;;  %15941 = vmatmul.mubr.bf16.gmra.mxu0 %v12150_v44  ;;  %15897 = vmatmul.mubr.bf16.gmra.mxu1 %v11575_v59  ;;  %v12188_v44 = vshrl.u32 %v16614_v45, 16  ;;  %v11580_v59 = vrot.slane %v20631_v16, 2 }
 0x4a7   :  { %v20626_v25 = vadd.f32 %v15642_v40, %v20518_v49  ;;  %15944 = vmatprep.mubr.bf16.mxu0 %v12159_v19  ;;  %15900 = vmatprep.mubr.bf16.mxu1 %v11577_v4  ;;  %v11578_v49 = vrot.slane %v16613_v7, 2  ;;  %v12191_v40 = vshll.u32 %v16614_v45, 16  ;;  %v12177_v61 = vsel %vm22374_vm8, %v12167_v17, %v12176_v26  ;;  %vm22380_vm8 = vmmov %vm22375_vm6 }
 0x4a8   :  { %v8969_v30 = vpop.f32.mrf.mxu0  ;;  %v12190_v7 = vrot.slane %v12188_v44, 2  ;;  %v12197_v44 = vshrl.u32 %v16617_v9, 16 }
 0x4a9   :  { %v20634_v58 = vadd.f32 %v8969_v30, %v20523_v10  ;;  %v12168_v10 = vsel %vm22373_vm15, %v12158_v23, %v12167_v17  ;;  %v12193_v45 = vrot.slane %v12191_v40, 3  ;;  %v16618_v30 = vld [vmem:[#allocation2 + $0x80] sm:$0xff]   ;;  %v20654_v23 = vld [vmem:[#allocation2 + $0x88] sm:$0xff]   ;;  %v12200_v40 = vshll.u32 %v16617_v9, 16  ;;  %vm22379_vm15 = vmmov %vm22377_vm2 }
 0x4aa   :  { %v15643_v24 = vpop.f32.mrf.mxu0 }
 0x4ab   :  { %v20637_v19 = vadd.f32 %v15643_v24, %v20535_v46  ;;  %v11579_v46 = vsel %vm22375_vm6, %v11576_v12, %v11578_v49  ;;  %v16619_v24 = vld [vmem:[#allocation2 + $0x78] sm:$0xff]   ;;  %v12185_v12 = vor.u32 %v12184_v22, %v12181_v20 }
 0x4ac   :  { %v8972_v52 = vpop.f32.mrf.mxu0  ;;  %v12209_v18 = vshll.u32 %v16619_v24, 16 }
 0x4ad   :  { %v20643_v4 = vadd.f32 %v8972_v52, %v20547_v33  ;;  %v11581_v33 = vsel %vm22376_vm12, %v11578_v49, %v11580_v59  ;;  %v12186_v22 = vsel %vm22377_vm2, %v12176_v26, %v12185_v12  ;;  %v20679_v26 = vld [vmem:[#allocation2 + $0x98] sm:$0xff]   ;;  %vm22382_vm12 = vmmov %vm22377_vm2 }
 0x4ae   :  { %v15646_v53 = vpop.f32.mrf.mxu0  ;;  %15945 = vmatmul.mubr.bf16.gmra.mxu0 %v12168_v10  ;;  %v20651_v52 = vpop.f32.mrf.mxu1  ;;  %15901 = vmatmul.mubr.bf16.gmra.mxu1 %v11579_v46  ;;  %v12194_v10 = vor.u32 %v12193_v45, %v12190_v7  ;;  %v12199_v7 = vrot.slane %v12197_v44, 2  ;;  %v12202_v45 = vrot.slane %v12200_v40, 3  ;;  %vm22383_vm2 = vmmov %vm22375_vm6 }
 0x4af   :  { %v20649_v16 = vadd.f32 %v15646_v53, %v20558_v5  ;;  %15948 = vmatprep.mubr.bf16.mxu0 %v12177_v61  ;;  %15904 = vmatprep.mubr.bf16.mxu1 %v11581_v33  ;;  %v11582_v53 = vrot.slane %v16618_v30, 2  ;;  %v12206_v61 = vshrl.u32 %v16619_v24, 16  ;;  %v11584_v33 = vrot.slane %v20654_v23, 2  ;;  %v16623_v30 = vld [vmem:[#allocation2 + $0x90] sm:$0xff]  }
 0x4b0   :  { %v8985_v32 = vpop.f32.mrf.mxu0  ;;  %v20659_v39 = vpop.f32.mrf.mxu1  ;;  %v12211_v23 = vrot.slane %v12209_v18, 3 }
 0x4b1   :  { %v20657_v17 = vadd.f32 %v8985_v32, %v20566_v14  ;;  %v16622_v14 = vld [vmem:[#allocation2 + $0x80] sm:$0xff]   ;;  %v11583_v32 = vsel %vm22380_vm8, %v11580_v59, %v11582_v53  ;;  %vm22385_vm8 = vmmov %vm22383_vm2 }
 0x4b2   :  { %v15647_v5 = vpop.f32.mrf.mxu0  ;;  %v20664_v49 = vpop.f32.mrf.mxu1  ;;  %v12218_v59 = vshll.u32 %v16622_v14, 16 }
 0x4b3   :  { %v20662_v46 = vadd.f32 %v15647_v5, %v20580_v36  ;;  %v12195_v36 = vsel %vm22379_vm15, %v12185_v12, %v12194_v10  ;;  %v12208_v5 = vrot.slane %v12206_v61, 2  ;;  %v12215_v12 = vshrl.u32 %v16622_v14, 16  ;;  %vm22384_vm15 = vmmov %vm22382_vm12 }
 0x4b4   :  { %v8988_v56 = vpop.f32.mrf.mxu0  ;;  %v20671_v9 = vpop.f32.mrf.mxu1  ;;  %v12203_v61 = vor.u32 %v12202_v45, %v12199_v7 }
 0x4b5   :  { %v20668_v20 = vadd.f32 %v8988_v56, %v20594_v15  ;;  %22378 = vst [vmem:[#allocation70_spill] sm:$0xff] %v20671_v9  ;;  %v11585_v15 = vsel %vm22375_vm6, %v11582_v53, %v11584_v33  ;;  %v12224_v53 = vshrl.u32 %v16624_v41, 16  ;;  %v12227_v9 = vshll.u32 %v16624_v41, 16  ;;  %vm22386_vm6 = vmmov %vm22382_vm12 }
 0x4b6   :  { %v15650_v24 = vpop.f32.mrf.mxu0  ;;  %15949 = vmatmul.mubr.bf16.gmra.mxu0 %v12186_v22  ;;  %v15674_v56 = vpop.f32.mrf.mxu1  ;;  %15905 = vmatmul.mubr.bf16.gmra.mxu1 %v11583_v32  ;;  %v11586_v22 = vrot.slane %v16623_v30, 2  ;;  %v12217_v45 = vrot.slane %v12215_v12, 2  ;;  %v12220_v30 = vrot.slane %v12218_v59, 3  ;;  %v12204_v41 = vsel %vm22382_vm12, %v12194_v10, %v12203_v61  ;;  %v16629_v12 = vld [vmem:[#allocation2 + $0x98] sm:$0xff]   ;;  %vm22387_vm12 = vmmov %vm22383_vm2 }
 0x4b7   :  { %v20676_v8 = vadd.f32 %v15650_v24, %v20606_v28  ;;  %15952 = vmatprep.mubr.bf16.mxu0 %v12195_v36  ;;  %v20682_v40 = vadd.f32 %v15674_v56, %v20460_v6  ;;  %15908 = vmatprep.mubr.bf16.mxu1 %v11585_v15  ;;  %v12212_v36 = vor.u32 %v12211_v23, %v12208_v5  ;;  %v11588_v56 = vrot.slane %v20679_v26, 2  ;;  %v16627_v23 = vld [vmem:[#allocation2 + $0x90] sm:$0xff]   ;;  %v16628_v15 = vld [vmem:[#allocation2 + $0xa0] ss:$0 sps:$4 sm:$0x33]  }
 0x4b8   :  { %v9001_v44 = vpop.f32.mrf.mxu0  ;;  %v9423_v28 = vpop.f32.mrf.mxu1 }
 0x4b9   :  { %22381 = vst [vmem:[#allocation69_spill] sm:$0xff] %v20676_v8  ;;  %v20685_v18 = vadd.f32 %v9001_v44, %v20617_v11  ;;  %v20688_v32 = vadd.f32 %v9423_v28, %v20467_v38  ;;  %v9069_v11 = vadd.f32 %v20489_v34, %v20361_v47  ;;  %v12213_v47 = vsel %vm22384_vm15, %v12203_v61, %v12212_v36 }
 0x4ba   :  { %v15651_v24 = vpop.f32.mrf.mxu0  ;;  %v15675_v6 = vpop.f32.mrf.mxu1  ;;  %v12229_v44 = vrot.slane %v12227_v9, 3  ;;  %v11589_v10 = vsel %vm22385_vm8, %v11586_v22, %v11588_v56  ;;  %vm22389_vm15 = vcmask 1044480  }
 0x4bb   :  { %v20691_v8 = vadd.f32 %v15651_v24, %v20629_v51  ;;  %v20697_v7 = vadd.f32 %v15675_v6, %v20473_v0  ;;  %v11587_v51 = vsel %vm22383_vm2, %v11584_v33, %v11586_v22  ;;  %v12226_v0 = vrot.slane %v12224_v53, 2  ;;  %v20711_v33 = vld [vmem:[#allocation2 + $0x18] sm:$0xff]   ;;  %vm22388_vm2 = vmmov %vm22386_vm6 }
 0x4bc   :  { %v9004_v14 = vpop.f32.mrf.mxu0  ;;  %v9426_v5 = vpop.f32.mrf.mxu1  ;;  %v12221_v24 = vor.u32 %v12220_v30, %v12217_v45  ;;  %v12233_v53 = vshrl.u32 %v16627_v23, 16  ;;  %v12757_v30 = vrot.slane %v20711_v33, 3  ;;  %vm22390_vm8 = vmmov %vm22388_vm2 }
 0x4bd   :  { %v20700_v38 = vadd.f32 %v9004_v14, %v20639_v42  ;;  %v20705_v34 = vadd.f32 %v9426_v5, %v9069_v11  ;;  %v11590_v11 = vrot.slane %v16628_v15, 2  ;;  %v16630_v14 = vld [vmem:[#allocation2 + $0x10] sm:$0xf8]   ;;  %v12230_v5 = vor.u32 %v12229_v44, %v12226_v0 }
 0x4be   :  { %v15654_v26 = vpop.f32.mrf.mxu0  ;;  %15953 = vmatmul.mubr.bf16.gmra.mxu0 %v12204_v41  ;;  %v15678_v42 = vpop.f32.mrf.mxu1  ;;  %15909 = vmatmul.mubr.bf16.gmra.mxu1 %v11587_v51  ;;  %v12242_v51 = vshrl.u32 %v16629_v12, 16  ;;  %v12235_v0 = vrot.slane %v12233_v53, 2 }
 0x4bf   :  { %v20708_v59 = vadd.f32 %v15654_v26, %v20651_v52  ;;  %15956 = vmatprep.mubr.bf16.mxu0 %v12213_v47  ;;  %v20714_v6 = vadd.f32 %v15678_v42, %v20496_v48  ;;  %15912 = vmatprep.mubr.bf16.mxu1 %v11589_v10  ;;  %v12236_v52 = vshll.u32 %v16627_v23, 16  ;;  %v12245_v26 = vshll.u32 %v16629_v12, 16  ;;  %v16632_v42 = vld [vmem:[#allocation2 + $0xa0] ss:$0 sps:$4 sm:$0x77]  }
 0x4c0   :  { %v9017_v28 = vpop.f32.mrf.mxu0  ;;  %v9439_v9 = vpop.f32.mrf.mxu1  ;;  %v12222_v23 = vsel %vm22386_vm6, %v12212_v36, %v12221_v24  ;;  %v11591_v12 = vsel %vm22387_vm12, %v11588_v56, %v11590_v11  ;;  %v12231_v33 = vsel %vm22388_vm2, %v12221_v24, %v12230_v5  ;;  %vm22391_vm6 = vmmov %vm22388_vm2 }
 0x4c1   :  { %v20717_v61 = vadd.f32 %v9017_v28, %v20659_v39  ;;  %v20720_v22 = vadd.f32 %v9439_v9, %v20502_v35  ;;  %v9073_v39 = vadd.f32 %v20520_v1, %v20398_v63  ;;  %v12238_v44 = vrot.slane %v12236_v52, 3  ;;  %v16633_v9 = vld [vmem:[#allocation2 + $0x20] sm:$0xff]   ;;  %v16634_v52 = vld [vmem:[#allocation2 + $0x28] sm:$0xff]   ;;  %vm22392_vm12 = vmmov %vm22389_vm15 }
 0x4c2   :  { %v15655_v41 = vpop.f32.mrf.mxu0  ;;  %v15679_v48 = vpop.f32.mrf.mxu1  ;;  %v12244_v63 = vrot.slane %v12242_v51, 2  ;;  %v12247_v1 = vrot.slane %v12245_v26, 3  ;;  %v12251_v51 = vshrl.u32 %v16632_v42, 16  ;;  %v12254_v26 = vshll.u32 %v16632_v42, 16  ;;  %vm22393_vm2 = vmmov %vm22392_vm12 }
 0x4c3   :  { %v20723_v45 = vadd.f32 %v15655_v41, %v20664_v49  ;;  %v20732_v15 = vadd.f32 %v15679_v48, %v20508_v60  ;;  %v12756_v49 = vrot.slane %v16630_v14, 3  ;;  %v12239_v24 = vor.u32 %v12238_v44, %v12235_v0 }
 0x4c4   :  { %v20728_v47 = vpop.f32.mrf.mxu0  ;;  %v9442_v35 = vpop.f32.mrf.mxu1 }
 0x4c5   :  { %v9607_v28 = vadd.f32 %v9442_v35, %v9073_v39  ;;  %v12758_v53 = vsel %vm22389_vm15, %v12756_v49, %v12757_v30  ;;  %v12761_v49 = vrot.slane %v16634_v52, 3  ;;  %v12240_v44 = vsel %vm22390_vm8, %v12230_v5, %v12239_v24  ;;  %vm22394_vm15 = vmmov %vm22391_vm6 }
 0x4c6   :  { %v15726_v10 = vpop.f32.mrf.mxu0  ;;  %15957 = vmatmul.mubr.bf16.gmra.mxu0 %v12222_v23  ;;  %v15682_v60 = vpop.f32.mrf.mxu1  ;;  %15913 = vmatmul.mubr.bf16.gmra.mxu1 %v11591_v12  ;;  %v12759_v23 = vrot.slane %v16633_v9, 3  ;;  %vm22395_vm8 = vmmov %vm22393_vm2 }
 0x4c7   :  { %v20737_v36 = vadd.f32 %v15726_v10, %v20682_v40  ;;  %15960 = vmatprep.mubr.bf16.mxu0 %v12231_v33  ;;  %v9612_v11 = vadd.f32 %v15682_v60, %v20532_v31  ;;  %15984 = vmatprep.mubr.bf16.mxu1 %v12758_v53  ;;  %v12248_v40 = vor.u32 %v12247_v1, %v12244_v63  ;;  %v12253_v33 = vrot.slane %v12251_v51, 2  ;;  %v16635_v60 = vld [vmem:[#allocation2 + $0x30] sm:$0xff]  }
 0x4c8   :  { %v9957_v56 = vpop.f32.mrf.mxu0  ;;  %v9455_v41 = vpop.f32.mrf.mxu1  ;;  %v9077_v31 = vadd.f32 %v20560_v54, %v20445_v55  ;;  %v12760_v9 = vsel %vm22392_vm12, %v12757_v30, %v12759_v23  ;;  %v12762_v54 = vsel %vm22393_vm2, %v12759_v23, %v12761_v49  ;;  %v9081_v23 = vadd.f32 %v20591_v21, %v20483_v62  ;;  %v16638_v21 = vld [vmem:[#allocation2 + $0x48] sm:$0xff]   ;;  %vm22397_vm12 = vmmov %vm22393_vm2 }
 0x4c9   :  { %v20742_v14 = vadd.f32 %v9957_v56, %v20688_v32  ;;  %v9610_v39 = vadd.f32 %v9455_v41, %v20539_v43  ;;  %v12256_v43 = vrot.slane %v12254_v26, 3 }
 0x4ca   :  { %v15727_v48 = vpop.f32.mrf.mxu0  ;;  %v15683_v12 = vpop.f32.mrf.mxu1 }
 0x4cb   :  { %v20746_v35 = vadd.f32 %v15727_v48, %v20697_v7  ;;  %v9613_v32 = vadd.f32 %v15683_v12, %v20545_v50  ;;  %v12249_v7 = vsel %vm22391_vm6, %v12239_v24, %v12248_v40  ;;  %v12257_v56 = vor.u32 %v12256_v43, %v12253_v33  ;;  %vm22396_vm6 = vmmov %vm22393_vm2 }
 0x4cc   :  { %v9960_v10 = vpop.f32.mrf.mxu0  ;;  %v9458_v42 = vpop.f32.mrf.mxu1 }
 0x4cd   :  { %v20752_v0 = vadd.f32 %v9960_v10, %v20705_v34  ;;  %v9611_v1 = vadd.f32 %v9458_v42, %v9077_v31  ;;  %v16636_v34 = vld [vmem:[#allocation2 + $0x38] sm:$0xff]  }
 0x4ce   :  { %v15730_v63 = vpop.f32.mrf.mxu0  ;;  %15961 = vmatmul.mubr.bf16.gmra.mxu0 %v12240_v44  ;;  %v15686_v50 = vpop.f32.mrf.mxu1  ;;  %15985 = vmatmul.mubr.bf16.vlgmr.msra.gmra.mxu1 %v12760_v9  ;;  %v12765_v48 = vrot.slane %v16636_v34, 3 }
 0x4cf   :  { %v20758_v55 = vadd.f32 %v15730_v63, %v20714_v6  ;;  %15964 = vmatprep.mubr.bf16.mxu0 %v12249_v7  ;;  %v9616_v53 = vadd.f32 %v15686_v50, %v20574_v29  ;;  %15988 = vmatprep.mubr.bf16.mxu1 %v12762_v54  ;;  %v12763_v6 = vrot.slane %v16635_v60, 3  ;;  %v12769_v50 = vrot.slane %v16638_v21, 3 }
 0x4d0   :  { %v9973_v5 = vpop.f32.mrf.mxu0  ;;  %v9471_v24 = vpop.f32.mrf.mxu1 }
 0x4d1   :  { %v20763_v52 = vadd.f32 %v9973_v5, %v20720_v22  ;;  %v9614_v41 = vadd.f32 %v9471_v24, %v20583_v37  ;;  %v12258_v22 = vsel %vm22394_vm15, %v12248_v40, %v12257_v56  ;;  %v12764_v42 = vsel %vm22395_vm8, %v12761_v49, %v12763_v6  ;;  %vm22398_vm15 = vmmov %vm22393_vm2 }
 0x4d2   :  { %v15731_v30 = vpop.f32.mrf.mxu0  ;;  %v15687_v26 = vpop.f32.mrf.mxu1  ;;  %v12766_v62 = vsel %vm22396_vm6, %v12763_v6, %v12765_v48  ;;  %vm22399_vm8 = vmmov %vm22393_vm2 }
 0x4d3   :  { %v20767_v51 = vadd.f32 %v15731_v30, %v20732_v15  ;;  %v9617_v29 = vadd.f32 %v15687_v26, %v20589_v27  ;;  %v16637_v15 = vld [vmem:[#allocation2 + $0x40] sm:$0xff]   ;;  %v16639_v30 = vld [vmem:[#allocation2 + $0x50] sm:$0xff]   ;;  %v16640_v26 = vld [vmem:[#allocation2 + $0x58] sm:$0xff]  }
 0x4d4   :  { %v9976_v12 = vpop.f32.mrf.mxu0  ;;  %v9474_v10 = vpop.f32.mrf.mxu1  ;;  %v12767_v60 = vrot.slane %v16637_v15, 3  ;;  %vm22400_vm6 = vmmov %vm22393_vm2 }
 0x4d5   :  { %v20772_v31 = vadd.f32 %v9976_v12, %v9607_v28  ;;  %v9615_v37 = vadd.f32 %v9474_v10, %v9081_v23  ;;  %v12771_v10 = vrot.slane %v16639_v30, 3 }
 0x4d6   :  { %v15734_v44 = vpop.f32.mrf.mxu0  ;;  %15965 = vmatmul.mubr.bf16.gmra.mxu0 %v12258_v22  ;;  %v15690_v43 = vpop.f32.mrf.mxu1  ;;  %15989 = vmatmul.mubr.bf16.gmra.mxu1 %v12764_v42 }
 0x4d7   :  { %v20776_v33 = vadd.f32 %v15734_v44, %v9612_v11  ;;  %v9620_v27 = vadd.f32 %v15690_v43, %v20603_v13  ;;  %15992 = vmatprep.mubr.bf16.mxu1 %v12766_v62  ;;  %v12773_v44 = vrot.slane %v16640_v26, 3 }
 0x4d8   :  { %v9989_v63 = vpop.f32.mrf.mxu0  ;;  %v9487_v40 = vpop.f32.mrf.mxu1 }
 0x4d9   :  { %v20780_v28 = vadd.f32 %v9989_v63, %v9610_v39  ;;  %v9618_v9 = vadd.f32 %v9487_v40, %v20611_v3  ;;  %v12768_v39 = vsel %vm22397_vm12, %v12765_v48, %v12767_v60  ;;  %v16641_v63 = vld [vmem:[#allocation2 + $0x60] sm:$0xff]   ;;  %vm22401_vm12 = vmmov %vm22393_vm2 }
 0x4da   :  { %v15735_v7 = vpop.f32.mrf.mxu0  ;;  %v15691_v11 = vpop.f32.mrf.mxu1 }
 0x4db   :  { %v20783_v49 = vadd.f32 %v15735_v7, %v9613_v32  ;;  %v9621_v34 = vadd.f32 %v15691_v11, %v20614_v57  ;;  %v12770_v32 = vsel %vm22393_vm2, %v12767_v60, %v12769_v50  ;;  %v16642_v7 = vld [vmem:[#allocation2 + $0x68] sm:$0xff]  }
 0x4dc   :  { %v9992_v54 = vpop.f32.mrf.mxu0  ;;  %v9490_v56 = vpop.f32.mrf.mxu1 }
 0x4dd   :  { %v20786_v5 = vadd.f32 %v9992_v54, %v9611_v1  ;;  %v9619_v13 = vadd.f32 %v9490_v56, %v20620_v2  ;;  %v12775_v56 = vrot.slane %v16641_v63, 3 }
 0x4de   :  { %v15738_v24 = vpop.f32.mrf.mxu0  ;;  %v15694_v3 = vpop.f32.mrf.mxu1  ;;  %15993 = vmatmul.mubr.bf16.gmra.mxu1 %v12768_v39 }
 0x4df   :  { %v20790_v6 = vadd.f32 %v15738_v24, %v9616_v53  ;;  %v9624_v12 = vadd.f32 %v15694_v3, %v20626_v25  ;;  %15996 = vmatprep.mubr.bf16.mxu1 %v12770_v32  ;;  %v12777_v24 = vrot.slane %v16642_v7, 3 }
 0x4e0   :  { %v10005_v23 = vpop.f32.mrf.mxu0  ;;  %v9503_v1 = vpop.f32.mrf.mxu1 }
 0x4e1   :  { %v20794_v57 = vadd.f32 %v10005_v23, %v9614_v41  ;;  %v9622_v2 = vadd.f32 %v9503_v1, %v20634_v58  ;;  %v12772_v41 = vsel %vm22398_vm15, %v12769_v50, %v12771_v10  ;;  %v16643_v23 = vld [vmem:[#allocation2 + $0x70] sm:$0xff]   ;;  %vm22403_vm15 = vmmov %vm22393_vm2 }
 0x4e2   :  { %v15739_v22 = vpop.f32.mrf.mxu0  ;;  %v15695_v53 = vpop.f32.mrf.mxu1 }
 0x4e3   :  { %v20797_v48 = vadd.f32 %v15739_v22, %v9617_v29  ;;  %v9625_v15 = vadd.f32 %v15695_v53, %v20637_v19  ;;  %v12774_v29 = vsel %vm22399_vm8, %v12771_v10, %v12773_v44  ;;  %v16644_v22 = vld [vmem:[#allocation2 + $0x78] sm:$0xff]   ;;  %v22402_v53 = vld [vmem:[#allocation69_spill] sm:$0xff]  ;;  %vm22405_vm8 = vmmov %vm22393_vm2 }
 0x4e4   :  { %v10008_v42 = vpop.f32.mrf.mxu0  ;;  %v9506_v62 = vpop.f32.mrf.mxu1 }
 0x4e5   :  { %v20800_v43 = vadd.f32 %v10008_v42, %v9615_v37  ;;  %v9623_v25 = vadd.f32 %v9506_v62, %v20643_v4 }
 0x4e6   :  { %v15742_v21 = vpop.f32.mrf.mxu0  ;;  %v15698_v58 = vpop.f32.mrf.mxu1  ;;  %15997 = vmatmul.mubr.bf16.gmra.mxu1 %v12772_v41  ;;  %v12781_v41 = vrot.slane %v16644_v22, 3 }
 0x4e7   :  { %v20804_v40 = vadd.f32 %v15742_v21, %v9620_v27  ;;  %v9628_v11 = vadd.f32 %v15698_v58, %v20649_v16  ;;  %16000 = vmatprep.mubr.bf16.mxu1 %v12774_v29  ;;  %v12779_v21 = vrot.slane %v16643_v23, 3 }
 0x4e8   :  { %v10021_v60 = vpop.f32.mrf.mxu0  ;;  %v9519_v37 = vpop.f32.mrf.mxu1 }
 0x4e9   :  { %v20808_v19 = vadd.f32 %v10021_v60, %v9618_v9  ;;  %v9626_v4 = vadd.f32 %v9519_v37, %v20657_v17  ;;  %v12776_v9 = vsel %vm22400_vm6, %v12773_v44, %v12775_v56  ;;  %vm22406_vm6 = vmmov %vm22393_vm2 }
 0x4ea   :  { %v15743_v54 = vpop.f32.mrf.mxu0  ;;  %v15699_v27 = vpop.f32.mrf.mxu1 }
 0x4eb   :  { %v20811_v50 = vadd.f32 %v15743_v54, %v9621_v34  ;;  %v9629_v30 = vadd.f32 %v15699_v27, %v20662_v46  ;;  %v12778_v34 = vsel %vm22401_vm12, %v12775_v56, %v12777_v24  ;;  %v16645_v54 = vld [vmem:[#allocation2 + $0x80] sm:$0xff]   ;;  %v16646_v27 = vld [vmem:[#allocation2 + $0x88] sm:$0xff]   ;;  %vm22407_vm12 = vmmov %vm22393_vm2 }
 0x4ec   :  { %v10024_v39 = vpop.f32.mrf.mxu0  ;;  %v9522_v32 = vpop.f32.mrf.mxu1  ;;  %v12785_v23 = vrot.slane %v16646_v27, 3 }
 0x4ed   :  { %v20814_v3 = vadd.f32 %v10024_v39, %v9619_v13  ;;  %v9627_v16 = vadd.f32 %v9522_v32, %v20668_v20 }
 0x4ee   :  { %v15746_v26 = vpop.f32.mrf.mxu0  ;;  %v15702_v17 = vpop.f32.mrf.mxu1  ;;  %16001 = vmatmul.mubr.bf16.gmra.mxu1 %v12776_v9  ;;  %v12783_v9 = vrot.slane %v16645_v54, 3 }
 0x4ef   :  { %v20818_v1 = vadd.f32 %v15746_v26, %v9624_v12  ;;  %v9632_v42 = vadd.f32 %v15702_v17, %v22402_v53  ;;  %16004 = vmatprep.mubr.bf16.mxu1 %v12778_v34  ;;  %v22404_v17 = vld [vmem:[#allocation70_spill] sm:$0xff] }
 0x4f0   :  { %v10037_v10 = vpop.f32.mrf.mxu0  ;;  %v9535_v13 = vpop.f32.mrf.mxu1  ;;  %v9101_v34 = vadd.f32 %v20728_v47, %v22404_v17 }
 0x4f1   :  { %v20822_v46 = vadd.f32 %v10037_v10, %v9622_v2  ;;  %v9630_v20 = vadd.f32 %v9535_v13, %v20685_v18  ;;  %v12780_v2 = vsel %vm22393_vm2, %v12777_v24, %v12779_v21 }
 0x4f2   :  { %v15747_v62 = vpop.f32.mrf.mxu0  ;;  %v15703_v12 = vpop.f32.mrf.mxu1 }
 0x4f3   :  { %v20825_v44 = vadd.f32 %v15747_v62, %v9625_v15  ;;  %v9633_v58 = vadd.f32 %v15703_v12, %v20691_v8  ;;  %v12782_v15 = vsel %vm22403_vm15, %v12779_v21, %v12781_v41  ;;  %v12784_v62 = vsel %vm22405_vm8, %v12781_v41, %v12783_v9  ;;  %v16647_v21 = vld [vmem:[#allocation2 + $0x90] sm:$0xff]   ;;  %vm22408_vm15 = vmmov %vm22393_vm2 }
 0x4f4   :  { %v10040_v63 = vpop.f32.mrf.mxu0  ;;  %v9538_v7 = vpop.f32.mrf.mxu1  ;;  %v12786_v12 = vsel %vm22406_vm6, %v12783_v9, %v12785_v23  ;;  %v12787_v54 = vrot.slane %v16647_v21, 3  ;;  %v16649_v9 = vld [vmem:[#allocation2 + $0xa0] ss:$0 sps:$4 sm:$0x77]   ;;  %vm16688_vm8 = vmmov 0  }
 0x4f5   :  { %v20828_v29 = vadd.f32 %v10040_v63, %v9623_v25  ;;  %v9631_v37 = vadd.f32 %v9538_v7, %v20700_v38  ;;  %v16648_v63 = vld [vmem:[#allocation2 + $0x98] sm:$0xff]  }
 0x4f6   :  { %v15750_v60 = vpop.f32.mrf.mxu0  ;;  %v15706_v18 = vpop.f32.mrf.mxu1  ;;  %16005 = vmatmul.mubr.bf16.gmra.mxu1 %v12780_v2 }
 0x4f7   :  { %v20832_v56 = vadd.f32 %v15750_v60, %v9628_v11  ;;  %v9636_v32 = vadd.f32 %v15706_v18, %v20708_v59  ;;  %16008 = vmatprep.mubr.bf16.mxu1 %v12782_v15  ;;  %v12789_v18 = vrot.slane %v16648_v63, 3 }
 0x4f8   :  { %v10053_v39 = vpop.f32.mrf.mxu0  ;;  %v9551_v25 = vpop.f32.mrf.mxu1 }
 0x4f9   :  { %v20836_v8 = vadd.f32 %v10053_v39, %v9626_v4  ;;  %v9634_v38 = vadd.f32 %v9551_v25, %v20717_v61 }
 0x4fa   :  { %v15751_v26 = vpop.f32.mrf.mxu0  ;;  %v15707_v11 = vpop.f32.mrf.mxu1 }
 0x4fb   :  { %v20839_v24 = vadd.f32 %v15751_v26, %v9629_v30  ;;  %v9637_v10 = vadd.f32 %v15707_v11, %v20723_v45 }
 0x4fc   :  { %v10056_v22 = vpop.f32.mrf.mxu0  ;;  %v9554_v59 = vpop.f32.mrf.mxu1 }
 0x4fd   :  { %v20844_v53 = vadd.f32 %v10056_v22, %v9627_v16  ;;  %v9635_v13 = vadd.f32 %v9554_v59, %v9101_v34 }
 0x4fe   :  { %v15754_v4 = vpop.f32.mrf.mxu0  ;;  %v15778_v30 = vpop.f32.mrf.mxu1  ;;  %16009 = vmatmul.mubr.bf16.gmra.mxu1 %v12784_v62 }
 0x4ff   :  { %v20847_v61 = vadd.f32 %v15754_v4, %v9632_v42  ;;  %v10805_v47 = vadd.f32 %v15778_v30, %v20737_v36  ;;  %16012 = vmatprep.mubr.bf16.mxu1 %v12786_v12 }
 0x500   :  { %v10069_v7 = vpop.f32.mrf.mxu0  ;;  %v10624_v16 = vpop.f32.mrf.mxu1 }
 0x501   :  { %v20851_v45 = vadd.f32 %v10069_v7, %v9630_v20  ;;  %v10803_v2 = vadd.f32 %v10624_v16, %v20742_v14  ;;  %v12788_v20 = vsel %vm22407_vm12, %v12785_v23, %v12787_v54 }
 0x502   :  { %v15755_v60 = vpop.f32.mrf.mxu0  ;;  %v15779_v42 = vpop.f32.mrf.mxu1 }
 0x503   :  { %v20854_v41 = vadd.f32 %v15755_v60, %v9633_v58  ;;  %v10806_v27 = vadd.f32 %v15779_v42, %v20746_v35  ;;  %v12790_v58 = vsel %vm22393_vm2, %v12787_v54, %v12789_v18 }
 0x504   :  { %v10072_v15 = vpop.f32.mrf.mxu0  ;;  %v10627_v25 = vpop.f32.mrf.mxu1 }
 0x505   :  { %v20857_v39 = vadd.f32 %v10072_v15, %v9631_v37  ;;  %v10804_v36 = vadd.f32 %v10627_v25, %v20752_v0  ;;  %v12791_v0 = vrot.slane %v16649_v9, 3 }
 0x506   :  { %v15758_v26 = vpop.f32.mrf.mxu0  ;;  %v15782_v14 = vpop.f32.mrf.mxu1  ;;  %16013 = vmatmul.mubr.bf16.gmra.mxu1 %v12788_v20 }
 0x507   :  { %v20861_v11 = vadd.f32 %v15758_v26, %v9636_v32  ;;  %v10809_v34 = vadd.f32 %v15782_v14, %v20758_v55  ;;  %16016 = vmatprep.mubr.bf16.mxu1 %v12790_v58 }
 0x508   :  { %v10085_v17 = vpop.f32.mrf.mxu0  ;;  %v10640_v37 = vpop.f32.mrf.mxu1 }
 0x509   :  { %v20865_v35 = vadd.f32 %v10085_v17, %v9634_v38  ;;  %v10807_v59 = vadd.f32 %v10640_v37, %v20763_v52  ;;  %v12792_v38 = vsel %vm22408_vm15, %v12789_v18, %v12791_v0 }
 0x50a   :  { %v15759_v22 = vpop.f32.mrf.mxu0  ;;  %v15783_v23 = vpop.f32.mrf.mxu1 }
 0x50b   :  { %v20868_v4 = vadd.f32 %v15759_v22, %v9637_v10  ;;  %v10810_v62 = vadd.f32 %v15783_v23, %v20767_v51 }
 0x50c   :  { %v10088_v32 = vpop.f32.mrf.mxu0  ;;  %v10643_v30 = vpop.f32.mrf.mxu1 }
 0x50d   :  { %v20871_v21 = vadd.f32 %v10088_v32, %v9635_v13  ;;  %v10808_v55 = vadd.f32 %v10643_v30, %v20772_v31 }
 0x50e   :  { %v15830_v12 = vpop.f32.mrf.mxu0  ;;  %v15786_v7 = vpop.f32.mrf.mxu1  ;;  %16017 = vmatmul.mubr.bf16.gmra.mxu1 %v12792_v38 }
 0x50f   :  { %v20875_v63 = vadd.f32 %v15830_v12, %v10805_v47  ;;  %v10813_v10 = vadd.f32 %v15786_v7, %v20776_v33 }
 0x510   :  { %v11158_v52 = vpop.f32.mrf.mxu0  ;;  %v10656_v60 = vpop.f32.mrf.mxu1 }
 0x511   :  { %v20878_v16 = vadd.f32 %v11158_v52, %v10803_v2  ;;  %v10811_v51 = vadd.f32 %v10656_v60, %v20780_v28 }
 0x512   :  { %v15831_v54 = vpop.f32.mrf.mxu0  ;;  %v15787_v42 = vpop.f32.mrf.mxu1 }
 0x513   :  { %v20881_v13 = vadd.f32 %v15831_v54, %v10806_v27  ;;  %v10814_v31 = vadd.f32 %v15787_v42, %v20783_v49 }
 0x514   :  { %v11161_v15 = vpop.f32.mrf.mxu0  ;;  %v10659_v47 = vpop.f32.mrf.mxu1 }
 0x515   :  { %v20884_v18 = vadd.f32 %v11161_v15, %v10804_v36  ;;  %v10812_v26 = vadd.f32 %v10659_v47, %v20786_v5 }
 0x516   :  { %v15834_v25 = vpop.f32.mrf.mxu0  ;;  %v15790_v33 = vpop.f32.mrf.mxu1 }
 0x517   :  { %v20887_v20 = vadd.f32 %v15834_v25, %v10809_v34  ;;  %v10817_v9 = vadd.f32 %v15790_v33, %v20790_v6 }
 0x518   :  { %v11174_v2 = vpop.f32.mrf.mxu0  ;;  %v10672_v28 = vpop.f32.mrf.mxu1 }
 0x519   :  { %v20890_v14 = vadd.f32 %v11174_v2, %v10807_v59  ;;  %v10815_v58 = vadd.f32 %v10672_v28, %v20794_v57 }
 0x51a   :  { %v15835_v27 = vpop.f32.mrf.mxu0  ;;  %v15791_v49 = vpop.f32.mrf.mxu1 }
 0x51b   :  { %v20893_v17 = vadd.f32 %v15835_v27, %v10810_v62  ;;  %v10818_v37 = vadd.f32 %v15791_v49, %v20797_v48 }
 0x51c   :  { %v11177_v36 = vpop.f32.mrf.mxu0  ;;  %v10675_v5 = vpop.f32.mrf.mxu1 }
 0x51d   :  { %v20896_v22 = vadd.f32 %v11177_v36, %v10808_v55  ;;  %v10816_v0 = vadd.f32 %v10675_v5, %v20800_v43 }
 0x51e   :  { %v15838_v34 = vpop.f32.mrf.mxu0  ;;  %v15794_v6 = vpop.f32.mrf.mxu1 }
 0x51f   :  { %v20899_v23 = vadd.f32 %v15838_v34, %v10813_v10  ;;  %v10821_v32 = vadd.f32 %v15794_v6, %v20804_v40 }
 0x520   :  { %v11190_v59 = vpop.f32.mrf.mxu0  ;;  %v10688_v57 = vpop.f32.mrf.mxu1 }
 0x521   :  { %v20902_v30 = vadd.f32 %v11190_v59, %v10811_v51  ;;  %v10819_v12 = vadd.f32 %v10688_v57, %v20808_v19 }
 0x522   :  { %v15839_v62 = vpop.f32.mrf.mxu0  ;;  %v15795_v48 = vpop.f32.mrf.mxu1 }
 0x523   :  { %v20905_v38 = vadd.f32 %v15839_v62, %v10814_v31  ;;  %v10822_v7 = vadd.f32 %v15795_v48, %v20811_v50 }
 0x524   :  { %v11193_v55 = vpop.f32.mrf.mxu0  ;;  %v10691_v43 = vpop.f32.mrf.mxu1 }
 0x525   :  { %v20908_v52 = vadd.f32 %v11193_v55, %v10812_v26  ;;  %v10820_v60 = vadd.f32 %v10691_v43, %v20814_v3 }
 0x526   :  { %v15842_v10 = vpop.f32.mrf.mxu0  ;;  %v15798_v40 = vpop.f32.mrf.mxu1 }
 0x527   :  { %v20911_v54 = vadd.f32 %v15842_v10, %v10817_v9  ;;  %v10825_v42 = vadd.f32 %v15798_v40, %v20818_v1 }
 0x528   :  { %v11206_v51 = vpop.f32.mrf.mxu0  ;;  %v10704_v19 = vpop.f32.mrf.mxu1 }
 0x529   :  { %v20914_v15 = vadd.f32 %v11206_v51, %v10815_v58  ;;  %v10823_v47 = vadd.f32 %v10704_v19, %v20822_v46  ;;  %v16687_v51 = vmov 0.0  }
 0x52a   :  { %v15843_v31 = vpop.f32.mrf.mxu0  ;;  %v15799_v50 = vpop.f32.mrf.mxu1  ;;  %16020 = vmatprep.subr.bf16.mxu0 %v16687_v51  ;;  %16036 = vmatprep.mubr.msk.bf16.mxu0 %vm16688_vm8, %v16687_v51 }
 0x52b   :  { %v20917_v25 = vadd.f32 %v15843_v31, %v10818_v37  ;;  %v10826_v33 = vadd.f32 %v15799_v50, %v20825_v44 }
 0x52c   :  { %v11209_v26 = vpop.f32.mrf.mxu0  ;;  %v10707_v3 = vpop.f32.mrf.mxu1 }
 0x52d   :  { %v20920_v2 = vadd.f32 %v11209_v26, %v10816_v0  ;;  %v10824_v28 = vadd.f32 %v10707_v3, %v20828_v29 }
 0x52e   :  { %v15846_v9 = vpop.f32.mrf.mxu0  ;;  %v15802_v1 = vpop.f32.mrf.mxu1 }
 0x52f   :  { %v20923_v27 = vadd.f32 %v15846_v9, %v10821_v32  ;;  %v10829_v49 = vadd.f32 %v15802_v1, %v20832_v56 }
 0x530   :  { %v11222_v58 = vpop.f32.mrf.mxu0  ;;  %v10720_v46 = vpop.f32.mrf.mxu1 }
 0x531   :  { %v20926_v36 = vadd.f32 %v11222_v58, %v10819_v12  ;;  %v10827_v5 = vadd.f32 %v10720_v46, %v20836_v8 }
 0x532   :  { %v15847_v37 = vpop.f32.mrf.mxu0  ;;  %v15803_v44 = vpop.f32.mrf.mxu1 }
 0x533   :  { %v20929_v34 = vadd.f32 %v15847_v37, %v10822_v7  ;;  %v10830_v6 = vadd.f32 %v15803_v44, %v20839_v24 }
 0x534   :  { %v11225_v0 = vpop.f32.mrf.mxu0  ;;  %v10723_v29 = vpop.f32.mrf.mxu1 }
 0x535   :  { %v20932_v59 = vadd.f32 %v11225_v0, %v10820_v60  ;;  %v10828_v57 = vadd.f32 %v10723_v29, %v20844_v53  ;;  %v16650_v60 = vld [vmem:[%s21363_s5 + $0x38] sm:$0xff]  }
 0x536   :  { %v15850_v32 = vpop.f32.mrf.mxu0  ;;  %v15806_v56 = vpop.f32.mrf.mxu1  ;;  %16021 = vmatpush3.bf16.msra.mxu0 %v16650_v60 }
 0x537   :  { %v20935_v62 = vadd.f32 %v15850_v32, %v10825_v42  ;;  %v10833_v48 = vadd.f32 %v15806_v56, %v20847_v61  ;;  %16022 = vmatprep.subr.bf16.mxu0 %v16687_v51 }
 0x538   :  { %v11238_v12 = vpop.f32.mrf.mxu0  ;;  %v10736_v8 = vpop.f32.mrf.mxu1 }
 0x539   :  { %v20938_v55 = vadd.f32 %v11238_v12, %v10823_v47  ;;  %v10831_v43 = vadd.f32 %v10736_v8, %v20851_v45 }
 0x53a   :  { %v15851_v7 = vpop.f32.mrf.mxu0  ;;  %v15807_v24 = vpop.f32.mrf.mxu1 }
 0x53b   :  { %v20941_v10 = vadd.f32 %v15851_v7, %v10826_v33  ;;  %v10834_v40 = vadd.f32 %v15807_v24, %v20854_v41 }
 0x53c   :  { %v11241_v53 = vpop.f32.mrf.mxu0  ;;  %v10739_v42 = vpop.f32.mrf.mxu1 }
 0x53d   :  { %v20948_v61 = vadd.f32 %v11241_v53, %v10824_v28  ;;  %v10832_v45 = vadd.f32 %v10739_v42, %v20857_v39  ;;  %v16651_v39 = vld [vmem:[%s21363_s5 + $0x30] sm:$0xff]  }
 0x53e   :  { %v15854_v19 = vpop.f32.mrf.mxu0  ;;  %v15810_v47 = vpop.f32.mrf.mxu1  ;;  %16023 = vmatpush3.bf16.msra.mxu0 %v16651_v39 }
 0x53f   :  { %v20952_v31 = vadd.f32 %v15854_v19, %v10829_v49  ;;  %v10837_v26 = vadd.f32 %v15810_v47, %v20861_v11  ;;  %16024 = vmatprep.subr.bf16.mxu0 %v16687_v51 }
 0x540   :  { %v11254_v50 = vpop.f32.mrf.mxu0  ;;  %v10752_v41 = vpop.f32.mrf.mxu1 }
 0x541   :  { %v20955_v33 = vadd.f32 %v11254_v50, %v10827_v5  ;;  %v10835_v9 = vadd.f32 %v10752_v41, %v20865_v35 }
 0x542   :  { %v15855_v3 = vpop.f32.mrf.mxu0  ;;  %v15811_v1 = vpop.f32.mrf.mxu1 }
 0x543   :  { %v20958_v28 = vadd.f32 %v15855_v3, %v10830_v6  ;;  %v10838_v49 = vadd.f32 %v15811_v1, %v20868_v4 }
 0x544   :  { %v11257_v58 = vpop.f32.mrf.mxu0  ;;  %v10755_v37 = vpop.f32.mrf.mxu1 }
 0x545   :  { %v20964_v46 = vadd.f32 %v11257_v58, %v10828_v57  ;;  %v10836_v5 = vadd.f32 %v10755_v37, %v20871_v21 }
 0x546   :  { %v15858_v11 = vpop.f32.mrf.mxu0  ;;  %v15882_v44 = vpop.f32.mrf.mxu1 }
 0x547   :  { %v20968_v35 = vadd.f32 %v15858_v11, %v10833_v48  ;;  %v20971_v6 = vadd.f32 %v15882_v44, %v20875_v63 }
 0x548   :  { %v11270_v0 = vpop.f32.mrf.mxu0  ;;  %v11692_v32 = vpop.f32.mrf.mxu1 }
 0x549   :  { %v20973_v29 = vadd.f32 %v11270_v0, %v10831_v43  ;;  %v20976_v57 = vadd.f32 %v11692_v32, %v20878_v16  ;;  %v16652_v16 = vld [vmem:[%s21363_s5 + $0x28] sm:$0xff]  }
 0x54a   :  { %v15859_v4 = vpop.f32.mrf.mxu0  ;;  %v15883_v12 = vpop.f32.mrf.mxu1  ;;  %16025 = vmatpush3.bf16.msra.mxu0 %v16652_v16 }
 0x54b   :  { %v20978_v56 = vadd.f32 %v15859_v4, %v10834_v40  ;;  %v20981_v8 = vadd.f32 %v15883_v12, %v20881_v13  ;;  %16026 = vmatprep.subr.bf16.mxu0 %v16687_v51 }
 0x54c   :  { %v11273_v21 = vpop.f32.mrf.mxu0  ;;  %v11695_v7 = vpop.f32.mrf.mxu1 }
 0x54d   :  { %v20983_v48 = vadd.f32 %v11273_v21, %v10832_v45  ;;  %v20986_v63 = vadd.f32 %v11695_v7, %v20884_v18 }
 0x54e   :  { %v15862_v24 = vpop.f32.mrf.mxu0  ;;  %v15886_v60 = vpop.f32.mrf.mxu1 }
 0x54f   :  { %v20988_v43 = vadd.f32 %v15862_v24, %v10837_v26  ;;  %v20994_v40 = vadd.f32 %v15886_v60, %v20887_v20 }
 0x550   :  { %v11286_v53 = vpop.f32.mrf.mxu0  ;;  %v11708_v42 = vpop.f32.mrf.mxu1 }
 0x551   :  { %v20996_v13 = vadd.f32 %v11286_v53, %v10835_v9  ;;  %v20999_v45 = vadd.f32 %v11708_v42, %v20890_v14  ;;  %v16653_v14 = vld [vmem:[%s21363_s5 + $0x20] sm:$0xff]  }
 0x552   :  { %v15863_v19 = vpop.f32.mrf.mxu0  ;;  %v15887_v47 = vpop.f32.mrf.mxu1  ;;  %16027 = vmatpush3.bf16.msra.mxu0 %v16653_v14 }
 0x553   :  { %v21002_v18 = vadd.f32 %v15863_v19, %v10838_v49  ;;  %v21005_v26 = vadd.f32 %v15887_v47, %v20893_v17  ;;  %16028 = vmatprep.subr.bf16.mxu0 %v16687_v51 }
 0x554   :  { %v11289_v50 = vpop.f32.mrf.mxu0  ;;  %v11711_v20 = vpop.f32.mrf.mxu1 }
 0x555   :  { %v21007_v41 = vadd.f32 %v11289_v50, %v10836_v5  ;;  %v21012_v9 = vadd.f32 %v11711_v20, %v20896_v22 }
 0x556   :  { %v21009_v3 = vpop.f32.mrf.mxu0  ;;  %v15890_v1 = vpop.f32.mrf.mxu1 }
 0x557   :  { %v21020_v58 = vadd.f32 %v15890_v1, %v20899_v23 }
 0x558   :  { %v21017_v39 = vpop.f32.mrf.mxu0  ;;  %v11724_v17 = vpop.f32.mrf.mxu1 }
 0x559   :  { %v21025_v37 = vadd.f32 %v11724_v17, %v20902_v30 }
 0x55a   :  { %v21022_v49 = vpop.f32.mrf.mxu0  ;;  %v15891_v22 = vpop.f32.mrf.mxu1 }
 0x55b   :  { %v21031_v5 = vadd.f32 %v15891_v22, %v20905_v38 }
 0x55c   :  { %v21028_v11 = vpop.f32.mrf.mxu0  ;;  %v11727_v44 = vpop.f32.mrf.mxu1 }
 0x55d   :  { %v21036_v23 = vadd.f32 %v11727_v44, %v20908_v52 }
 0x55e   :  { %v21033_v0 = vpop.f32.mrf.mxu0  ;;  %v15894_v32 = vpop.f32.mrf.mxu1 }
 0x55f   :  { %v21041_v30 = vadd.f32 %v15894_v32, %v20911_v54 }
 0x560   :  { %v21038_v4 = vpop.f32.mrf.mxu0  ;;  %v11740_v12 = vpop.f32.mrf.mxu1 }
 0x561   :  { %v21046_v7 = vadd.f32 %v11740_v12, %v20914_v15 }
 0x562   :  { %v21043_v21 = vpop.f32.mrf.mxu0  ;;  %v15895_v38 = vpop.f32.mrf.mxu1 }
 0x563   :  { %v21051_v60 = vadd.f32 %v15895_v38, %v20917_v25 }
 0x564   :  { %v21048_v24 = vpop.f32.mrf.mxu0  ;;  %v11743_v52 = vpop.f32.mrf.mxu1 }
 0x565   :  { %v21056_v53 = vadd.f32 %v11743_v52, %v20920_v2  ;;  %v16656_v52 = vld [vmem:[%s21363_s5 + $0x8] sm:$0xff]  }
 0x566   :  { %v21053_v16 = vpop.f32.mrf.mxu0  ;;  %v15898_v54 = vpop.f32.mrf.mxu1 }
 0x567   :  { %v21061_v19 = vadd.f32 %v15898_v54, %v20923_v27 }
 0x568   :  { %v21058_v42 = vpop.f32.mrf.mxu0  ;;  %v11756_v15 = vpop.f32.mrf.mxu1 }
 0x569   :  { %v21064_v47 = vadd.f32 %v11756_v15, %v20926_v36  ;;  %v16654_v36 = vld [vmem:[%s21363_s5 + $0x18] sm:$0xff]  }
 0x56a   :  { %v15899_v50 = vpop.f32.mrf.mxu1  ;;  %v21066_v20 = vpop.f32.mrf.mxu0  ;;  %16029 = vmatpush3.bf16.msra.mxu0 %v16654_v36 }
 0x56b   :  { %v21069_v25 = vadd.f32 %v15899_v50, %v20929_v34  ;;  %16030 = vmatprep.subr.bf16.mxu0 %v16687_v51 }
 0x56c   :  { %v11759_v1 = vpop.f32.mrf.mxu1  ;;  %v21074_v17 = vpop.f32.mrf.mxu0 }
 0x56d   :  { %v21072_v2 = vadd.f32 %v11759_v1, %v20932_v59  ;;  %v16655_v59 = vld [vmem:[%s21363_s5 + $0x10] sm:$0xff]  }
 0x56e   :  { %v15902_v14 = vpop.f32.mrf.mxu1  ;;  %v21089_v32 = vpop.f32.mrf.mxu0  ;;  %16031 = vmatpush3.bf16.msra.mxu0 %v16655_v59 }
 0x56f   :  { %v21077_v27 = vadd.f32 %v15902_v14, %v20935_v62  ;;  %16032 = vmatprep.subr.bf16.mxu0 %v16687_v51 }
 0x570   :  { %v11772_v22 = vpop.f32.mrf.mxu1  ;;  %v21101_v54 = vpop.f32.mrf.mxu0 }
 0x571   :  { %v21083_v44 = vadd.f32 %v11772_v22, %v20938_v55 }
 0x572   :  { %v15903_v34 = vpop.f32.mrf.mxu1  ;;  %16033 = vmatpush3.bf16.msra.mxu0 %v16656_v52  ;;  %v21113_v14 = vpop.f32.mrf.mxu0 }
 0x573   :  { %v21092_v62 = vadd.f32 %v15903_v34, %v20941_v10  ;;  %16034 = vmatprep.subr.bf16.mxu0 %v16687_v51 }
 0x574   :  { %v11775_v12 = vpop.f32.mrf.mxu1 }
 0x575   :  { %v21096_v55 = vadd.f32 %v11775_v12, %v20948_v61  ;;  %v16657_v61 = vld [vmem:[%s21363_s5] sm:$0xff]  }
 0x576   :  { %v15906_v38 = vpop.f32.mrf.mxu1  ;;  %16035 = vmatpush3.bf16.msra.mxu0 %v16657_v61 }
 0x577   :  { %v21104_v15 = vadd.f32 %v15906_v38, %v20952_v31 }
 0x578   :  { %v11788_v10 = vpop.f32.mrf.mxu1 }
 0x579   :  { %v21108_v50 = vadd.f32 %v11788_v10, %v20955_v33  ;;  %v21122_v33 = vpop.f32.mrf.mxu0 }
 0x57a   :  { %v15907_v1 = vpop.f32.mrf.mxu1 }
 0x57b   :  { %v21116_v22 = vadd.f32 %v15907_v1, %v20958_v28  ;;  %v21130_v28 = vpop.f32.mrf.mxu0 }
 0x57c   :  { %v11791_v31 = vpop.f32.mrf.mxu1 }
 0x57d   :  { %v21120_v36 = vadd.f32 %v11791_v31, %v20964_v46  ;;  %v21138_v61 = vpop.f32.mrf.mxu0 }
 0x57e   :  { %v15910_v34 = vpop.f32.mrf.mxu1 }
 0x57f   :  { %v21125_v59 = vadd.f32 %v15910_v34, %v20968_v35 }
 0x580   :  { %v11804_v12 = vpop.f32.mrf.mxu1 }
 0x581   :  { %v21128_v38 = vadd.f32 %v11804_v12, %v20973_v29  ;;  %v21146_v12 = vpop.f32.mrf.mxu0 }
 0x582   :  { %v15911_v52 = vpop.f32.mrf.mxu1 }
 0x583   :  { %v21133_v51 = vadd.f32 %v15911_v52, %v20978_v56 }
 0x584   :  { %v11807_v10 = vpop.f32.mrf.mxu1 }
 0x585   :  { %v21136_v46 = vadd.f32 %v11807_v10, %v20983_v48 }
 0x586   :  { %v15914_v1 = vpop.f32.mrf.mxu1 }
 0x587   :  { %22409 = vst [vmem:[#allocation29_spill] sm:$0xff] %v21136_v46  ;;  %v21141_v35 = vadd.f32 %v15914_v1, %v20988_v43  ;;  %v12540_v46 = vadd.f32 %v21009_v3, %v20971_v6  ;;  %v12538_v43 = vadd.f32 %v21017_v39, %v20976_v57  ;;  %v21158_v1 = vpop.f32.mrf.mxu0  ;;  %v12539_v6 = vadd.f32 %v21028_v11, %v20986_v63 }
 0x588   :  { %v11820_v31 = vpop.f32.mrf.mxu1 }
 0x589   :  { %v21144_v29 = vadd.f32 %v11820_v31, %v20996_v13  ;;  %v12541_v31 = vadd.f32 %v21022_v49, %v20981_v8  ;;  %v21169_v3 = vpop.f32.mrf.mxu0  ;;  %v12544_v49 = vadd.f32 %v21033_v0, %v20994_v40  ;;  %v12543_v40 = vadd.f32 %v21048_v24, %v21012_v9 }
 0x58a   :  { %v15915_v34 = vpop.f32.mrf.mxu1 }
 0x58b   :  { %22410 = vst [vmem:[#allocation8_spill] sm:$0xff] %v21144_v29  ;;  %v21149_v56 = vadd.f32 %v15915_v34, %v21002_v18 }
 0x58c   :  { %v11823_v52 = vpop.f32.mrf.mxu1 }
 0x58d   :  { %22411 = vst [vmem:[#allocation9_spill] sm:$0xff] %v21149_v56  ;;  %v21152_v48 = vadd.f32 %v11823_v52, %v21007_v41  ;;  %v21165_v41 = vld [vmem:[%s21362_s4] ss:$0 sm:$0xff]  ;;  %v12546_v56 = vadd.f32 %v21058_v42, %v21025_v37 }
 0x58e   :  { %v15986_v10 = vpop.f32.mrf.mxu1 }
 0x58f   :  { %22412 = vst [vmem:[#allocation60_spill] sm:$0xff] %v21152_v48  ;;  %v13074_v29 = vadd.f32 %v15986_v10, %v12540_v46 }
 0x590   :  { %v12893_v13 = vpop.f32.mrf.mxu1 }
 0x591   :  { %v13072_v18 = vadd.f32 %v12893_v13, %v12538_v43  ;;  %v13189_v48 = vadd.f32 %v21165_v41, %v13074_v29  ;;  %v12542_v43 = vadd.f32 %v21038_v4, %v20999_v45  ;;  %v21177_v13 = vpop.f32.mrf.mxu0  ;;  %v12545_v29 = vadd.f32 %v21043_v21, %v21005_v26 }
 0x592   :  { %v15987_v34 = vpop.f32.mrf.mxu1 }
 0x593   :  { %v13187_v57 = vadd.f32 %v21165_v41, %v13072_v18  ;;  %v13075_v39 = vadd.f32 %v15987_v34, %v12541_v31  ;;  %v13225_v34 = vmax.f32 %v13189_v48, 0.0 }
 0x594   :  { %v12896_v52 = vpop.f32.mrf.mxu1 }
 0x595   :  { %v13073_v8 = vadd.f32 %v12896_v52, %v12539_v6  ;;  %v13223_v46 = vmax.f32 %v13187_v57, 0.0  ;;  %v13190_v63 = vadd.f32 %v21165_v41, %v13075_v39  ;;  %v21187_v57 = vpop.f32.mrf.mxu0 }
 0x596   :  { %v15990_v10 = vpop.f32.mrf.mxu1 }
 0x597   :  { %v13188_v11 = vadd.f32 %v21165_v41, %v13073_v8  ;;  %v13078_v18 = vadd.f32 %v15990_v10, %v12544_v49  ;;  %v13259_v45 = vsel %vm22208_vm3, %v13223_v46, 0.0  ;;  %v13226_v39 = vmax.f32 %v13190_v63, 0.0 }
 0x598   :  { %v12909_v31 = vpop.f32.mrf.mxu1  ;;  %v12548_v46 = vadd.f32 %v21053_v16, %v21020_v58  ;;  %v22419_v16 = vld [vmem:[#allocation39_spill] sm:$0xff] }
 0x599   :  { %v13224_v6 = vmax.f32 %v13188_v11, 0.0  ;;  %v13076_v52 = vadd.f32 %v12909_v31, %v12542_v43  ;;  %v13193_v21 = vadd.f32 %v21165_v41, %v13078_v18  ;;  %v22415_v43 = vld [vmem:[#allocation27_spill] sm:$0xff] }
 0x59a   :  { %v15991_v4 = vpop.f32.mrf.mxu1  ;;  %vm22416_vm6 = vnez %v22415_v43  ;;  %v22421_v43 = vld [vmem:[#allocation20_spill] sm:$0xff] }
 0x59b   :  { %v13260_v8 = vsel %vm22210_vm11, %v13224_v6, 0.0  ;;  %v13191_v49 = vadd.f32 %v21165_v41, %v13076_v52  ;;  %v13079_v10 = vadd.f32 %v15991_v4, %v12545_v29  ;;  %v13261_v9 = vsel %vm22416_vm6, %v13225_v34, 0.0  ;;  %v21199_v6 = vpop.f32.mrf.mxu0  ;;  %v22417_v29 = vld [vmem:[#allocation17_spill] sm:$0xff] }
 0x59c   :  { %v13295_v26 = vadd.f32 %v13260_v8, %v13259_v45  ;;  %v12912_v48 = vpop.f32.mrf.mxu1  ;;  %vm22418_vm3 = vnez %v22417_v29  ;;  %v12549_v34 = vadd.f32 %v21066_v20, %v21031_v5  ;;  %vm22420_vm11 = vnez %v22419_v16 }
 0x59d   :  { %v13227_v24 = vmax.f32 %v13191_v49, 0.0  ;;  %v13077_v11 = vadd.f32 %v12912_v48, %v12543_v40  ;;  %v13262_v52 = vsel %vm22418_vm3, %v13226_v39, 0.0  ;;  %v13194_v18 = vadd.f32 %v21165_v41, %v13079_v10  ;;  %v21211_v10 = vpop.f32.mrf.mxu0 }
 0x59e   :  { %v13296_v31 = vadd.f32 %v13295_v26, %v13261_v9  ;;  %v15994_v63 = vpop.f32.mrf.mxu1  ;;  %v13229_v40 = vmax.f32 %v13193_v21, 0.0  ;;  %v12547_v49 = vadd.f32 %v21074_v17, %v21036_v23  ;;  %vm22422_vm12 = vnez %v22421_v43  ;;  %v22428_v43 = vld [vmem:[#allocation73_spill] sm:$0xff] }
 0x59f   :  { %v13192_v0 = vadd.f32 %v21165_v41, %v13077_v11  ;;  %v13263_v4 = vsel %vm22420_vm11, %v13227_v24, 0.0  ;;  %v13082_v37 = vadd.f32 %v15994_v63, %v12548_v46  ;;  %v13230_v48 = vmax.f32 %v13194_v18, 0.0  ;;  %v22423_v24 = vld [vmem:[#allocation19_spill] sm:$0xff]  ;;  %v21223_v18 = vpop.f32.mrf.mxu0 }
 0x5a0   :  { %v13297_v45 = vadd.f32 %v13296_v31, %v13262_v52  ;;  %v12925_v58 = vpop.f32.mrf.mxu1  ;;  %vm22424_vm2 = vnez %v22423_v24  ;;  %v12552_v17 = vadd.f32 %v21089_v32, %v21041_v30  ;;  %v12550_v52 = vadd.f32 %v21101_v54, %v21046_v7 }
 0x5a1   :  { %v13228_v8 = vmax.f32 %v13192_v0, 0.0  ;;  %v13080_v42 = vadd.f32 %v12925_v58, %v12546_v56  ;;  %v13265_v46 = vsel %vm22424_vm2, %v13229_v40, 0.0  ;;  %v13197_v31 = vadd.f32 %v21165_v41, %v13082_v37  ;;  %v22425_v0 = vld [vmem:[#allocation71_spill] sm:$0xff] }
 0x5a2   :  { %v13298_v39 = vadd.f32 %v13297_v45, %v13263_v4  ;;  %v15995_v26 = vpop.f32.mrf.mxu1  ;;  %vm22426_vm15 = vnez %v22425_v0  ;;  %v12553_v58 = vadd.f32 %v21113_v14, %v21051_v60  ;;  %vm22429_vm8 = vnez %v22428_v43 }
 0x5a3   :  { %v13264_v5 = vsel %vm22422_vm12, %v13228_v8, 0.0  ;;  %v13195_v20 = vadd.f32 %v21165_v41, %v13080_v42  ;;  %v13083_v21 = vadd.f32 %v15995_v26, %v12549_v34  ;;  %v13266_v34 = vsel %vm22426_vm15, %v13230_v48, 0.0  ;;  %v21235_v26 = vpop.f32.mrf.mxu0 }
 0x5a4   :  { %v13299_v9 = vadd.f32 %v13298_v39, %v13264_v5  ;;  %v12928_v11 = vpop.f32.mrf.mxu1  ;;  %v13233_v32 = vmax.f32 %v13197_v31, 0.0  ;;  %v12551_v42 = vadd.f32 %v21122_v33, %v21056_v53  ;;  %v12556_v33 = vadd.f32 %v21130_v28, %v21061_v19  ;;  %v22434_v28 = vld [vmem:[#allocation74_spill] sm:$0xff] }
 0x5a5   :  { %v13231_v63 = vmax.f32 %v13195_v20, 0.0  ;;  %v13081_v23 = vadd.f32 %v12928_v11, %v12547_v49  ;;  %v13198_v45 = vadd.f32 %v21165_v41, %v13083_v21  ;;  %v22430_v11 = vld [vmem:[#allocation26_spill] sm:$0xff]  ;;  %vm22435_vm3 = vnez %v22434_v28 }
 0x5a6   :  { %v13300_v56 = vadd.f32 %v13299_v9, %v13265_v46  ;;  %v15998_v29 = vpop.f32.mrf.mxu1 }
 0x5a7   :  { %v13196_v40 = vadd.f32 %v21165_v41, %v13081_v23  ;;  %v13086_v4 = vadd.f32 %v15998_v29, %v12552_v17  ;;  %v13267_v37 = vsel %vm22231_vm13, %v13231_v63, 0.0  ;;  %v13234_v48 = vmax.f32 %v13198_v45, 0.0  ;;  %v21247_v17 = vpop.f32.mrf.mxu0 }
 0x5a8   :  { %v13301_v16 = vadd.f32 %v13300_v56, %v13266_v34  ;;  %v12941_v30 = vpop.f32.mrf.mxu1  ;;  %vm22431_vm13 = vnez %v22430_v11  ;;  %v12554_v23 = vadd.f32 %v21138_v61, %v21064_v47  ;;  %v22432_v56 = vld [vmem:[#allocation25_spill] sm:$0xff]  ;;  %v12557_v34 = vadd.f32 %v21146_v12, %v21069_v25 }
 0x5a9   :  { %v13232_v7 = vmax.f32 %v13196_v40, 0.0  ;;  %v13084_v54 = vadd.f32 %v12941_v30, %v12550_v52  ;;  %v13201_v21 = vadd.f32 %v21165_v41, %v13086_v4  ;;  %v13269_v24 = vsel %vm22431_vm13, %v13233_v32, 0.0  ;;  %v21259_v8 = vpop.f32.mrf.mxu0 }
 0x5aa   :  { %v13302_v49 = vadd.f32 %v13301_v16, %v13267_v37  ;;  %v15999_v39 = vpop.f32.mrf.mxu1  ;;  %vm22433_vm6 = vnez %v22432_v56  ;;  %v12555_v4 = vadd.f32 %v21158_v1, %v21072_v2  ;;  %v12560_v1 = vadd.f32 %v21169_v3, %v21077_v27  ;;  %v22442_v3 = vld [vmem:[#allocation40_spill] sm:$0xff] }
 0x5ab   :  { %v13268_v60 = vsel %vm22429_vm8, %v13232_v7, 0.0  ;;  %v13199_v14 = vadd.f32 %v21165_v41, %v13084_v54  ;;  %v13087_v5 = vadd.f32 %v15999_v39, %v12553_v58  ;;  %v13270_v29 = vsel %vm22433_vm6, %v13234_v48, 0.0  ;;  %v22436_v7 = vld [vmem:[#allocation30_spill] sm:$0xff] }
 0x5ac   :  { %v13303_v20 = vadd.f32 %v13302_v49, %v13268_v60  ;;  %v12944_v9 = vpop.f32.mrf.mxu1  ;;  %v13237_v45 = vmax.f32 %v13201_v21, 0.0  ;;  %vm22437_vm11 = vnez %v22436_v7  ;;  %v22438_v39 = vld [vmem:[#allocation54_spill] sm:$0xff]  ;;  %v12471_v21 = vpop.f32.mrf.mxu0  ;;  %vm22443_vm15 = vnez %v22442_v3  ;;  %v22448_v7 = vld [vmem:[#allocation31_spill] sm:$0xff] }
 0x5ad   :  { %v13235_v46 = vmax.f32 %v13199_v14, 0.0  ;;  %v13085_v53 = vadd.f32 %v12944_v9, %v12551_v42  ;;  %v13202_v52 = vadd.f32 %v21165_v41, %v13087_v5  ;;  %vm22439_vm12 = vnez %v22438_v39  ;;  %v22440_v9 = vld [vmem:[#allocation35_spill] sm:$0xff] }
 0x5ae   :  { %v13304_v31 = vadd.f32 %v13303_v20, %v13269_v24  ;;  %v16002_v63 = vpop.f32.mrf.mxu1  ;;  %v13273_v48 = vsel %vm22439_vm12, %v13237_v45, 0.0  ;;  %v12558_v20 = vadd.f32 %v21177_v13, %v21083_v44  ;;  %vm22441_vm2 = vnez %v22440_v9  ;;  %v22444_v45 = vld [vmem:[#allocation41_spill] sm:$0xff] }
 0x5af   :  { %v13200_v0 = vadd.f32 %v21165_v41, %v13085_v53  ;;  %v13271_v58 = vsel %vm22435_vm3, %v13235_v46, 0.0  ;;  %v13090_v47 = vadd.f32 %v16002_v63, %v12556_v33  ;;  %v13238_v37 = vmax.f32 %v13202_v52, 0.0 }
 0x5b0   :  { %v13305_v40 = vadd.f32 %v13304_v31, %v13270_v29  ;;  %v12957_v19 = vpop.f32.mrf.mxu1  ;;  %v12561_v53 = vadd.f32 %v21187_v57, %v21092_v62  ;;  %v12559_v13 = vadd.f32 %v21199_v6, %v21096_v55  ;;  %vm22445_vm8 = vnez %v22444_v45 }
 0x5b1   :  { %v13236_v16 = vmax.f32 %v13200_v0, 0.0  ;;  %v13088_v61 = vadd.f32 %v12957_v19, %v12554_v23  ;;  %v13205_v43 = vadd.f32 %v21165_v41, %v13090_v47  ;;  %v13274_v11 = vsel %vm22441_vm2, %v13238_v37, 0.0  ;;  %v15963_v0 = vpop.f32.mrf.mxu0 }
 0x5b2   :  { %v13306_v30 = vadd.f32 %v13305_v40, %v13271_v58  ;;  %v16003_v32 = vpop.f32.mrf.mxu1  ;;  %v12564_v55 = vadd.f32 %v21211_v10, %v21104_v15  ;;  %vm22449_vm6 = vnez %v22448_v7  ;;  %v22450_v15 = vld [vmem:[#allocation43_spill] sm:$0xff]  ;;  %v12566_v3 = vadd.f32 %v12471_v21, %v21128_v38  ;;  %v22457_v38 = vld [vmem:[#allocation29_spill] sm:$0xff] }
 0x5b3   :  { %v13272_v25 = vsel %vm22437_vm11, %v13236_v16, 0.0  ;;  %v13203_v12 = vadd.f32 %v21165_v41, %v13088_v61  ;;  %v13091_v54 = vadd.f32 %v16003_v32, %v12557_v34  ;;  %v13241_v27 = vmax.f32 %v13205_v43, 0.0  ;;  %v22446_v16 = vld [vmem:[#allocation56_spill] sm:$0xff]  ;;  %v12474_v37 = vpop.f32.mrf.mxu0 }
 0x5b4   :  { %v13307_v42 = vadd.f32 %v13306_v30, %v13272_v25  ;;  %v12960_v49 = vpop.f32.mrf.mxu1  ;;  %vm22447_vm13 = vnez %v22446_v16  ;;  %v12562_v32 = vadd.f32 %v21223_v18, %v21108_v50  ;;  %vm22451_vm3 = vnez %v22450_v15  ;;  %v22461_v15 = vld [vmem:[#allocation37_spill] sm:$0xff] }
 0x5b5   :  { %v13239_v60 = vmax.f32 %v13203_v12, 0.0  ;;  %v13089_v2 = vadd.f32 %v12960_v49, %v12555_v4  ;;  %v13206_v24 = vadd.f32 %v21165_v41, %v13091_v54  ;;  %v13277_v47 = vsel %vm22447_vm13, %v13241_v27, 0.0 }
 0x5b6   :  { %v13308_v14 = vadd.f32 %v13307_v42, %v13273_v48  ;;  %v16006_v5 = vpop.f32.mrf.mxu1  ;;  %v12565_v42 = vadd.f32 %v21235_v26, %v21116_v22  ;;  %v12563_v18 = vadd.f32 %v21247_v17, %v21120_v36  ;;  %v12568_v36 = vadd.f32 %v21259_v8, %v21125_v59 }
 0x5b7   :  { %v13204_v46 = vadd.f32 %v21165_v41, %v13089_v2  ;;  %v13094_v31 = vadd.f32 %v16006_v5, %v12560_v1  ;;  %v13275_v23 = vsel %vm22443_vm15, %v13239_v60, 0.0  ;;  %v13242_v34 = vmax.f32 %v13206_v24, 0.0 }
 0x5b8   :  { %v13309_v33 = vadd.f32 %v13308_v14, %v13274_v11  ;;  %v12973_v63 = vpop.f32.mrf.mxu1  ;;  %v15966_v14 = vpop.f32.mrf.mxu0  ;;  %v12567_v21 = vadd.f32 %v12474_v37, %v22457_v38 }
 0x5b9   :  { %v13240_v56 = vmax.f32 %v13204_v46, 0.0  ;;  %v13092_v44 = vadd.f32 %v12973_v63, %v12558_v20  ;;  %v13209_v28 = vadd.f32 %v21165_v41, %v13094_v31  ;;  %v13278_v25 = vsel %vm22449_vm6, %v13242_v34, 0.0  ;;  %v22453_v46 = vld [vmem:[#allocation33_spill] sm:$0xff]  ;;  %v22464_v20 = vld [vmem:[#allocation38_spill] sm:$0xff] }
 0x5ba   :  { %v13310_v29 = vadd.f32 %v13309_v33, %v13275_v23  ;;  %v16007_v52 = vpop.f32.mrf.mxu1  ;;  %vm22454_vm11 = vnez %v22453_v46  ;;  %v12487_v23 = vpop.f32.mrf.mxu0  ;;  %v12572_v37 = vadd.f32 %v15966_v14, %v21141_v35 }
 0x5bb   :  { %v13276_v40 = vsel %vm22445_vm8, %v13240_v56, 0.0  ;;  %v13207_v62 = vadd.f32 %v21165_v41, %v13092_v44  ;;  %v13095_v57 = vadd.f32 %v16007_v52, %v12561_v53  ;;  %v13245_v49 = vmax.f32 %v13209_v28, 0.0 }
 0x5bc   :  { %v13311_v19 = vadd.f32 %v13310_v29, %v13276_v40  ;;  %v12976_v58 = vpop.f32.mrf.mxu1  ;;  %v12569_v52 = vadd.f32 %v15963_v0, %v21133_v51  ;;  %v15967_v16 = vpop.f32.mrf.mxu0 }
 0x5bd   :  { %v13243_v61 = vmax.f32 %v13207_v62, 0.0  ;;  %v13093_v4 = vadd.f32 %v12976_v58, %v12559_v13  ;;  %v13210_v12 = vadd.f32 %v21165_v41, %v13095_v57  ;;  %v13281_v53 = vsel %vm22454_vm11, %v13245_v49, 0.0  ;;  %v22460_v49 = vld [vmem:[#allocation8_spill] sm:$0xff] }
 0x5be   :  { %v13312_v6 = vadd.f32 %v13311_v19, %v13277_v47  ;;  %v16010_v30 = vpop.f32.mrf.mxu1 }
 0x5bf   :  { %v13208_v54 = vadd.f32 %v21165_v41, %v13093_v4  ;;  %v13279_v10 = vsel %vm22451_vm3, %v13243_v61, 0.0  ;;  %v13098_v60 = vadd.f32 %v16010_v30, %v12564_v55  ;;  %v13246_v5 = vmax.f32 %v13210_v12, 0.0 }
 0x5c0   :  { %v13313_v39 = vadd.f32 %v13312_v6, %v13278_v25  ;;  %v12989_v48 = vpop.f32.mrf.mxu1 }
 0x5c1   :  { %v13244_v43 = vmax.f32 %v13208_v54, 0.0  ;;  %v13096_v50 = vadd.f32 %v12989_v48, %v12562_v32  ;;  %v13213_v33 = vadd.f32 %v21165_v41, %v13098_v60  ;;  %v13282_v44 = vsel %vm22265_vm14, %v13246_v5, 0.0  ;;  %v12490_v48 = vpop.f32.mrf.mxu0 }
 0x5c2   :  { %v13314_v2 = vadd.f32 %v13313_v39, %v13279_v10  ;;  %v16011_v1 = vpop.f32.mrf.mxu1  ;;  %v12570_v39 = vadd.f32 %v12487_v23, %v22460_v49  ;;  %vm22462_vm14 = vnez %v22461_v15 }
 0x5c3   :  { %v13280_v9 = vsel %vm22267_vm9, %v13244_v43, 0.0  ;;  %v13211_v22 = vadd.f32 %v21165_v41, %v13096_v50  ;;  %v13099_v26 = vadd.f32 %v16011_v1, %v12565_v42  ;;  %v13249_v62 = vmax.f32 %v13213_v33, 0.0  ;;  %v22463_v50 = vld [vmem:[#allocation9_spill] sm:$0xff] }
 0x5c4   :  { %v13315_v11 = vadd.f32 %v13314_v2, %v13280_v9  ;;  %v12992_v24 = vpop.f32.mrf.mxu1 }
 0x5c5   :  { %v13247_v31 = vmax.f32 %v13211_v22, 0.0  ;;  %v13097_v63 = vadd.f32 %v12992_v24, %v12563_v18  ;;  %v13214_v13 = vadd.f32 %v21165_v41, %v13099_v26  ;;  %v13285_v7 = vsel %vm22269_vm7, %v13249_v62, 0.0  ;;  %v22466_v26 = vld [vmem:[#allocation60_spill] sm:$0xff] }
 0x5c6   :  { %v13316_v17 = vadd.f32 %v13315_v11, %v13281_v53  ;;  %v16014_v27 = vpop.f32.mrf.mxu1  ;;  %v12573_v18 = vadd.f32 %v15967_v16, %v22463_v50  ;;  %v12571_v11 = vadd.f32 %v12490_v48, %v22466_v26 }
 0x5c7   :  { %v13212_v29 = vadd.f32 %v21165_v41, %v13097_v63  ;;  %v13102_v45 = vadd.f32 %v16014_v27, %v12568_v36  ;;  %v13283_v59 = vsel %vm22272_vm0, %v13247_v31, 0.0  ;;  %v13250_v47 = vmax.f32 %v13214_v13, 0.0 }
 0x5c8   :  { %v13317_v34 = vadd.f32 %v13316_v17, %v13282_v44  ;;  %v13005_v40 = vpop.f32.mrf.mxu1 }
 0x5c9   :  { %v13248_v8 = vmax.f32 %v13212_v29, 0.0  ;;  %v13100_v19 = vadd.f32 %v13005_v40, %v12566_v3  ;;  %v13217_v6 = vadd.f32 %v21165_v41, %v13102_v45  ;;  %v13286_v10 = vsel %vm22462_vm14, %v13250_v47, 0.0  ;;  %v22468_v3 = vld [vmem:[#allocation48_spill] sm:$0xff]  ;;  %v22474_v47 = vld [vmem:[#allocation47_spill] sm:$0xff] }
 0x5ca   :  { %v13318_v28 = vadd.f32 %v13317_v34, %v13283_v59  ;;  %v16015_v58 = vpop.f32.mrf.mxu1  ;;  %vm22469_vm7 = vnez %v22468_v3  ;;  %vm22475_vm0 = vnez %v22474_v47 }
 0x5cb   :  { %v13284_v4 = vsel %vm18398_vm1, %v13248_v8, 0.0  ;;  %v13215_v51 = vadd.f32 %v21165_v41, %v13100_v19  ;;  %v13103_v0 = vadd.f32 %v16015_v58, %v12569_v52  ;;  %v13253_v2 = vmax.f32 %v13217_v6, 0.0  ;;  %v22470_v52 = vld [vmem:[#allocation64_spill] sm:$0xff] }
 0x5cc   :  { %v13319_v55 = vadd.f32 %v13318_v28, %v13284_v4  ;;  %v13008_v30 = vpop.f32.mrf.mxu1  ;;  %vm22465_vm1 = vnez %v22464_v20  ;;  %vm22471_vm9 = vnez %v22470_v52 }
 0x5cd   :  { %v13251_v25 = vmax.f32 %v13215_v51, 0.0  ;;  %v13101_v12 = vadd.f32 %v13008_v30, %v12567_v21  ;;  %v13218_v43 = vadd.f32 %v21165_v41, %v13103_v0  ;;  %v13289_v23 = vsel %vm22469_vm7, %v13253_v2, 0.0  ;;  %v22476_v51 = vld [vmem:[#allocation57_spill] sm:$0xff] }
 0x5ce   :  { %v13320_v54 = vadd.f32 %v13319_v55, %v13285_v7  ;;  %v16018_v42 = vpop.f32.mrf.mxu1 }
 0x5cf   :  { %v13216_v60 = vadd.f32 %v21165_v41, %v13101_v12  ;;  %v13287_v35 = vsel %vm22465_vm1, %v13251_v25, 0.0  ;;  %v13106_v9 = vadd.f32 %v16018_v42, %v12572_v37  ;;  %v13254_v53 = vmax.f32 %v13218_v43, 0.0  ;;  %v14370_v42 = vld [vmem:[%s21364_s6] ss:$0 sm:$0xff] }
 0x5d0   :  { %v13321_v1 = vadd.f32 %v13320_v54, %v13286_v10  ;;  %v13021_v5 = vpop.f32.mrf.mxu1 }
 0x5d1   :  { %v13252_v14 = vmax.f32 %v13216_v60, 0.0  ;;  %v13104_v22 = vadd.f32 %v13021_v5, %v12570_v39  ;;  %v13221_v56 = vadd.f32 %v21165_v41, %v13106_v9  ;;  %v13290_v34 = vsel %vm22471_vm9, %v13254_v53, 0.0 }
 0x5d2   :  { %v13322_v24 = vadd.f32 %v13321_v1, %v13287_v35  ;;  %v16019_v46 = vpop.f32.mrf.mxu1 }
 0x5d3   :  { %v13288_v31 = vsel %vm22281_vm5, %v13252_v14, 0.0  ;;  %v13219_v63 = vadd.f32 %v21165_v41, %v13104_v22  ;;  %v13107_v36 = vadd.f32 %v16019_v46, %v12573_v18  ;;  %v13257_v57 = vmax.f32 %v13221_v56, 0.0 }
 0x5d4   :  { %v13323_v17 = vadd.f32 %v13322_v24, %v13288_v31  ;;  %v13024_v27 = vpop.f32.mrf.mxu1  ;;  %vm22477_vm5 = vnez %v22476_v51 }
 0x5d5   :  { %v13255_v44 = vmax.f32 %v13219_v63, 0.0  ;;  %v13105_v13 = vadd.f32 %v13024_v27, %v12571_v11  ;;  %v13222_v45 = vadd.f32 %v21165_v41, %v13107_v36  ;;  %v13293_v61 = vsel %vm22475_vm0, %v13257_v57, 0.0 }
 0x5d6   :  { %v13324_v29 = vadd.f32 %v13323_v17, %v13289_v23 }
 0x5d7   :  { %v13220_v40 = vadd.f32 %v21165_v41, %v13105_v13  ;;  %v13291_v8 = vsel %vm22286_vm4, %v13255_v44, 0.0  ;;  %v13258_v21 = vmax.f32 %v13222_v45, 0.0 }
 0x5d8   :  { %v13325_v62 = vadd.f32 %v13324_v29, %v13290_v34 }
 0x5d9   :  { %v13256_v19 = vmax.f32 %v13220_v40, 0.0  ;;  %v13294_v0 = vsel %vm22477_vm5, %v13258_v21, 0.0 }
 0x5da   :  { %v13326_v38 = vadd.f32 %v13325_v62, %v13291_v8 }
 0x5db   :  { %v13292_v58 = vsel %vm22291_vm10, %v13256_v19, 0.0 }
 0x5dc   :  { %v13327_v16 = vadd.f32 %v13326_v38, %v13292_v58 }
 0x5de   :  { %v13328_v4 = vadd.f32 %v13327_v16, %v13293_v61 }
 0x5e0   :  { %v13329_v41 = vadd.f32 %v13328_v4, %v13294_v0 }
 0x5e2   :  { %v13330_v55 = vrot.slane %v13329_v41, 4 }
 0x5e4   :  { %v13331_v6 = vadd.f32 %v13330_v55, %v13329_v41 }
 0x5e6   :  { %v13332_v30 = vrot.slane %v13331_v6, 2 }
 0x5e8   :  { %v13333_v32 = vadd.f32 %v13332_v30, %v13331_v6 }
 0x5ea   :  { %v13334_v7 = vrot.slane %v13333_v32, 1 }
 0x5ec   :  { %v13335_v25 = vadd.f32 %v13334_v7, %v13333_v32 }
 0x5ee   :  { %v13336_v12 = vmul.f32 0.00390625, %v13335_v25 }
 0x5f0   :  { %13337 = vst [vmem:[#allocation4 + $0x1] sm:$0x1] %v13336_v12 }
 0x5f7   :  { %v13338_v37 = vld [vmem:[#allocation4] sm:$0x3] }
 0x5f8   :  { %v13339_v54 = vpack.c.bf16 %v13338_v37, %v13338_v37 }
 0x5fa   :  { %16037 = vmatmul.mubr.bf16.vlgmr.msra.gmra.mxu0 %v13339_v54 }
 0x6ba   :  { %v13445_v49 = vpop.f32.mrf.mxu0 }
 0x6bb   :  { %v13446_v39 = vadd.f32 %v14370_v42, %v13445_v49 }
 0x6bc   :  { %v16038_v48 = vpop.f32.mrf.mxu0 }
 0x6bd   :  { %13451 = vst [vmem:[#allocation5] sm:$0x3] %v13446_v39 }
 0x6be   :  { %v13448_v15 = vpop.f32.mrf.mxu0 }
 0x6bf   :  { %16675 = shalt.err (!%p16672_p4)
}
 0x6c0   :  { %13461 = dma.vmem_to_hbm [thread:$0]  %s13459_s15, 32, %s21365_s7, [#allocation6]   ;;  %v16039_v10 = vpop.f32.mrf.mxu0 }
 0x6c1   :  { %16684 = dma.done.wait [#allocation6], 32  }
 0x6c2   :  { %16685 = vsyncadd [#allocation6], 4294967264 }
 0x6c3   :  { %13465 = vsyncpa [#allocation6], 1 }

</bundles_post_ra>
